<compile_context>
chip_gen: v7x
topology: tpu7x:2x2x1
jax: 0.10.0
libtpu: 0.0.40
codegen_flags: <defaults>
</compile_context>

<pallas_src>
import jax
import jax.numpy as jnp
from jax.experimental import pallas as pl
from jax.experimental.pallas import tpu as pltpu

COP = 128          # MXU output width / padded Cout for the conv dots
_TARGET_M = 4096   # target matmul rows (bn * H * Wpad) per grid step


def _round_up(x, m):
    return (x + m - 1) // m * m


def _pick_bn(n, rows_per_image):
    """Batch-slab size targeting ~_TARGET_M rows, keeping grid >= 2 (v7x 2 TCs)."""
    bn = max(1, _TARGET_M // max(rows_per_image, 1))
    if n >= 2:
        bn = min(bn, n // 2)
    return max(1, min(bn, n))


def _pad_batch(x, bn):
    n = x.shape[0]
    rem = (-n) % bn
    if rem:
        x = jnp.pad(x, ((0, rem),) + ((0, 0),) * (x.ndim - 1))
    return x


def _mosaic_params():
    return pltpu.CompilerParams(
        dimension_semantics=("parallel",),
        vmem_limit_bytes=32 * 1024 * 1024)


def _pack_conv(w_oihw, b):
    """(Cout,Cin,KH,KW) -> (KH*KW*Cin, 128) bf16 (tap-major, channel-minor K);
    bias -> (1, 128) f32."""
    cout, cin, kh, kw = w_oihw.shape
    wt = jnp.transpose(w_oihw, (2, 3, 1, 0)).reshape(kh * kw * cin, cout)
    wt = jnp.pad(wt, ((0, 0), (0, COP - cout))).astype(jnp.bfloat16)
    bb = jnp.pad(b, (0, COP - cout)).reshape(1, COP).astype(jnp.float32)
    return wt, bb


# ----------------------------- Pallas kernels -----------------------------

def _conv1_maxpool_kernel(p_ref, w_ref, b_ref, o_ref):
    """conv1 (K pre-folded im2col patches) + bias + ReLU + 3x3/s2/p1 maxpool.
    H direction of the pool is strided in-kernel (even/odd phases); W direction
    is computed stride-1 and subsampled by the caller.

    p_ref : (bn, H, Wop, K)      bf16   (cols >= W are zero patches)
    w_ref : (K, 128)             bf16
    b_ref : (1, 128)             f32
    o_ref : (bn, H//2, W, Cout)  bf16
    """
    bn, h, wop, k = p_ref.shape
    hq, wv, cout = o_ref.shape[1], o_ref.shape[2], o_ref.shape[3]
    m = bn * h * wop

    y = jnp.dot(p_ref[...].reshape(m, k), w_ref[...],
                preferred_element_type=jnp.float32)
    y = jnp.maximum(y + b_ref[...], 0.0).reshape(bn, h, wop, COP)

    # 3-wide running max along W (stride 1; zero left-pad is exact post-ReLU).
    zc = jnp.zeros((bn, h, 1, COP), jnp.float32)
    left = jnp.concatenate([zc, y[:, :, 0:wv - 1, :]], axis=2)
    cw = jnp.maximum(jnp.maximum(left, y[:, :, 0:wv, :]), y[:, :, 1:wv + 1, :])

    # 3-wide / stride-2 max along H via even/odd row phases (single store).
    cwr = cw.reshape(bn, hq, 2, wv, COP)
    even, odd = cwr[:, :, 0], cwr[:, :, 1]
    zr = jnp.zeros((bn, 1, wv, COP), jnp.float32)
    odd_up = jnp.concatenate([zr, odd[:, 0:hq - 1]], axis=1)
    pooled = jnp.maximum(jnp.maximum(even, odd), odd_up)

    o_ref[...] = pooled[..., :cout].astype(o_ref.dtype)


def _fold9_dot_bias_relu(rows, w_ref, b_ref):
    """rows: 3 bf16 slabs (bn, Ho, Wop+2, Cin) (one per kernel row of the padded
    slab).  Lane-concatenates the 9 shifted windows into a single K = 9*Cin dot,
    adds bias and applies ReLU.  Returns f32 (bn, Ho, Wop, 128); columns beyond
    the real width are garbage and must be sliced off by the caller."""
    bn, ho, wp, cin = rows[0].shape
    wop = wp - 2
    taps = [r[:, :, kj:kj + wop, :] for r in rows for kj in range(3)]
    lhs = jnp.concatenate(taps, axis=-1)                       # (bn, ho, wop, 9*cin)
    m = bn * ho * wop
    y = jnp.dot(lhs.reshape(m, 9 * cin), w_ref[...],
                preferred_element_type=jnp.float32) + b_ref[...]
    y = jnp.maximum(y, 0.0)
    return y.reshape(bn, ho, wop, COP)


def _conv3x3_s1_kernel(x_ref, w_ref, b_ref, o_ref, pad_ref):
    """3x3 / stride 1 / pad 1 conv + ReLU; halo built in a VMEM scratch."""
    bn, hi, wi, cin = x_ref.shape
    cout = o_ref.shape[3]
    pad_ref[...] = jnp.zeros_like(pad_ref)
    pad_ref[:, 1:1 + hi, 1:1 + wi, :] = x_ref[...]
    rows = [pad_ref[:, ki:ki + hi, :, :] for ki in range(3)]
    y = _fold9_dot_bias_relu(rows, w_ref, b_ref)
    o_ref[...] = y[:, :, :wi, :cout].astype(o_ref.dtype)


def _conv3x3_s2_rows_kernel(x_ref, w_ref, b_ref, o_ref, pad_ref):
    """3x3 / stride 2 / pad 1 conv + ReLU, computing only the stride-2 output
    ROWS (even/odd phase windows); columns are stride-1 and the caller
    subsamples them."""
    bn, hi, wi, cin = x_ref.shape
    cout = o_ref.shape[3]
    ho = o_ref.shape[1]                       # = hi // 2
    pad_ref[...] = jnp.zeros_like(pad_ref)
    pad_ref[:, 1:1 + hi, 1:1 + wi, :] = x_ref[...]
    xp = pad_ref[...]
    hp, wp = xp.shape[1], xp.shape[2]
    xpr = xp.reshape(bn, hp // 2, 2, wp, cin)  # leading-dim split (free)
    ev, od = xpr[:, :, 0], xpr[:, :, 1]
    rows = [ev[:, 0:ho], od[:, 0:ho], ev[:, 1:ho + 1]]
    y = _fold9_dot_bias_relu(rows, w_ref, b_ref)
    o_ref[...] = y[:, :, :wi, :cout].astype(o_ref.dtype)


def _conv3x3_pool_fc_kernel(x_ref, w_ref, b_ref, wfc_ref, bfc_ref, o_ref, pad_ref):
    """conv4 (3x3 s1 p1) + ReLU + global AvgPool + Linear, fused."""
    bn, hi, wi, cin = x_ref.shape
    pad_ref[...] = jnp.zeros_like(pad_ref)
    pad_ref[:, 1:1 + hi, 1:1 + wi, :] = x_ref[...]
    rows = [pad_ref[:, ki:ki + hi, :, :] for ki in range(3)]
    y = _fold9_dot_bias_relu(rows, w_ref, b_ref)               # (bn, hi, wop, 128)
    feat = jnp.sum(y[:, :, :wi, :], axis=(1, 2)) * (1.0 / float(hi * wi))
    logits = jnp.dot(feat.astype(jnp.bfloat16), wfc_ref[...],
                     preferred_element_type=jnp.float32) + bfc_ref[...]
    o_ref[:, 0, :] = logits.astype(o_ref.dtype)


# ----------------------------- Pallas wrappers -----------------------------

def conv1_relu_maxpool(x_nhwc, w1, b1):
    """conv1 5x5 s1 p2 + ReLU + 3x3/s2/p1 maxpool.  Returns (N, H//2, W, Cout)
    bf16; maxpool columns are still stride-1 (caller keeps even columns)."""
    n, h, w, cin = x_nhwc.shape
    cout, _, kh, kw = w1.shape
    assert h % 2 == 0
    wop = _round_up(w + 1, 8)
    # Host-side K-folding (im2col) of the 25 taps: cheap because cin == 3.
    xp = jnp.pad(x_nhwc, ((0, 0), (2, 2), (2, wop + 2 - w), (0, 0)))
    patches = jnp.concatenate(
        [xp[:, ki:ki + h, kj:kj + wop, :] for ki in range(kh) for kj in range(kw)],
        axis=-1).astype(jnp.bfloat16)                          # (N, h, wop, kh*kw*cin)
    wp, bp = _pack_conv(w1, b1)
    k = wp.shape[0]
    bn = _pick_bn(n, h * wop)
    patches = _pad_batch(patches, bn)
    npad = patches.shape[0]
    out = pl.pallas_call(
        _conv1_maxpool_kernel,
        out_shape=jax.ShapeDtypeStruct((npad, h // 2, w, cout), jnp.bfloat16),
        grid=(npad // bn,),
        in_specs=[
            pl.BlockSpec((bn, h, wop, k), lambda i: (i, 0, 0, 0)),
            pl.BlockSpec((k, COP), lambda i: (0, 0)),
            pl.BlockSpec((1, COP), lambda i: (0, 0)),
        ],
        out_specs=pl.BlockSpec((bn, h // 2, w, cout), lambda i: (i, 0, 0, 0)),
        compiler_params=_mosaic_params(),
        cost_estimate=pl.CostEstimate(
            flops=int(2 * npad * h * wop * k * COP), transcendentals=0,
            bytes_accessed=int(patches.size * 2 + wp.size * 2
                               + npad * (h // 2) * w * cout * 2)),
    )(patches, wp, bp)
    return out[:n]


def conv3x3_relu(x, w, b, *, stride=1):
    """3x3 pad-1 conv + ReLU.  stride=2 computes only the stride-2 output rows
    (columns are subsampled by the caller)."""
    n, hi, wi, cin = x.shape
    cout = w.shape[0]
    assert stride in (1, 2)
    if stride == 2:
        assert hi % 2 == 0
    wop = _round_up(wi, 8)
    ho = hi // stride
    bn = _pick_bn(n, hi * wop)
    xpd = _pad_batch(x, bn)
    npad = xpd.shape[0]
    wpk, bpk = _pack_conv(w, b)
    kernel = _conv3x3_s1_kernel if stride == 1 else _conv3x3_s2_rows_kernel
    out = pl.pallas_call(
        kernel,
        out_shape=jax.ShapeDtypeStruct((npad, ho, wi, cout), jnp.bfloat16),
        grid=(npad // bn,),
        in_specs=[
            pl.BlockSpec((bn, hi, wi, cin), lambda i: (i, 0, 0, 0)),
            pl.BlockSpec((9 * cin, COP), lambda i: (0, 0)),
            pl.BlockSpec((1, COP), lambda i: (0, 0)),
        ],
        out_specs=pl.BlockSpec((bn, ho, wi, cout), lambda i: (i, 0, 0, 0)),
        scratch_shapes=[pltpu.VMEM((bn, hi + 2, wop + 2, cin), jnp.bfloat16)],
        compiler_params=_mosaic_params(),
        cost_estimate=pl.CostEstimate(
            flops=int(2 * npad * ho * wop * 9 * cin * COP), transcendentals=0,
            bytes_accessed=int(xpd.size * 2 + wpk.size * 2
                               + npad * ho * wi * cout * 2)),
    )(xpd, wpk, bpk)
    return out[:n]


def conv3x3_relu_avgpool_fc(x, w, b, wfc_t, bfc, *, latent):
    """conv4 3x3 s1 p1 + ReLU + AvgPool(full map) + Linear, fused."""
    n, hi, wi, cin = x.shape
    lat_pad = _round_up(latent, COP)
    wop = _round_up(wi, 8)
    bn = _pick_bn(n, hi * wop)
    xpd = _pad_batch(x, bn)
    npad = xpd.shape[0]
    wpk, bpk = _pack_conv(w, b)
    wfc_p = jnp.pad(wfc_t, ((0, COP - wfc_t.shape[0]),
                            (0, lat_pad - wfc_t.shape[1]))).astype(jnp.bfloat16)
    bfc_p = jnp.pad(bfc, (0, lat_pad - latent)).reshape(1, lat_pad).astype(jnp.float32)
    out = pl.pallas_call(
        _conv3x3_pool_fc_kernel,
        out_shape=jax.ShapeDtypeStruct((npad, 1, lat_pad), jnp.float32),
        grid=(npad // bn,),
        in_specs=[
            pl.BlockSpec((bn, hi, wi, cin), lambda i: (i, 0, 0, 0)),
            pl.BlockSpec((9 * cin, COP), lambda i: (0, 0)),
            pl.BlockSpec((1, COP), lambda i: (0, 0)),
            pl.BlockSpec((COP, lat_pad), lambda i: (0, 0)),
            pl.BlockSpec((1, lat_pad), lambda i: (0, 0)),
        ],
        out_specs=pl.BlockSpec((bn, 1, lat_pad), lambda i: (i, 0, 0)),
        scratch_shapes=[pltpu.VMEM((bn, hi + 2, wop + 2, cin), jnp.bfloat16)],
        compiler_params=_mosaic_params(),
        cost_estimate=pl.CostEstimate(
            flops=int(2 * npad * hi * wop * 9 * cin * COP
                      + 2 * npad * COP * lat_pad),
            transcendentals=0,
            bytes_accessed=int(xpd.size * 2 + wpk.size * 2 + wfc_p.size * 2
                               + npad * lat_pad * 4)),
    )(xpd, wpk, bpk, wfc_p, bfc_p)
    return out[:n, 0, :latent]


# ----------------------------- forward pass -----------------------------

def convnet_forward(x_nchw, params, *, latent_channels=96):
    # NOTE: MXU operands (weights + activations) run in bf16 with f32
    # accumulation/bias/ReLU; inter-layer activations are stored bf16.
    x = jnp.transpose(x_nchw, (0, 2, 3, 1)).astype(jnp.float32)   # NCHW -> NHWC

    # conv1 + ReLU + maxpool (fused kernel; H already strided in-kernel).
    mp = conv1_relu_maxpool(x, params["w1"], params["b1"])         # (N, 14, 28, 32)
    # TODO(synk): W-direction stride-2 subsamples stay as tiny XLA slices on the
    # small bf16 maps (sublane-strided selects are awkward inside the kernel).
    x2 = mp[:, :, 0:mp.shape[2] - 1:2, :]                          # (N, 14, 14, 32)

    y2 = conv3x3_relu(x2, params["w2"], params["b2"], stride=1)    # (N, 14, 14, 32)

    y3 = conv3x3_relu(y2, params["w3"], params["b3"], stride=2)    # (N, 7, 14, 64)
    x4 = y3[:, :, 0:y3.shape[2] - 1:2, :]                          # (N, 7, 7, 64)

    return conv3x3_relu_avgpool_fc(x4, params["w4"], params["b4"],
                                   params["wfc"].T, params["bfc"],
                                   latent=latent_channels)         # (N, latent)


# Pure-JAX reference (XLA conv / reduce_window) for validation.
def reference_forward(x_nchw, params):
    x = jnp.transpose(x_nchw, (0, 2, 3, 1)).astype(jnp.float32)

    def conv(x, w, b, stride, pad):
        y = jax.lax.conv_general_dilated(
            x, jnp.transpose(w, (2, 3, 1, 0)),
            window_strides=(stride, stride),
            padding=[(pad, pad), (pad, pad)],
            dimension_numbers=("NHWC", "HWIO", "NHWC"))
        return y + b

    x = jax.nn.relu(conv(x, params["w1"], params["b1"], 1, 2))
    x = jax.lax.reduce_window(x, -jnp.inf, jax.lax.max,
                              (1, 3, 3, 1), (1, 2, 2, 1),
                              [(0, 0), (1, 1), (1, 1), (0, 0)])
    x = jax.nn.relu(conv(x, params["w2"], params["b2"], 1, 1))
    x = jax.nn.relu(conv(x, params["w3"], params["b3"], 2, 1))
    x = jax.nn.relu(conv(x, params["w4"], params["b4"], 1, 1))
    feat = jnp.mean(x, axis=(1, 2))                          # AvgPool2d(7) -> flatten
    return feat @ params["wfc"].T + params["bfc"]


if __name__ == "__main__":
    key = jax.random.PRNGKey(0)
    kx, *kp = jax.random.split(key, 11)

    in_ch, latent = 3, 96
    # 28x28 input so that after maxpool(/2) and conv3(/2) the map is 7x7,
    # matching AvgPool2d(7) -> flatten(64) -> Linear(64, latent).
    x = jax.random.normal(kx, (2, in_ch, 28, 28), jnp.float32)

    def init(k, shape, scale=0.1):
        return jax.random.normal(k, shape, jnp.float32) * scale

    params = {
        "w1": init(kp[0], (32, in_ch, 5, 5)), "b1": init(kp[1], (32,)),
        "w2": init(kp[2], (32, 32, 3, 3)),    "b2": init(kp[3], (32,)),
        "w3": init(kp[4], (64, 32, 3, 3)),    "b3": init(kp[5], (64,)),
        "w4": init(kp[6], (64, 64, 3, 3)),    "b4": init(kp[7], (64,)),
        "wfc": init(kp[8], (latent, 64)),     "bfc": init(kp[9], (latent,)),
    }

    out = jax.block_until_ready(jax.jit(convnet_forward)(x, params))
    assert out.shape == (2, latent), out.shape

    ref = jax.block_until_ready(reference_forward(x, params))
    rel_err = float(jnp.max(jnp.abs(out - ref)) / (jnp.max(jnp.abs(ref)) + 1e-6))
    # bf16 MXU operands + bf16 inter-layer activations vs. an all-f32 reference.
    assert rel_err < 2e-2, f"mismatch vs reference: rel_err={rel_err}"

    print("KERNEL_OK")
</pallas_src>

<mosaic_0001>
module attributes {stable_mosaic.version = 11 : i64} {
  func.func @_conv1_maxpool_kernel(%arg0: i32, %arg1: memref<1x28x32x75xbf16, #tpu.memory_space<vmem>>, %arg2: memref<75x128xbf16, #tpu.memory_space<vmem>>, %arg3: memref<1x128xf32, #tpu.memory_space<vmem>>, %arg4: memref<1x14x28x32xbf16, #tpu.memory_space<vmem>>) attributes {dimension_semantics = [#tpu.dimension_semantics<parallel>], iteration_bounds = array<i64: 2>, scalar_prefetch = 0 : i64, scratch_operands = 0 : i64, tpu.core_type = #tpu.core_type<tc>, window_params = [{transform_indices = @transform_0, window_bounds = array<i64: 1, 28, 32, 75>}, {pipeline_mode = #tpu.pipeline_mode<synchronous>, transform_indices = @transform_1, window_bounds = array<i64: 75, 128>}, {pipeline_mode = #tpu.pipeline_mode<synchronous>, transform_indices = @transform_2, window_bounds = array<i64: 1, 128>}, {transform_indices = @transform_3, window_bounds = array<i64: 1, 14, 28, 32>}]} {
    %c0 = arith.constant 0 : index
    %c0_0 = arith.constant 0 : index
    %c0_1 = arith.constant 0 : index
    %c0_2 = arith.constant 0 : index
    %0 = vector.load %arg1[%c0, %c0_0, %c0_1, %c0_2] : memref<1x28x32x75xbf16, #tpu.memory_space<vmem>>, vector<1x28x32x75xbf16>
    %1 = vector.shape_cast %0 : vector<1x28x32x75xbf16> to vector<896x75xbf16>
    %c0_3 = arith.constant 0 : index
    %c0_4 = arith.constant 0 : index
    %2 = vector.load %arg2[%c0_3, %c0_4] : memref<75x128xbf16, #tpu.memory_space<vmem>>, vector<75x128xbf16>
    %cst = arith.constant dense<0.000000e+00> : vector<896x128xf32>
    %3 = tpu.matmul %1, %2, %cst {dimension_numbers = #tpu.dot_dimension_numbers<[1], [0], [0], [1], [0, 0, 1, 1], [], []>} : vector<896x75xbf16>, vector<75x128xbf16>, vector<896x128xf32> -> vector<896x128xf32>
    %c0_5 = arith.constant 0 : index
    %c0_6 = arith.constant 0 : index
    %4 = vector.load %arg3[%c0_5, %c0_6] : memref<1x128xf32, #tpu.memory_space<vmem>>, vector<1x128xf32>
    %5 = vector.broadcast %4 : vector<1x128xf32> to vector<896x128xf32>
    %6 = arith.addf %3, %5 : vector<896x128xf32>
    %cst_7 = arith.constant 0.000000e+00 : f32
    %7 = vector.broadcast %cst_7 : f32 to vector<896x128xf32>
    %8 = arith.maximumf %6, %7 : vector<896x128xf32>
    %9 = vector.shape_cast %8 : vector<896x128xf32> to vector<1x28x32x128xf32>
    %cst_8 = arith.constant 0.000000e+00 : f32
    %10 = vector.broadcast %cst_8 : f32 to vector<1x28x1x128xf32>
    %11 = vector.extract_strided_slice %9 {offsets = [0, 0, 0, 0], sizes = [1, 28, 27, 128], strides = [1, 1, 1, 1]} : vector<1x28x32x128xf32> to vector<1x28x27x128xf32>
    %12 = tpu.concatenate %10, %11 in 2 : vector<1x28x1x128xf32>, vector<1x28x27x128xf32> -> vector<1x28x28x128xf32>
    %13 = vector.extract_strided_slice %9 {offsets = [0, 0, 0, 0], sizes = [1, 28, 28, 128], strides = [1, 1, 1, 1]} : vector<1x28x32x128xf32> to vector<1x28x28x128xf32>
    %14 = arith.maximumf %12, %13 : vector<1x28x28x128xf32>
    %15 = vector.extract_strided_slice %9 {offsets = [0, 0, 1, 0], sizes = [1, 28, 28, 128], strides = [1, 1, 1, 1]} : vector<1x28x32x128xf32> to vector<1x28x28x128xf32>
    %16 = arith.maximumf %14, %15 : vector<1x28x28x128xf32>
    %17 = vector.shape_cast %16 : vector<1x28x28x128xf32> to vector<1x14x2x28x128xf32>
    %18 = vector.extract_strided_slice %17 {offsets = [0, 0, 0, 0, 0], sizes = [1, 14, 1, 28, 128], strides = [1, 1, 1, 1, 1]} : vector<1x14x2x28x128xf32> to vector<1x14x1x28x128xf32>
    %19 = vector.shape_cast %18 : vector<1x14x1x28x128xf32> to vector<1x14x28x128xf32>
    %20 = vector.extract_strided_slice %17 {offsets = [0, 0, 1, 0, 0], sizes = [1, 14, 1, 28, 128], strides = [1, 1, 1, 1, 1]} : vector<1x14x2x28x128xf32> to vector<1x14x1x28x128xf32>
    %21 = vector.shape_cast %20 : vector<1x14x1x28x128xf32> to vector<1x14x28x128xf32>
    %cst_9 = arith.constant 0.000000e+00 : f32
    %22 = vector.broadcast %cst_9 : f32 to vector<1x1x28x128xf32>
    %23 = vector.extract_strided_slice %21 {offsets = [0, 0, 0, 0], sizes = [1, 13, 28, 128], strides = [1, 1, 1, 1]} : vector<1x14x28x128xf32> to vector<1x13x28x128xf32>
    %24 = tpu.concatenate %22, %23 in 1 : vector<1x1x28x128xf32>, vector<1x13x28x128xf32> -> vector<1x14x28x128xf32>
    %25 = arith.maximumf %19, %21 : vector<1x14x28x128xf32>
    %26 = arith.maximumf %25, %24 : vector<1x14x28x128xf32>
    %27 = vector.extract_strided_slice %26 {offsets = [0, 0, 0, 0], sizes = [1, 14, 28, 32], strides = [1, 1, 1, 1]} : vector<1x14x28x128xf32> to vector<1x14x28x32xf32>
    %28 = arith.truncf %27 : vector<1x14x28x32xf32> to vector<1x14x28x32xbf16>
    %c0_10 = arith.constant 0 : index
    %c0_11 = arith.constant 0 : index
    %c0_12 = arith.constant 0 : index
    %c0_13 = arith.constant 0 : index
    %29 = vector.load %arg4[%c0_10, %c0_11, %c0_12, %c0_13] : memref<1x14x28x32xbf16, #tpu.memory_space<vmem>>, vector<1x14x28x32xbf16>
    tpu.vector_store %arg4[%c0_10, %c0_11, %c0_12, %c0_13], %28 {strides = array<i32>} : memref<1x14x28x32xbf16, #tpu.memory_space<vmem>>, vector<1x14x28x32xbf16>,
    return
  }
  func.func @transform_0(%arg0: i32) -> (i32, i32, i32, i32) {
    %c0_i32 = arith.constant 0 : i32
    %c0_i32_0 = arith.constant 0 : i32
    %c0_i32_1 = arith.constant 0 : i32
    %c0_i32_2 = arith.constant 0 : i32
    return %arg0, %c0_i32, %c0_i32_0, %c0_i32_1 : i32, i32, i32, i32
  }
  func.func @transform_1(%arg0: i32) -> (i32, i32) {
    %c0_i32 = arith.constant 0 : i32
    %c0_i32_0 = arith.constant 0 : i32
    %c0_i32_1 = arith.constant 0 : i32
    return %c0_i32, %c0_i32_0 : i32, i32
  }
  func.func @transform_2(%arg0: i32) -> (i32, i32) {
    %c0_i32 = arith.constant 0 : i32
    %c0_i32_0 = arith.constant 0 : i32
    %c0_i32_1 = arith.constant 0 : i32
    return %c0_i32, %c0_i32_0 : i32, i32
  }
  func.func @transform_3(%arg0: i32) -> (i32, i32, i32, i32) {
    %c0_i32 = arith.constant 0 : i32
    %c0_i32_0 = arith.constant 0 : i32
    %c0_i32_1 = arith.constant 0 : i32
    %c0_i32_2 = arith.constant 0 : i32
    return %arg0, %c0_i32, %c0_i32_0, %c0_i32_1 : i32, i32, i32, i32
  }
}

module attributes {stable_mosaic.version = 11 : i64} {
  func.func @_conv3x3_s1_kernel(%arg0: i32, %arg1: memref<1x14x14x32xbf16, #tpu.memory_space<vmem>>, %arg2: memref<288x128xbf16, #tpu.memory_space<vmem>>, %arg3: memref<1x128xf32, #tpu.memory_space<vmem>>, %arg4: memref<1x14x14x32xbf16, #tpu.memory_space<vmem>>, %arg5: memref<1x16x18x32xbf16, #tpu.memory_space<vmem>>) attributes {dimension_semantics = [#tpu.dimension_semantics<parallel>], iteration_bounds = array<i64: 2>, scalar_prefetch = 0 : i64, scratch_operands = 1 : i64, tpu.core_type = #tpu.core_type<tc>, window_params = [{transform_indices = @transform_0, window_bounds = array<i64: 1, 14, 14, 32>}, {pipeline_mode = #tpu.pipeline_mode<synchronous>, transform_indices = @transform_1, window_bounds = array<i64: 288, 128>}, {pipeline_mode = #tpu.pipeline_mode<synchronous>, transform_indices = @transform_2, window_bounds = array<i64: 1, 128>}, {transform_indices = @transform_3, window_bounds = array<i64: 1, 14, 14, 32>}]} {
    %cst = arith.constant 0.000000e+00 : bf16
    %0 = vector.broadcast %cst : bf16 to vector<1x16x18x32xbf16>
    %c0 = arith.constant 0 : index
    %c0_0 = arith.constant 0 : index
    %c0_1 = arith.constant 0 : index
    %c0_2 = arith.constant 0 : index
    %1 = vector.load %arg5[%c0, %c0_0, %c0_1, %c0_2] : memref<1x16x18x32xbf16, #tpu.memory_space<vmem>>, vector<1x16x18x32xbf16>
    tpu.vector_store %arg5[%c0, %c0_0, %c0_1, %c0_2], %0 {strides = array<i32>} : memref<1x16x18x32xbf16, #tpu.memory_space<vmem>>, vector<1x16x18x32xbf16>,
    %c0_3 = arith.constant 0 : index
    %c0_4 = arith.constant 0 : index
    %c0_5 = arith.constant 0 : index
    %c0_6 = arith.constant 0 : index
    %2 = vector.load %arg1[%c0_3, %c0_4, %c0_5, %c0_6] : memref<1x14x14x32xbf16, #tpu.memory_space<vmem>>, vector<1x14x14x32xbf16>
    %c0_7 = arith.constant 0 : index
    %c1 = arith.constant 1 : index
    %c1_8 = arith.constant 1 : index
    %c0_9 = arith.constant 0 : index
    %3 = vector.load %arg5[%c0_7, %c1, %c1_8, %c0_9] : memref<1x16x18x32xbf16, #tpu.memory_space<vmem>>, vector<1x14x14x32xbf16>
    tpu.vector_store %arg5[%c0_7, %c1, %c1_8, %c0_9], %2 {strides = array<i32>} : memref<1x16x18x32xbf16, #tpu.memory_space<vmem>>, vector<1x14x14x32xbf16>,
    %c0_10 = arith.constant 0 : index
    %c0_11 = arith.constant 0 : index
    %c0_12 = arith.constant 0 : index
    %c0_13 = arith.constant 0 : index
    %4 = vector.load %arg5[%c0_10, %c0_11, %c0_12, %c0_13] : memref<1x16x18x32xbf16, #tpu.memory_space<vmem>>, vector<1x14x18x32xbf16>
    %c0_14 = arith.constant 0 : index
    %c1_15 = arith.constant 1 : index
    %c0_16 = arith.constant 0 : index
    %c0_17 = arith.constant 0 : index
    %5 = vector.load %arg5[%c0_14, %c1_15, %c0_16, %c0_17] : memref<1x16x18x32xbf16, #tpu.memory_space<vmem>>, vector<1x14x18x32xbf16>
    %c0_18 = arith.constant 0 : index
    %c2 = arith.constant 2 : index
    %c0_19 = arith.constant 0 : index
    %c0_20 = arith.constant 0 : index
    %6 = vector.load %arg5[%c0_18, %c2, %c0_19, %c0_20] : memref<1x16x18x32xbf16, #tpu.memory_space<vmem>>, vector<1x14x18x32xbf16>
    %7 = vector.extract_strided_slice %4 {offsets = [0, 0, 0, 0], sizes = [1, 14, 16, 32], strides = [1, 1, 1, 1]} : vector<1x14x18x32xbf16> to vector<1x14x16x32xbf16>
    %8 = vector.extract_strided_slice %4 {offsets = [0, 0, 1, 0], sizes = [1, 14, 16, 32], strides = [1, 1, 1, 1]} : vector<1x14x18x32xbf16> to vector<1x14x16x32xbf16>
    %9 = vector.extract_strided_slice %4 {offsets = [0, 0, 2, 0], sizes = [1, 14, 16, 32], strides = [1, 1, 1, 1]} : vector<1x14x18x32xbf16> to vector<1x14x16x32xbf16>
    %10 = vector.extract_strided_slice %5 {offsets = [0, 0, 0, 0], sizes = [1, 14, 16, 32], strides = [1, 1, 1, 1]} : vector<1x14x18x32xbf16> to vector<1x14x16x32xbf16>
    %11 = vector.extract_strided_slice %5 {offsets = [0, 0, 1, 0], sizes = [1, 14, 16, 32], strides = [1, 1, 1, 1]} : vector<1x14x18x32xbf16> to vector<1x14x16x32xbf16>
    %12 = vector.extract_strided_slice %5 {offsets = [0, 0, 2, 0], sizes = [1, 14, 16, 32], strides = [1, 1, 1, 1]} : vector<1x14x18x32xbf16> to vector<1x14x16x32xbf16>
    %13 = vector.extract_strided_slice %6 {offsets = [0, 0, 0, 0], sizes = [1, 14, 16, 32], strides = [1, 1, 1, 1]} : vector<1x14x18x32xbf16> to vector<1x14x16x32xbf16>
    %14 = vector.extract_strided_slice %6 {offsets = [0, 0, 1, 0], sizes = [1, 14, 16, 32], strides = [1, 1, 1, 1]} : vector<1x14x18x32xbf16> to vector<1x14x16x32xbf16>
    %15 = vector.extract_strided_slice %6 {offsets = [0, 0, 2, 0], sizes = [1, 14, 16, 32], strides = [1, 1, 1, 1]} : vector<1x14x18x32xbf16> to vector<1x14x16x32xbf16>
    %16 = tpu.concatenate %7, %8, %9, %10, %11, %12, %13, %14, %15 in 3 : vector<1x14x16x32xbf16>, vector<1x14x16x32xbf16>, vector<1x14x16x32xbf16>, vector<1x14x16x32xbf16>, vector<1x14x16x32xbf16>, vector<1x14x16x32xbf16>, vector<1x14x16x32xbf16>, vector<1x14x16x32xbf16>, vector<1x14x16x32xbf16> -> vector<1x14x16x288xbf16>
    %17 = vector.shape_cast %16 : vector<1x14x16x288xbf16> to vector<224x288xbf16>
    %c0_21 = arith.constant 0 : index
    %c0_22 = arith.constant 0 : index
    %18 = vector.load %arg2[%c0_21, %c0_22] : memref<288x128xbf16, #tpu.memory_space<vmem>>, vector<288x128xbf16>
    %cst_23 = arith.constant dense<0.000000e+00> : vector<224x128xf32>
    %19 = tpu.matmul %17, %18, %cst_23 {dimension_numbers = #tpu.dot_dimension_numbers<[1], [0], [0], [1], [0, 0, 1, 1], [], []>} : vector<224x288xbf16>, vector<288x128xbf16>, vector<224x128xf32> -> vector<224x128xf32>
    %c0_24 = arith.constant 0 : index
    %c0_25 = arith.constant 0 : index
    %20 = vector.load %arg3[%c0_24, %c0_25] : memref<1x128xf32, #tpu.memory_space<vmem>>, vector<1x128xf32>
    %21 = vector.broadcast %20 : vector<1x128xf32> to vector<224x128xf32>
    %22 = arith.addf %19, %21 : vector<224x128xf32>
    %cst_26 = arith.constant 0.000000e+00 : f32
    %23 = vector.broadcast %cst_26 : f32 to vector<224x128xf32>
    %24 = arith.maximumf %22, %23 : vector<224x128xf32>
    %25 = vector.shape_cast %24 : vector<224x128xf32> to vector<1x14x16x128xf32>
    %26 = vector.extract_strided_slice %25 {offsets = [0, 0, 0, 0], sizes = [1, 14, 14, 32], strides = [1, 1, 1, 1]} : vector<1x14x16x128xf32> to vector<1x14x14x32xf32>
    %27 = arith.truncf %26 : vector<1x14x14x32xf32> to vector<1x14x14x32xbf16>
    %c0_27 = arith.constant 0 : index
    %c0_28 = arith.constant 0 : index
    %c0_29 = arith.constant 0 : index
    %c0_30 = arith.constant 0 : index
    %28 = vector.load %arg4[%c0_27, %c0_28, %c0_29, %c0_30] : memref<1x14x14x32xbf16, #tpu.memory_space<vmem>>, vector<1x14x14x32xbf16>
    tpu.vector_store %arg4[%c0_27, %c0_28, %c0_29, %c0_30], %27 {strides = array<i32>} : memref<1x14x14x32xbf16, #tpu.memory_space<vmem>>, vector<1x14x14x32xbf16>,
    return
  }
  func.func @transform_0(%arg0: i32) -> (i32, i32, i32, i32) {
    %c0_i32 = arith.constant 0 : i32
    %c0_i32_0 = arith.constant 0 : i32
    %c0_i32_1 = arith.constant 0 : i32
    %c0_i32_2 = arith.constant 0 : i32
    return %arg0, %c0_i32, %c0_i32_0, %c0_i32_1 : i32, i32, i32, i32
  }
  func.func @transform_1(%arg0: i32) -> (i32, i32) {
    %c0_i32 = arith.constant 0 : i32
    %c0_i32_0 = arith.constant 0 : i32
    %c0_i32_1 = arith.constant 0 : i32
    return %c0_i32, %c0_i32_0 : i32, i32
  }
  func.func @transform_2(%arg0: i32) -> (i32, i32) {
    %c0_i32 = arith.constant 0 : i32
    %c0_i32_0 = arith.constant 0 : i32
    %c0_i32_1 = arith.constant 0 : i32
    return %c0_i32, %c0_i32_0 : i32, i32
  }
  func.func @transform_3(%arg0: i32) -> (i32, i32, i32, i32) {
    %c0_i32 = arith.constant 0 : i32
    %c0_i32_0 = arith.constant 0 : i32
    %c0_i32_1 = arith.constant 0 : i32
    %c0_i32_2 = arith.constant 0 : i32
    return %arg0, %c0_i32, %c0_i32_0, %c0_i32_1 : i32, i32, i32, i32
  }
}

module attributes {stable_mosaic.version = 11 : i64} {
  func.func @_conv3x3_s2_rows_kernel(%arg0: i32, %arg1: memref<1x14x14x32xbf16, #tpu.memory_space<vmem>>, %arg2: memref<288x128xbf16, #tpu.memory_space<vmem>>, %arg3: memref<1x128xf32, #tpu.memory_space<vmem>>, %arg4: memref<1x7x14x64xbf16, #tpu.memory_space<vmem>>, %arg5: memref<1x16x18x32xbf16, #tpu.memory_space<vmem>>) attributes {dimension_semantics = [#tpu.dimension_semantics<parallel>], iteration_bounds = array<i64: 2>, scalar_prefetch = 0 : i64, scratch_operands = 1 : i64, tpu.core_type = #tpu.core_type<tc>, window_params = [{transform_indices = @transform_0, window_bounds = array<i64: 1, 14, 14, 32>}, {pipeline_mode = #tpu.pipeline_mode<synchronous>, transform_indices = @transform_1, window_bounds = array<i64: 288, 128>}, {pipeline_mode = #tpu.pipeline_mode<synchronous>, transform_indices = @transform_2, window_bounds = array<i64: 1, 128>}, {transform_indices = @transform_3, window_bounds = array<i64: 1, 7, 14, 64>}]} {
    %cst = arith.constant 0.000000e+00 : bf16
    %0 = vector.broadcast %cst : bf16 to vector<1x16x18x32xbf16>
    %c0 = arith.constant 0 : index
    %c0_0 = arith.constant 0 : index
    %c0_1 = arith.constant 0 : index
    %c0_2 = arith.constant 0 : index
    %1 = vector.load %arg5[%c0, %c0_0, %c0_1, %c0_2] : memref<1x16x18x32xbf16, #tpu.memory_space<vmem>>, vector<1x16x18x32xbf16>
    tpu.vector_store %arg5[%c0, %c0_0, %c0_1, %c0_2], %0 {strides = array<i32>} : memref<1x16x18x32xbf16, #tpu.memory_space<vmem>>, vector<1x16x18x32xbf16>,
    %c0_3 = arith.constant 0 : index
    %c0_4 = arith.constant 0 : index
    %c0_5 = arith.constant 0 : index
    %c0_6 = arith.constant 0 : index
    %2 = vector.load %arg1[%c0_3, %c0_4, %c0_5, %c0_6] : memref<1x14x14x32xbf16, #tpu.memory_space<vmem>>, vector<1x14x14x32xbf16>
    %c0_7 = arith.constant 0 : index
    %c1 = arith.constant 1 : index
    %c1_8 = arith.constant 1 : index
    %c0_9 = arith.constant 0 : index
    %3 = vector.load %arg5[%c0_7, %c1, %c1_8, %c0_9] : memref<1x16x18x32xbf16, #tpu.memory_space<vmem>>, vector<1x14x14x32xbf16>
    tpu.vector_store %arg5[%c0_7, %c1, %c1_8, %c0_9], %2 {strides = array<i32>} : memref<1x16x18x32xbf16, #tpu.memory_space<vmem>>, vector<1x14x14x32xbf16>,
    %c0_10 = arith.constant 0 : index
    %c0_11 = arith.constant 0 : index
    %c0_12 = arith.constant 0 : index
    %c0_13 = arith.constant 0 : index
    %4 = vector.load %arg5[%c0_10, %c0_11, %c0_12, %c0_13] : memref<1x16x18x32xbf16, #tpu.memory_space<vmem>>, vector<1x16x18x32xbf16>
    %5 = vector.shape_cast %4 : vector<1x16x18x32xbf16> to vector<1x8x2x18x32xbf16>
    %6 = vector.extract_strided_slice %5 {offsets = [0, 0, 0, 0, 0], sizes = [1, 8, 1, 18, 32], strides = [1, 1, 1, 1, 1]} : vector<1x8x2x18x32xbf16> to vector<1x8x1x18x32xbf16>
    %7 = vector.shape_cast %6 : vector<1x8x1x18x32xbf16> to vector<1x8x18x32xbf16>
    %8 = vector.extract_strided_slice %5 {offsets = [0, 0, 1, 0, 0], sizes = [1, 8, 1, 18, 32], strides = [1, 1, 1, 1, 1]} : vector<1x8x2x18x32xbf16> to vector<1x8x1x18x32xbf16>
    %9 = vector.shape_cast %8 : vector<1x8x1x18x32xbf16> to vector<1x8x18x32xbf16>
    %10 = vector.extract_strided_slice %7 {offsets = [0, 0, 0, 0], sizes = [1, 7, 18, 32], strides = [1, 1, 1, 1]} : vector<1x8x18x32xbf16> to vector<1x7x18x32xbf16>
    %11 = vector.extract_strided_slice %9 {offsets = [0, 0, 0, 0], sizes = [1, 7, 18, 32], strides = [1, 1, 1, 1]} : vector<1x8x18x32xbf16> to vector<1x7x18x32xbf16>
    %12 = vector.extract_strided_slice %7 {offsets = [0, 1, 0, 0], sizes = [1, 7, 18, 32], strides = [1, 1, 1, 1]} : vector<1x8x18x32xbf16> to vector<1x7x18x32xbf16>
    %13 = vector.extract_strided_slice %10 {offsets = [0, 0, 0, 0], sizes = [1, 7, 16, 32], strides = [1, 1, 1, 1]} : vector<1x7x18x32xbf16> to vector<1x7x16x32xbf16>
    %14 = vector.extract_strided_slice %10 {offsets = [0, 0, 1, 0], sizes = [1, 7, 16, 32], strides = [1, 1, 1, 1]} : vector<1x7x18x32xbf16> to vector<1x7x16x32xbf16>
    %15 = vector.extract_strided_slice %10 {offsets = [0, 0, 2, 0], sizes = [1, 7, 16, 32], strides = [1, 1, 1, 1]} : vector<1x7x18x32xbf16> to vector<1x7x16x32xbf16>
    %16 = vector.extract_strided_slice %11 {offsets = [0, 0, 0, 0], sizes = [1, 7, 16, 32], strides = [1, 1, 1, 1]} : vector<1x7x18x32xbf16> to vector<1x7x16x32xbf16>
    %17 = vector.extract_strided_slice %11 {offsets = [0, 0, 1, 0], sizes = [1, 7, 16, 32], strides = [1, 1, 1, 1]} : vector<1x7x18x32xbf16> to vector<1x7x16x32xbf16>
    %18 = vector.extract_strided_slice %11 {offsets = [0, 0, 2, 0], sizes = [1, 7, 16, 32], strides = [1, 1, 1, 1]} : vector<1x7x18x32xbf16> to vector<1x7x16x32xbf16>
    %19 = vector.extract_strided_slice %12 {offsets = [0, 0, 0, 0], sizes = [1, 7, 16, 32], strides = [1, 1, 1, 1]} : vector<1x7x18x32xbf16> to vector<1x7x16x32xbf16>
    %20 = vector.extract_strided_slice %12 {offsets = [0, 0, 1, 0], sizes = [1, 7, 16, 32], strides = [1, 1, 1, 1]} : vector<1x7x18x32xbf16> to vector<1x7x16x32xbf16>
    %21 = vector.extract_strided_slice %12 {offsets = [0, 0, 2, 0], sizes = [1, 7, 16, 32], strides = [1, 1, 1, 1]} : vector<1x7x18x32xbf16> to vector<1x7x16x32xbf16>
    %22 = tpu.concatenate %13, %14, %15, %16, %17, %18, %19, %20, %21 in 3 : vector<1x7x16x32xbf16>, vector<1x7x16x32xbf16>, vector<1x7x16x32xbf16>, vector<1x7x16x32xbf16>, vector<1x7x16x32xbf16>, vector<1x7x16x32xbf16>, vector<1x7x16x32xbf16>, vector<1x7x16x32xbf16>, vector<1x7x16x32xbf16> -> vector<1x7x16x288xbf16>
    %23 = vector.shape_cast %22 : vector<1x7x16x288xbf16> to vector<112x288xbf16>
    %c0_14 = arith.constant 0 : index
    %c0_15 = arith.constant 0 : index
    %24 = vector.load %arg2[%c0_14, %c0_15] : memref<288x128xbf16, #tpu.memory_space<vmem>>, vector<288x128xbf16>
    %cst_16 = arith.constant dense<0.000000e+00> : vector<112x128xf32>
    %25 = tpu.matmul %23, %24, %cst_16 {dimension_numbers = #tpu.dot_dimension_numbers<[1], [0], [0], [1], [0, 0, 1, 1], [], []>} : vector<112x288xbf16>, vector<288x128xbf16>, vector<112x128xf32> -> vector<112x128xf32>
    %c0_17 = arith.constant 0 : index
    %c0_18 = arith.constant 0 : index
    %26 = vector.load %arg3[%c0_17, %c0_18] : memref<1x128xf32, #tpu.memory_space<vmem>>, vector<1x128xf32>
    %27 = vector.broadcast %26 : vector<1x128xf32> to vector<112x128xf32>
    %28 = arith.addf %25, %27 : vector<112x128xf32>
    %cst_19 = arith.constant 0.000000e+00 : f32
    %29 = vector.broadcast %cst_19 : f32 to vector<112x128xf32>
    %30 = arith.maximumf %28, %29 : vector<112x128xf32>
    %31 = vector.shape_cast %30 : vector<112x128xf32> to vector<1x7x16x128xf32>
    %32 = vector.extract_strided_slice %31 {offsets = [0, 0, 0, 0], sizes = [1, 7, 14, 64], strides = [1, 1, 1, 1]} : vector<1x7x16x128xf32> to vector<1x7x14x64xf32>
    %33 = arith.truncf %32 : vector<1x7x14x64xf32> to vector<1x7x14x64xbf16>
    %c0_20 = arith.constant 0 : index
    %c0_21 = arith.constant 0 : index
    %c0_22 = arith.constant 0 : index
    %c0_23 = arith.constant 0 : index
    %34 = vector.load %arg4[%c0_20, %c0_21, %c0_22, %c0_23] : memref<1x7x14x64xbf16, #tpu.memory_space<vmem>>, vector<1x7x14x64xbf16>
    tpu.vector_store %arg4[%c0_20, %c0_21, %c0_22, %c0_23], %33 {strides = array<i32>} : memref<1x7x14x64xbf16, #tpu.memory_space<vmem>>, vector<1x7x14x64xbf16>,
    return
  }
  func.func @transform_0(%arg0: i32) -> (i32, i32, i32, i32) {
    %c0_i32 = arith.constant 0 : i32
    %c0_i32_0 = arith.constant 0 : i32
    %c0_i32_1 = arith.constant 0 : i32
    %c0_i32_2 = arith.constant 0 : i32
    return %arg0, %c0_i32, %c0_i32_0, %c0_i32_1 : i32, i32, i32, i32
  }
  func.func @transform_1(%arg0: i32) -> (i32, i32) {
    %c0_i32 = arith.constant 0 : i32
    %c0_i32_0 = arith.constant 0 : i32
    %c0_i32_1 = arith.constant 0 : i32
    return %c0_i32, %c0_i32_0 : i32, i32
  }
  func.func @transform_2(%arg0: i32) -> (i32, i32) {
    %c0_i32 = arith.constant 0 : i32
    %c0_i32_0 = arith.constant 0 : i32
    %c0_i32_1 = arith.constant 0 : i32
    return %c0_i32, %c0_i32_0 : i32, i32
  }
  func.func @transform_3(%arg0: i32) -> (i32, i32, i32, i32) {
    %c0_i32 = arith.constant 0 : i32
    %c0_i32_0 = arith.constant 0 : i32
    %c0_i32_1 = arith.constant 0 : i32
    %c0_i32_2 = arith.constant 0 : i32
    return %arg0, %c0_i32, %c0_i32_0, %c0_i32_1 : i32, i32, i32, i32
  }
}

module attributes {stable_mosaic.version = 11 : i64} {
  func.func @_conv3x3_pool_fc_kernel(%arg0: i32, %arg1: memref<1x7x7x64xbf16, #tpu.memory_space<vmem>>, %arg2: memref<576x128xbf16, #tpu.memory_space<vmem>>, %arg3: memref<1x128xf32, #tpu.memory_space<vmem>>, %arg4: memref<128x128xbf16, #tpu.memory_space<vmem>>, %arg5: memref<1x128xf32, #tpu.memory_space<vmem>>, %arg6: memref<1x1x128xf32, #tpu.memory_space<vmem>>, %arg7: memref<1x9x10x64xbf16, #tpu.memory_space<vmem>>) attributes {dimension_semantics = [#tpu.dimension_semantics<parallel>], iteration_bounds = array<i64: 2>, scalar_prefetch = 0 : i64, scratch_operands = 1 : i64, tpu.core_type = #tpu.core_type<tc>, window_params = [{transform_indices = @transform_0, window_bounds = array<i64: 1, 7, 7, 64>}, {pipeline_mode = #tpu.pipeline_mode<synchronous>, transform_indices = @transform_1, window_bounds = array<i64: 576, 128>}, {pipeline_mode = #tpu.pipeline_mode<synchronous>, transform_indices = @transform_2, window_bounds = array<i64: 1, 128>}, {pipeline_mode = #tpu.pipeline_mode<synchronous>, transform_indices = @transform_3, window_bounds = array<i64: 128, 128>}, {pipeline_mode = #tpu.pipeline_mode<synchronous>, transform_indices = @transform_4, window_bounds = array<i64: 1, 128>}, {transform_indices = @transform_5, window_bounds = array<i64: 1, 1, 128>}]} {
    %cst = arith.constant 0.000000e+00 : bf16
    %0 = vector.broadcast %cst : bf16 to vector<1x9x10x64xbf16>
    %c0 = arith.constant 0 : index
    %c0_0 = arith.constant 0 : index
    %c0_1 = arith.constant 0 : index
    %c0_2 = arith.constant 0 : index
    %1 = vector.load %arg7[%c0, %c0_0, %c0_1, %c0_2] : memref<1x9x10x64xbf16, #tpu.memory_space<vmem>>, vector<1x9x10x64xbf16>
    tpu.vector_store %arg7[%c0, %c0_0, %c0_1, %c0_2], %0 {strides = array<i32>} : memref<1x9x10x64xbf16, #tpu.memory_space<vmem>>, vector<1x9x10x64xbf16>,
    %c0_3 = arith.constant 0 : index
    %c0_4 = arith.constant 0 : index
    %c0_5 = arith.constant 0 : index
    %c0_6 = arith.constant 0 : index
    %2 = vector.load %arg1[%c0_3, %c0_4, %c0_5, %c0_6] : memref<1x7x7x64xbf16, #tpu.memory_space<vmem>>, vector<1x7x7x64xbf16>
    %c0_7 = arith.constant 0 : index
    %c1 = arith.constant 1 : index
    %c1_8 = arith.constant 1 : index
    %c0_9 = arith.constant 0 : index
    %3 = vector.load %arg7[%c0_7, %c1, %c1_8, %c0_9] : memref<1x9x10x64xbf16, #tpu.memory_space<vmem>>, vector<1x7x7x64xbf16>
    tpu.vector_store %arg7[%c0_7, %c1, %c1_8, %c0_9], %2 {strides = array<i32>} : memref<1x9x10x64xbf16, #tpu.memory_space<vmem>>, vector<1x7x7x64xbf16>,
    %c0_10 = arith.constant 0 : index
    %c0_11 = arith.constant 0 : index
    %c0_12 = arith.constant 0 : index
    %c0_13 = arith.constant 0 : index
    %4 = vector.load %arg7[%c0_10, %c0_11, %c0_12, %c0_13] : memref<1x9x10x64xbf16, #tpu.memory_space<vmem>>, vector<1x7x10x64xbf16>
    %c0_14 = arith.constant 0 : index
    %c1_15 = arith.constant 1 : index
    %c0_16 = arith.constant 0 : index
    %c0_17 = arith.constant 0 : index
    %5 = vector.load %arg7[%c0_14, %c1_15, %c0_16, %c0_17] : memref<1x9x10x64xbf16, #tpu.memory_space<vmem>>, vector<1x7x10x64xbf16>
    %c0_18 = arith.constant 0 : index
    %c2 = arith.constant 2 : index
    %c0_19 = arith.constant 0 : index
    %c0_20 = arith.constant 0 : index
    %6 = vector.load %arg7[%c0_18, %c2, %c0_19, %c0_20] : memref<1x9x10x64xbf16, #tpu.memory_space<vmem>>, vector<1x7x10x64xbf16>
    %7 = vector.extract_strided_slice %4 {offsets = [0, 0, 0, 0], sizes = [1, 7, 8, 64], strides = [1, 1, 1, 1]} : vector<1x7x10x64xbf16> to vector<1x7x8x64xbf16>
    %8 = vector.extract_strided_slice %4 {offsets = [0, 0, 1, 0], sizes = [1, 7, 8, 64], strides = [1, 1, 1, 1]} : vector<1x7x10x64xbf16> to vector<1x7x8x64xbf16>
    %9 = vector.extract_strided_slice %4 {offsets = [0, 0, 2, 0], sizes = [1, 7, 8, 64], strides = [1, 1, 1, 1]} : vector<1x7x10x64xbf16> to vector<1x7x8x64xbf16>
    %10 = vector.extract_strided_slice %5 {offsets = [0, 0, 0, 0], sizes = [1, 7, 8, 64], strides = [1, 1, 1, 1]} : vector<1x7x10x64xbf16> to vector<1x7x8x64xbf16>
    %11 = vector.extract_strided_slice %5 {offsets = [0, 0, 1, 0], sizes = [1, 7, 8, 64], strides = [1, 1, 1, 1]} : vector<1x7x10x64xbf16> to vector<1x7x8x64xbf16>
    %12 = vector.extract_strided_slice %5 {offsets = [0, 0, 2, 0], sizes = [1, 7, 8, 64], strides = [1, 1, 1, 1]} : vector<1x7x10x64xbf16> to vector<1x7x8x64xbf16>
    %13 = vector.extract_strided_slice %6 {offsets = [0, 0, 0, 0], sizes = [1, 7, 8, 64], strides = [1, 1, 1, 1]} : vector<1x7x10x64xbf16> to vector<1x7x8x64xbf16>
    %14 = vector.extract_strided_slice %6 {offsets = [0, 0, 1, 0], sizes = [1, 7, 8, 64], strides = [1, 1, 1, 1]} : vector<1x7x10x64xbf16> to vector<1x7x8x64xbf16>
    %15 = vector.extract_strided_slice %6 {offsets = [0, 0, 2, 0], sizes = [1, 7, 8, 64], strides = [1, 1, 1, 1]} : vector<1x7x10x64xbf16> to vector<1x7x8x64xbf16>
    %16 = tpu.concatenate %7, %8, %9, %10, %11, %12, %13, %14, %15 in 3 : vector<1x7x8x64xbf16>, vector<1x7x8x64xbf16>, vector<1x7x8x64xbf16>, vector<1x7x8x64xbf16>, vector<1x7x8x64xbf16>, vector<1x7x8x64xbf16>, vector<1x7x8x64xbf16>, vector<1x7x8x64xbf16>, vector<1x7x8x64xbf16> -> vector<1x7x8x576xbf16>
    %17 = vector.shape_cast %16 : vector<1x7x8x576xbf16> to vector<56x576xbf16>
    %c0_21 = arith.constant 0 : index
    %c0_22 = arith.constant 0 : index
    %18 = vector.load %arg2[%c0_21, %c0_22] : memref<576x128xbf16, #tpu.memory_space<vmem>>, vector<576x128xbf16>
    %cst_23 = arith.constant dense<0.000000e+00> : vector<56x128xf32>
    %19 = tpu.matmul %17, %18, %cst_23 {dimension_numbers = #tpu.dot_dimension_numbers<[1], [0], [0], [1], [0, 0, 1, 1], [], []>} : vector<56x576xbf16>, vector<576x128xbf16>, vector<56x128xf32> -> vector<56x128xf32>
    %c0_24 = arith.constant 0 : index
    %c0_25 = arith.constant 0 : index
    %20 = vector.load %arg3[%c0_24, %c0_25] : memref<1x128xf32, #tpu.memory_space<vmem>>, vector<1x128xf32>
    %21 = vector.broadcast %20 : vector<1x128xf32> to vector<56x128xf32>
    %22 = arith.addf %19, %21 : vector<56x128xf32>
    %cst_26 = arith.constant 0.000000e+00 : f32
    %23 = vector.broadcast %cst_26 : f32 to vector<56x128xf32>
    %24 = arith.maximumf %22, %23 : vector<56x128xf32>
    %25 = vector.shape_cast %24 : vector<56x128xf32> to vector<1x7x8x128xf32>
    %26 = vector.extract_strided_slice %25 {offsets = [0, 0, 0, 0], sizes = [1, 7, 7, 128], strides = [1, 1, 1, 1]} : vector<1x7x8x128xf32> to vector<1x7x7x128xf32>
    %cst_27 = arith.constant dense<0.000000e+00> : vector<1x128xf32>
    %27 = vector.multi_reduction <add>, %26, %cst_27 [1, 2] : vector<1x7x7x128xf32> to vector<1x128xf32>
    %cst_28 = arith.constant 0.0204081628 : f32
    %28 = vector.broadcast %cst_28 : f32 to vector<1x128xf32>
    %29 = arith.mulf %27, %28 : vector<1x128xf32>
    %30 = arith.truncf %29 : vector<1x128xf32> to vector<1x128xbf16>
    %c0_29 = arith.constant 0 : index
    %c0_30 = arith.constant 0 : index
    %31 = vector.load %arg4[%c0_29, %c0_30] : memref<128x128xbf16, #tpu.memory_space<vmem>>, vector<128x128xbf16>
    %cst_31 = arith.constant dense<0.000000e+00> : vector<1x128xf32>
    %32 = tpu.matmul %30, %31, %cst_31 {dimension_numbers = #tpu.dot_dimension_numbers<[1], [0], [0], [1], [0, 0, 1, 1], [], []>} : vector<1x128xbf16>, vector<128x128xbf16>, vector<1x128xf32> -> vector<1x128xf32>
    %c0_32 = arith.constant 0 : index
    %c0_33 = arith.constant 0 : index
    %33 = vector.load %arg5[%c0_32, %c0_33] : memref<1x128xf32, #tpu.memory_space<vmem>>, vector<1x128xf32>
    %34 = arith.addf %32, %33 : vector<1x128xf32>
    %c0_34 = arith.constant 0 : index
    %c0_35 = arith.constant 0 : index
    %c0_36 = arith.constant 0 : index
    %35 = vector.load %arg6[%c0_34, %c0_35, %c0_36] : memref<1x1x128xf32, #tpu.memory_space<vmem>>, vector<1x1x128xf32>
    %36 = vector.shape_cast %35 : vector<1x1x128xf32> to vector<1x128xf32>
    %37 = vector.shape_cast %34 : vector<1x128xf32> to vector<1x1x128xf32>
    tpu.vector_store %arg6[%c0_34, %c0_35, %c0_36], %37 {strides = array<i32>} : memref<1x1x128xf32, #tpu.memory_space<vmem>>, vector<1x1x128xf32>,
    return
  }
  func.func @transform_0(%arg0: i32) -> (i32, i32, i32, i32) {
    %c0_i32 = arith.constant 0 : i32
    %c0_i32_0 = arith.constant 0 : i32
    %c0_i32_1 = arith.constant 0 : i32
    %c0_i32_2 = arith.constant 0 : i32
    return %arg0, %c0_i32, %c0_i32_0, %c0_i32_1 : i32, i32, i32, i32
  }
  func.func @transform_1(%arg0: i32) -> (i32, i32) {
    %c0_i32 = arith.constant 0 : i32
    %c0_i32_0 = arith.constant 0 : i32
    %c0_i32_1 = arith.constant 0 : i32
    return %c0_i32, %c0_i32_0 : i32, i32
  }
  func.func @transform_2(%arg0: i32) -> (i32, i32) {
    %c0_i32 = arith.constant 0 : i32
    %c0_i32_0 = arith.constant 0 : i32
    %c0_i32_1 = arith.constant 0 : i32
    return %c0_i32, %c0_i32_0 : i32, i32
  }
  func.func @transform_3(%arg0: i32) -> (i32, i32) {
    %c0_i32 = arith.constant 0 : i32
    %c0_i32_0 = arith.constant 0 : i32
    %c0_i32_1 = arith.constant 0 : i32
    return %c0_i32, %c0_i32_0 : i32, i32
  }
  func.func @transform_4(%arg0: i32) -> (i32, i32) {
    %c0_i32 = arith.constant 0 : i32
    %c0_i32_0 = arith.constant 0 : i32
    %c0_i32_1 = arith.constant 0 : i32
    return %c0_i32, %c0_i32_0 : i32, i32
  }
  func.func @transform_5(%arg0: i32) -> (i32, i32, i32) {
    %c0_i32 = arith.constant 0 : i32
    %c0_i32_0 = arith.constant 0 : i32
    %c0_i32_1 = arith.constant 0 : i32
    return %arg0, %c0_i32, %c0_i32_0 : i32, i32, i32
  }
}

</mosaic_0001>

<bundles_post_ra>
// kernel: convnet_forward.4
= control target key start
LH: loop header
LB: loop body
LE: loop exit
PB: predicated region body
PF: predicated region fallthrough
CT: control target
= control target key end

     0   :  { %s3345_s12 = smov 0   ;;  %s4867_s0 = inlined_call_operand.vmem [shape: bf16[2,28,32,75], index: 0, kind: input, shape index: {}]   ;;  %s4868_s1 = inlined_call_operand.vmem [shape: bf16[75,128], index: 1, kind: input, shape index: {}]   ;;  %s4869_s2 = inlined_call_operand.vmem [shape: f32[1,128], index: 2, kind: input, shape index: {}]   ;;  %s4870_s3 = inlined_call_operand.vmem [shape: bf16[2,14,28,32], index: 3, kind: output, shape index: {}]  }
   0x1 LB: > { %s2810_s13 = sadd.s32 4294967295, %s3322_s12   ;;  %p2814_p0 = scmp.ge.s32.totalorder %s3322_s12, 1  ;;  %s3322_s12 = sphi %s3345_s12, %s13_s12  }
   0x2   : > { %p137_p1 = scmp.lt.s32.totalorder %s3322_s12, 3 }
   0x4   : > { %p138_p2 = pnand %p2814_p0, %p137_p1 }
   0x6   : > { %141 = sbr.rel (%p138_p2) target bundleno = 518 (0x206), region = 32 }
   0xd   : > { %v3253_v0 = vld [vmem:[%s4868_s1] sm:$0xff]   ;;  %v3254_v1 = vld [vmem:[%s4868_s1 + $0x8] sm:$0xff]   ;;  %vm779_vm0 = vcmask 1044480   ;;  %v3255_v2 = vld [vmem:[%s4868_s1 + $0x10] sm:$0xff]   ;;  %p161_p3 = scmp.lt.s32.totalorder %s2810_s13, 1  ;;  %vm780_vm1 = vcmask 1045504  }
   0xe   : > { %3110 = vmatprep.subr.bf16.mxu0 %v3253_v0  ;;  %3232 = vmatprep.subr.bf16.mxu1 %v3253_v0  ;;  %v3324_v3 = vmov 65535   ;;  %v3256_v5 = vld [vmem:[%s4868_s1 + $0x18] sm:$0xff]   ;;  %v3257_v6 = vld [vmem:[%s4868_s1 + $0x20] sm:$0x3f]   ;;  %vm610_vm2 = vcmask 613376   ;;  %vm1491_vm3 = vcmask 1040384  }
   0xf   : > { %3111 = vmatpush3.bf16.msra.mxu0 %v3253_v0  ;;  %3237 = vmatpush3.bf16.msra.mxu1 %v3253_v0  ;;  %v781_v4 = vsel %vm779_vm0, 4294967295, %v3324_v3  ;;  %s5030_s13 = smov (!%p161_p3, %s2810_s13), 1  ;;  %vm1940_vm4 = vcmask 1046528   ;;  %vm2701_vm5 = vcmask 254976   ;;  %vm2697_vm6 = vcmask 257024  }
  0x10   : > { %3112 = vmatprep.subr.bf16.mxu0 %v3254_v1  ;;  %3233 = vmatprep.subr.bf16.mxu1 %v3254_v1  ;;  %v782_v7 = vsel %vm780_vm1, %v781_v4, 0  ;;  %s3242_s24 = smul.u32 448, %s5030_s13 }
  0x11   : > { %v784_v8 = vand.u32 %v3257_v6, %v782_v7  ;;  %s3243_s30 = smul.u32 224, %s5030_s13 }
  0x12   : > { %s3374_s27 = scalar_lea.vmem %s4867_s0, %s3242_s24 }
  0x13   : > { %3113 = vmatpush3.bf16.msra.mxu0 %v3254_v1  ;;  %3238 = vmatpush3.bf16.msra.mxu1 %v3254_v1  ;;  %v3258_v9 = vld [vmem:[%s3374_s27] sm:$0xff]   ;;  %v3260_v11 = vld [vmem:[%s3374_s27 + $0x8] sm:$0xff]   ;;  %v3262_v13 = vld [vmem:[%s3374_s27 + $0x10] sm:$0xff]   ;;  %s3665_s6 = scalar_lea.vmem %s4870_s3, %s3243_s30 }
  0x14   : > { %3114 = vmatprep.subr.bf16.mxu0 %v3255_v2  ;;  %3234 = vmatprep.subr.bf16.mxu1 %v3255_v2  ;;  %v3259_v10 = vld [vmem:[%s3374_s27 + $0xe0] sm:$0xff]   ;;  %v3261_v12 = vld [vmem:[%s3374_s27 + $0xe8] sm:$0xff]   ;;  %v3263_v14 = vld [vmem:[%s3374_s27 + $0xf0] sm:$0xff]  }
  0x15   : > { %3120 = vmatprep.mubr.msk.bf16.mxu0 %vm610_vm2, %v3258_v9  ;;  %3176 = vmatprep.mubr.msk.bf16.mxu1 %vm610_vm2, %v3259_v10  ;;  %v3264_v15 = vld [vmem:[%s3374_s27 + $0x18] sm:$0xff]   ;;  %v3266_v17 = vld [vmem:[%s3374_s27 + $0x20] sm:$0xff]   ;;  %v3268_v19 = vld [vmem:[%s3374_s27 + $0x28] sm:$0xff]  }
  0x16   : > { %v3265_v16 = vld [vmem:[%s3374_s27 + $0xf8] sm:$0xff]   ;;  %v3267_v18 = vld [vmem:[%s3374_s27 + $0x100] sm:$0xff]   ;;  %v3269_v20 = vld [vmem:[%s3374_s27 + $0x108] sm:$0xff]  }
  0x17   : > { %3115 = vmatpush3.bf16.msra.mxu0 %v3255_v2  ;;  %3239 = vmatpush3.bf16.msra.mxu1 %v3255_v2  ;;  %v3270_v21 = vld [vmem:[%s3374_s27 + $0x30] sm:$0xff]   ;;  %v3272_v23 = vld [vmem:[%s3374_s27 + $0x38] sm:$0xff]   ;;  %v3274_v25 = vld [vmem:[%s3374_s27 + $0x40] sm:$0xff]  }
  0x18   : > { %3116 = vmatprep.subr.bf16.mxu0 %v3256_v5  ;;  %3235 = vmatprep.subr.bf16.mxu1 %v3256_v5  ;;  %v3271_v22 = vld [vmem:[%s3374_s27 + $0x110] sm:$0xff]   ;;  %v3273_v24 = vld [vmem:[%s3374_s27 + $0x118] sm:$0xff]   ;;  %v3275_v26 = vld [vmem:[%s3374_s27 + $0x120] sm:$0xff]  }
  0x19   : > { %v3276_v27 = vld [vmem:[%s3374_s27 + $0x48] sm:$0xff]   ;;  %v3278_v29 = vld [vmem:[%s3374_s27 + $0x50] sm:$0xff]   ;;  %v3280_v31 = vld [vmem:[%s3374_s27 + $0x58] sm:$0xff]  }
  0x1a   : > { %v3277_v28 = vld [vmem:[%s3374_s27 + $0x128] sm:$0xff]   ;;  %v3279_v30 = vld [vmem:[%s3374_s27 + $0x130] sm:$0xff]   ;;  %v3281_v32 = vld [vmem:[%s3374_s27 + $0x138] sm:$0xff]  }
  0x1b   : > { %3117 = vmatpush3.bf16.msra.mxu0 %v3256_v5  ;;  %3240 = vmatpush3.bf16.msra.mxu1 %v3256_v5  ;;  %v3282_v33 = vld [vmem:[%s3374_s27 + $0x60] sm:$0xff]   ;;  %v3284_v35 = vld [vmem:[%s3374_s27 + $0x68] sm:$0xff]   ;;  %v3286_v37 = vld [vmem:[%s3374_s27 + $0x70] sm:$0xff]  }
  0x1c   : > { %3118 = vmatprep.subr.bf16.mxu0 %v784_v8  ;;  %3236 = vmatprep.subr.bf16.mxu1 %v784_v8  ;;  %v3283_v34 = vld [vmem:[%s3374_s27 + $0x140] sm:$0xff]   ;;  %v3285_v36 = vld [vmem:[%s3374_s27 + $0x148] sm:$0xff]   ;;  %v3287_v38 = vld [vmem:[%s3374_s27 + $0x150] sm:$0xff]  }
  0x1d   : > { %v3288_v39 = vld [vmem:[%s3374_s27 + $0x78] sm:$0xff]   ;;  %v3290_v41 = vld [vmem:[%s3374_s27 + $0x80] sm:$0xff]   ;;  %v3292_v43 = vld [vmem:[%s3374_s27 + $0x88] sm:$0xff]  }
  0x1e   : > { %v3289_v40 = vld [vmem:[%s3374_s27 + $0x158] sm:$0xff]   ;;  %v3291_v42 = vld [vmem:[%s3374_s27 + $0x160] sm:$0xff]   ;;  %v3293_v44 = vld [vmem:[%s3374_s27 + $0x168] sm:$0xff]  }
  0x1f   : > { %3119 = vmatpush3.bf16.msra.mxu0 %v784_v8  ;;  %3241 = vmatpush3.bf16.msra.mxu1 %v784_v8  ;;  %v3294_v45 = vld [vmem:[%s3374_s27 + $0x90] sm:$0xff]   ;;  %v3296_v47 = vld [vmem:[%s3374_s27 + $0x98] sm:$0xff]   ;;  %v3298_v49 = vld [vmem:[%s3374_s27 + $0xa0] sm:$0xff]  }
  0x20   : > { %v3295_v46 = vld [vmem:[%s3374_s27 + $0x170] sm:$0xff]   ;;  %v3297_v48 = vld [vmem:[%s3374_s27 + $0x178] sm:$0xff]   ;;  %v3299_v50 = vld [vmem:[%s3374_s27 + $0x180] sm:$0xff]  }
  0x21   : > { %v3300_v51 = vld [vmem:[%s3374_s27 + $0xa8] sm:$0xff]   ;;  %v3302_v53 = vld [vmem:[%s3374_s27 + $0xb0] sm:$0xff]   ;;  %v3304_v55 = vld [vmem:[%s3374_s27 + $0xb8] sm:$0xff]  }
  0x22   : > { %3121 = vmatmul.mubr.msk.bf16.vlgmr.msra.gmra.mrb[0].mxu0 %vm610_vm2, %v3260_v11  ;;  %3177 = vmatmul.mubr.msk.bf16.vlgmr.msra.gmra.mrb[0].mxu1 %vm610_vm2, %v3261_v12  ;;  %v3301_v52 = vld [vmem:[%s3374_s27 + $0x188] sm:$0xff]   ;;  %v3303_v54 = vld [vmem:[%s3374_s27 + $0x190] sm:$0xff]   ;;  %v3305_v56 = vld [vmem:[%s3374_s27 + $0x198] sm:$0xff]  }
  0x23   : > { %3124 = vmatprep.mubr.msk.bf16.mxu0 %vm610_vm2, %v3262_v13  ;;  %3180 = vmatprep.mubr.msk.bf16.mxu1 %vm610_vm2, %v3263_v14  ;;  %v3306_v57 = vld [vmem:[%s3374_s27 + $0xc0] sm:$0xff]   ;;  %v3308_v59 = vld [vmem:[%s3374_s27 + $0xc8] sm:$0xff]   ;;  %v3310_v61 = vld [vmem:[%s3374_s27 + $0xd0] sm:$0xff]  }
  0x24   : > { %v3307_v58 = vld [vmem:[%s3374_s27 + $0x1a0] sm:$0xff]   ;;  %v3309_v60 = vld [vmem:[%s3374_s27 + $0x1a8] sm:$0xff]   ;;  %v3311_v62 = vld [vmem:[%s3374_s27 + $0x1b0] sm:$0xff]  }
  0x25   : > { %v3312_v63 = vld [vmem:[%s3374_s27 + $0xd8] sm:$0xff]   ;;  %v3491_v1 = vld [vmem:[%s4869_s2] ss:$0 sm:$0xff] }
  0x26   : > { %v3313_v0 = vld [vmem:[%s3374_s27 + $0x1b8] sm:$0xff]  }
  0x2a   : > { %3125 = vmatmul.mubr.msk.bf16.gmra.mrb[4].mxu0 %vm610_vm2, %v3264_v15  ;;  %3181 = vmatmul.mubr.msk.bf16.gmra.mrb[4].mxu1 %vm610_vm2, %v3265_v16 }
  0x2b   : > { %3128 = vmatprep.mubr.msk.bf16.mxu0 %vm610_vm2, %v3266_v17  ;;  %3184 = vmatprep.mubr.msk.bf16.mxu1 %vm610_vm2, %v3267_v18 }
  0x32   : > { %3129 = vmatmul.mubr.msk.bf16.gmra.mrb[8].mxu0 %vm610_vm2, %v3268_v19  ;;  %3185 = vmatmul.mubr.msk.bf16.gmra.mrb[8].mxu1 %vm610_vm2, %v3269_v20 }
  0x33   : > { %3132 = vmatprep.mubr.msk.bf16.mxu0 %vm610_vm2, %v3270_v21  ;;  %3188 = vmatprep.mubr.msk.bf16.mxu1 %vm610_vm2, %v3271_v22 }
  0x3a   : > { %3133 = vmatmul.mubr.msk.bf16.gmra.mrb[12].mxu0 %vm610_vm2, %v3272_v23  ;;  %3189 = vmatmul.mubr.msk.bf16.gmra.mrb[12].mxu1 %vm610_vm2, %v3273_v24 }
  0x3b   : > { %3136 = vmatprep.mubr.msk.bf16.mxu0 %vm610_vm2, %v3274_v25  ;;  %3192 = vmatprep.mubr.msk.bf16.mxu1 %vm610_vm2, %v3275_v26 }
  0x42   : > { %3137 = vmatmul.mubr.msk.bf16.gmra.mrb[16].mxu0 %vm610_vm2, %v3276_v27  ;;  %3193 = vmatmul.mubr.msk.bf16.gmra.mrb[16].mxu1 %vm610_vm2, %v3277_v28 }
  0x43   : > { %3140 = vmatprep.mubr.msk.bf16.mxu0 %vm610_vm2, %v3278_v29  ;;  %3196 = vmatprep.mubr.msk.bf16.mxu1 %vm610_vm2, %v3279_v30 }
  0x4a   : > { %3141 = vmatmul.mubr.msk.bf16.gmra.mrb[20].mxu0 %vm610_vm2, %v3280_v31  ;;  %3197 = vmatmul.mubr.msk.bf16.gmra.mrb[20].mxu1 %vm610_vm2, %v3281_v32 }
  0x4b   : > { %3144 = vmatprep.mubr.msk.bf16.mxu0 %vm610_vm2, %v3282_v33  ;;  %3200 = vmatprep.mubr.msk.bf16.mxu1 %vm610_vm2, %v3283_v34 }
  0x52   : > { %3145 = vmatmul.mubr.msk.bf16.gmra.mrb[24].mxu0 %vm610_vm2, %v3284_v35  ;;  %3201 = vmatmul.mubr.msk.bf16.gmra.mrb[24].mxu1 %vm610_vm2, %v3285_v36 }
  0x53   : > { %3148 = vmatprep.mubr.msk.bf16.mxu0 %vm610_vm2, %v3286_v37  ;;  %3204 = vmatprep.mubr.msk.bf16.mxu1 %vm610_vm2, %v3287_v38 }
  0x5a   : > { %3149 = vmatmul.mubr.msk.bf16.gmra.mrb[28].mxu0 %vm610_vm2, %v3288_v39  ;;  %3205 = vmatmul.mubr.msk.bf16.gmra.mrb[28].mxu1 %vm610_vm2, %v3289_v40 }
  0x5b   : > { %3152 = vmatprep.mubr.msk.bf16.mxu0 %vm610_vm2, %v3290_v41  ;;  %3208 = vmatprep.mubr.msk.bf16.mxu1 %vm610_vm2, %v3291_v42 }
  0x62   : > { %3153 = vmatmul.mubr.msk.bf16.gmra.mrb[32].mxu0 %vm610_vm2, %v3292_v43  ;;  %3209 = vmatmul.mubr.msk.bf16.gmra.mrb[32].mxu1 %vm610_vm2, %v3293_v44 }
  0x63   : > { %3156 = vmatprep.mubr.msk.bf16.mxu0 %vm610_vm2, %v3294_v45  ;;  %3212 = vmatprep.mubr.msk.bf16.mxu1 %vm610_vm2, %v3295_v46 }
  0x6a   : > { %3157 = vmatmul.mubr.msk.bf16.gmra.mrb[36].mxu0 %vm610_vm2, %v3296_v47  ;;  %3213 = vmatmul.mubr.msk.bf16.gmra.mrb[36].mxu1 %vm610_vm2, %v3297_v48 }
  0x6b   : > { %3160 = vmatprep.mubr.msk.bf16.mxu0 %vm610_vm2, %v3298_v49  ;;  %3216 = vmatprep.mubr.msk.bf16.mxu1 %vm610_vm2, %v3299_v50 }
  0x72   : > { %3161 = vmatmul.mubr.msk.bf16.gmra.mrb[40].mxu0 %vm610_vm2, %v3300_v51  ;;  %3217 = vmatmul.mubr.msk.bf16.gmra.mrb[40].mxu1 %vm610_vm2, %v3301_v52 }
  0x73   : > { %3164 = vmatprep.mubr.msk.bf16.mxu0 %vm610_vm2, %v3302_v53  ;;  %3220 = vmatprep.mubr.msk.bf16.mxu1 %vm610_vm2, %v3303_v54 }
  0x7a   : > { %3165 = vmatmul.mubr.msk.bf16.gmra.mrb[44].mxu0 %vm610_vm2, %v3304_v55  ;;  %3221 = vmatmul.mubr.msk.bf16.gmra.mrb[44].mxu1 %vm610_vm2, %v3305_v56 }
  0x7b   : > { %3168 = vmatprep.mubr.msk.bf16.mxu0 %vm610_vm2, %v3306_v57  ;;  %3224 = vmatprep.mubr.msk.bf16.mxu1 %vm610_vm2, %v3307_v58 }
  0x82   : > { %3169 = vmatmul.mubr.msk.bf16.gmra.mrb[48].mxu0 %vm610_vm2, %v3308_v59  ;;  %3225 = vmatmul.mubr.msk.bf16.gmra.mrb[48].mxu1 %vm610_vm2, %v3309_v60 }
  0x83   : > { %3172 = vmatprep.mubr.msk.bf16.mxu0 %vm610_vm2, %v3310_v61  ;;  %3228 = vmatprep.mubr.msk.bf16.mxu1 %vm610_vm2, %v3311_v62 }
  0x8a   : > { %3173 = vmatmul.mubr.msk.bf16.gmra.mrb[52].mxu0 %vm610_vm2, %v3312_v63  ;;  %3229 = vmatmul.mubr.msk.bf16.gmra.mrb[52].mxu1 %vm610_vm2, %v3313_v0 }
  0xf5   : > { %v3122_v2 = vpop.f32.mrb[0].mxu0  ;;  %v3178_v3 = vpop.f32.mrb[0].mxu1 }
  0xf6   : > { %v829_v4 = vadd.f32 %v3122_v2, %v3491_v1  ;;  %v1053_v5 = vadd.f32 %v3178_v3, %v3491_v1  ;;  %v820_v6 = vpop.f32.mrb[1].mxu0  ;;  %v1044_v7 = vpop.f32.mrb[1].mxu1 }
  0xf7   : > { %v821_v8 = vadd.f32 %v3491_v1, %v820_v6  ;;  %v1045_v9 = vadd.f32 %v3491_v1, %v1044_v7  ;;  %v3123_v10 = vpop.f32.mrb[2].mxu0  ;;  %v3179_v11 = vpop.f32.mrb[2].mxu1 }
  0xf8   : > { %v3497_v12 = vmax.f32 %v829_v4, 0.0  ;;  %v3499_v13 = vmax.f32 %v1053_v5, 0.0  ;;  %v832_v14 = vadd.f32 %v3123_v10, %v3491_v1  ;;  %v1056_v15 = vadd.f32 %v3179_v11, %v3491_v1  ;;  %v823_v16 = vpop.f32.mrb[3].mxu0  ;;  %v1047_v17 = vpop.f32.mrb[3].mxu1 }
  0xf9   : > { %v1267_v18 = vmax.f32 %v821_v8, 0.0  ;;  %v3503_v19 = vmax.f32 %v1045_v9, 0.0  ;;  %v824_v20 = vadd.f32 %v3491_v1, %v823_v16  ;;  %v1048_v21 = vadd.f32 %v3491_v1, %v1047_v17 }
  0xfa   : > { %v1495_v22 = vrot.slane %v3497_v12, 7  ;;  %v1944_v23 = vrot.slane %v3497_v12, 1  ;;  %v1593_v24 = vrot.slane %v3499_v13, 7  ;;  %v2042_v25 = vrot.slane %v3499_v13, 1 }
  0xfb   : > { %v1492_v26 = vrot.slane %v1267_v18, 7  ;;  %v1590_v27 = vrot.slane %v3503_v19, 7  ;;  %v1270_v28 = vmax.f32 %v832_v14, 0.0  ;;  %v1326_v29 = vmax.f32 %v1056_v15, 0.0 }
  0xfc   : > { %v1268_v30 = vmax.f32 %v824_v20, 0.0  ;;  %v1324_v31 = vmax.f32 %v1048_v21, 0.0  ;;  %v1941_v33 = vrot.slane %v1267_v18, 1  ;;  %v2039_v35 = vrot.slane %v3503_v19, 1 }
  0xfd   : > { %v1800_v32 = vsel %vm1491_vm3, 0.0, %v1492_v26  ;;  %v1814_v34 = vsel %vm1491_vm3, 0.0, %v1590_v27  ;;  %v3126_v36 = vpop.f32.mrb[4].mxu0  ;;  %v3182_v37 = vpop.f32.mrb[4].mxu1  ;;  %v1497_v40 = vrot.slane %v1270_v28, 7  ;;  %v1946_v41 = vrot.slane %v1270_v28, 1 }
  0xfe   : > { %v1828_v38 = vmax.f32 %v1800_v32, %v1267_v18  ;;  %v1884_v39 = vmax.f32 %v1814_v34, %v3503_v19  ;;  %v836_v42 = vpop.f32.mrb[5].mxu0  ;;  %v1060_v43 = vpop.f32.mrb[5].mxu1  ;;  %v1595_v44 = vrot.slane %v1326_v29, 7  ;;  %v2044_v45 = vrot.slane %v1326_v29, 1 }
  0xff   : > { %v1493_v46 = vrot.slane %v1268_v30, 7  ;;  %v1942_v47 = vrot.slane %v1268_v30, 1  ;;  %v3127_v48 = vpop.f32.mrb[6].mxu0  ;;  %v3183_v49 = vpop.f32.mrb[6].mxu1  ;;  %v1498_v50 = vsel %vm1491_vm3, %v1495_v22, %v1497_v40  ;;  %v1947_v51 = vsel %vm1940_vm4, %v1944_v23, %v1946_v41 }
 0x100   : > { %v1591_v52 = vrot.slane %v1324_v31, 7  ;;  %v2040_v53 = vrot.slane %v1324_v31, 1  ;;  %v839_v54 = vpop.f32.mrb[7].mxu0  ;;  %v1063_v55 = vpop.f32.mrb[7].mxu1  ;;  %v1831_v56 = vmax.f32 %v1498_v50, %v1270_v28  ;;  %v1596_v57 = vsel %vm1491_vm3, %v1593_v24, %v1595_v44 }
 0x101   : > { %v2045_v58 = vsel %vm1940_vm4, %v2042_v25, %v2044_v45  ;;  %v1494_v59 = vsel %vm1491_vm3, %v1492_v26, %v1493_v46  ;;  %v1887_v60 = vmax.f32 %v1596_v57, %v1326_v29  ;;  %v1496_v61 = vsel %vm1491_vm3, %v1493_v46, %v1495_v22 }
 0x102   : > { %v1829_v62 = vmax.f32 %v1494_v59, %v1268_v30  ;;  %v1943_v63 = vsel %vm1940_vm4, %v1941_v33, %v1942_v47  ;;  %v3523_v0 = vmax.f32 %v1831_v56, %v1946_v41  ;;  %v1830_v2 = vmax.f32 %v1496_v61, %v3497_v12 }
 0x103   : > { %v1945_v3 = vsel %vm1940_vm4, %v1942_v47, %v1944_v23  ;;  %v3527_v4 = vmax.f32 %v1828_v38, %v1943_v63  ;;  %v3529_v5 = vmax.f32 %v1887_v60, %v2044_v45  ;;  %v1592_v7 = vsel %vm1491_vm3, %v1590_v27, %v1591_v52 }
 0x104   : > { %v3531_v6 = vmax.f32 %v1829_v62, %v1945_v3  ;;  %v1594_v8 = vsel %vm1491_vm3, %v1591_v52, %v1593_v24  ;;  %v3535_v9 = vmax.f32 %v1830_v2, %v1947_v51  ;;  %v1885_v10 = vmax.f32 %v1592_v7, %v1324_v31 }
 0x105   : > { %4879 = vst [vmem:[#allocation2_spill] sm:$0xff] %v3529_v5  ;;  %v1886_v11 = vmax.f32 %v1594_v8, %v3499_v13  ;;  %v2041_v14 = vsel %vm1940_vm4, %v2039_v35, %v2040_v53  ;;  %v3130_v12 = vpop.f32.mrb[8].mxu0  ;;  %v3186_v15 = vpop.f32.mrb[8].mxu1  ;;  %v2043_v16 = vsel %vm1940_vm4, %v2040_v53, %v2042_v25  ;;  %v845_v18 = vadd.f32 %v3126_v36, %v3491_v1 }
 0x106   : > { %v3540_v17 = vmax.f32 %v1884_v39, %v2041_v14  ;;  %v1069_v19 = vadd.f32 %v3182_v37, %v3491_v1  ;;  %v3544_v20 = vpop.f32.mrb[9].mxu0  ;;  %v3546_v21 = vpop.f32.mrb[9].mxu1  ;;  %v3548_v22 = vmax.f32 %v1885_v10, %v2043_v16  ;;  %v837_v13 = vadd.f32 %v3491_v1, %v836_v42 }
 0x107   : > { %v3550_v23 = vmax.f32 %v1886_v11, %v2045_v58  ;;  %v1061_v24 = vadd.f32 %v3491_v1, %v1060_v43  ;;  %v3554_v26 = vpop.f32.mrb[10].mxu0  ;;  %v3556_v25 = vpop.f32.mrb[10].mxu1  ;;  %v3558_v27 = vmax.f32 %v845_v18, 0.0  ;;  %v848_v29 = vadd.f32 %v3127_v48, %v3491_v1 }
 0x108   : > { %4880 = vst [vmem:[#allocation3_spill] sm:$0xff] %v3540_v17  ;;  %4881 = vst [vmem:[#allocation4_spill] sm:$0xff] %v3548_v22  ;;  %v3560_v28 = vmax.f32 %v1069_v19, 0.0  ;;  %v1072_v30 = vadd.f32 %v3183_v49, %v3491_v1  ;;  %v3564_v31 = vpop.f32.mrb[11].mxu0  ;;  %v3566_v32 = vpop.f32.mrb[11].mxu1  ;;  %v1271_v33 = vmax.f32 %v837_v13, 0.0  ;;  %v840_v35 = vadd.f32 %v3491_v1, %v839_v54 }
 0x109   : > { %4882 = vst [vmem:[#allocation5_spill] sm:$0xff] %v3550_v23  ;;  %v3568_v34 = vmax.f32 %v1061_v24, 0.0  ;;  %v1064_v36 = vadd.f32 %v3491_v1, %v1063_v55  ;;  %v1502_v37 = vrot.slane %v3558_v27, 7  ;;  %v1951_v38 = vrot.slane %v3558_v27, 1 }
 0x10a   : > { %v1600_v39 = vrot.slane %v3560_v28, 7  ;;  %v2049_v40 = vrot.slane %v3560_v28, 1  ;;  %v1499_v41 = vrot.slane %v1271_v33, 7  ;;  %v1948_v42 = vrot.slane %v1271_v33, 1 }
 0x10b   : > { %v1597_v43 = vrot.slane %v3568_v34, 7  ;;  %v2046_v44 = vrot.slane %v3568_v34, 1  ;;  %v1274_v45 = vmax.f32 %v848_v29, 0.0  ;;  %v1330_v46 = vmax.f32 %v1072_v30, 0.0 }
 0x10c   : > { %v1272_v47 = vmax.f32 %v840_v35, 0.0  ;;  %v3578_v48 = vmax.f32 %v1064_v36, 0.0  ;;  %v1801_v49 = vsel %vm1491_vm3, 0.0, %v1499_v41  ;;  %v3585_v51 = vadd.f32 %v3130_v12, %v3491_v1 }
 0x10d   : > { %v3582_v50 = vsel %vm1491_vm3, 0.0, %v1597_v43  ;;  %v3588_v52 = vadd.f32 %v3186_v15, %v3491_v1  ;;  %v3590_v53 = vpop.f32.mrb[12].mxu0  ;;  %v3592_v54 = vpop.f32.mrb[12].mxu1  ;;  %v1832_v55 = vmax.f32 %v1801_v49, %v1271_v33  ;;  %v1504_v57 = vrot.slane %v1274_v45, 7 }
 0x10e   : > { %v1888_v56 = vmax.f32 %v3582_v50, %v3568_v34  ;;  %v1953_v58 = vrot.slane %v1274_v45, 1  ;;  %v3596_v59 = vpop.f32.mrb[13].mxu0  ;;  %v3598_v60 = vpop.f32.mrb[13].mxu1  ;;  %v1602_v61 = vrot.slane %v1330_v46, 7  ;;  %v2051_v62 = vrot.slane %v1330_v46, 1 }
 0x10f   : > { %v1500_v63 = vrot.slane %v1272_v47, 7  ;;  %v1949_v2 = vrot.slane %v1272_v47, 1  ;;  %v3600_v3 = vpop.f32.mrb[14].mxu0  ;;  %v3602_v7 = vpop.f32.mrb[14].mxu1  ;;  %v1505_v8 = vsel %vm1491_vm3, %v1502_v37, %v1504_v57  ;;  %v1598_v11 = vrot.slane %v3578_v48, 7 }
 0x110   : > { %v1954_v10 = vsel %vm1940_vm4, %v1951_v38, %v1953_v58  ;;  %v2047_v14 = vrot.slane %v3578_v48, 1  ;;  %v3608_v12 = vpop.f32.mrb[15].mxu0  ;;  %v3610_v15 = vpop.f32.mrb[15].mxu1  ;;  %v1835_v16 = vmax.f32 %v1505_v8, %v1274_v45  ;;  %v1603_v18 = vsel %vm1491_vm3, %v1600_v39, %v1602_v61 }
 0x111   : > { %v2052_v19 = vsel %vm1940_vm4, %v2049_v40, %v2051_v62  ;;  %v1501_v13 = vsel %vm1491_vm3, %v1499_v41, %v1500_v63  ;;  %v1891_v24 = vmax.f32 %v1603_v18, %v1330_v46  ;;  %v1503_v29 = vsel %vm1491_vm3, %v1500_v63, %v1502_v37 }
 0x112   : > { %v1833_v30 = vmax.f32 %v1501_v13, %v1272_v47  ;;  %v1950_v33 = vsel %vm1940_vm4, %v1948_v42, %v1949_v2  ;;  %v3619_v34 = vmax.f32 %v1835_v16, %v1953_v58  ;;  %v1834_v35 = vmax.f32 %v1503_v29, %v3558_v27 }
 0x113   : > { %v1952_v36 = vsel %vm1940_vm4, %v1949_v2, %v1951_v38  ;;  %v3623_v45 = vmax.f32 %v1832_v55, %v1950_v33  ;;  %v3626_v49 = vmax.f32 %v1891_v24, %v2051_v62  ;;  %v1599_v41 = vsel %vm1491_vm3, %v1597_v43, %v1598_v11 }
 0x114   : > { %v3628_v50 = vmax.f32 %v1833_v30, %v1952_v36  ;;  %v1601_v37 = vsel %vm1491_vm3, %v1598_v11, %v1600_v39  ;;  %v2364_v42 = vmax.f32 %v3523_v0, %v3619_v34  ;;  %v3634_v46 = vmax.f32 %v1834_v35, %v1954_v10 }
 0x115   : > { %4883 = vst [vmem:[#allocation6_spill] sm:$0xff] %v3626_v49  ;;  %v2361_v27 = vmax.f32 %v3527_v4, %v3623_v45  ;;  %v1889_v38 = vmax.f32 %v1599_v41, %v3578_v48  ;;  %v3639_v47 = vpop.f32.mrb[16].mxu0  ;;  %v3641_v55 = vpop.f32.mrb[16].mxu1  ;;  %v1890_v43 = vmax.f32 %v1601_v37, %v3560_v28  ;;  %v2048_v0 = vsel %vm1940_vm4, %v2046_v44, %v2047_v14 }
 0x116   : > { %v2362_v39 = vmax.f32 %v3531_v6, %v3628_v50  ;;  %v3649_v58 = vpop.f32.mrb[17].mxu0  ;;  %v3651_v61 = vpop.f32.mrb[17].mxu1  ;;  %v2420_v4 = vmax.f32 %v2364_v42, 0.0  ;;  %v2363_v48 = vmax.f32 %v3535_v9, %v3634_v46  ;;  %v2050_v63 = vsel %vm1940_vm4, %v2047_v14, %v2049_v40 }
 0x117   : > { %v2417_v62 = vmax.f32 %v2361_v27, 0.0  ;;  %v3658_v2 = vpop.f32.mrb[18].mxu0  ;;  %v3660_v6 = vpop.f32.mrb[18].mxu1  ;;  %v3667_v8 = vmax.f32 %v1888_v56, %v2048_v0  ;;  %v3669_v9 = vmax.f32 %v1889_v38, %v2050_v63  ;;  %v3671_v10 = vmax.f32 %v1890_v43, %v2052_v19 }
 0x118   : > { %v2418_v44 = vmax.f32 %v2362_v39, 0.0  ;;  %v3673_v28 = vpop.f32.mrb[19].mxu0  ;;  %v3675_v40 = vpop.f32.mrb[19].mxu1  ;;  %v2996_v11 = vpack.c.bf16 %v2420_v4, %v2420_v4  ;;  %v2419_v14 = vmax.f32 %v2363_v48, 0.0  ;;  %v3678_v18 = vmax.f32 %v3585_v51, 0.0 }
 0x119   : > { %4884 = vst [vmem:[#allocation7_spill] sm:$0xff] %v3667_v8  ;;  %4885 = vst [vmem:[#allocation8_spill] sm:$0xff] %v3669_v9  ;;  %v2993_v16 = vpack.c.bf16 %v2417_v62, %v2417_v62  ;;  %v3693_v33 = vmax.f32 %v3588_v52, 0.0  ;;  %v853_v35 = vadd.f32 %v3491_v1, %v3544_v20  ;;  %v1077_v36 = vadd.f32 %v3491_v1, %v3546_v21 }
 0x11a   : > { %4886 = vst [vmem:[#allocation9_spill] sm:$0xff] %v3671_v10  ;;  %v2994_v13 = vpack.c.bf16 %v2418_v44, %v2418_v44  ;;  %2702 = vst.msk [vmem:[%s3665_s6 + $0xc] sm:$0x3] %vm2701_vm5, %v2996_v11  ;;  %v2995_v29 = vpack.c.bf16 %v2419_v14, %v2419_v14  ;;  %v1509_v30 = vrot.slane %v3678_v18, 7  ;;  %v1958_v51 = vrot.slane %v3678_v18, 1 }
 0x11b   : > { %2698 = vst.msk [vmem:[%s3665_s6] sm:$0xf] %vm2697_vm6, %v2993_v16  ;;  %v864_v41 = vadd.f32 %v3554_v26, %v3491_v1  ;;  %v1088_v37 = vadd.f32 %v3556_v25, %v3491_v1  ;;  %v856_v27 = vadd.f32 %v3491_v1, %v3564_v31  ;;  %v1080_v20 = vadd.f32 %v3491_v1, %v3566_v32 }
 0x11c   : > { %2699 = vst.msk [vmem:[%s3665_s6 + $0x4] sm:$0xf] %vm2697_vm6, %v2994_v13  ;;  %2700 = vst.msk [vmem:[%s3665_s6 + $0x8] sm:$0xf] %vm2697_vm6, %v2995_v29  ;;  %v1275_v26 = vmax.f32 %v853_v35, 0.0  ;;  %v3717_v39 = vmax.f32 %v1077_v36, 0.0  ;;  %v877_v31 = vadd.f32 %v3590_v53, %v3491_v1  ;;  %v1101_v32 = vadd.f32 %v3592_v54, %v3491_v1 }
 0x11d   : > { %v3713_v38 = vpop.f32.mrb[20].mxu0  ;;  %v3715_v21 = vpop.f32.mrb[20].mxu1  ;;  %v1278_v25 = vmax.f32 %v864_v41, 0.0  ;;  %v1334_v43 = vmax.f32 %v1088_v37, 0.0  ;;  %v1276_v48 = vmax.f32 %v856_v27, 0.0  ;;  %v3723_v62 = vmax.f32 %v1080_v20, 0.0 }
 0x11e   : > { %v3719_v0 = vpop.f32.mrb[21].mxu0  ;;  %v3721_v4 = vpop.f32.mrb[21].mxu1  ;;  %v1506_v11 = vrot.slane %v1275_v26, 7  ;;  %v1955_v14 = vrot.slane %v1275_v26, 1  ;;  %v1604_v16 = vrot.slane %v3717_v39, 7  ;;  %v2053_v13 = vrot.slane %v3717_v39, 1 }
 0x11f   : > { %v3729_v63 = vpop.f32.mrb[22].mxu0  ;;  %v3731_v44 = vpop.f32.mrb[22].mxu1  ;;  %v1511_v36 = vrot.slane %v1278_v25, 7  ;;  %v1960_v41 = vrot.slane %v1278_v25, 1  ;;  %v1609_v53 = vrot.slane %v1334_v43, 7  ;;  %v2058_v37 = vrot.slane %v1334_v43, 1 }
 0x120   : > { %v3735_v29 = vpop.f32.mrb[23].mxu0  ;;  %v3737_v35 = vpop.f32.mrb[23].mxu1  ;;  %v1802_v54 = vsel %vm1491_vm3, 0.0, %v1506_v11  ;;  %v1816_v27 = vsel %vm1491_vm3, 0.0, %v1604_v16  ;;  %v1507_v20 = vrot.slane %v1276_v48, 7  ;;  %v1956_v24 = vrot.slane %v1276_v48, 1 }
 0x121   : > { %4887 = vst [vmem:[#allocation10_spill] sm:$0xff] %v3735_v29  ;;  %4888 = vst [vmem:[#allocation11_spill] sm:$0xff] %v3737_v35  ;;  %v1836_v19 = vmax.f32 %v1802_v54, %v1275_v26  ;;  %v1892_v56 = vmax.f32 %v1816_v27, %v3717_v39  ;;  %v1512_v57 = vsel %vm1491_vm3, %v1509_v30, %v1511_v36  ;;  %v4889_v23 = vrot.slane %v3693_v33, 7 }
 0x122   : > { %v1961_v52 = vsel %vm1940_vm4, %v1958_v51, %v1960_v41  ;;  %v1839_v42 = vmax.f32 %v1512_v57, %v1278_v25  ;;  %v4890_v17 = vrot.slane %v3693_v33, 1  ;;  %v1508_v35 = vsel %vm1491_vm3, %v1506_v11, %v1507_v20 }
 0x123   : > { %v1610_v22 = vsel %vm1491_vm3, %v4889_v23, %v1609_v53  ;;  %v1510_v26 = vsel %vm1491_vm3, %v1507_v20, %v1509_v30  ;;  %v1837_v54 = vmax.f32 %v1508_v35, %v1276_v48  ;;  %v1957_v39 = vsel %vm1940_vm4, %v1955_v14, %v1956_v24 }
 0x124   : > { %v2059_v5 = vsel %vm1940_vm4, %v4890_v17, %v2058_v37  ;;  %v1895_v29 = vmax.f32 %v1610_v22, %v1334_v43  ;;  %v3757_v57 = vmax.f32 %v1839_v42, %v1960_v41  ;;  %v1838_v23 = vmax.f32 %v1510_v26, %v3678_v18 }
 0x125   : > { %v3753_v36 = vpop.f32.mrb[24].mxu0  ;;  %v3755_v27 = vpop.f32.mrb[24].mxu1  ;;  %v1959_v25 = vsel %vm1940_vm4, %v1956_v24, %v1958_v51  ;;  %v3761_v53 = vmax.f32 %v1836_v19, %v1957_v39  ;;  %v1605_v48 = vrot.slane %v3723_v62, 7  ;;  %v2054_v11 = vrot.slane %v3723_v62, 1 }
 0x126   : > { %4891 = vst [vmem:[#allocation12_spill] sm:$0xff] %v3753_v36  ;;  %4892 = vst [vmem:[#allocation13_spill] sm:$0xff] %v3755_v27  ;;  %v3763_v17 = vpop.f32.mrb[25].mxu0  ;;  %v3765_v22 = vpop.f32.mrb[25].mxu1  ;;  %v3767_v30 = vmax.f32 %v1895_v29, %v2058_v37  ;;  %v3769_v43 = vmax.f32 %v1837_v54, %v1959_v25  ;;  %v3777_v18 = vmax.f32 %v1838_v23, %v1961_v52  ;;  %v3779_v19 = vmax.f32 %v877_v31, 0.0 }
 0x127   : > { %4893 = vst [vmem:[#allocation14_spill] sm:$0xff] %v3763_v17  ;;  %4894 = vst [vmem:[#allocation15_spill] sm:$0xff] %v3765_v22  ;;  %v3773_v42 = vpop.f32.mrb[26].mxu0  ;;  %v3775_v14 = vpop.f32.mrb[26].mxu1  ;;  %v3781_v24 = vmax.f32 %v1101_v32, 0.0  ;;  %v869_v51 = vadd.f32 %v3491_v1, %v3596_v59  ;;  %v1606_v41 = vsel %vm1491_vm3, %v1604_v16, %v1605_v48  ;;  %v4899_v37 = vrot.slane %v3693_v33, 7 }
 0x128   : > { %4895 = vst [vmem:[#allocation16_spill] sm:$0xff] %v3773_v42  ;;  %4896 = vst [vmem:[#allocation17_spill] sm:$0xff] %v3775_v14  ;;  %v3785_v29 = vpop.f32.mrb[27].mxu0  ;;  %v3787_v35 = vpop.f32.mrb[27].mxu1  ;;  %v2055_v52 = vsel %vm1940_vm4, %v2053_v13, %v2054_v11  ;;  %v4900_v31 = vrot.slane %v3693_v33, 1  ;;  %v1893_v26 = vmax.f32 %v1606_v41, %v3723_v62  ;;  %v1516_v39 = vrot.slane %v3779_v19, 7 }
 0x129   : > { %4897 = vst [vmem:[#allocation18_spill] sm:$0xff] %v3785_v29  ;;  %4898 = vst [vmem:[#allocation19_spill] sm:$0xff] %v3787_v35  ;;  %v1608_v20 = vsel %vm1491_vm3, %v1605_v48, %v4899_v37  ;;  %v3799_v54 = vmax.f32 %v1892_v56, %v2055_v52  ;;  %v1965_v16 = vrot.slane %v3779_v19, 1  ;;  %v1279_v48 = vmax.f32 %v869_v51, 0.0 }
 0x12a   : > { %v2057_v32 = vsel %vm1940_vm4, %v2054_v11, %v4900_v31  ;;  %v1894_v59 = vmax.f32 %v1608_v20, %v3693_v33  ;;  %v1093_v62 = vadd.f32 %v3491_v1, %v3598_v60  ;;  %v880_v56 = vadd.f32 %v3600_v3, %v3491_v1 }
 0x12b   : > { %v3805_v13 = vmax.f32 %v1893_v26, %v2057_v32  ;;  %v1513_v33 = vrot.slane %v1279_v48, 7  ;;  %v1962_v11 = vrot.slane %v1279_v48, 1  ;;  %v1104_v41 = vadd.f32 %v3602_v7, %v3491_v1 }
 0x12c   : > { %v3807_v37 = vmax.f32 %v1894_v59, %v2059_v5  ;;  %v872_v20 = vadd.f32 %v3491_v1, %v3608_v12  ;;  %v3821_v5 = vmax.f32 %v1093_v62, 0.0  ;;  %v1282_v31 = vmax.f32 %v880_v56, 0.0 }
 0x12d   : > { %v3817_v52 = vpop.f32.mrb[28].mxu0  ;;  %v3819_v51 = vpop.f32.mrb[28].mxu1  ;;  %v1096_v60 = vadd.f32 %v3491_v1, %v3610_v15  ;;  %v3827_v3 = vadd.f32 %v3639_v47, %v3491_v1  ;;  %v1803_v12 = vsel %vm1491_vm3, 0.0, %v1513_v33  ;;  %v1338_v26 = vmax.f32 %v1104_v41, 0.0 }
 0x12e   : > { %4901 = vst [vmem:[#allocation20_spill] sm:$0xff] %v3817_v52  ;;  %4902 = vst [vmem:[#allocation21_spill] sm:$0xff] %v3819_v51  ;;  %v3829_v32 = vpop.f32.mrb[29].mxu0  ;;  %v3831_v7 = vpop.f32.mrb[29].mxu1  ;;  %v1280_v59 = vmax.f32 %v872_v20, 0.0  ;;  %v3836_v62 = vadd.f32 %v3641_v55, %v3491_v1  ;;  %v1840_v15 = vmax.f32 %v1803_v12, %v1279_v48  ;;  %v1611_v47 = vrot.slane %v3821_v5, 7 }
 0x12f   : > { %4903 = vst [vmem:[#allocation22_spill] sm:$0xff] %v3829_v32  ;;  %4904 = vst [vmem:[#allocation23_spill] sm:$0xff] %v3831_v7  ;;  %v3838_v56 = vpop.f32.mrb[30].mxu0  ;;  %v3840_v25 = vpop.f32.mrb[30].mxu1  ;;  %v2060_v23 = vrot.slane %v3821_v5, 1  ;;  %v1518_v32 = vrot.slane %v1282_v31, 7 }
 0x130   : > { %4905 = vst [vmem:[#allocation24_spill] sm:$0xff] %v3838_v56  ;;  %4906 = vst [vmem:[#allocation25_spill] sm:$0xff] %v3840_v25  ;;  %v3844_v51 = vpop.f32.mrb[31].mxu0  ;;  %v3846_v7 = vpop.f32.mrb[31].mxu1  ;;  %v1967_v41 = vrot.slane %v1282_v31, 1  ;;  %v1616_v20 = vrot.slane %v1338_v26, 7 }
 0x131   : > { %4907 = vst [vmem:[#allocation26_spill] sm:$0xff] %v3844_v51  ;;  %4908 = vst [vmem:[#allocation27_spill] sm:$0xff] %v3846_v7  ;;  %v2065_v52 = vrot.slane %v1338_v26, 1  ;;  %v1514_v35 = vrot.slane %v1280_v59, 7  ;;  %v1817_v55 = vsel %vm1491_vm3, 0.0, %v1611_v47  ;;  %v1519_v56 = vsel %vm1491_vm3, %v1516_v39, %v1518_v32 }
 0x132   : > { %v1963_v29 = vrot.slane %v1280_v59, 1  ;;  %v1336_v25 = vmax.f32 %v1096_v60, 0.0  ;;  %v1896_v48 = vmax.f32 %v1817_v55, %v3821_v5  ;;  %v1843_v12 = vmax.f32 %v1519_v56, %v1282_v31 }
 0x133   : > { %v1968_v14 = vsel %vm1940_vm4, %v1965_v16, %v1967_v41  ;;  %v4909_v42 = vrot.slane %v3781_v24, 7  ;;  %v4910_v22 = vrot.slane %v3781_v24, 1  ;;  %v1515_v27 = vsel %vm1491_vm3, %v1513_v33, %v1514_v35 }
 0x134   : > { %v1517_v32 = vsel %vm1491_vm3, %v1514_v35, %v1516_v39  ;;  %v3860_v36 = vmax.f32 %v1843_v12, %v1967_v41  ;;  %v1841_v60 = vmax.f32 %v1515_v27, %v1280_v59  ;;  %v1964_v31 = vsel %vm1940_vm4, %v1962_v11, %v1963_v29 }
 0x135   : > { %v1617_v51 = vsel %vm1491_vm3, %v4909_v42, %v1616_v20  ;;  %v2066_v17 = vsel %vm1940_vm4, %v4910_v22, %v2065_v52  ;;  %v1842_v5 = vmax.f32 %v1517_v32, %v3779_v19  ;;  %v3864_v56 = vpop.f32.mrb[32].mxu0  ;;  %v3866_v55 = vpop.f32.mrb[32].mxu1  ;;  %v3871_v22 = vmax.f32 %v1840_v15, %v1964_v31 }
 0x136   : > { %v1899_v7 = vmax.f32 %v1617_v51, %v1338_v26  ;;  %v1966_v51 = vsel %vm1940_vm4, %v1963_v29, %v1965_v16  ;;  %v1612_v33 = vrot.slane %v1336_v25, 7  ;;  %v3873_v26 = vpop.f32.mrb[33].mxu0  ;;  %v3875_v35 = vpop.f32.mrb[33].mxu1  ;;  %v2368_v27 = vmax.f32 %v3757_v57, %v3860_v36 }
 0x137   : > { %v3879_v19 = vmax.f32 %v1841_v60, %v1966_v51  ;;  %v3881_v39 = vmax.f32 %v1842_v5, %v1968_v14  ;;  %v2061_v11 = vrot.slane %v1336_v25, 1  ;;  %v3883_v59 = vpop.f32.mrb[34].mxu0  ;;  %v2365_v16 = vmax.f32 %v3761_v53, %v3871_v22 }
 0x138   : > { %v3868_v42 = vmax.f32 %v1899_v7, %v2065_v52  ;;  %v3885_v52 = vpop.f32.mrb[34].mxu1  ;;  %v1613_v7 = vsel %vm1491_vm3, %v1611_v47, %v1612_v33  ;;  %v4911_v15 = vrot.slane %v3781_v24, 7  ;;  %v3895_v41 = vpop.f32.mrb[35].mxu0  ;;  %v2424_v20 = vmax.f32 %v2368_v27, %v3619_v34 }
 0x139   : > { %v3897_v14 = vpop.f32.mrb[35].mxu1  ;;  %v2366_v12 = vmax.f32 %v3769_v43, %v3879_v19  ;;  %v1897_v53 = vmax.f32 %v1613_v7, %v1336_v25  ;;  %v2421_v32 = vmax.f32 %v2365_v16, %v3623_v45  ;;  %v2062_v5 = vsel %vm1940_vm4, %v2060_v23, %v2061_v11 }
 0x13a   : > { %v2396_v29 = vmax.f32 %v3767_v30, %v3868_v42  ;;  %v1615_v57 = vsel %vm1491_vm3, %v1612_v33, %v4911_v15  ;;  %v2367_v30 = vmax.f32 %v3777_v18, %v3881_v39  ;;  %v3000_v31 = vpack.c.bf16 %v2424_v20, %v2424_v20 }
 0x13b   : > { %v1898_v60 = vmax.f32 %v1615_v57, %v3781_v24  ;;  %v2422_v34 = vmax.f32 %v2366_v12, %v3628_v50  ;;  %v4912_v43 = vrot.slane %v3781_v24, 1  ;;  %v2997_v33 = vpack.c.bf16 %v2421_v32, %v2421_v32 }
 0x13c   : > { %v2452_v47 = vmax.f32 %v2396_v29, %v3626_v49  ;;  %v2423_v51 = vmax.f32 %v2367_v30, %v3634_v46  ;;  %v3913_v27 = vmax.f32 %v1896_v48, %v2062_v5  ;;  %2706 = vst.msk [vmem:[%s3665_s6 + $0x1c] sm:$0x3] %vm2701_vm5, %v3000_v31  ;;  %v3922_v50 = vmax.f32 %v3827_v3, 0.0 }
 0x13d   : > { %v2064_v18 = vsel %vm1940_vm4, %v2061_v11, %v4912_v43  ;;  %v2998_v23 = vpack.c.bf16 %v2422_v34, %v2422_v34  ;;  %v3919_v16 = vmax.f32 %v1898_v60, %v2066_v17  ;;  %v3924_v46 = vpop.f32.mrb[36].mxu0  ;;  %v3926_v24 = vpop.f32.mrb[36].mxu1  ;;  %2703 = vst.msk [vmem:[%s3665_s6 + $0x10] sm:$0xf] %vm2697_vm6, %v2997_v33  ;;  %v3937_v17 = vmax.f32 %v3836_v62, 0.0 }
 0x13e   : > { %v3028_v25 = vpack.c.bf16 %v2452_v47, %v2452_v47  ;;  %v3915_v45 = vmax.f32 %v1897_v53, %v2064_v18  ;;  %v2999_v29 = vpack.c.bf16 %v2423_v51, %v2423_v51  ;;  %v2393_v48 = vmax.f32 %v3799_v54, %v3913_v27  ;;  %v3941_v7 = vpop.f32.mrb[37].mxu0  ;;  %v3943_v15 = vpop.f32.mrb[37].mxu1 }
 0x13f   : > { %v885_v3 = vadd.f32 %v3491_v1, %v3649_v58  ;;  %4913 = vst [vmem:[#allocation28_spill] sm:$0xff] %v3943_v15  ;;  %2704 = vst.msk [vmem:[%s3665_s6 + $0x14] sm:$0xf] %vm2697_vm6, %v2998_v23  ;;  %v2395_v54 = vmax.f32 %v3807_v37, %v3919_v16  ;;  %v1523_v57 = vrot.slane %v3922_v50, 7  ;;  %v1109_v62 = vadd.f32 %v3491_v1, %v3651_v61  ;;  %v3955_v20 = vpop.f32.mrb[38].mxu0  ;;  %v3957_v58 = vpop.f32.mrb[38].mxu1 }
 0x140   : > { %2734 = vst.msk [vmem:[%s3665_s6 + $0x8c] sm:$0x3] %vm2701_vm5, %v3028_v25  ;;  %v2394_v11 = vmax.f32 %v3805_v13, %v3915_v45  ;;  %4914 = vst [vmem:[#allocation29_spill] sm:$0xff] %v3955_v20  ;;  %v2449_v12 = vmax.f32 %v2393_v48, %v3667_v8  ;;  %v3963_v47 = vpop.f32.mrb[39].mxu0  ;;  %v3965_v32 = vpop.f32.mrb[39].mxu1  ;;  %v896_v31 = vadd.f32 %v3658_v2, %v3491_v1 }
 0x141   : > { %2705 = vst.msk [vmem:[%s3665_s6 + $0x18] sm:$0xf] %vm2697_vm6, %v2999_v29  ;;  %4915 = vst [vmem:[#allocation30_spill] sm:$0xff] %v3957_v58  ;;  %v2451_v61 = vmax.f32 %v2395_v54, %v3671_v10  ;;  %v1283_v60 = vmax.f32 %v885_v3, 0.0  ;;  %v3968_v5 = vmax.f32 %v1109_v62, 0.0  ;;  %v1120_v43 = vadd.f32 %v3660_v6, %v3491_v1 }
 0x142   : > { %v2450_v30 = vmax.f32 %v2394_v11, %v3669_v9  ;;  %4916 = vst [vmem:[#allocation31_spill] sm:$0xff] %v3963_v47  ;;  %4917 = vst [vmem:[#allocation32_spill] sm:$0xff] %v3965_v32  ;;  %v3025_v34 = vpack.c.bf16 %v2449_v12, %v2449_v12  ;;  %v888_v18 = vadd.f32 %v3491_v1, %v3673_v28  ;;  %v1286_v2 = vmax.f32 %v896_v31, 0.0 }
 0x143   : > { %v3027_v25 = vpack.c.bf16 %v2451_v61, %v2451_v61  ;;  %v1520_v33 = vrot.slane %v1283_v60, 7  ;;  %v1969_v23 = vrot.slane %v1283_v60, 1  ;;  %v1618_v29 = vrot.slane %v3968_v5, 7 }
 0x144   : > { %v3026_v51 = vpack.c.bf16 %v2450_v30, %v2450_v30  ;;  %2731 = vst.msk [vmem:[%s3665_s6 + $0x80] sm:$0xf] %vm2697_vm6, %v3025_v34  ;;  %v2067_v48 = vrot.slane %v3968_v5, 1  ;;  %v1342_v11 = vmax.f32 %v1120_v43, 0.0  ;;  %v1284_v3 = vmax.f32 %v888_v18, 0.0 }
 0x145   : > { %2733 = vst.msk [vmem:[%s3665_s6 + $0x88] sm:$0xf] %vm2697_vm6, %v3027_v25  ;;  %v1804_v6 = vsel %vm1491_vm3, 0.0, %v1520_v33  ;;  %v1818_v28 = vsel %vm1491_vm3, 0.0, %v1618_v29  ;;  %v1112_v54 = vadd.f32 %v3491_v1, %v3675_v40  ;;  %v909_v62 = vadd.f32 %v3713_v38, %v3491_v1  ;;  %v3990_v12 = vpop.f32.mrb[40].mxu0  ;;  %v3992_v30 = vpop.f32.mrb[40].mxu1 }
 0x146   : > { %2732 = vst.msk [vmem:[%s3665_s6 + $0x84] sm:$0xf] %vm2697_vm6, %v3026_v51  ;;  %4918 = vst [vmem:[#allocation33_spill] sm:$0xff] %v3990_v12  ;;  %v1844_v61 = vmax.f32 %v1804_v6, %v1283_v60  ;;  %v1900_v31 = vmax.f32 %v1818_v28, %v3968_v5  ;;  %v1525_v34 = vrot.slane %v1286_v2, 7  ;;  %v1974_v51 = vrot.slane %v1286_v2, 1  ;;  %v3995_v43 = vpop.f32.mrb[41].mxu0 }
 0x147   : > { %4919 = vst [vmem:[#allocation34_spill] sm:$0xff] %v3992_v30  ;;  %4920 = vst [vmem:[#allocation35_spill] sm:$0xff] %v3995_v43  ;;  %v3997_v18 = vpop.f32.mrb[41].mxu1  ;;  %v1623_v25 = vrot.slane %v1342_v11, 7  ;;  %v2072_v37 = vrot.slane %v1342_v11, 1  ;;  %v1521_v53 = vrot.slane %v1284_v3, 7 }
 0x148   : > { %4921 = vst [vmem:[#allocation36_spill] sm:$0xff] %v3997_v18  ;;  %v1970_v40 = vrot.slane %v1284_v3, 1  ;;  %v3999_v13 = vpop.f32.mrb[42].mxu0  ;;  %v4001_v38 = vpop.f32.mrb[42].mxu1  ;;  %v1526_v10 = vsel %vm1491_vm3, %v1523_v57, %v1525_v34  ;;  %v4924_v60 = vrot.slane %v3922_v50, 1  ;;  %v1340_v6 = vmax.f32 %v1112_v54, 0.0 }
 0x149   : > { %4922 = vst [vmem:[#allocation37_spill] sm:$0xff] %v3999_v13  ;;  %4923 = vst [vmem:[#allocation38_spill] sm:$0xff] %v4001_v38  ;;  %v4007_v28 = vmax.f32 %v909_v62, 0.0  ;;  %v4009_v9 = vpop.f32.mrb[43].mxu0  ;;  %v4011_v8 = vpop.f32.mrb[43].mxu1  ;;  %v1847_v49 = vmax.f32 %v1526_v10, %v1286_v2  ;;  %v4927_v18 = vrot.slane %v3937_v17, 7  ;;  %v1522_v43 = vsel %vm1491_vm3, %v1520_v33, %v1521_v53 }
 0x14a   : > { %v1975_v5 = vsel %vm1940_vm4, %v4924_v60, %v1974_v51  ;;  %4925 = vst [vmem:[#allocation39_spill] sm:$0xff] %v4009_v9  ;;  %4926 = vst [vmem:[#allocation40_spill] sm:$0xff] %v4011_v8  ;;  %v4928_v38 = vrot.slane %v3937_v17, 1  ;;  %v1524_v54 = vsel %vm1491_vm3, %v1521_v53, %v1523_v57  ;;  %v1845_v62 = vmax.f32 %v1522_v43, %v1284_v3 }
 0x14b   : > { %v1624_v13 = vsel %vm1491_vm3, %v4927_v18, %v1623_v25  ;;  %v1971_v60 = vsel %vm1940_vm4, %v1969_v23, %v1970_v40  ;;  %v4022_v9 = vmax.f32 %v1847_v49, %v1974_v51  ;;  %v1846_v10 = vmax.f32 %v1524_v54, %v3922_v50 }
 0x14c   : > { %v2073_v34 = vsel %vm1940_vm4, %v4928_v38, %v2072_v37  ;;  %v1903_v30 = vmax.f32 %v1624_v13, %v1342_v11  ;;  %v4929_v2 = vrot.slane %v3922_v50, 1  ;;  %v4028_v25 = vmax.f32 %v1844_v61, %v1971_v60 }
 0x14d   : > { %v1619_v13 = vrot.slane %v1340_v6, 7  ;;  %v2068_v33 = vrot.slane %v1340_v6, 1  ;;  %v4034_v57 = vmax.f32 %v1846_v10, %v1975_v5  ;;  %v1133_v23 = vadd.f32 %v3715_v21, %v3491_v1  ;;  %v4040_v50 = vpop.f32.mrb[44].mxu0  ;;  %v4042_v11 = vpop.f32.mrb[44].mxu1 }
 0x14e   : > { %v1973_v18 = vsel %vm1940_vm4, %v1970_v40, %v4929_v2  ;;  %v4030_v8 = vmax.f32 %v1903_v30, %v2072_v37  ;;  %4930 = vst [vmem:[#allocation41_spill] sm:$0xff] %v4040_v50  ;;  %4931 = vst [vmem:[#allocation42_spill] sm:$0xff] %v4042_v11  ;;  %v4932_v3 = vrot.slane %v3937_v17, 7  ;;  %v4933_v51 = vrot.slane %v3937_v17, 1  ;;  %v4052_v40 = vpop.f32.mrb[45].mxu0  ;;  %v4054_v5 = vpop.f32.mrb[45].mxu1 }
 0x14f   : > { %v4032_v38 = vmax.f32 %v1845_v62, %v1973_v18  ;;  %v1620_v37 = vsel %vm1491_vm3, %v1618_v29, %v1619_v13  ;;  %v2069_v61 = vsel %vm1940_vm4, %v2067_v48, %v2068_v33  ;;  %4934 = vst [vmem:[#allocation43_spill] sm:$0xff] %v4052_v40  ;;  %4935 = vst [vmem:[#allocation44_spill] sm:$0xff] %v4054_v5  ;;  %v4059_v29 = vmax.f32 %v1133_v23, 0.0  ;;  %v4061_v60 = vpop.f32.mrb[46].mxu0  ;;  %v4063_v10 = vpop.f32.mrb[46].mxu1 }
 0x150   : > { %v1622_v30 = vsel %vm1491_vm3, %v1619_v13, %v4932_v3  ;;  %v2071_v43 = vsel %vm1940_vm4, %v2068_v33, %v4933_v51  ;;  %v1901_v21 = vmax.f32 %v1620_v37, %v1340_v6  ;;  %v4057_v62 = vmax.f32 %v1900_v31, %v2069_v61  ;;  %4936 = vst [vmem:[#allocation45_spill] sm:$0xff] %v4061_v60  ;;  %v4073_v31 = vpop.f32.mrb[47].mxu0  ;;  %v4075_v6 = vpop.f32.mrb[47].mxu1  ;;  %v4941_v61 = vld [vmem:[#allocation11_spill] sm:$0xff] }
 0x151   : > { %v1902_v54 = vmax.f32 %v1622_v30, %v3937_v17  ;;  %4937 = vst [vmem:[#allocation46_spill] sm:$0xff] %v4063_v10  ;;  %v901_v48 = vadd.f32 %v3491_v1, %v3719_v0  ;;  %v1125_v2 = vadd.f32 %v3491_v1, %v3721_v4  ;;  %v912_v18 = vadd.f32 %v3729_v63, %v3491_v1  ;;  %v4940_v30 = vld [vmem:[#allocation10_spill] sm:$0xff] }
 0x152   : > { %v1136_v17 = vadd.f32 %v3731_v44, %v3491_v1  ;;  %4938 = vst [vmem:[#allocation47_spill] sm:$0xff] %v4073_v31  ;;  %4939 = vst [vmem:[#allocation48_spill] sm:$0xff] %v4075_v6  ;;  %v4077_v13 = vmax.f32 %v1901_v21, %v2071_v43  ;;  %v1628_v23 = vrot.slane %v4059_v29, 7  ;;  %v904_v44 = vadd.f32 %v3491_v1, %v4940_v30  ;;  %v4942_v43 = vld [vmem:[#allocation12_spill] sm:$0xff] }
 0x153   : > { %v4079_v33 = vmax.f32 %v1902_v54, %v2073_v34  ;;  %v1287_v37 = vmax.f32 %v901_v48, 0.0  ;;  %v4083_v4 = vmax.f32 %v1125_v2, 0.0  ;;  %v1290_v3 = vmax.f32 %v912_v18, 0.0  ;;  %v4943_v34 = vld [vmem:[#allocation13_spill] sm:$0xff] }
 0x154   : > { %v1346_v63 = vmax.f32 %v1136_v17, 0.0  ;;  %v1128_v51 = vadd.f32 %v3491_v1, %v4941_v61  ;;  %v925_v21 = vadd.f32 %v4942_v43, %v3491_v1  ;;  %v4093_v54 = vadd.f32 %v4943_v34, %v3491_v1 }
 0x155   : > { %v1527_v49 = vrot.slane %v1287_v37, 7  ;;  %v1976_v0 = vrot.slane %v1287_v37, 1  ;;  %v1625_v48 = vrot.slane %v4083_v4, 7  ;;  %v2074_v2 = vrot.slane %v4083_v4, 1  ;;  %v4097_v6 = vpop.f32.mrb[48].mxu0  ;;  %v4099_v61 = vpop.f32.mrb[48].mxu1 }
 0x156   : > { %v1532_v18 = vrot.slane %v1290_v3, 7  ;;  %v1981_v17 = vrot.slane %v1290_v3, 1  ;;  %v1630_v53 = vrot.slane %v1346_v63, 7  ;;  %v2079_v30 = vrot.slane %v1346_v63, 1  ;;  %4944 = vst [vmem:[#allocation10_spill] sm:$0xff] %v4097_v6  ;;  %4945 = vst [vmem:[#allocation11_spill] sm:$0xff] %v4099_v61 }
 0x157   : > { %v1805_v43 = vsel %vm1491_vm3, 0.0, %v1527_v49  ;;  %v1819_v31 = vsel %vm1491_vm3, 0.0, %v1625_v48  ;;  %v1288_v1 = vmax.f32 %v904_v44, 0.0  ;;  %v1344_v34 = vmax.f32 %v1128_v51, 0.0  ;;  %v4103_v10 = vpop.f32.mrb[49].mxu0  ;;  %v4105_v60 = vpop.f32.mrb[49].mxu1 }
 0x158   : > { %4946 = vst [vmem:[#allocation12_spill] sm:$0xff] %v4103_v10  ;;  %4947 = vst [vmem:[#allocation13_spill] sm:$0xff] %v4105_v60  ;;  %v1848_v5 = vmax.f32 %v1805_v43, %v1287_v37  ;;  %v1904_v40 = vmax.f32 %v1819_v31, %v4083_v4  ;;  %v4948_v11 = vrot.slane %v4007_v28, 7  ;;  %v4949_v6 = vrot.slane %v4007_v28, 1  ;;  %v4114_v12 = vpop.f32.mrb[50].mxu0  ;;  %v4116_v32 = vpop.f32.mrb[50].mxu1 }
 0x159   : > { %4950 = vst [vmem:[#allocation49_spill] sm:$0xff] %v4114_v12  ;;  %4951 = vst [vmem:[#allocation50_spill] sm:$0xff] %v4116_v32  ;;  %v1631_v51 = vsel %vm1491_vm3, %v1628_v23, %v1630_v53  ;;  %v4952_v60 = vrot.slane %v4059_v29, 1  ;;  %v1528_v31 = vrot.slane %v1288_v1, 7  ;;  %v4122_v4 = vpop.f32.mrb[51].mxu0  ;;  %v4124_v43 = vpop.f32.mrb[51].mxu1 }
 0x15a   : > { %v1533_v50 = vsel %vm1491_vm3, %v4948_v11, %v1532_v18  ;;  %v1982_v61 = vsel %vm1940_vm4, %v4949_v6, %v1981_v17  ;;  %4953 = vst [vmem:[#allocation51_spill] sm:$0xff] %v4122_v4  ;;  %4954 = vst [vmem:[#allocation52_spill] sm:$0xff] %v4124_v43  ;;  %v1907_v11 = vmax.f32 %v1631_v51, %v1346_v63  ;;  %v1977_v18 = vrot.slane %v1288_v1, 1 }
 0x15b   : > { %v1851_v44 = vmax.f32 %v1533_v50, %v1290_v3  ;;  %v2080_v37 = vsel %vm1940_vm4, %v4952_v60, %v2079_v30  ;;  %v1626_v10 = vrot.slane %v1344_v34, 7  ;;  %v2075_v6 = vrot.slane %v1344_v34, 1 }
 0x15c   : > { %v1529_v32 = vsel %vm1491_vm3, %v1527_v49, %v1528_v31  ;;  %v4955_v50 = vrot.slane %v4007_v28, 7  ;;  %v4132_v3 = vmax.f32 %v925_v21, 0.0  ;;  %v4134_v60 = vmax.f32 %v1907_v11, %v2079_v30 }
 0x15d   : > { %v4126_v47 = vmax.f32 %v1851_v44, %v1981_v17  ;;  %v1849_v12 = vmax.f32 %v1529_v32, %v1288_v1  ;;  %v1978_v63 = vsel %vm1940_vm4, %v1976_v0, %v1977_v18  ;;  %v4956_v17 = vrot.slane %v4007_v28, 1 }
 0x15e   : > { %v1531_v53 = vsel %vm1491_vm3, %v1528_v31, %v4955_v50  ;;  %v4143_v44 = vmax.f32 %v1848_v5, %v1978_v63  ;;  %v1627_v31 = vsel %vm1491_vm3, %v1625_v48, %v1626_v10  ;;  %v2400_v21 = vmax.f32 %v4030_v8, %v4134_v60 }
 0x15f   : > { %v1850_v4 = vmax.f32 %v1531_v53, %v4007_v28  ;;  %v2372_v51 = vmax.f32 %v4022_v9, %v4126_v47  ;;  %v1980_v49 = vsel %vm1940_vm4, %v1977_v18, %v4956_v17  ;;  %v1629_v0 = vsel %vm1491_vm3, %v1626_v10, %v1628_v23  ;;  %v4204_v17 = vld [vmem:[%s4869_s2] ss:$0 sm:$0xff] }
 0x160   : > { %v4148_v30 = vmax.f32 %v1849_v12, %v1980_v49  ;;  %v2369_v9 = vmax.f32 %v4028_v25, %v4143_v44  ;;  %v1905_v28 = vmax.f32 %v1627_v31, %v1344_v34  ;;  %v1906_v5 = vmax.f32 %v1629_v0, %v4059_v29  ;;  %v4966_v0 = vld [vmem:[#allocation16_spill] sm:$0xff] }
 0x161   : > { %v4150_v32 = vmax.f32 %v1850_v4, %v1982_v61  ;;  %v2428_v1 = vmax.f32 %v2372_v51, %v3860_v36  ;;  %v2456_v48 = vmax.f32 %v2400_v21, %v3868_v42  ;;  %v2076_v61 = vsel %vm1940_vm4, %v2074_v2, %v2075_v6  ;;  %v4169_v4 = vpop.f32.mrb[52].mxu0  ;;  %v4171_v42 = vpop.f32.mrb[52].mxu1 }
 0x162   : > { %v2370_v8 = vmax.f32 %v4032_v38, %v4148_v30  ;;  %v2425_v36 = vmax.f32 %v2369_v9, %v3871_v22  ;;  %v4957_v25 = vrot.slane %v4059_v29, 1  ;;  %v4167_v34 = vmax.f32 %v1904_v40, %v2076_v61  ;;  %4958 = vst [vmem:[#allocation53_spill] sm:$0xff] %v4169_v4  ;;  %4959 = vst [vmem:[#allocation54_spill] sm:$0xff] %v4171_v42  ;;  %v4177_v18 = vpop.f32.mrb[53].mxu0  ;;  %v4191_v63 = vpop.f32.mrb[53].mxu1  ;;  %v4967_v9 = vld [vmem:[#allocation17_spill] sm:$0xff] }
 0x163   : > { %v2371_v12 = vmax.f32 %v4034_v57, %v4150_v32  ;;  %v3004_v10 = vpack.c.bf16 %v2428_v1, %v2428_v1  ;;  %v3032_v38 = vpack.c.bf16 %v2456_v48, %v2456_v48  ;;  %4960 = vst [vmem:[#allocation55_spill] sm:$0xff] %v4177_v18  ;;  %v4181_v29 = vmax.f32 %v1906_v5, %v2080_v37  ;;  %v4208_v31 = vpop.f32.mrb[54].mxu0  ;;  %v4210_v21 = vpop.f32.mrb[54].mxu1 }
 0x164   : > { %v2078_v23 = vsel %vm1940_vm4, %v2075_v6, %v4957_v25  ;;  %v2426_v57 = vmax.f32 %v2370_v8, %v3879_v19  ;;  %v3001_v22 = vpack.c.bf16 %v2425_v36, %v2425_v36  ;;  %v2397_v40 = vmax.f32 %v4057_v62, %v4167_v34  ;;  %4961 = vst [vmem:[#allocation56_spill] sm:$0xff] %v4191_v63  ;;  %v4226_v61 = vpop.f32.mrb[55].mxu0 }
 0x165   : > { %v2427_v2 = vmax.f32 %v2371_v12, %v3881_v39  ;;  %v4175_v11 = vmax.f32 %v1905_v28, %v2078_v23  ;;  %2710 = vst.msk [vmem:[%s3665_s6 + $0x2c] sm:$0x3] %vm2701_vm5, %v3004_v10  ;;  %v1537_v6 = vrot.slane %v4132_v3, 7  ;;  %2738 = vst.msk [vmem:[%s3665_s6 + $0x9c] sm:$0x3] %vm2701_vm5, %v3032_v38  ;;  %v1986_v53 = vrot.slane %v4132_v3, 1 }
 0x166   : > { %v3002_v19 = vpack.c.bf16 %v2426_v57, %v2426_v57  ;;  %2707 = vst.msk [vmem:[%s3665_s6 + $0x20] sm:$0xf] %vm2697_vm6, %v3001_v22  ;;  %v2399_v62 = vmax.f32 %v4079_v33, %v4181_v29  ;;  %v2453_v37 = vmax.f32 %v2397_v40, %v3913_v27  ;;  %v4199_v51 = vmax.f32 %v4093_v54, 0.0  ;;  %4964 = vst [vmem:[#allocation57_spill] sm:$0xff] %v4210_v21  ;;  %v4965_v33 = vld [vmem:[#allocation15_spill] sm:$0xff]  ;;  %v4969_v57 = vld [vmem:[#allocation18_spill] sm:$0xff] }
 0x167   : > { %v3003_v39 = vpack.c.bf16 %v2427_v2, %v2427_v2  ;;  %v2398_v50 = vmax.f32 %v4077_v13, %v4175_v11  ;;  %v4962_v13 = vld [vmem:[#allocation14_spill] sm:$0xff]  ;;  %v1141_v54 = vadd.f32 %v4204_v17, %v4965_v33  ;;  %v928_v1 = vadd.f32 %v4204_v17, %v4966_v0  ;;  %4968 = vst [vmem:[#allocation15_spill] sm:$0xff] %v4226_v61 }
 0x168   : > { %v917_v49 = vadd.f32 %v4204_v17, %v4962_v13  ;;  %4963 = vst [vmem:[#allocation14_spill] sm:$0xff] %v4208_v31  ;;  %2708 = vst.msk [vmem:[%s3665_s6 + $0x24] sm:$0xf] %vm2697_vm6, %v3002_v19  ;;  %v1152_v28 = vadd.f32 %v4204_v17, %v4967_v9  ;;  %v2455_v5 = vmax.f32 %v2399_v62, %v3919_v16  ;;  %v1635_v8 = vrot.slane %v4199_v51, 7  ;;  %v4970_v16 = vld [vmem:[#allocation19_spill] sm:$0xff]  ;;  %v4236_v62 = vpop.f32.mrb[55].mxu1 }
 0x169   : > { %2709 = vst.msk [vmem:[%s3665_s6 + $0x28] sm:$0xf] %vm2697_vm6, %v3003_v39  ;;  %v2454_v27 = vmax.f32 %v2398_v50, %v3915_v45  ;;  %v3029_v48 = vpack.c.bf16 %v2453_v37, %v2453_v37  ;;  %v2084_v12 = vrot.slane %v4199_v51, 1  ;;  %v1347_v36 = vmax.f32 %v1141_v54, 0.0  ;;  %4971 = vst [vmem:[#allocation16_spill] sm:$0xff] %v4236_v62 }
 0x16a   : > { %v1291_v10 = vmax.f32 %v917_v49, 0.0  ;;  %v1294_v25 = vmax.f32 %v928_v1, 0.0  ;;  %v3031_v23 = vpack.c.bf16 %v2455_v5, %v2455_v5  ;;  %v1350_v38 = vmax.f32 %v1152_v28, 0.0 }
 0x16b   : > { %v3030_v45 = vpack.c.bf16 %v2454_v27, %v2454_v27  ;;  %2735 = vst.msk [vmem:[%s3665_s6 + $0x90] sm:$0xf] %vm2697_vm6, %v3029_v48  ;;  %v920_v2 = vadd.f32 %v4204_v17, %v4969_v57  ;;  %v1144_v22 = vadd.f32 %v4204_v17, %v4970_v16  ;;  %v1632_v39 = vrot.slane %v1347_v36, 7 }
 0x16c   : > { %v1534_v40 = vrot.slane %v1291_v10, 7  ;;  %v1983_v19 = vrot.slane %v1291_v10, 1  ;;  %v2081_v50 = vrot.slane %v1347_v36, 1  ;;  %2737 = vst.msk [vmem:[%s3665_s6 + $0x98] sm:$0xf] %vm2697_vm6, %v3031_v23  ;;  %v1539_v37 = vrot.slane %v1294_v25, 7 }
 0x16d   : > { %2736 = vst.msk [vmem:[%s3665_s6 + $0x94] sm:$0xf] %vm2697_vm6, %v3030_v45  ;;  %v1988_v13 = vrot.slane %v1294_v25, 1  ;;  %v1637_v49 = vrot.slane %v1350_v38, 7  ;;  %v2086_v27 = vrot.slane %v1350_v38, 1  ;;  %v1820_v54 = vsel %vm1491_vm3, 0.0, %v1632_v39 }
 0x16e   : > { %v1806_v33 = vsel %vm1491_vm3, 0.0, %v1534_v40  ;;  %v1292_v0 = vmax.f32 %v920_v2, 0.0  ;;  %v1348_v1 = vmax.f32 %v1144_v22, 0.0  ;;  %v1908_v28 = vmax.f32 %v1820_v54, %v1347_v36 }
 0x16f   : > { %v1852_v9 = vmax.f32 %v1806_v33, %v1291_v10  ;;  %v1540_v5 = vsel %vm1491_vm3, %v1537_v6, %v1539_v37  ;;  %v1989_v48 = vsel %vm1940_vm4, %v1986_v53, %v1988_v13  ;;  %v1638_v23 = vsel %vm1491_vm3, %v1635_v8, %v1637_v49  ;;  %v4972_v33 = vld [vmem:[#allocation20_spill] sm:$0xff] }
 0x170   : > { %v1855_v45 = vmax.f32 %v1540_v5, %v1294_v25  ;;  %v2087_v57 = vsel %vm1940_vm4, %v2084_v12, %v2086_v27  ;;  %v1535_v16 = vrot.slane %v1292_v0, 7  ;;  %v1911_v62 = vmax.f32 %v1638_v23, %v1350_v38 }
 0x171   : > { %v1984_v61 = vrot.slane %v1292_v0, 1  ;;  %v1633_v2 = vrot.slane %v1348_v1, 7  ;;  %v2082_v22 = vrot.slane %v1348_v1, 1  ;;  %v941_v25 = vadd.f32 %v4204_v17, %v4972_v33 }
 0x172   : > { %v4250_v10 = vmax.f32 %v1855_v45, %v1988_v13  ;;  %v1536_v36 = vsel %vm1491_vm3, %v1534_v40, %v1535_v16  ;;  %v1538_v37 = vsel %vm1491_vm3, %v1535_v16, %v1537_v6  ;;  %v4258_v54 = vmax.f32 %v1911_v62, %v2086_v27 }
 0x173   : > { %v1853_v49 = vmax.f32 %v1536_v36, %v1292_v0  ;;  %v1854_v5 = vmax.f32 %v1538_v37, %v4132_v3  ;;  %v1985_v38 = vsel %vm1940_vm4, %v1983_v19, %v1984_v61  ;;  %v1987_v13 = vsel %vm1940_vm4, %v1984_v61, %v1986_v53  ;;  %v4973_v36 = vld [vmem:[#allocation21_spill] sm:$0xff]  ;;  %v4975_v37 = vld [vmem:[#allocation23_spill] sm:$0xff] }
 0x174   : > { %v4265_v45 = vmax.f32 %v1852_v9, %v1985_v38  ;;  %v1634_v40 = vsel %vm1491_vm3, %v1632_v39, %v1633_v2  ;;  %v1636_v6 = vsel %vm1491_vm3, %v1633_v2, %v1635_v8  ;;  %v2083_v0 = vsel %vm1940_vm4, %v2081_v50, %v2082_v22  ;;  %v4974_v9 = vld [vmem:[#allocation22_spill] sm:$0xff] }
 0x175   : > { %v4269_v23 = vmax.f32 %v1853_v49, %v1987_v13  ;;  %v4271_v16 = vmax.f32 %v1854_v5, %v1989_v48  ;;  %v1909_v62 = vmax.f32 %v1634_v40, %v1348_v1  ;;  %v1910_v27 = vmax.f32 %v1636_v6, %v4199_v51  ;;  %v4978_v49 = vld [vmem:[#allocation26_spill] sm:$0xff]  ;;  %v4979_v40 = vld [vmem:[#allocation27_spill] sm:$0xff] }
 0x176   : > { %v2085_v19 = vsel %vm1940_vm4, %v2082_v22, %v2084_v12  ;;  %v1297_v3 = vmax.f32 %v941_v25, 0.0  ;;  %v1165_v53 = vadd.f32 %v4204_v17, %v4973_v36  ;;  %v4278_v61 = vmax.f32 %v1908_v28, %v2083_v0  ;;  %v4976_v22 = vld [vmem:[#allocation24_spill] sm:$0xff]  ;;  %v4977_v25 = vld [vmem:[#allocation25_spill] sm:$0xff] }
 0x177   : > { %v4280_v39 = vmax.f32 %v1909_v62, %v2085_v19  ;;  %v4282_v8 = vmax.f32 %v1910_v27, %v2087_v57  ;;  %v933_v48 = vadd.f32 %v4204_v17, %v4974_v9  ;;  %v1157_v50 = vadd.f32 %v4204_v17, %v4975_v37 }
 0x178   : > { %v1544_v1 = vrot.slane %v1297_v3, 7  ;;  %v1993_v2 = vrot.slane %v1297_v3, 1  ;;  %v1353_v51 = vmax.f32 %v1165_v53, 0.0  ;;  %v944_v33 = vadd.f32 %v4204_v17, %v4976_v22 }
 0x179   : > { %v1295_v12 = vmax.f32 %v933_v48, 0.0  ;;  %v1168_v28 = vadd.f32 %v4204_v17, %v4977_v25  ;;  %v936_v57 = vadd.f32 %v4204_v17, %v4978_v49  ;;  %v1351_v13 = vmax.f32 %v1157_v50, 0.0 }
 0x17a   : > { %v1642_v5 = vrot.slane %v1353_v51, 7  ;;  %v2091_v38 = vrot.slane %v1353_v51, 1  ;;  %v1160_v6 = vadd.f32 %v4204_v17, %v4979_v40  ;;  %v1298_v0 = vmax.f32 %v944_v33, 0.0 }
 0x17b   : > { %v1541_v62 = vrot.slane %v1295_v12, 7  ;;  %v1990_v27 = vrot.slane %v1295_v12, 1  ;;  %v1354_v19 = vmax.f32 %v1168_v28, 0.0  ;;  %v1639_v36 = vrot.slane %v1351_v13, 7 }
 0x17c   : > { %v2088_v53 = vrot.slane %v1351_v13, 1  ;;  %v1296_v9 = vmax.f32 %v936_v57, 0.0  ;;  %v1352_v48 = vmax.f32 %v1160_v6, 0.0  ;;  %v1546_v22 = vrot.slane %v1298_v0, 7 }
 0x17d   : > { %v1807_v37 = vsel %vm1491_vm3, 0.0, %v1541_v62  ;;  %v1995_v25 = vrot.slane %v1298_v0, 1  ;;  %v1644_v21 = vrot.slane %v1354_v19, 7  ;;  %v1821_v31 = vsel %vm1491_vm3, 0.0, %v1639_v36 }
 0x17e   : > { %v1856_v49 = vmax.f32 %v1807_v37, %v1295_v12  ;;  %v2093_v50 = vrot.slane %v1354_v19, 1  ;;  %v1542_v63 = vrot.slane %v1296_v9, 7  ;;  %v1912_v18 = vmax.f32 %v1821_v31, %v1351_v13 }
 0x17f   : > { %v1547_v40 = vsel %vm1491_vm3, %v1544_v1, %v1546_v22  ;;  %v1996_v33 = vsel %vm1940_vm4, %v1993_v2, %v1995_v25  ;;  %v1645_v28 = vsel %vm1491_vm3, %v1642_v5, %v1644_v21  ;;  %v1991_v37 = vrot.slane %v1296_v9, 1 }
 0x180   : > { %v1859_v42 = vmax.f32 %v1547_v40, %v1298_v0  ;;  %v1915_v57 = vmax.f32 %v1645_v28, %v1354_v19  ;;  %v2094_v6 = vsel %vm1940_vm4, %v2091_v38, %v2093_v50  ;;  %v1543_v4 = vsel %vm1491_vm3, %v1541_v62, %v1542_v63 }
 0x181   : > { %v1545_v43 = vsel %vm1491_vm3, %v1542_v63, %v1544_v1  ;;  %v1857_v12 = vmax.f32 %v1543_v4, %v1296_v9  ;;  %v1640_v58 = vrot.slane %v1352_v48, 7  ;;  %v2089_v22 = vrot.slane %v1352_v48, 1 }
 0x182   : > { %v4304_v20 = vmax.f32 %v1859_v42, %v1995_v25  ;;  %v4306_v31 = vmax.f32 %v1915_v57, %v2093_v50  ;;  %v1858_v13 = vmax.f32 %v1545_v43, %v1297_v3  ;;  %v1992_v15 = vsel %vm1940_vm4, %v1990_v27, %v1991_v37 }
 0x183   : > { %v1994_v21 = vsel %vm1940_vm4, %v1991_v37, %v1993_v2  ;;  %v1641_v0 = vsel %vm1491_vm3, %v1639_v36, %v1640_v58  ;;  %v1643_v19 = vsel %vm1491_vm3, %v1640_v58, %v1642_v5  ;;  %v4316_v42 = vmax.f32 %v1856_v49, %v1992_v15 }
 0x184   : > { %v2376_v63 = vmax.f32 %v4250_v10, %v4304_v20  ;;  %v2404_v4 = vmax.f32 %v4258_v54, %v4306_v31  ;;  %v4318_v1 = vmax.f32 %v1857_v12, %v1994_v21  ;;  %v4320_v43 = vmax.f32 %v1858_v13, %v1996_v33 }
 0x185   : > { %v1913_v3 = vmax.f32 %v1641_v0, %v1352_v48  ;;  %v1914_v62 = vmax.f32 %v1643_v19, %v1353_v51  ;;  %v2090_v2 = vsel %vm1940_vm4, %v2088_v53, %v2089_v22  ;;  %v2373_v10 = vmax.f32 %v4265_v45, %v4316_v42 }
 0x186   : > { %v2432_v27 = vmax.f32 %v2376_v63, %v4126_v47  ;;  %v2460_v58 = vmax.f32 %v2404_v4, %v4134_v60  ;;  %v2374_v15 = vmax.f32 %v4269_v23, %v4318_v1  ;;  %v2375_v54 = vmax.f32 %v4271_v16, %v4320_v43 }
 0x187   : > { %v2092_v5 = vsel %vm1940_vm4, %v2089_v22, %v2091_v38  ;;  %v4332_v51 = vmax.f32 %v1912_v18, %v2090_v2  ;;  %v4334_v36 = vmax.f32 %v1914_v62, %v2094_v6  ;;  %v2429_v60 = vmax.f32 %v2373_v10, %v4143_v44 }
 0x188   : > { %v3008_v47 = vpack.c.bf16 %v2432_v27, %v2432_v27  ;;  %v3036_v53 = vpack.c.bf16 %v2460_v58, %v2460_v58  ;;  %v2430_v9 = vmax.f32 %v2374_v15, %v4148_v30  ;;  %v2431_v45 = vmax.f32 %v2375_v54, %v4150_v32 }
 0x189   : > { %v4339_v23 = vmax.f32 %v1913_v3, %v2092_v5  ;;  %v2401_v16 = vmax.f32 %v4278_v61, %v4332_v51  ;;  %v2403_v18 = vmax.f32 %v4282_v8, %v4334_v36  ;;  %v3005_v44 = vpack.c.bf16 %v2429_v60, %v2429_v60 }
 0x18a   : > { %2714 = vst.msk [vmem:[%s3665_s6 + $0x3c] sm:$0x3] %vm2701_vm5, %v3008_v47  ;;  %2742 = vst.msk [vmem:[%s3665_s6 + $0xac] sm:$0x3] %vm2701_vm5, %v3036_v53  ;;  %v3006_v38 = vpack.c.bf16 %v2430_v9, %v2430_v9  ;;  %v957_v30 = vadd.f32 %v4204_v17, %v3864_v56  ;;  %v1181_v32 = vadd.f32 %v4204_v17, %v3866_v55 }
 0x18b   : > { %v3007_v48 = vpack.c.bf16 %v2431_v45, %v2431_v45  ;;  %v2402_v61 = vmax.f32 %v4280_v39, %v4339_v23  ;;  %v2457_v25 = vmax.f32 %v2401_v16, %v4167_v34  ;;  %v2459_v8 = vmax.f32 %v2403_v18, %v4181_v29  ;;  %2711 = vst.msk [vmem:[%s3665_s6 + $0x30] sm:$0xf] %vm2697_vm6, %v3005_v44 }
 0x18c   : > { %2712 = vst.msk [vmem:[%s3665_s6 + $0x34] sm:$0xf] %vm2697_vm6, %v3006_v38  ;;  %v4361_v49 = vmax.f32 %v957_v30, 0.0  ;;  %v4363_v56 = vmax.f32 %v1181_v32, 0.0  ;;  %v949_v55 = vadd.f32 %v4204_v17, %v3873_v26  ;;  %v1173_v39 = vadd.f32 %v4204_v17, %v3875_v35 }
 0x18d   : > { %2713 = vst.msk [vmem:[%s3665_s6 + $0x38] sm:$0xf] %vm2697_vm6, %v3007_v48  ;;  %v2458_v34 = vmax.f32 %v2402_v61, %v4175_v11  ;;  %v3033_v29 = vpack.c.bf16 %v2457_v25, %v2457_v25  ;;  %v3035_v50 = vpack.c.bf16 %v2459_v8, %v2459_v8  ;;  %v960_v40 = vadd.f32 %v4204_v17, %v3883_v59 }
 0x18e   : > { %v1551_v33 = vrot.slane %v4361_v49, 7  ;;  %v2000_v28 = vrot.slane %v4361_v49, 1  ;;  %v1649_v57 = vrot.slane %v4363_v56, 7  ;;  %v2098_v26 = vrot.slane %v4363_v56, 1 }
 0x18f   : > { %v3034_v6 = vpack.c.bf16 %v2458_v34, %v2458_v34  ;;  %2739 = vst.msk [vmem:[%s3665_s6 + $0xa0] sm:$0xf] %vm2697_vm6, %v3033_v29  ;;  %2741 = vst.msk [vmem:[%s3665_s6 + $0xa8] sm:$0xf] %vm2697_vm6, %v3035_v50  ;;  %v1299_v35 = vmax.f32 %v949_v55, 0.0  ;;  %v1355_v11 = vmax.f32 %v1173_v39, 0.0  ;;  %v1184_v37 = vadd.f32 %v4204_v17, %v3885_v52 }
 0x190   : > { %v1302_v12 = vmax.f32 %v960_v40, 0.0  ;;  %v952_v59 = vadd.f32 %v4204_v17, %v3895_v41  ;;  %v1176_v13 = vadd.f32 %v4204_v17, %v3897_v14  ;;  %v973_v22 = vadd.f32 %v4204_v17, %v3924_v46 }
 0x191   : > { %2740 = vst.msk [vmem:[%s3665_s6 + $0xa4] sm:$0xf] %vm2697_vm6, %v3034_v6  ;;  %v1548_v21 = vrot.slane %v1299_v35, 7  ;;  %v1997_v0 = vrot.slane %v1299_v35, 1  ;;  %v1646_v19 = vrot.slane %v1355_v11, 7  ;;  %v2095_v63 = vrot.slane %v1355_v11, 1 }
 0x192   : > { %v1553_v4 = vrot.slane %v1302_v12, 7  ;;  %v2002_v3 = vrot.slane %v1302_v12, 1  ;;  %v1358_v62 = vmax.f32 %v1184_v37, 0.0  ;;  %v1300_v2 = vmax.f32 %v952_v59, 0.0 }
 0x193   : > { %v1808_v52 = vsel %vm1491_vm3, 0.0, %v1548_v21  ;;  %v1822_v41 = vsel %vm1491_vm3, 0.0, %v1646_v19  ;;  %v1356_v27 = vmax.f32 %v1176_v13, 0.0  ;;  %v4394_v58 = vmax.f32 %v973_v22, 0.0  ;;  %v4980_v22 = vld [vmem:[#allocation28_spill] sm:$0xff] }
 0x194   : > { %v1860_v14 = vmax.f32 %v1808_v52, %v1299_v35  ;;  %v1916_v10 = vmax.f32 %v1822_v41, %v1355_v11  ;;  %v1554_v46 = vsel %vm1491_vm3, %v1551_v33, %v1553_v4  ;;  %v2003_v15 = vsel %vm1940_vm4, %v2000_v28, %v2002_v3  ;;  %v4983_v4 = vld [vmem:[#allocation31_spill] sm:$0xff]  ;;  %v4985_v41 = vld [vmem:[#allocation33_spill] sm:$0xff] }
 0x195   : > { %v1863_v54 = vmax.f32 %v1554_v46, %v1302_v12  ;;  %v1651_v5 = vrot.slane %v1358_v62, 7  ;;  %v2100_v47 = vrot.slane %v1358_v62, 1  ;;  %v1549_v53 = vrot.slane %v1300_v2, 7 }
 0x196   : > { %v1998_v60 = vrot.slane %v1300_v2, 1  ;;  %v1647_v9 = vrot.slane %v1356_v27, 7  ;;  %v2096_v45 = vrot.slane %v1356_v27, 1  ;;  %v1558_v16 = vrot.slane %v4394_v58, 7 }
 0x197   : > { %v4399_v18 = vmax.f32 %v1863_v54, %v2002_v3  ;;  %v1652_v44 = vsel %vm1491_vm3, %v1649_v57, %v1651_v5  ;;  %v2101_v38 = vsel %vm1940_vm4, %v2098_v26, %v2100_v47  ;;  %v1550_v30 = vsel %vm1491_vm3, %v1548_v21, %v1549_v53  ;;  %v4981_v21 = vld [vmem:[#allocation29_spill] sm:$0xff] }
 0x198   : > { %v1919_v32 = vmax.f32 %v1652_v44, %v1358_v62  ;;  %v1552_v48 = vsel %vm1491_vm3, %v1549_v53, %v1551_v33  ;;  %v1861_v61 = vmax.f32 %v1550_v30, %v1300_v2  ;;  %v1999_v25 = vsel %vm1940_vm4, %v1997_v0, %v1998_v60 }
 0x199   : > { %v1862_v8 = vmax.f32 %v1552_v48, %v4361_v49  ;;  %v2001_v55 = vsel %vm1940_vm4, %v1998_v60, %v2000_v28  ;;  %v4408_v39 = vmax.f32 %v1860_v14, %v1999_v25  ;;  %v1648_v34 = vsel %vm1491_vm3, %v1646_v19, %v1647_v9  ;;  %v4982_v19 = vld [vmem:[#allocation30_spill] sm:$0xff] }
 0x19a   : > { %v4411_v29 = vmax.f32 %v1919_v32, %v2100_v47  ;;  %v4413_v50 = vmax.f32 %v1861_v61, %v2001_v55  ;;  %v1650_v40 = vsel %vm1491_vm3, %v1647_v9, %v1649_v57  ;;  %v1917_v6 = vmax.f32 %v1648_v34, %v1356_v27 }
 0x19b   : > { %v4416_v35 = vmax.f32 %v1862_v8, %v2003_v15  ;;  %v1918_v33 = vmax.f32 %v1650_v40, %v4363_v56  ;;  %v2097_v11 = vsel %vm1940_vm4, %v2095_v63, %v2096_v45  ;;  %v2099_v49 = vsel %vm1940_vm4, %v2096_v45, %v2098_v26 }
 0x19c   : > { %v4421_v28 = vmax.f32 %v1916_v10, %v2097_v11  ;;  %v4423_v12 = vmax.f32 %v1917_v6, %v2099_v49  ;;  %v2007_v37 = vrot.slane %v4394_v58, 1  ;;  %v1197_v59 = vadd.f32 %v4204_v17, %v3926_v24  ;;  %v4984_v24 = vld [vmem:[#allocation32_spill] sm:$0xff] }
 0x19d   : > { %v4428_v13 = vmax.f32 %v1918_v33, %v2101_v38  ;;  %v965_v57 = vadd.f32 %v4204_v17, %v3941_v7  ;;  %v1189_v56 = vadd.f32 %v4204_v17, %v4980_v22  ;;  %v976_v26 = vadd.f32 %v4204_v17, %v4981_v21 }
 0x19e   : > { %v4436_v0 = vmax.f32 %v1197_v59, 0.0  ;;  %v1200_v63 = vadd.f32 %v4204_v17, %v4982_v19  ;;  %v968_v3 = vadd.f32 %v4204_v17, %v4983_v4  ;;  %v1192_v62 = vadd.f32 %v4204_v17, %v4984_v24 }
 0x19f   : > { %v1303_v2 = vmax.f32 %v965_v57, 0.0  ;;  %v4444_v52 = vmax.f32 %v1189_v56, 0.0  ;;  %v1306_v7 = vmax.f32 %v976_v26, 0.0  ;;  %v989_v27 = vadd.f32 %v4204_v17, %v4985_v41 }
 0x1a0   : > { %v1656_v14 = vrot.slane %v4436_v0, 7  ;;  %v2105_v10 = vrot.slane %v4436_v0, 1  ;;  %v1362_v46 = vmax.f32 %v1200_v63, 0.0  ;;  %v1304_v15 = vmax.f32 %v968_v3, 0.0 }
 0x1a1   : > { %v1555_v54 = vrot.slane %v1303_v2, 7  ;;  %v2004_v5 = vrot.slane %v1303_v2, 1  ;;  %v1653_v47 = vrot.slane %v4444_v52, 7  ;;  %v2102_v53 = vrot.slane %v4444_v52, 1 }
 0x1a2   : > { %v1560_v60 = vrot.slane %v1306_v7, 7  ;;  %v2009_v9 = vrot.slane %v1306_v7, 1  ;;  %v1658_v45 = vrot.slane %v1362_v46, 7  ;;  %v2107_v44 = vrot.slane %v1362_v46, 1 }
 0x1a3   : > { %v1809_v38 = vsel %vm1491_vm3, 0.0, %v1555_v54  ;;  %v1823_v30 = vsel %vm1491_vm3, 0.0, %v1653_v47  ;;  %v1556_v32 = vrot.slane %v1304_v15, 7  ;;  %v2005_v48 = vrot.slane %v1304_v15, 1 }
 0x1a4   : > { %v1864_v61 = vmax.f32 %v1809_v38, %v1303_v2  ;;  %v1920_v25 = vmax.f32 %v1823_v30, %v4444_v52  ;;  %v1561_v8 = vsel %vm1491_vm3, %v1558_v16, %v1560_v60  ;;  %v2010_v55 = vsel %vm1940_vm4, %v2007_v37, %v2009_v9  ;;  %v4987_v30 = vld [vmem:[#allocation35_spill] sm:$0xff] }
 0x1a5   : > { %v1867_v34 = vmax.f32 %v1561_v8, %v1306_v7  ;;  %v1659_v40 = vsel %vm1491_vm3, %v1656_v14, %v1658_v45  ;;  %v2108_v6 = vsel %vm1940_vm4, %v2105_v10, %v2107_v44  ;;  %v1557_v33 = vsel %vm1491_vm3, %v1555_v54, %v1556_v32  ;;  %v4990_v8 = vld [vmem:[#allocation38_spill] sm:$0xff] }
 0x1a6   : > { %v1923_v11 = vmax.f32 %v1659_v40, %v1362_v46  ;;  %v1559_v49 = vsel %vm1491_vm3, %v1556_v32, %v1558_v16  ;;  %v1865_v59 = vmax.f32 %v1557_v33, %v1304_v15  ;;  %v2006_v57 = vsel %vm1940_vm4, %v2004_v5, %v2005_v48 }
 0x1a7   : > { %v4468_v22 = vmax.f32 %v1867_v34, %v2009_v9  ;;  %v1866_v56 = vmax.f32 %v1559_v49, %v4394_v58  ;;  %v2008_v21 = vsel %vm1940_vm4, %v2005_v48, %v2007_v37  ;;  %v4472_v26 = vmax.f32 %v1864_v61, %v2006_v57  ;;  %v4986_v58 = vld [vmem:[#allocation34_spill] sm:$0xff]  ;;  %v4989_v61 = vld [vmem:[#allocation37_spill] sm:$0xff] }
 0x1a8   : > { %v4474_v19 = vmax.f32 %v1923_v11, %v2107_v44  ;;  %v4476_v63 = vmax.f32 %v1865_v59, %v2008_v21  ;;  %v1360_v4 = vmax.f32 %v1192_v62, 0.0  ;;  %v4478_v3 = vmax.f32 %v989_v27, 0.0 }
 0x1a9   : > { %v2380_v16 = vmax.f32 %v4399_v18, %v4468_v22  ;;  %v4482_v24 = vmax.f32 %v1866_v56, %v2010_v55  ;;  %v2377_v2 = vmax.f32 %v4408_v39, %v4472_v26  ;;  %v1213_v37 = vadd.f32 %v4204_v17, %v4986_v58 }
 0x1aa   : > { %v2408_v52 = vmax.f32 %v4411_v29, %v4474_v19  ;;  %v2378_v7 = vmax.f32 %v4413_v50, %v4476_v63  ;;  %v1654_v62 = vrot.slane %v1360_v4, 7  ;;  %v2103_v41 = vrot.slane %v1360_v4, 1 }
 0x1ab   : > { %v2436_v27 = vmax.f32 %v2380_v16, %v4304_v20  ;;  %v2379_v18 = vmax.f32 %v4416_v35, %v4482_v24  ;;  %v2433_v46 = vmax.f32 %v2377_v2, %v4316_v42  ;;  %v1565_v39 = vrot.slane %v4478_v3, 7 }
 0x1ac   : > { %v2464_v15 = vmax.f32 %v2408_v52, %v4306_v31  ;;  %v2434_v29 = vmax.f32 %v2378_v7, %v4318_v1  ;;  %v1655_v54 = vsel %vm1491_vm3, %v1653_v47, %v1654_v62  ;;  %v1657_v50 = vsel %vm1491_vm3, %v1654_v62, %v1656_v14 }
 0x1ad   : > { %v3012_v20 = vpack.c.bf16 %v2436_v27, %v2436_v27  ;;  %v2435_v5 = vmax.f32 %v2379_v18, %v4320_v43  ;;  %v3009_v60 = vpack.c.bf16 %v2433_v46, %v2433_v46  ;;  %v1921_v35 = vmax.f32 %v1655_v54, %v1360_v4 }
 0x1ae   : > { %v3040_v9 = vpack.c.bf16 %v2464_v15, %v2464_v15  ;;  %v3010_v42 = vpack.c.bf16 %v2434_v29, %v2434_v29  ;;  %v1922_v45 = vmax.f32 %v1657_v50, %v4436_v0  ;;  %v2104_v31 = vsel %vm1940_vm4, %v2102_v53, %v2103_v41 }
 0x1af   : > { %2718 = vst.msk [vmem:[%s3665_s6 + $0x4c] sm:$0x3] %vm2701_vm5, %v3012_v20  ;;  %v3011_v1 = vpack.c.bf16 %v2435_v5, %v2435_v5  ;;  %v2106_v14 = vsel %vm1940_vm4, %v2103_v41, %v2105_v10  ;;  %v4511_v47 = vmax.f32 %v1920_v25, %v2104_v31  ;;  %v2014_v43 = vrot.slane %v4478_v3, 1  ;;  %v4988_v10 = vld [vmem:[#allocation36_spill] sm:$0xff] }
 0x1b0   : > { %2715 = vst.msk [vmem:[%s3665_s6 + $0x40] sm:$0xf] %vm2697_vm6, %v3009_v60  ;;  %2716 = vst.msk [vmem:[%s3665_s6 + $0x44] sm:$0xf] %vm2697_vm6, %v3010_v42  ;;  %v4518_v44 = vmax.f32 %v1921_v35, %v2106_v14  ;;  %v4520_v53 = vmax.f32 %v1922_v45, %v2108_v6  ;;  %v4522_v38 = vmax.f32 %v1213_v37, 0.0  ;;  %v981_v32 = vadd.f32 %v4204_v17, %v4987_v30  ;;  %v4992_v35 = vld [vmem:[#allocation40_spill] sm:$0xff] }
 0x1b1   : > { %2746 = vst.msk [vmem:[%s3665_s6 + $0xbc] sm:$0x3] %vm2701_vm5, %v3040_v9  ;;  %v2405_v0 = vmax.f32 %v4421_v28, %v4511_v47  ;;  %v1205_v48 = vadd.f32 %v4204_v17, %v4988_v10  ;;  %v992_v25 = vadd.f32 %v4204_v17, %v4989_v61  ;;  %v1216_v55 = vadd.f32 %v4204_v17, %v4990_v8  ;;  %v4993_v42 = vld [vmem:[#allocation41_spill] sm:$0xff]  ;;  %v4994_v30 = vld [vmem:[#allocation42_spill] sm:$0xff]  ;;  %v4995_v61 = vld [vmem:[#allocation43_spill] sm:$0xff] }
 0x1b2   : > { %2717 = vst.msk [vmem:[%s3665_s6 + $0x48] sm:$0xf] %vm2697_vm6, %v3011_v1  ;;  %v2406_v34 = vmax.f32 %v4423_v12, %v4518_v44  ;;  %v2407_v40 = vmax.f32 %v4428_v13, %v4520_v53  ;;  %v1663_v6 = vrot.slane %v4522_v38, 7  ;;  %v2112_v33 = vrot.slane %v4522_v38, 1  ;;  %v4991_v12 = vld [vmem:[#allocation39_spill] sm:$0xff] }
 0x1b3   : > { %v2461_v28 = vmax.f32 %v2405_v0, %v4332_v51  ;;  %v1307_v11 = vmax.f32 %v981_v32, 0.0  ;;  %v1363_v49 = vmax.f32 %v1205_v48, 0.0  ;;  %v1310_v59 = vmax.f32 %v992_v25, 0.0 }
 0x1b4   : > { %v2462_v57 = vmax.f32 %v2406_v34, %v4339_v23  ;;  %v2463_v56 = vmax.f32 %v2407_v40, %v4334_v36  ;;  %v1366_v21 = vmax.f32 %v1216_v55, 0.0  ;;  %v984_v13 = vadd.f32 %v4204_v17, %v4991_v12 }
 0x1b5   : > { %v3037_v4 = vpack.c.bf16 %v2461_v28, %v2461_v28  ;;  %v1562_v16 = vrot.slane %v1307_v11, 7  ;;  %v2011_v2 = vrot.slane %v1307_v11, 1  ;;  %v1660_v58 = vrot.slane %v1363_v49, 7 }
 0x1b6   : > { %v3038_v37 = vpack.c.bf16 %v2462_v57, %v2462_v57  ;;  %v3039_v51 = vpack.c.bf16 %v2463_v56, %v2463_v56  ;;  %v2109_v52 = vrot.slane %v1363_v49, 1  ;;  %v1567_v7 = vrot.slane %v1310_v59, 7 }
 0x1b7   : > { %2743 = vst.msk [vmem:[%s3665_s6 + $0xb0] sm:$0xf] %vm2697_vm6, %v3037_v4  ;;  %v1810_v23 = vsel %vm1491_vm3, 0.0, %v1562_v16  ;;  %v1824_v36 = vsel %vm1491_vm3, 0.0, %v1660_v58  ;;  %v2016_v62 = vrot.slane %v1310_v59, 1  ;;  %v1665_v41 = vrot.slane %v1366_v21, 7 }
 0x1b8   : > { %2744 = vst.msk [vmem:[%s3665_s6 + $0xb4] sm:$0xf] %vm2697_vm6, %v3038_v37  ;;  %2745 = vst.msk [vmem:[%s3665_s6 + $0xb8] sm:$0xf] %vm2697_vm6, %v3039_v51  ;;  %v1868_v27 = vmax.f32 %v1810_v23, %v1307_v11  ;;  %v1924_v18 = vmax.f32 %v1824_v36, %v1363_v49  ;;  %v1568_v46 = vsel %vm1491_vm3, %v1565_v39, %v1567_v7  ;;  %v2114_v15 = vrot.slane %v1366_v21, 1 }
 0x1b9   : > { %v1871_v29 = vmax.f32 %v1568_v46, %v1310_v59  ;;  %v2017_v54 = vsel %vm1940_vm4, %v2014_v43, %v2016_v62  ;;  %v1666_v50 = vsel %vm1491_vm3, %v1663_v6, %v1665_v41  ;;  %v1308_v20 = vmax.f32 %v984_v13, 0.0 }
 0x1ba   : > { %v1927_v5 = vmax.f32 %v1666_v50, %v1366_v21  ;;  %v2115_v60 = vsel %vm1940_vm4, %v2112_v33, %v2114_v15  ;;  %v1208_v9 = vadd.f32 %v4204_v17, %v4992_v35  ;;  %v1005_v45 = vadd.f32 %v4204_v17, %v4993_v42 }
 0x1bb   : > { %v4569_v31 = vmax.f32 %v1871_v29, %v2016_v62  ;;  %v1563_v1 = vrot.slane %v1308_v20, 7  ;;  %v2012_v14 = vrot.slane %v1308_v20, 1  ;;  %v1229_v32 = vadd.f32 %v4204_v17, %v4994_v30 }
 0x1bc   : > { %v4573_v0 = vmax.f32 %v1927_v5, %v2114_v15  ;;  %v1364_v10 = vmax.f32 %v1208_v9, 0.0  ;;  %v4575_v48 = vmax.f32 %v1005_v45, 0.0  ;;  %v997_v25 = vadd.f32 %v4204_v17, %v4995_v61  ;;  %v4999_v15 = vld [vmem:[#allocation47_spill] sm:$0xff] }
 0x1bd   : > { %v1564_v8 = vsel %vm1491_vm3, %v1562_v16, %v1563_v1  ;;  %v1566_v55 = vsel %vm1491_vm3, %v1563_v1, %v1565_v39  ;;  %v2013_v34 = vsel %vm1940_vm4, %v2011_v2, %v2012_v14  ;;  %v2015_v40 = vsel %vm1940_vm4, %v2012_v14, %v2014_v43  ;;  %v5002_v1 = vld [vmem:[#allocation11_spill] sm:$0xff] }
 0x1be   : > { %v1869_v28 = vmax.f32 %v1564_v8, %v1308_v20  ;;  %v1870_v11 = vmax.f32 %v1566_v55, %v4478_v3  ;;  %v4588_v49 = vmax.f32 %v1868_v27, %v2013_v34  ;;  %v1661_v59 = vrot.slane %v1364_v10, 7  ;;  %v4997_v27 = vld [vmem:[#allocation45_spill] sm:$0xff]  ;;  %v5000_v20 = vld [vmem:[#allocation48_spill] sm:$0xff] }
 0x1bf   : > { %v2110_v57 = vrot.slane %v1364_v10, 1  ;;  %v1572_v56 = vrot.slane %v4575_v48, 7  ;;  %v2021_v21 = vrot.slane %v4575_v48, 1  ;;  %v4592_v12 = vmax.f32 %v1229_v32, 0.0 }
 0x1c0   : > { %v4594_v39 = vmax.f32 %v1869_v28, %v2015_v40  ;;  %v4596_v13 = vmax.f32 %v1870_v11, %v2017_v54  ;;  %v1662_v4 = vsel %vm1491_vm3, %v1660_v58, %v1661_v59  ;;  %v1664_v43 = vsel %vm1491_vm3, %v1661_v59, %v1663_v6  ;;  %v4996_v6 = vld [vmem:[#allocation44_spill] sm:$0xff] }
 0x1c1   : > { %v1925_v16 = vmax.f32 %v1662_v4, %v1364_v10  ;;  %v1926_v3 = vmax.f32 %v1664_v43, %v4522_v38  ;;  %v2111_v2 = vsel %vm1940_vm4, %v2109_v52, %v2110_v57  ;;  %v2113_v37 = vsel %vm1940_vm4, %v2110_v57, %v2112_v33  ;;  %v4998_v33 = vld [vmem:[#allocation46_spill] sm:$0xff] }
 0x1c2   : > { %v4605_v51 = vmax.f32 %v1924_v18, %v2111_v2  ;;  %v1670_v7 = vrot.slane %v4592_v12, 7  ;;  %v2119_v23 = vrot.slane %v4592_v12, 1  ;;  %v1311_v36 = vmax.f32 %v997_v25, 0.0 }
 0x1c3   : > { %v4609_v62 = vmax.f32 %v1925_v16, %v2113_v37  ;;  %v4611_v58 = vmax.f32 %v1926_v3, %v2115_v60  ;;  %v1221_v41 = vadd.f32 %v4204_v17, %v4996_v6  ;;  %v1008_v52 = vadd.f32 %v4204_v17, %v4997_v27  ;;  %v5001_v60 = vld [vmem:[#allocation10_spill] sm:$0xff] }
 0x1c4   : > { %v1569_v38 = vrot.slane %v1311_v36, 7  ;;  %v2018_v46 = vrot.slane %v1311_v36, 1  ;;  %v1232_v18 = vadd.f32 %v4204_v17, %v4998_v33  ;;  %v1000_v29 = vadd.f32 %v4204_v17, %v4999_v15 }
 0x1c5   : > { %v1367_v54 = vmax.f32 %v1221_v41, 0.0  ;;  %v1314_v50 = vmax.f32 %v1008_v52, 0.0  ;;  %v1224_v5 = vadd.f32 %v4204_v17, %v5000_v20  ;;  %v1021_v35 = vadd.f32 %v4204_v17, %v5001_v60 }
 0x1c6   : > { %v1811_v9 = vsel %vm1491_vm3, 0.0, %v1569_v38  ;;  %v1370_v42 = vmax.f32 %v1232_v18, 0.0  ;;  %v1312_v45 = vmax.f32 %v1000_v29, 0.0  ;;  %v1245_v14 = vadd.f32 %v4204_v17, %v5002_v1 }
 0x1c7   : > { %v1872_v30 = vmax.f32 %v1811_v9, %v1311_v36  ;;  %v1667_v32 = vrot.slane %v1367_v54, 7  ;;  %v2116_v10 = vrot.slane %v1367_v54, 1  ;;  %v1574_v61 = vrot.slane %v1314_v50, 7 }
 0x1c8   : > { %v2023_v25 = vrot.slane %v1314_v50, 1  ;;  %v1672_v8 = vrot.slane %v1370_v42, 7  ;;  %v2121_v55 = vrot.slane %v1370_v42, 1  ;;  %v1570_v34 = vrot.slane %v1312_v45, 7 }
 0x1c9   : > { %v1825_v40 = vsel %vm1491_vm3, 0.0, %v1667_v32  ;;  %v1575_v28 = vsel %vm1491_vm3, %v1572_v56, %v1574_v61  ;;  %v2019_v11 = vrot.slane %v1312_v45, 1  ;;  %v1368_v59 = vmax.f32 %v1224_v5, 0.0 }
 0x1ca   : > { %v1928_v57 = vmax.f32 %v1825_v40, %v1367_v54  ;;  %v1875_v4 = vmax.f32 %v1575_v28, %v1314_v50  ;;  %v2024_v43 = vsel %vm1940_vm4, %v2021_v21, %v2023_v25  ;;  %v1673_v16 = vsel %vm1491_vm3, %v1670_v7, %v1672_v8 }
 0x1cb   : > { %v1931_v3 = vmax.f32 %v1673_v16, %v1370_v42  ;;  %v2122_v2 = vsel %vm1940_vm4, %v2119_v23, %v2121_v55  ;;  %v1571_v37 = vsel %vm1491_vm3, %v1569_v38, %v1570_v34  ;;  %v1573_v36 = vsel %vm1491_vm3, %v1570_v34, %v1572_v56  ;;  %v5004_v34 = vld [vmem:[#allocation13_spill] sm:$0xff] }
 0x1cc   : > { %v4637_v6 = vmax.f32 %v1875_v4, %v2023_v25  ;;  %v1873_v41 = vmax.f32 %v1571_v37, %v1312_v45  ;;  %v1874_v27 = vmax.f32 %v1573_v36, %v4575_v48  ;;  %v2020_v52 = vsel %vm1940_vm4, %v2018_v46, %v2019_v11  ;;  %v5003_v25 = vld [vmem:[#allocation12_spill] sm:$0xff] }
 0x1cd   : > { %v4641_v33 = vmax.f32 %v1931_v3, %v2121_v55  ;;  %v2022_v18 = vsel %vm1940_vm4, %v2019_v11, %v2021_v21  ;;  %v4644_v15 = vmax.f32 %v1872_v30, %v2020_v52  ;;  %v1668_v29 = vrot.slane %v1368_v59, 7  ;;  %v5006_v3 = vld [vmem:[#allocation50_spill] sm:$0xff] }
 0x1ce   : > { %v2384_v54 = vmax.f32 %v4569_v31, %v4637_v6  ;;  %v4648_v38 = vmax.f32 %v1873_v41, %v2022_v18  ;;  %v4650_v56 = vmax.f32 %v1874_v27, %v2024_v43  ;;  %v2117_v50 = vrot.slane %v1368_v59, 1 }
 0x1cf   : > { %v2412_v48 = vmax.f32 %v4573_v0, %v4641_v33  ;;  %v2381_v46 = vmax.f32 %v4588_v49, %v4644_v15  ;;  %v1669_v20 = vsel %vm1491_vm3, %v1667_v32, %v1668_v29  ;;  %v1671_v21 = vsel %vm1491_vm3, %v1668_v29, %v1670_v7 }
 0x1d0   : > { %v2440_v5 = vmax.f32 %v2384_v54, %v4468_v22  ;;  %v2382_v31 = vmax.f32 %v4594_v39, %v4648_v38  ;;  %v2383_v60 = vmax.f32 %v4596_v13, %v4650_v56  ;;  %v1929_v9 = vmax.f32 %v1669_v20, %v1368_v59 }
 0x1d1   : > { %v2468_v42 = vmax.f32 %v2412_v48, %v4474_v19  ;;  %v2437_v0 = vmax.f32 %v2381_v46, %v4472_v26  ;;  %v1930_v49 = vmax.f32 %v1671_v21, %v4592_v12  ;;  %v2118_v7 = vsel %vm1940_vm4, %v2116_v10, %v2117_v50  ;;  %v5008_v46 = vld [vmem:[#allocation52_spill] sm:$0xff] }
 0x1d2   : > { %v3016_v45 = vpack.c.bf16 %v2440_v5, %v2440_v5  ;;  %v2438_v22 = vmax.f32 %v2382_v31, %v4476_v63  ;;  %v2439_v1 = vmax.f32 %v2383_v60, %v4482_v24  ;;  %v2120_v39 = vsel %vm1940_vm4, %v2117_v50, %v2119_v23  ;;  %v5009_v60 = vld [vmem:[#allocation53_spill] sm:$0xff] }
 0x1d3   : > { %v3044_v13 = vpack.c.bf16 %v2468_v42, %v2468_v42  ;;  %v3013_v19 = vpack.c.bf16 %v2437_v0, %v2437_v0  ;;  %v4672_v26 = vmax.f32 %v1928_v57, %v2118_v7  ;;  %v4674_v30 = vmax.f32 %v1929_v9, %v2120_v39 }
 0x1d4   : > { %2722 = vst.msk [vmem:[%s3665_s6 + $0x5c] sm:$0x3] %vm2701_vm5, %v3016_v45  ;;  %v3014_v32 = vpack.c.bf16 %v2438_v22, %v2438_v22  ;;  %v3015_v10 = vpack.c.bf16 %v2439_v1, %v2439_v1  ;;  %v4678_v61 = vmax.f32 %v1930_v49, %v2122_v2  ;;  %v4680_v63 = vmax.f32 %v1021_v35, 0.0  ;;  %v5007_v2 = vld [vmem:[#allocation51_spill] sm:$0xff] }
 0x1d5   : > { %2750 = vst.msk [vmem:[%s3665_s6 + $0xcc] sm:$0x3] %vm2701_vm5, %v3044_v13  ;;  %v2409_v24 = vmax.f32 %v4605_v51, %v4672_v26  ;;  %v2410_v12 = vmax.f32 %v4609_v62, %v4674_v30  ;;  %v4690_v23 = vmax.f32 %v1245_v14, 0.0  ;;  %v1013_v8 = vadd.f32 %v4204_v17, %v5003_v25 }
 0x1d6   : > { %2719 = vst.msk [vmem:[%s3665_s6 + $0x50] sm:$0xf] %vm2697_vm6, %v3013_v19  ;;  %2720 = vst.msk [vmem:[%s3665_s6 + $0x54] sm:$0xf] %vm2697_vm6, %v3014_v32  ;;  %v2411_v35 = vmax.f32 %v4611_v58, %v4678_v61  ;;  %v1579_v55 = vrot.slane %v4680_v63, 7  ;;  %v1237_v51 = vadd.f32 %v4204_v17, %v5004_v34  ;;  %v2028_v14 = vrot.slane %v4680_v63, 1 }
 0x1d7   : > { %2721 = vst.msk [vmem:[%s3665_s6 + $0x58] sm:$0xf] %vm2697_vm6, %v3015_v10  ;;  %v2465_v40 = vmax.f32 %v2409_v24, %v4511_v47  ;;  %v2466_v62 = vmax.f32 %v2410_v12, %v4518_v44  ;;  %v1677_v28 = vrot.slane %v4690_v23, 7  ;;  %v1315_v59 = vmax.f32 %v1013_v8, 0.0  ;;  %v5005_v58 = vld [vmem:[#allocation49_spill] sm:$0xff] }
 0x1d8   : > { %v2467_v11 = vmax.f32 %v2411_v35, %v4520_v53  ;;  %v1371_v57 = vmax.f32 %v1237_v51, 0.0  ;;  %v1024_v4 = vadd.f32 %v4204_v17, %v5005_v58  ;;  %v1248_v47 = vadd.f32 %v4204_v17, %v5006_v3  ;;  %v3315_v58 = vld [vmem:[%s4869_s2] ss:$0 sm:$0xff] }
 0x1d9   : > { %v3041_v43 = vpack.c.bf16 %v2465_v40, %v2465_v40  ;;  %v3042_v16 = vpack.c.bf16 %v2466_v62, %v2466_v62  ;;  %v1016_v44 = vadd.f32 %v4204_v17, %v5007_v2  ;;  %v2126_v36 = vrot.slane %v4690_v23, 1 }
 0x1da   : > { %v3043_v37 = vpack.c.bf16 %v2467_v11, %v2467_v11  ;;  %v1576_v41 = vrot.slane %v1315_v59, 7  ;;  %v1674_v27 = vrot.slane %v1371_v57, 7  ;;  %v2025_v53 = vrot.slane %v1315_v59, 1 }
 0x1db   : > { %2747 = vst.msk [vmem:[%s3665_s6 + $0xc0] sm:$0xf] %vm2697_vm6, %v3041_v43  ;;  %2748 = vst.msk [vmem:[%s3665_s6 + $0xc4] sm:$0xf] %vm2697_vm6, %v3042_v16  ;;  %v1318_v52 = vmax.f32 %v1024_v4, 0.0  ;;  %v1374_v18 = vmax.f32 %v1248_v47, 0.0  ;;  %v1240_v20 = vadd.f32 %v4204_v17, %v5008_v46  ;;  %v1037_v9 = vadd.f32 %v4204_v17, %v5009_v60 }
 0x1dc   : > { %v1316_v29 = vmax.f32 %v1016_v44, 0.0  ;;  %2749 = vst.msk [vmem:[%s3665_s6 + $0xc8] sm:$0xf] %vm2697_vm6, %v3043_v37  ;;  %v1812_v54 = vsel %vm1491_vm3, 0.0, %v1576_v41  ;;  %v1826_v50 = vsel %vm1491_vm3, 0.0, %v1674_v27  ;;  %v2123_v48 = vrot.slane %v1371_v57, 1 }
 0x1dd   : > { %v1876_v21 = vmax.f32 %v1812_v54, %v1315_v59  ;;  %v1581_v5 = vrot.slane %v1318_v52, 7  ;;  %v2030_v31 = vrot.slane %v1318_v52, 1  ;;  %v1679_v42 = vrot.slane %v1374_v18, 7  ;;  %v5010_v4 = vld [vmem:[#allocation54_spill] sm:$0xff]  ;;  %v5015_v60 = vld [vmem:[#allocation15_spill] sm:$0xff] }
 0x1de   : > { %v2128_v0 = vrot.slane %v1374_v18, 1  ;;  %v1577_v49 = vrot.slane %v1316_v29, 7  ;;  %v2026_v7 = vrot.slane %v1316_v29, 1  ;;  %v1932_v45 = vmax.f32 %v1826_v50, %v1371_v57 }
 0x1df   : > { %v1582_v22 = vsel %vm1491_vm3, %v1579_v55, %v1581_v5  ;;  %v2031_v1 = vsel %vm1940_vm4, %v2028_v14, %v2030_v31  ;;  %v1372_v39 = vmax.f32 %v1240_v20, 0.0  ;;  %v1680_v19 = vsel %vm1491_vm3, %v1677_v28, %v1679_v42  ;;  %v5016_v42 = vld [vmem:[#allocation16_spill] sm:$0xff] }
 0x1e0   : > { %v1879_v13 = vmax.f32 %v1582_v22, %v1318_v52  ;;  %v2129_v32 = vsel %vm1940_vm4, %v2126_v36, %v2128_v0  ;;  %v1578_v10 = vsel %vm1491_vm3, %v1576_v41, %v1577_v49  ;;  %v1935_v24 = vmax.f32 %v1680_v19, %v1374_v18  ;;  %v5011_v41 = vld [vmem:[#allocation55_spill] sm:$0xff]  ;;  %v5012_v52 = vld [vmem:[#allocation56_spill] sm:$0xff] }
 0x1e1   : > { %v1580_v17 = vsel %vm1491_vm3, %v1577_v49, %v1579_v55  ;;  %v1877_v12 = vmax.f32 %v1578_v10, %v1316_v29  ;;  %v2027_v25 = vsel %vm1940_vm4, %v2025_v53, %v2026_v7  ;;  %v2029_v34 = vsel %vm1940_vm4, %v2026_v7, %v2028_v14  ;;  %v5013_v29 = vld [vmem:[#allocation14_spill] sm:$0xff] }
 0x1e2   : > { %v4734_v8 = vmax.f32 %v1879_v13, %v2030_v31  ;;  %v1878_v35 = vmax.f32 %v1580_v17, %v4680_v63  ;;  %v4738_v51 = vmax.f32 %v1876_v21, %v2027_v25  ;;  %v4740_v40 = vmax.f32 %v1935_v24, %v2128_v0 }
 0x1e3   : > { %v4742_v62 = vmax.f32 %v1877_v12, %v2029_v34  ;;  %v1675_v11 = vrot.slane %v1372_v39, 7  ;;  %v2124_v59 = vrot.slane %v1372_v39, 1  ;;  %v4746_v55 = vmax.f32 %v1037_v9, 0.0 }
 0x1e4   : > { %v4744_v57 = vmax.f32 %v1878_v35, %v2031_v1  ;;  %v1261_v63 = vadd.f32 %v3315_v58, %v5010_v4  ;;  %v1029_v53 = vadd.f32 %v3315_v58, %v5011_v41  ;;  %v1253_v18 = vadd.f32 %v3315_v58, %v5012_v52 }
 0x1e5   : > { %v1676_v14 = vsel %vm1491_vm3, %v1674_v27, %v1675_v11  ;;  %v1678_v43 = vsel %vm1491_vm3, %v1675_v11, %v1677_v28  ;;  %v2125_v16 = vsel %vm1940_vm4, %v2123_v48, %v2124_v59  ;;  %v2127_v3 = vsel %vm1940_vm4, %v2124_v59, %v2126_v36  ;;  %v5014_v27 = vld [vmem:[#allocation57_spill] sm:$0xff] }
 0x1e6   : > { %v1933_v47 = vmax.f32 %v1676_v14, %v1372_v39  ;;  %v1934_v2 = vmax.f32 %v1678_v43, %v4690_v23  ;;  %v4757_v44 = vmax.f32 %v1932_v45, %v2125_v16  ;;  %v4759_v37 = vmax.f32 %v1261_v63, 0.0 }
 0x1e7   : > { %v1040_v54 = vadd.f32 %v3315_v58, %v5013_v29  ;;  %v1264_v50 = vadd.f32 %v3315_v58, %v5014_v27  ;;  %v1586_v36 = vrot.slane %v4746_v55, 7  ;;  %v1319_v46 = vmax.f32 %v1029_v53, 0.0  ;;  %v5017_v27 = vld [vmem:[#allocation2_spill] sm:$0xff] }
 0x1e8   : > { %v4765_v28 = vmax.f32 %v1933_v47, %v2127_v3  ;;  %v4767_v48 = vmax.f32 %v1934_v2, %v2129_v32  ;;  %v4770_v23 = vmax.f32 %v1253_v18, 0.0  ;;  %v2035_v5 = vrot.slane %v4746_v55, 1 }
 0x1e9   : > { %v1322_v20 = vmax.f32 %v1040_v54, 0.0  ;;  %v1378_v21 = vmax.f32 %v1264_v50, 0.0  ;;  %v1684_v31 = vrot.slane %v4759_v37, 7  ;;  %v1032_v9 = vadd.f32 %v3315_v58, %v5015_v60  ;;  %v5018_v50 = vld [vmem:[#allocation6_spill] sm:$0xff] }
 0x1ea   : > { %v1256_v0 = vadd.f32 %v3315_v58, %v5016_v42  ;;  %v2133_v49 = vrot.slane %v4759_v37, 1  ;;  %v1583_v7 = vrot.slane %v1319_v46, 7  ;;  %v2032_v45 = vrot.slane %v1319_v46, 1 }
 0x1eb   : > { %v1681_v22 = vrot.slane %v4770_v23, 7  ;;  %v1588_v1 = vrot.slane %v1322_v20, 7  ;;  %v2037_v39 = vrot.slane %v1322_v20, 1  ;;  %v1686_v13 = vrot.slane %v1378_v21, 7 }
 0x1ec   : > { %v2135_v19 = vrot.slane %v1378_v21, 1  ;;  %v1813_v32 = vsel %vm1491_vm3, 0.0, %v1583_v7  ;;  %v1320_v24 = vmax.f32 %v1032_v9, 0.0  ;;  %v4782_v17 = vmax.f32 %v1256_v0, 0.0 }
 0x1ed   : > { %v4780_v10 = vsel %vm1491_vm3, 0.0, %v1681_v22  ;;  %v1880_v12 = vmax.f32 %v1813_v32, %v1319_v46  ;;  %v2130_v25 = vrot.slane %v4770_v23, 1  ;;  %v1589_v35 = vsel %vm1491_vm3, %v1586_v36, %v1588_v1  ;;  %v5024_v32 = vld [vmem:[#allocation8_spill] sm:$0xff] }
 0x1ee   : > { %v2038_v34 = vsel %vm1940_vm4, %v2035_v5, %v2037_v39  ;;  %v1883_v11 = vmax.f32 %v1589_v35, %v1322_v20  ;;  %v1687_v59 = vsel %vm1491_vm3, %v1684_v31, %v1686_v13  ;;  %v2136_v58 = vsel %vm1940_vm4, %v2133_v49, %v2135_v19 }
 0x1ef   : > { %v1584_v4 = vrot.slane %v1320_v24, 7  ;;  %v1936_v63 = vmax.f32 %v4780_v10, %v4770_v23  ;;  %v1939_v14 = vmax.f32 %v1687_v59, %v1378_v21  ;;  %v2033_v43 = vrot.slane %v1320_v24, 1 }
 0x1f0   : > { %v1682_v16 = vrot.slane %v4782_v17, 7  ;;  %v2304_v3 = vmax.f32 %v1883_v11, %v2037_v39  ;;  %v2131_v41 = vrot.slane %v4782_v17, 1  ;;  %v5019_v46 = vmax.f32 %v5017_v27, %v5018_v50 }
 0x1f1   : > { %v1585_v47 = vsel %vm1491_vm3, %v1583_v7, %v1584_v4  ;;  %v1587_v2 = vsel %vm1491_vm3, %v1584_v4, %v1586_v36  ;;  %v2360_v53 = vmax.f32 %v1939_v14, %v2135_v19  ;;  %v2034_v29 = vsel %vm1940_vm4, %v2032_v45, %v2033_v43  ;;  %v5020_v7 = vld [vmem:[#allocation3_spill] sm:$0xff]  ;;  %v5023_v19 = vld [vmem:[#allocation4_spill] sm:$0xff] }
 0x1f2   : > { %v1881_v52 = vmax.f32 %v1585_v47, %v1320_v24  ;;  %v1882_v18 = vmax.f32 %v1587_v2, %v4746_v55  ;;  %v2388_v54 = vmax.f32 %v4734_v8, %v2304_v3  ;;  %v2448_v23 = vmax.f32 %v5019_v46, %v2304_v3  ;;  %v5021_v45 = vld [vmem:[#allocation7_spill] sm:$0xff]  ;;  %v5026_v24 = vld [vmem:[#allocation5_spill] sm:$0xff] }
 0x1f3   : > { %v2036_v20 = vsel %vm1940_vm4, %v2033_v43, %v2035_v5  ;;  %v2301_v21 = vmax.f32 %v1880_v12, %v2034_v29  ;;  %v2416_v36 = vmax.f32 %v4740_v40, %v2360_v53  ;;  %v1683_v42 = vsel %vm1491_vm3, %v1681_v22, %v1682_v16  ;;  %v5027_v12 = vld [vmem:[#allocation9_spill] sm:$0xff] }
 0x1f4   : > { %v2302_v60 = vmax.f32 %v1881_v52, %v2036_v20  ;;  %v2303_v9 = vmax.f32 %v1882_v18, %v2038_v34  ;;  %v2444_v55 = vmax.f32 %v2388_v54, %v4637_v6  ;;  %v3024_v0 = vpack.c.bf16 %v2448_v23, %v2448_v23 }
 0x1f5   : > { %v2385_v8 = vmax.f32 %v4738_v51, %v2301_v21  ;;  %v5022_v1 = vmax.f32 %v5020_v7, %v5021_v45  ;;  %v2472_v13 = vmax.f32 %v2416_v36, %v4641_v33  ;;  %v5025_v22 = vmax.f32 %v5023_v19, %v5024_v32 }
 0x1f6   : > { %v2386_v5 = vmax.f32 %v4742_v62, %v2302_v60  ;;  %v2387_v40 = vmax.f32 %v4744_v57, %v2303_v9  ;;  %v3020_v6 = vpack.c.bf16 %v2444_v55, %v2444_v55  ;;  %2730 = vst.msk [vmem:[%s3665_s6 + $0x7c] sm:$0x3] %vm2701_vm5, %v3024_v0  ;;  %v5028_v35 = vmax.f32 %v5026_v24, %v5027_v12 }
 0x1f7   : > { %v2445_v39 = vmax.f32 %v5022_v1, %v2301_v21  ;;  %v2446_v10 = vmax.f32 %v5025_v22, %v2302_v60  ;;  %v2441_v51 = vmax.f32 %v2385_v8, %v4644_v15  ;;  %v3048_v11 = vpack.c.bf16 %v2472_v13, %v2472_v13 }
 0x1f8   : > { %v2447_v33 = vmax.f32 %v5028_v35, %v2303_v9  ;;  %v2442_v62 = vmax.f32 %v2386_v5, %v4648_v38  ;;  %v2443_v57 = vmax.f32 %v2387_v40, %v4650_v56  ;;  %2726 = vst.msk [vmem:[%s3665_s6 + $0x6c] sm:$0x3] %vm2701_vm5, %v3020_v6  ;;  %v1685_v14 = vsel %vm1491_vm3, %v1682_v16, %v1684_v31 }
 0x1f9   : > { %v3021_v34 = vpack.c.bf16 %v2445_v39, %v2445_v39  ;;  %v3022_v59 = vpack.c.bf16 %v2446_v10, %v2446_v10  ;;  %v3017_v4 = vpack.c.bf16 %v2441_v51, %v2441_v51  ;;  %v1937_v43 = vmax.f32 %v1683_v42, %v4782_v17  ;;  %2754 = vst.msk [vmem:[%s3665_s6 + $0xdc] sm:$0x3] %vm2701_vm5, %v3048_v11 }
 0x1fa   : > { %v3023_v15 = vpack.c.bf16 %v2447_v33, %v2447_v33  ;;  %v3018_v38 = vpack.c.bf16 %v2442_v62, %v2442_v62  ;;  %v3019_v3 = vpack.c.bf16 %v2443_v57, %v2443_v57  ;;  %v1938_v56 = vmax.f32 %v1685_v14, %v4759_v37 }
 0x1fb   : > { %2727 = vst.msk [vmem:[%s3665_s6 + $0x70] sm:$0xf] %vm2697_vm6, %v3021_v34  ;;  %2728 = vst.msk [vmem:[%s3665_s6 + $0x74] sm:$0xf] %vm2697_vm6, %v3022_v59  ;;  %v2132_v47 = vsel %vm1940_vm4, %v2130_v25, %v2131_v41  ;;  %v2134_v31 = vsel %vm1940_vm4, %v2131_v41, %v2133_v49 }
 0x1fc   : > { %2723 = vst.msk [vmem:[%s3665_s6 + $0x60] sm:$0xf] %vm2697_vm6, %v3017_v4  ;;  %2729 = vst.msk [vmem:[%s3665_s6 + $0x78] sm:$0xf] %vm2697_vm6, %v3023_v15  ;;  %v2357_v17 = vmax.f32 %v1936_v63, %v2132_v47  ;;  %v2358_v16 = vmax.f32 %v1937_v43, %v2134_v31  ;;  %v2359_v2 = vmax.f32 %v1938_v56, %v2136_v58 }
 0x1fd   : > { %2724 = vst.msk [vmem:[%s3665_s6 + $0x64] sm:$0xf] %vm2697_vm6, %v3018_v38  ;;  %2725 = vst.msk [vmem:[%s3665_s6 + $0x68] sm:$0xf] %vm2697_vm6, %v3019_v3 }
 0x1fe   : > { %v2413_v25 = vmax.f32 %v4757_v44, %v2357_v17  ;;  %v2414_v53 = vmax.f32 %v4765_v28, %v2358_v16  ;;  %v2415_v52 = vmax.f32 %v4767_v48, %v2359_v2 }
 0x200   : > { %v2469_v37 = vmax.f32 %v2413_v25, %v4672_v26  ;;  %v2470_v18 = vmax.f32 %v2414_v53, %v4674_v30  ;;  %v2471_v49 = vmax.f32 %v2415_v52, %v4678_v61 }
 0x202   : > { %v3045_v63 = vpack.c.bf16 %v2469_v37, %v2469_v37  ;;  %v3046_v41 = vpack.c.bf16 %v2470_v18, %v2470_v18  ;;  %v3047_v29 = vpack.c.bf16 %v2471_v49, %v2471_v49 }
 0x204   : > { %2751 = vst.msk [vmem:[%s3665_s6 + $0xd0] sm:$0xf] %vm2697_vm6, %v3045_v63  ;;  %2752 = vst.msk [vmem:[%s3665_s6 + $0xd4] sm:$0xf] %vm2697_vm6, %v3046_v41 }
 0x205   : > { %2753 = vst.msk [vmem:[%s3665_s6 + $0xd8] sm:$0xf] %vm2697_vm6, %v3047_v29 }
 0x206 PF: > { %s13_s12 = sadd.s32 1, %s3322_s12  }
 0x207   : > { %p10_p4 = scmp.ge.s32.totalorder %s13_s12, 4  }
 0x209   :  { %12 = sbr.rel (!%p10_p4) target bundleno = 1 (0x1), region = 62 }

// kernel: convnet_forward.6
= control target key start
LH: loop header
LB: loop body
LE: loop exit
PB: predicated region body
PF: predicated region fallthrough
CT: control target
= control target key end

     0   :  { %s1962_s12 = smov 0   ;;  %s2639_s0 = inlined_call_operand.vmem [shape: bf16[2,14,14,32], index: 0, kind: input, shape index: {}]   ;;  %s2640_s1 = inlined_call_operand.vmem [shape: bf16[288,128], index: 1, kind: input, shape index: {}]   ;;  %s2641_s2 = inlined_call_operand.vmem [shape: f32[1,128], index: 2, kind: input, shape index: {}]   ;;  %s2642_s3 = inlined_call_operand.vmem [shape: bf16[2,7,14,64], index: 3, kind: output, shape index: {}]  }
   0x1 LB: > { %s1670_s13 = sadd.s32 4294967295, %s1934_s12   ;;  %p1674_p0 = scmp.ge.s32.totalorder %s1934_s12, 1  ;;  %s1934_s12 = sphi %s1962_s12, %s13_s12  }
   0x2   : > { %p137_p1 = scmp.lt.s32.totalorder %s1934_s12, 3 }
   0x4   : > { %p138_p2 = pnand %p1674_p0, %p137_p1 }
   0x5   : > { %vm172_vm0 = vcmask (!%p138_p2), 257024   ;;  %vm175_vm1 = vcmask (!%p138_p2), 253952   ;;  %v1936_v0 = vmov (!%p138_p2), 0   ;;  %p161_p3 = scmp.lt.s32.totalorder (!%p138_p2), %s1670_s13, 1  ;;  %vm250_vm2 = vsmask.f32 (!%p138_p2), 256 }
   0x6   : > { %141 = sbr.rel (%p138_p2) target bundleno = 467 (0x1d3), region = 32  ;;  %173 = vst.msk [vmem:[#allocation2] sm:$0xf] (!%p138_p2), %vm172_vm0, %v1936_v0  ;;  %174 = vst.msk [vmem:[#allocation2 + $0x4] sm:$0xf] (!%p138_p2), %vm172_vm0, %v1936_v0  ;;  %v1908_v1 = vld [vmem:[%s2640_s1 + $0x40] sm:$0xff] (!%p138_p2)  }
   0x7   : > { %176 = vst.msk [vmem:[#allocation2 + $0x8] sm:$0x1] (!%p138_p2), %vm175_vm1, %v1936_v0  ;;  %179 = vst.msk [vmem:[#allocation2 + $0x14] sm:$0x1] (!%p138_p2), %vm175_vm1, %v1936_v0  ;;  %vm251_vm3 = vsmask.f32 (!%p138_p2), 4368  ;;  %1763 = vmatprep.subr.bf16.mxu0 (!%p138_p2), %v1908_v1 }
   0x8   : > { %177 = vst.msk [vmem:[#allocation2 + $0xc] sm:$0xf] (!%p138_p2), %vm172_vm0, %v1936_v0  ;;  %178 = vst.msk [vmem:[#allocation2 + $0x10] sm:$0xf] (!%p138_p2), %vm172_vm0, %v1936_v0  ;;  %vm507_vm4 = vsmask.f32 (!%p138_p2), 7938 }
   0x9   : > { %180 = vst.msk [vmem:[#allocation2 + $0x18] sm:$0xf] (!%p138_p2), %vm172_vm0, %v1936_v0  ;;  %181 = vst.msk [vmem:[#allocation2 + $0x1c] sm:$0xf] (!%p138_p2), %vm172_vm0, %v1936_v0  ;;  %v1909_v2 = vld [vmem:[%s2640_s1] sm:$0xff] (!%p138_p2)   ;;  %vm795_vm5 = vcmask (!%p138_p2), 1046528  }
   0xa   : > { %182 = vst.msk [vmem:[#allocation2 + $0x20] sm:$0x1] (!%p138_p2), %vm175_vm1, %v1936_v0  ;;  %185 = vst.msk [vmem:[#allocation2 + $0x2c] sm:$0x1] (!%p138_p2), %vm175_vm1, %v1936_v0  ;;  %vm696_vm6 = vsmask.f32 (!%p138_p2), 7424  ;;  %1764 = vmatpush3.bf16.msra.mxu0 (!%p138_p2), %v1909_v2 }
   0xb   : > { %183 = vst.msk [vmem:[#allocation2 + $0x24] sm:$0xf] (!%p138_p2), %vm172_vm0, %v1936_v0  ;;  %184 = vst.msk [vmem:[#allocation2 + $0x28] sm:$0xf] (!%p138_p2), %vm172_vm0, %v1936_v0  ;;  %v1910_v3 = vld [vmem:[%s2640_s1 + $0x48] sm:$0xff] (!%p138_p2)   ;;  %v1912_v27 = vld [vmem:[%s2640_s1 + $0x50] sm:$0xff] (!%p138_p2)  }
   0xc   : > { %186 = vst.msk [vmem:[#allocation2 + $0x30] sm:$0xf] (!%p138_p2), %vm172_vm0, %v1936_v0  ;;  %187 = vst.msk [vmem:[#allocation2 + $0x34] sm:$0xf] (!%p138_p2), %vm172_vm0, %v1936_v0  ;;  %v1911_v4 = vld [vmem:[%s2640_s1 + $0x8] sm:$0xff] (!%p138_p2)   ;;  %1765 = vmatprep.subr.bf16.mxu0 (!%p138_p2), %v1910_v3  ;;  %s1937_s28 = smov (!%p138_p2), 64  }
   0xd   : > { %188 = vst.msk [vmem:[#allocation2 + $0x38] sm:$0x1] %vm175_vm1, %v1936_v0  ;;  %191 = vst.msk [vmem:[#allocation2 + $0x44] sm:$0x1] %vm175_vm1, %v1936_v0  ;;  %s2650_s13 = smov (!%p161_p3, %s1670_s13), 1  ;;  %v1878_v5 = vld [vmem:[#allocation2] sm:$0xff]  }
   0xe   : > { %189 = vst.msk [vmem:[#allocation2 + $0x3c] sm:$0xf] %vm172_vm0, %v1936_v0  ;;  %190 = vst.msk [vmem:[#allocation2 + $0x40] sm:$0xf] %vm172_vm0, %v1936_v0  ;;  %s1862_s16 = smul.u32 112, %s2650_s13  ;;  %v796_v11 = vrot.slane %v1878_v5, 1  ;;  %1766 = vmatpush3.bf16.msra.mxu0 %v1911_v4 }
   0xf   : > { %192 = vst.msk [vmem:[#allocation2 + $0x48] sm:$0xf] %vm172_vm0, %v1936_v0  ;;  %193 = vst.msk [vmem:[#allocation2 + $0x4c] sm:$0xf] %vm172_vm0, %v1936_v0  ;;  %vm512_vm7 = vsmask.f32 3328  ;;  %1767 = vmatprep.subr.bf16.mxu0 %v1912_v27 }
  0x10   : > { %194 = vst.msk [vmem:[#allocation2 + $0x50] sm:$0x1] %vm175_vm1, %v1936_v0  ;;  %197 = vst.msk [vmem:[#allocation2 + $0x5c] sm:$0x1] %vm175_vm1, %v1936_v0  ;;  %s2034_s23 = scalar_lea.vmem %s2639_s0, %s1862_s16  ;;  %v698_v13 = vshrl.u32 %v1878_v5, 16  ;;  %v700_v14 = vshll.u32 %v1878_v5, 16 }
  0x11   : > { %195 = vst.msk [vmem:[#allocation2 + $0x54] sm:$0xf] %vm172_vm0, %v1936_v0  ;;  %196 = vst.msk [vmem:[#allocation2 + $0x58] sm:$0xf] %vm172_vm0, %v1936_v0  ;;  %v228_v7 = vld [vmem:[%s2034_s23 + $0x18] sm:$0xf] }
  0x12   : > { %198 = vst.msk [vmem:[#allocation2 + $0x60] sm:$0xf] %vm172_vm0, %v1936_v0  ;;  %199 = vst.msk [vmem:[#allocation2 + $0x64] sm:$0xf] %vm172_vm0, %v1936_v0  ;;  %v229_v8 = vld [vmem:[%s2034_s23 + $0x1c] sm:$0x7] }
  0x13   : > { %200 = vst.msk [vmem:[#allocation2 + $0x68] sm:$0x1] %vm175_vm1, %v1936_v0  ;;  %203 = vst.msk [vmem:[#allocation2 + $0x74] sm:$0x1] %vm175_vm1, %v1936_v0  ;;  %v302_v9 = vshrl.u32 %v228_v7, 16  ;;  %v305_v10 = vshll.u32 %v228_v7, 16 }
  0x14   : > { %201 = vst.msk [vmem:[#allocation2 + $0x6c] sm:$0xf] %vm172_vm0, %v1936_v0  ;;  %202 = vst.msk [vmem:[#allocation2 + $0x70] sm:$0xf] %vm172_vm0, %v1936_v0  ;;  %v529_v15 = vld [vmem:[#allocation2 + $0x30] sm:$0xf] }
  0x15   : > { %204 = vst.msk [vmem:[#allocation2 + $0x78] sm:$0xf] %vm172_vm0, %v1936_v0  ;;  %205 = vst.msk [vmem:[#allocation2 + $0x7c] sm:$0xf] %vm172_vm0, %v1936_v0  ;;  %v304_v17 = vrot.slane %v302_v9, 7  ;;  %v310_v18 = vshrl.u32 %v229_v8, 16 }
  0x16   : > { %206 = vst.msk [vmem:[#allocation2 + $0x80] sm:$0x1] %vm175_vm1, %v1936_v0  ;;  %209 = vst.msk [vmem:[#allocation2 + $0x8c] sm:$0x1] %vm175_vm1, %v1936_v0  ;;  %v313_v19 = vshll.u32 %v229_v8, 16  ;;  %v702_v22 = vrot.slane %v700_v14, 1 }
  0x17   : > { %207 = vst.msk [vmem:[#allocation2 + $0x84] sm:$0xf] %vm172_vm0, %v1936_v0  ;;  %208 = vst.msk [vmem:[#allocation2 + $0x88] sm:$0xf] %vm172_vm0, %v1936_v0  ;;  %v224_v20 = vld [vmem:[%s2034_s23 + $0x8] sm:$0xf]  ;;  %v307_v30 = vor.u32 %v305_v10, %v304_v17 }
  0x18   : > { %210 = vst.msk [vmem:[#allocation2 + $0x90] sm:$0xf] %vm172_vm0, %v1936_v0  ;;  %211 = vst.msk [vmem:[#allocation2 + $0x94] sm:$0xf] %vm172_vm0, %v1936_v0  ;;  %v225_v24 = vld [vmem:[%s2034_s23 + $0xc] sm:$0x7]  ;;  %v703_v34 = vor.u32 %v702_v22, %v698_v13 }
  0x19   : > { %212 = vst.msk [vmem:[#allocation2 + $0x98] sm:$0x1] %vm175_vm1, %v1936_v0  ;;  %215 = vst.msk [vmem:[#allocation2 + $0xa4] sm:$0x1] %vm175_vm1, %v1936_v0  ;;  %v270_v25 = vshrl.u32 %v224_v20, 16  ;;  %v273_v26 = vshll.u32 %v224_v20, 16 }
  0x1a   : > { %213 = vst.msk [vmem:[#allocation2 + $0x9c] sm:$0xf] %vm172_vm0, %v1936_v0  ;;  %214 = vst.msk [vmem:[#allocation2 + $0xa0] sm:$0xf] %vm172_vm0, %v1936_v0  ;;  %v308_v31 = vrot.slane %v304_v17, 4  ;;  %v312_v32 = vrot.slane %v310_v18, 7 }
  0x1b   : > { %216 = vst.msk [vmem:[#allocation2 + $0xa8] sm:$0xf] %vm172_vm0, %v1936_v0  ;;  %217 = vst.msk [vmem:[#allocation2 + $0xac] sm:$0xf] %vm172_vm0, %v1936_v0  ;;  %v1913_v33 = vld [vmem:[%s2640_s1 + $0x10] sm:$0xff]   ;;  %v272_v37 = vrot.slane %v270_v25, 7 }
  0x1c   : > { %218 = vst.msk [vmem:[#allocation2 + $0xb0] sm:$0x1] %vm175_vm1, %v1936_v0  ;;  %v1879_v6 = vld [vmem:[#allocation2 + $0x8] ss:$0 sps:$4 sm:$0x11]   ;;  %vm2045_vm8 = vmand %vm172_vm0, %vm507_vm4  ;;  %v278_v38 = vshrl.u32 %v225_v24, 16  ;;  %v315_v40 = vor.u32 %v313_v19, %v312_v32  ;;  %1768 = vmatpush3.bf16.msra.mxu0 %v1913_v33 }
  0x1d   : > { %v797_v12 = vrot.slane %v1879_v6, 1  ;;  %v705_v16 = vshll.u32 %v1879_v6, 16  ;;  %vm2056_vm9 = vmor %vm250_vm2, %vm251_vm3  ;;  %v532_v36 = vld [vmem:[#allocation2 + $0x34] sm:$0xf]  ;;  %v281_v39 = vshll.u32 %v225_v24, 16  ;;  %v530_v41 = vsel %vm2045_vm8, %v307_v30, %v529_v15  ;;  %s1938_s4 = smov 32  }
  0x1e   : > { %vm2065_vm10 = vmand %vm172_vm0, %vm512_vm7  ;;  %v517_v42 = vld [vmem:[#allocation2 + $0x18] sm:$0xf]  ;;  %v232_v43 = vld [vmem:[%s2034_s23 + $0x28] sm:$0xf]  ;;  %531 = vst [vmem:[#allocation2 + $0x30] sm:$0xf] %v530_v41  ;;  %v275_v46 = vor.u32 %v273_v26, %v272_v37  ;;  %v316_v50 = vsel %vm2056_vm9, %v308_v31, %v315_v40 }
  0x1f   : > { %v798_v21 = vsel %vm795_vm5, %v796_v11, %v797_v12  ;;  %v707_v28 = vrot.slane %v705_v16, 1  ;;  %v233_v44 = vld [vmem:[%s2034_s23 + $0x2c] sm:$0x7]  ;;  %v276_v47 = vrot.slane %v272_v37, 4  ;;  %v280_v48 = vrot.slane %v278_v38, 7  ;;  %v1914_v55 = vld [vmem:[%s2640_s1 + $0x58] sm:$0xff]  }
  0x20   : > { %817 = vrot.lane.b32.xlu1 %v798_v21, %s1937_s28  ;;  %v222_v49 = vld [vmem:[%s2034_s23] sm:$0xf]  ;;  %v334_v51 = vshrl.u32 %v232_v43, 16  ;;  %v337_v52 = vshll.u32 %v232_v43, 16  ;;  %v342_v53 = vshrl.u32 %v233_v44, 16  ;;  %v533_v56 = vsel %vm2065_vm10, %v316_v50, %v532_v36  ;;  %v1915_v62 = vld [vmem:[%s2640_s1 + $0x18] sm:$0xff]   ;;  %1769 = vmatprep.subr.bf16.mxu0 %v1914_v55 }
  0x21   : > { %v708_v45 = vsel %vm696_vm6, %v703_v34, %v707_v28  ;;  %v223_v54 = vld [vmem:[%s2034_s23 + $0x4] sm:$0x7]  ;;  %v283_v57 = vor.u32 %v281_v39, %v280_v48  ;;  %v518_v58 = vsel %vm2045_vm8, %v275_v46, %v517_v42  ;;  %v520_v59 = vld [vmem:[#allocation2 + $0x1c] sm:$0xf]  ;;  %v345_v60 = vshll.u32 %v233_v44, 16  ;;  %1770 = vmatpush3.bf16.msra.mxu0 %v1915_v62  ;;  %s1939_s17 = smov 96  }
  0x22   : > { %781 = vrot.lane.b32.xlu0 %v708_v45, %s1938_s4  ;;  %v541_v61 = vld [vmem:[#allocation2 + $0x48] sm:$0xf]  ;;  %534 = vst [vmem:[#allocation2 + $0x34] sm:$0xf] %v533_v56  ;;  %519 = vst [vmem:[#allocation2 + $0x18] sm:$0xf] %v518_v58 }
  0x23   : > { %v336_v63 = vrot.slane %v334_v51, 7  ;;  %v344_v0 = vrot.slane %v342_v53, 7  ;;  %v254_v1 = vshrl.u32 %v222_v49, 16  ;;  %v257_v2 = vshll.u32 %v222_v49, 16  ;;  %v226_v3 = vld [vmem:[%s2034_s23 + $0x10] sm:$0xf] }
  0x24   : > { %v284_v4 = vsel %vm2056_vm9, %v276_v47, %v283_v57  ;;  %v262_v5 = vshrl.u32 %v223_v54, 16  ;;  %v265_v6 = vshll.u32 %v223_v54, 16  ;;  %v227_v7 = vld [vmem:[%s2034_s23 + $0x14] sm:$0x7]  ;;  %v286_v8 = vshrl.u32 %v226_v3, 16  ;;  %v1916_v39 = vld [vmem:[%s2640_s1 + $0x60] sm:$0xff]  }
  0x25   : > { %v521_v9 = vsel %vm2065_vm10, %v284_v4, %v520_v59  ;;  %v339_v10 = vor.u32 %v337_v52, %v336_v63  ;;  %v340_v11 = vrot.slane %v336_v63, 4  ;;  %v347_v12 = vor.u32 %v345_v60, %v344_v0  ;;  %v544_v13 = vld [vmem:[#allocation2 + $0x4c] sm:$0xf]  ;;  %v230_v24 = vld [vmem:[%s2034_s23 + $0x20] sm:$0xf]  ;;  %1771 = vmatprep.subr.bf16.mxu0 %v1916_v39  ;;  %s1863_s7 = smul.u32 56, %s2650_s13 }
  0x26   : > { %v509_v14 = vld [vmem:[#allocation2 + $0xc] sm:$0xf]  ;;  %522 = vst [vmem:[#allocation2 + $0x1c] sm:$0xf] %v521_v9  ;;  %v256_v15 = vrot.slane %v254_v1, 7  ;;  %v264_v16 = vrot.slane %v262_v5, 7 }
  0x27   : > { %v288_v17 = vrot.slane %v286_v8, 7  ;;  %v289_v18 = vshll.u32 %v226_v3, 16  ;;  %v348_v19 = vsel %vm2056_vm9, %v340_v11, %v347_v12  ;;  %v542_v20 = vsel %vm2045_vm8, %v339_v10, %v541_v61  ;;  %v514_v30 = vld [vmem:[#allocation2 + $0x10] sm:$0xf]  ;;  %v523_v31 = vld [vmem:[#allocation2 + $0x24] sm:$0xf]  ;;  %s2584_s10 = scalar_lea.vmem %s2642_s3, %s1863_s7 }
  0x28   : > { %v294_v21 = vshrl.u32 %v227_v7, 16  ;;  %v297_v22 = vshll.u32 %v227_v7, 16  ;;  %543 = vst [vmem:[#allocation2 + $0x48] sm:$0xf] %v542_v20  ;;  %v545_v25 = vsel %vm2065_vm10, %v348_v19, %v544_v13  ;;  %v259_v26 = vor.u32 %v257_v2, %v256_v15  ;;  %v526_v36 = vld [vmem:[#allocation2 + $0x28] sm:$0xf] }
  0x29   : > { %v260_v27 = vrot.slane %v256_v15, 4  ;;  %v267_v28 = vor.u32 %v265_v6, %v264_v16  ;;  %546 = vst [vmem:[#allocation2 + $0x4c] sm:$0xf] %v545_v25  ;;  %v291_v32 = vor.u32 %v289_v18, %v288_v17  ;;  %v292_v33 = vrot.slane %v288_v17, 4  ;;  %v231_v37 = vld [vmem:[%s2034_s23 + $0x24] sm:$0x7] }
  0x2a   : > { %v296_v34 = vrot.slane %v294_v21, 7  ;;  %v318_v38 = vshrl.u32 %v230_v24, 16  ;;  %v2106_v40 = vld [vmem:[#allocation2 + $0x30] sm:$0xff]   ;;  %v510_v42 = vsel %vm2045_vm8, %v259_v26, %v509_v14  ;;  %v535_v47 = vld [vmem:[#allocation2 + $0x3c] sm:$0xf]  ;;  %v1917_v48 = vld [vmem:[%s2640_s1 + $0x20] sm:$0xff]  }
  0x2b   : > { %v268_v41 = vsel %vm2056_vm9, %v260_v27, %v267_v28  ;;  %511 = vst [vmem:[#allocation2 + $0xc] sm:$0xf] %v510_v42  ;;  %v524_v45 = vsel %vm2045_vm8, %v291_v32, %v523_v31  ;;  %1027 = vrot.lane.b32.xlu0 %v2106_v40, %s1937_s28  ;;  %v2121_v49 = vld [vmem:[#allocation2 + $0x14] ss:$0 sps:$4 sm:$0x11]   ;;  %v321_v50 = vshll.u32 %v230_v24, 16  ;;  %1772 = vmatpush3.bf16.msra.mxu0 %v1917_v48 }
  0x2c   : > { %v515_v43 = vsel %vm2065_vm10, %v268_v41, %v514_v30  ;;  %v299_v44 = vor.u32 %v297_v22, %v296_v34  ;;  %v320_v46 = vrot.slane %v318_v38, 7  ;;  %525 = vst [vmem:[#allocation2 + $0x24] sm:$0xf] %v524_v45  ;;  %v326_v51 = vshrl.u32 %v231_v37, 16  ;;  %v1918_v61 = vld [vmem:[%s2640_s1 + $0x68] sm:$0xff]   ;;  %v1920_v30 = vld [vmem:[%s2640_s1 + $0x70] sm:$0xff]  }
  0x2d   : > { %516 = vst [vmem:[#allocation2 + $0x10] sm:$0xf] %v515_v43  ;;  %v329_v52 = vshll.u32 %v231_v37, 16  ;;  %v2123_v53 = vld [vmem:[#allocation2 + $0x2c] ss:$0 sps:$4 sm:$0x11]   ;;  %1773 = vmatprep.subr.bf16.mxu0 %v1918_v61 }
  0x2e   : > { %v2125_v54 = vld [vmem:[#allocation2 + $0x18] sm:$0xff]   ;;  %v300_v55 = vsel %vm2056_vm9, %v292_v33, %v299_v44  ;;  %v323_v57 = vor.u32 %v321_v50, %v320_v46  ;;  %v324_v58 = vrot.slane %v320_v46, 4  ;;  %v328_v59 = vrot.slane %v326_v51, 7  ;;  %v1888_v60 = vld [vmem:[#allocation2 + $0x20] ss:$0 sps:$4 sm:$0x11]  }
  0x2f   : > { %v527_v56 = vsel %vm2065_vm10, %v300_v55, %v526_v36  ;;  %1025 = vrot.lane.b32.xlu1 %v2125_v54, %s1937_s28  ;;  %v538_v62 = vld [vmem:[#allocation2 + $0x40] sm:$0xf]  ;;  %v2140_v2 = vld [vmem:[#allocation2 + $0x44] ss:$0 sps:$4 sm:$0x11]   ;;  %v986_v4 = vrot.slane %v2121_v49, 1 }
  0x30   : > { %528 = vst [vmem:[#allocation2 + $0x28] sm:$0xf] %v527_v56  ;;  %v2136_v63 = vld [vmem:[#allocation2 + $0x48] sm:$0xff]   ;;  %v331_v0 = vor.u32 %v329_v52, %v328_v59  ;;  %v536_v1 = vsel %vm2045_vm8, %v323_v57, %v535_v47  ;;  %v2142_v3 = vld [vmem:[#allocation2 + $0x38] ss:$0 sps:$4 sm:$0x11]  }
  0x31   : > { %537 = vst [vmem:[#allocation2 + $0x3c] sm:$0xf] %v536_v1  ;;  %1029 = vrot.lane.b32.xlu0 %v2136_v63, %s1937_s28  ;;  %v989_v6 = vrot.slane %v2123_v53, 1  ;;  %v712_v9 = vshll.u32 %v2125_v54, 16  ;;  %v799_v10 = vrot.slane %v2125_v54, 1  ;;  %v800_v11 = vrot.slane %v1888_v60, 1 }
  0x32   : > { %v332_v5 = vsel %vm2056_vm9, %v324_v58, %v331_v0  ;;  %v802_v12 = vrot.slane %v2106_v40, 1  ;;  %v717_v13 = vshll.u32 %v1888_v60, 16  ;;  %v234_v14 = vld [vmem:[%s2034_s23 + $0x30] sm:$0xf]  ;;  %v710_v16 = vshrl.u32 %v2125_v54, 16  ;;  %v1919_v22 = vld [vmem:[%s2640_s1 + $0x28] sm:$0xff]  }
  0x33   : > { %v539_v8 = vsel %vm2065_vm10, %v332_v5, %v538_v62  ;;  %v724_v17 = vshll.u32 %v2106_v40, 16  ;;  %v2163_v18 = vld [vmem:[#allocation2 + $0x50] ss:$0 sps:$4 sm:$0x11]   ;;  %v992_v20 = vrot.slane %v2140_v2, 1  ;;  %v803_v21 = vrot.slane %v2142_v3, 1  ;;  %1774 = vmatpush3.bf16.msra.mxu0 %v1919_v22 }
  0x34   : > { %v2150_v7 = vld [vmem:[#allocation2 + $0xc] sm:$0xff]   ;;  %540 = vst [vmem:[#allocation2 + $0x40] sm:$0xf] %v539_v8  ;;  %v714_v25 = vrot.slane %v712_v9, 1  ;;  %v722_v26 = vshrl.u32 %v2106_v40, 16  ;;  %v729_v27 = vshll.u32 %v2142_v3, 16  ;;  %1775 = vmatprep.subr.bf16.mxu0 %v1920_v30  ;;  %v2195_v48 = vsel %vm795_vm5, %v799_v10, %v800_v11 }
  0x35   : > { %866 = vrot.lane.b32.xlu1 %v2150_v7, %s1939_s17  ;;  %v985_v15 = vrot.slane %v2150_v7, 1  ;;  %v235_v28 = vld [vmem:[%s2034_s23 + $0x34] sm:$0x7]  ;;  %v719_v32 = vrot.slane %v717_v13, 1  ;;  %v350_v33 = vshrl.u32 %v234_v14, 16  ;;  %v726_v36 = vrot.slane %v724_v17, 1 }
  0x36   : > { %v1921_v34 = vld [vmem:[%s2640_s1 + $0x30] sm:$0xff]   ;;  %v736_v37 = vshll.u32 %v2136_v63, 16  ;;  %v353_v38 = vshll.u32 %v234_v14, 16  ;;  %v358_v39 = vshrl.u32 %v235_v28, 16  ;;  %v1922_v41 = vld [vmem:[%s2640_s1 + $0x78] sm:$0xff]   ;;  %v741_v43 = vshll.u32 %v2163_v18, 16 }
  0x37   : > { %v2165_v19 = vld [vmem:[#allocation2 + $0x24] sm:$0xff]   ;;  %v987_v24 = vsel %vm795_vm5, %v985_v15, %v986_v4  ;;  %v352_v44 = vrot.slane %v350_v33, 7  ;;  %v361_v45 = vshll.u32 %v235_v28, 16  ;;  %v547_v46 = vld [vmem:[#allocation2 + $0x54] sm:$0xf]  ;;  %v715_v50 = vor.u32 %v714_v25, %v710_v16  ;;  %1776 = vmatpush3.bf16.msra.mxu0 %v1921_v34  ;;  %v1923_v59 = vld [vmem:[%s2640_s1 + $0x38] sm:$0xff]  }
  0x38   : > { %1006 = vrot.lane.b32.xlu0 %v987_v24, %s1938_s4  ;;  %v988_v31 = vrot.slane %v2165_v19, 1  ;;  %v360_v51 = vrot.slane %v358_v39, 7  ;;  %v731_v52 = vrot.slane %v729_v27, 1  ;;  %v734_v55 = vshrl.u32 %v2136_v63, 16  ;;  %v550_v58 = vld [vmem:[#allocation2 + $0x58] sm:$0xf]  ;;  %1777 = vmatprep.subr.bf16.mxu0 %v1922_v41 }
  0x39   : > { %868 = vrot.lane.b32.xlu1 %v2165_v19, %s1939_s17  ;;  %v355_v56 = vor.u32 %v353_v38, %v352_v44  ;;  %v356_v57 = vrot.slane %v352_v44, 4  ;;  %v727_v61 = vor.u32 %v726_v36, %v722_v26  ;;  %v738_v62 = vrot.slane %v736_v37, 1  ;;  %v236_v1 = vld [vmem:[%s2034_s23 + $0x38] sm:$0xf]  ;;  %v237_v4 = vld [vmem:[%s2034_s23 + $0x3c] sm:$0x7] }
  0x3a   : > { %v990_v42 = vsel %vm795_vm5, %v988_v31, %v989_v6  ;;  %v363_v0 = vor.u32 %v361_v45, %v360_v51  ;;  %v2207_v5 = vrot.slane %v741_v43, 1  ;;  %v2211_v8 = vld [vmem:[#allocation2 + $0x5c] ss:$0 sps:$4 sm:$0x11]   ;;  %v805_v9 = vrot.slane %v2136_v63, 1 }
  0x3b   : > { %v2192_v47 = vld [vmem:[#allocation2 + $0x3c] sm:$0xff]   ;;  %v548_v6 = vsel %vm2045_vm8, %v355_v56, %v547_v46  ;;  %v366_v10 = vshrl.u32 %v236_v1, 16  ;;  %v369_v14 = vshll.u32 %v236_v1, 16  ;;  %v374_v15 = vshrl.u32 %v237_v4, 16  ;;  %1778 = vmatpush3.bf16.msra.mxu0 %v1923_v59  ;;  %v556_v30 = vld [vmem:[#allocation2 + $0x64] sm:$0xf] }
  0x3c   : > { %1008 = vrot.lane.b32.xlu0 %v990_v42, %s1938_s4  ;;  %v991_v60 = vrot.slane %v2192_v47, 1  ;;  %v364_v13 = vsel %vm2056_vm9, %v356_v57, %v363_v0  ;;  %549 = vst [vmem:[#allocation2 + $0x54] sm:$0xf] %v548_v6  ;;  %v238_v16 = vld [vmem:[%s2034_s23 + $0x40] sm:$0xf]  ;;  %v377_v24 = vshll.u32 %v237_v4, 16  ;;  %v720_v27 = vsel %vm696_vm6, %v715_v50, %v719_v32 }
  0x3d   : > { %870 = vrot.lane.b32.xlu1 %v2192_v47, %s1939_s17  ;;  %v551_v17 = vsel %vm2065_vm10, %v364_v13, %v550_v58  ;;  %v368_v22 = vrot.slane %v366_v10, 7  ;;  %v553_v25 = vld [vmem:[#allocation2 + $0x60] sm:$0xf]  ;;  %v382_v26 = vshrl.u32 %v238_v16, 16  ;;  %v376_v28 = vrot.slane %v374_v15, 7 }
  0x3e   : > { %v993_v11 = vsel %vm795_vm5, %v991_v60, %v992_v20  ;;  %v2228_v20 = vsel %vm795_vm5, %v802_v12, %v803_v21  ;;  %552 = vst [vmem:[#allocation2 + $0x58] sm:$0xf] %v551_v17  ;;  %v239_v31 = vld [vmem:[%s2034_s23 + $0x44] sm:$0x7]  ;;  %v385_v33 = vshll.u32 %v238_v16, 16  ;;  %v806_v34 = vrot.slane %v2163_v18, 1 }
  0x3f   : > { %v371_v36 = vor.u32 %v369_v14, %v368_v22  ;;  %v372_v37 = vrot.slane %v368_v22, 4  ;;  %v2233_v38 = vld [vmem:[#allocation2 + $0x68] ss:$0 sps:$4 sm:$0x11]   ;;  %v384_v39 = vrot.slane %v382_v26, 7  ;;  %v732_v3 = vsel %vm696_vm6, %v727_v61, %v731_v52 }
  0x40   : > { %1010 = vrot.lane.b32.xlu0 %v993_v11, %s1938_s4  ;;  %v379_v40 = vor.u32 %v377_v24, %v376_v28  ;;  %v390_v12 = vshrl.u32 %v239_v31, 16  ;;  %v393_v21 = vshll.u32 %v239_v31, 16  ;;  %v559_v32 = vld [vmem:[#allocation2 + $0x6c] sm:$0xf]  ;;  %v995_v41 = vrot.slane %v2211_v8, 1 }
  0x41   : > { %819 = vrot.lane.b32.xlu1 %v2195_v48, %s1937_s28  ;;  %v554_v42 = vsel %vm2045_vm8, %v371_v36, %v553_v25  ;;  %v387_v43 = vor.u32 %v385_v33, %v384_v39  ;;  %v909_v44 = vshll.u32 %v2121_v49, 16  ;;  %v739_v45 = vor.u32 %v738_v62, %v734_v55  ;;  %v240_v52 = vld [vmem:[%s2034_s23 + $0x48] sm:$0xf]  ;;  %v241_v56 = vld [vmem:[%s2034_s23 + $0x4c] sm:$0x7] }
  0x42   : > { %v380_v46 = vsel %vm2056_vm9, %v372_v37, %v379_v40  ;;  %555 = vst [vmem:[#allocation2 + $0x60] sm:$0xf] %v554_v42  ;;  %v388_v50 = vrot.slane %v384_v39, 4  ;;  %v392_v51 = vrot.slane %v390_v12, 7  ;;  %v753_v58 = vshll.u32 %v2233_v38, 16 }
  0x43   : > { %v557_v57 = vsel %vm2065_vm10, %v380_v46, %v556_v30  ;;  %v560_v49 = vsel %vm2045_vm8, %v387_v43, %v559_v32  ;;  %v398_v59 = vshrl.u32 %v240_v52, 16  ;;  %v562_v60 = vld [vmem:[#allocation2 + $0x70] sm:$0xf]  ;;  %v401_v61 = vshll.u32 %v240_v52, 16  ;;  %v565_v14 = vld [vmem:[#allocation2 + $0x78] sm:$0xf] }
  0x44   : > { %1054 = vrot.lane.b32.xlu0 %v720_v27, %s1939_s17  ;;  %558 = vst [vmem:[#allocation2 + $0x64] sm:$0xf] %v557_v57  ;;  %v395_v55 = vor.u32 %v393_v21, %v392_v51  ;;  %561 = vst [vmem:[#allocation2 + $0x6c] sm:$0xf] %v560_v49  ;;  %v406_v62 = vshrl.u32 %v241_v56, 16  ;;  %v409_v0 = vshll.u32 %v241_v56, 16  ;;  %v744_v6 = vsel %vm696_vm6, %v739_v45, %v2207_v5 }
  0x45   : > { %821 = vrot.lane.b32.xlu1 %v2228_v20, %s1937_s28  ;;  %v2253_v1 = vld [vmem:[#allocation2 + $0x54] sm:$0xff]   ;;  %v400_v4 = vrot.slane %v398_v59, 7  ;;  %v809_v11 = vrot.slane %v2233_v38, 1  ;;  %v242_v15 = vld [vmem:[%s2034_s23 + $0x50] sm:$0xf]  ;;  %v2292_v52 = vrot.slane %v909_v44, 1 }
  0x46   : > { %v396_v10 = vsel %vm2056_vm9, %v388_v50, %v395_v55  ;;  %v408_v13 = vrot.slane %v406_v62, 7  ;;  %v994_v16 = vrot.slane %v2253_v1, 1  ;;  %v2265_v22 = vld [vmem:[#allocation2 + $0x74] ss:$0 sps:$4 sm:$0x11]   ;;  %v414_v30 = vshrl.u32 %v242_v15, 16 }
  0x47   : > { %v563_v17 = vsel %vm2065_vm10, %v396_v10, %v562_v60  ;;  %v403_v24 = vor.u32 %v401_v61, %v400_v4  ;;  %v404_v25 = vrot.slane %v400_v4, 4  ;;  %v243_v26 = vld [vmem:[%s2034_s23 + $0x54] sm:$0x7]  ;;  %v568_v28 = vld [vmem:[#allocation2 + $0x7c] sm:$0xf]  ;;  %v417_v31 = vshll.u32 %v242_v15, 16 }
  0x48   : > { %1056 = vrot.lane.b32.xlu0 %v732_v3, %s1939_s17  ;;  %564 = vst [vmem:[#allocation2 + $0x70] sm:$0xf] %v563_v17  ;;  %v411_v5 = vor.u32 %v409_v0, %v408_v13  ;;  %v422_v36 = vshrl.u32 %v243_v26, 16  ;;  %v425_v37 = vshll.u32 %v243_v26, 16  ;;  %v996_v39 = vsel %vm795_vm5, %v994_v16, %v995_v41  ;;  %v571_v32 = vld [vmem:[#allocation2 + $0x84] sm:$0xf] }
  0x49   : > { %783 = vrot.lane.b32.xlu1 %v720_v27, %s1938_s4  ;;  %v2268_v27 = vrot.slane %v753_v58, 1  ;;  %v566_v33 = vsel %vm2045_vm8, %v403_v24, %v565_v14  ;;  %v2277_v12 = vld [vmem:[#allocation2 + $0x80] ss:$0 sps:$4 sm:$0x11]   ;;  %v416_v21 = vrot.slane %v414_v30, 7  ;;  %v998_v18 = vrot.slane %v2265_v22, 1 }
  0x4a   : > { %v412_v40 = vsel %vm2056_vm9, %v404_v25, %v411_v5  ;;  %567 = vst [vmem:[#allocation2 + $0x78] sm:$0xf] %v566_v33  ;;  %v424_v45 = vrot.slane %v422_v36, 7  ;;  %v244_v50 = vld [vmem:[%s2034_s23 + $0x58] sm:$0xf]  ;;  %v765_v61 = vshll.u32 %v2277_v12, 16 }
  0x4b   : > { %v2279_v42 = vld [vmem:[#allocation2 + $0x60] sm:$0xff]   ;;  %v569_v43 = vsel %vm2065_vm10, %v412_v40, %v568_v28  ;;  %v419_v41 = vor.u32 %v417_v31, %v416_v21  ;;  %v420_v46 = vrot.slane %v416_v21, 4  ;;  %v245_v51 = vld [vmem:[%s2034_s23 + $0x5c] sm:$0x7]  ;;  %v574_v49 = vld [vmem:[#allocation2 + $0x88] sm:$0xf] }
  0x4c   : > { %1058 = vrot.lane.b32.xlu0 %v744_v6, %s1939_s17  ;;  %570 = vst [vmem:[#allocation2 + $0x7c] sm:$0xf] %v569_v43  ;;  %v746_v56 = vshrl.u32 %v2279_v42, 16  ;;  %v748_v57 = vshll.u32 %v2279_v42, 16  ;;  %v427_v58 = vor.u32 %v425_v37, %v424_v45  ;;  %v433_v59 = vshll.u32 %v244_v50, 16 }
  0x4d   : > { %785 = vrot.lane.b32.xlu1 %v732_v3, %s1938_s4  ;;  %v2288_v3 = vsel %vm795_vm5, %v805_v9, %v806_v34  ;;  %v572_v9 = vsel %vm2045_vm8, %v419_v41, %v571_v32  ;;  %v430_v34 = vshrl.u32 %v244_v50, 16  ;;  %v438_v44 = vshrl.u32 %v245_v51, 16  ;;  %v2306_v0 = vld [vmem:[#allocation2 + $0x8c] ss:$0 sps:$4 sm:$0x11]  }
  0x4e   : > { %v750_v55 = vrot.slane %v748_v57, 1  ;;  %v428_v62 = vsel %vm2056_vm9, %v420_v46, %v427_v58  ;;  %573 = vst [vmem:[#allocation2 + $0x84] sm:$0xf] %v572_v9  ;;  %v441_v4 = vshll.u32 %v245_v51, 16  ;;  %v246_v15 = vld [vmem:[%s2034_s23 + $0x60] sm:$0xf] }
  0x4f   : > { %v2301_v60 = vld [vmem:[#allocation2 + $0x6c] sm:$0xff]   ;;  %v575_v10 = vsel %vm2065_vm10, %v428_v62, %v574_v49  ;;  %v432_v13 = vrot.slane %v430_v34, 7  ;;  %v440_v14 = vrot.slane %v438_v44, 7  ;;  %v2314_v24 = vld [vmem:[#allocation2 + $0x98] ss:$0 sps:$4 sm:$0x11]  }
  0x50   : > { %1012 = vrot.lane.b32.xlu0 %v996_v39, %s1938_s4  ;;  %v751_v16 = vor.u32 %v750_v55, %v746_v56  ;;  %v997_v17 = vrot.slane %v2301_v60, 1  ;;  %576 = vst [vmem:[#allocation2 + $0x88] sm:$0xf] %v575_v10  ;;  %v580_v28 = vld [vmem:[#allocation2 + $0x94] sm:$0xf]  ;;  %v446_v31 = vshrl.u32 %v246_v15, 16 }
  0x51   : > { %787 = vrot.lane.b32.xlu1 %v744_v6, %s1938_s4  ;;  %v577_v6 = vld [vmem:[#allocation2 + $0x90] sm:$0xf]  ;;  %v435_v25 = vor.u32 %v433_v59, %v432_v13  ;;  %v436_v26 = vrot.slane %v432_v13, 4  ;;  %v443_v5 = vor.u32 %v441_v4, %v440_v14  ;;  %v247_v30 = vld [vmem:[%s2034_s23 + $0x64] sm:$0x7]  ;;  %v767_v37 = vrot.slane %v765_v61, 1 }
  0x52   : > { %v756_v33 = vsel %vm696_vm6, %v751_v16, %v2268_v27  ;;  %v812_v39 = vrot.slane %v2277_v12, 1  ;;  %v449_v40 = vshll.u32 %v246_v15, 16  ;;  %v448_v43 = vrot.slane %v446_v31, 7  ;;  %v583_v51 = vld [vmem:[#allocation2 + $0x9c] sm:$0xf] }
  0x53   : > { %v2321_v36 = vld [vmem:[#allocation2 + $0x78] sm:$0xff]   ;;  %v444_v21 = vsel %vm2056_vm9, %v436_v26, %v443_v5  ;;  %v578_v32 = vsel %vm2045_vm8, %v435_v25, %v577_v6  ;;  %v454_v45 = vshrl.u32 %v247_v30, 16  ;;  %v808_v41 = vrot.slane %v2279_v42, 1  ;;  %v248_v55 = vld [vmem:[%s2034_s23 + $0x68] sm:$0xf] }
  0x54   : > { %1031 = vrot.lane.b32.xlu0 %v2279_v42, %s1937_s28  ;;  %v760_v27 = vshll.u32 %v2321_v36, 16  ;;  %v1001_v46 = vrot.slane %v2306_v0, 1  ;;  %579 = vst [vmem:[#allocation2 + $0x90] sm:$0xf] %v578_v32  ;;  %v581_v50 = vsel %vm2065_vm10, %v444_v21, %v580_v28  ;;  %v999_v56 = vsel %vm795_vm5, %v997_v17, %v998_v18  ;;  %v586_v62 = vld [vmem:[#allocation2 + $0xa0] sm:$0xf] }
  0x55   : > { %823 = vrot.lane.b32.xlu1 %v2288_v3, %s1937_s28  ;;  %v758_v57 = vshrl.u32 %v2321_v36, 16  ;;  %582 = vst [vmem:[#allocation2 + $0x94] sm:$0xf] %v581_v50  ;;  %v451_v58 = vor.u32 %v449_v40, %v448_v43  ;;  %v456_v49 = vrot.slane %v454_v45, 7  ;;  %v777_v34 = vshll.u32 %v2314_v24, 16 }
  0x56   : > { %v762_v9 = vrot.slane %v760_v27, 1  ;;  %v452_v59 = vrot.slane %v448_v43, 4  ;;  %v457_v44 = vshll.u32 %v247_v30, 16  ;;  %v249_v4 = vld [vmem:[%s2034_s23 + $0x6c] sm:$0x7]  ;;  %v462_v13 = vshrl.u32 %v248_v55, 16 }
  0x57   : > { %v584_v61 = vsel %vm2045_vm8, %v451_v58, %v583_v51  ;;  %v2344_v6 = vld [vmem:[#allocation2 + $0x84] sm:$0xff]   ;;  %v465_v14 = vshll.u32 %v248_v55, 16  ;;  %v811_v16 = vrot.slane %v2321_v36, 1  ;;  %v470_v17 = vshrl.u32 %v249_v4, 16  ;;  %v592_v21 = vld [vmem:[#allocation2 + $0xac] sm:$0xf] }
  0x58   : > { %1060 = vrot.lane.b32.xlu0 %v756_v33, %s1939_s17  ;;  %v459_v18 = vor.u32 %v457_v44, %v456_v49  ;;  %585 = vst [vmem:[#allocation2 + $0x9c] sm:$0xf] %v584_v61  ;;  %v2346_v10 = vld [vmem:[#allocation2 + $0xa4] ss:$0 sps:$4 sm:$0x11]   ;;  %v763_v15 = vor.u32 %v762_v9, %v758_v57  ;;  %v473_v25 = vshll.u32 %v249_v4, 16  ;;  %v2353_v26 = vsel %vm795_vm5, %v808_v41, %v809_v11 }
  0x59   : > { %872 = vrot.lane.b32.xlu1 %v2253_v1, %s1939_s17  ;;  %v779_v5 = vrot.slane %v777_v34, 1  ;;  %v464_v30 = vrot.slane %v462_v13, 7  ;;  %v589_v31 = vld [vmem:[#allocation2 + $0xa8] sm:$0xf]  ;;  %v904_v32 = vshll.u32 %v2150_v7, 16  ;;  %v1000_v38 = vrot.slane %v2344_v6, 1 }
  0x5a   : > { %v460_v28 = vsel %vm2056_vm9, %v452_v59, %v459_v18  ;;  %v902_v41 = vshrl.u32 %v2150_v7, 16  ;;  %v768_v27 = vsel %vm696_vm6, %v763_v15, %v767_v37  ;;  %v914_v58 = vshrl.u32 %v2165_v19, 16  ;;  %v2388_v55 = vld [vmem:[#allocation2 + $0xb0] ss:$0 sps:$4 sm:$0x11]  }
  0x5b   : > { %v587_v40 = vsel %vm2065_vm10, %v460_v28, %v586_v62  ;;  %v467_v43 = vor.u32 %v465_v14, %v464_v30  ;;  %v468_v45 = vrot.slane %v464_v30, 4  ;;  %v906_v9 = vrot.slane %v904_v32, 1 }
  0x5c   : > { %1014 = vrot.lane.b32.xlu0 %v999_v56, %s1938_s4  ;;  %v2363_v11 = vld [vmem:[#allocation2 + $0x90] sm:$0xff]   ;;  %588 = vst [vmem:[#allocation2 + $0xa0] sm:$0xf] %v587_v40  ;;  %v1004_v56 = vrot.slane %v2346_v10, 1  ;;  %v916_v59 = vshll.u32 %v2165_v19, 16  ;;  %v1002_v23 = vsel %vm795_vm5, %v1000_v38, %v1001_v46  ;;  %v1924_v19 = vld [vmem:[%s2640_s1 + $0x80] sm:$0xff]   ;;  %v2406_v14 = vsel %vm795_vm5, %v811_v16, %v812_v39 }
  0x5d   : > { %789 = vrot.lane.b32.xlu1 %v756_v33, %s1938_s4  ;;  %v472_v33 = vrot.slane %v470_v17, 7  ;;  %v772_v51 = vshll.u32 %v2363_v11, 16  ;;  %v590_v57 = vsel %vm2045_vm8, %v467_v43, %v589_v31  ;;  %v770_v49 = vshrl.u32 %v2363_v11, 16 }
  0x5e   : > { %591 = vst [vmem:[#allocation2 + $0xa8] sm:$0xf] %v590_v57  ;;  %v907_v29 = vor.u32 %v906_v9, %v902_v41  ;;  %v918_v35 = vrot.slane %v916_v59, 1  ;;  %v921_v62 = vshll.u32 %v2123_v53, 16  ;;  %v926_v46 = vshrl.u32 %v2192_v47, 16 }
  0x5f   : > { %v475_v50 = vor.u32 %v473_v25, %v472_v33  ;;  %v774_v37 = vrot.slane %v772_v51, 1  ;;  %v933_v17 = vshll.u32 %v2140_v2, 16  ;;  %vm1071_vm11 = vcmask 261120   ;;  %v1925_v25 = vld [vmem:[%s2640_s1 + $0x88] sm:$0xff]  }
  0x60   : > { %1033 = vrot.lane.b32.xlu0 %v2321_v36, %s1937_s28  ;;  %v2392_v61 = vsel %vm696_vm6, %v907_v29, %v2292_v52  ;;  %v919_v13 = vor.u32 %v918_v35, %v914_v58  ;;  %v928_v52 = vshll.u32 %v2192_v47, 16  ;;  %v923_v15 = vrot.slane %v921_v62, 1 }
  0x61   : > { %825 = vrot.lane.b32.xlu1 %v2353_v26, %s1937_s28  ;;  %v476_v7 = vsel %vm2056_vm9, %v468_v45, %v475_v50  ;;  %v775_v4 = vor.u32 %v774_v37, %v770_v49  ;;  %v935_v12 = vrot.slane %v933_v17, 1  ;;  %v1940_v39 = vmov 0.0  }
  0x62   : > { %v593_v34 = vsel %vm2065_vm10, %v476_v7, %v592_v21  ;;  %v930_v53 = vrot.slane %v928_v52, 1  ;;  %v2417_v47 = vsel %vm696_vm6, %v919_v13, %v923_v15  ;;  %1830 = vmatprep.subr.bf16.mxu1 %v1940_v39  ;;  %v815_v16 = vrot.slane %v2314_v24, 1 }
  0x63   : > { %594 = vst [vmem:[#allocation2 + $0xac] sm:$0xf] %v593_v34  ;;  %v2386_v44 = vld [vmem:[#allocation2 + $0x9c] sm:$0xff]   ;;  %v780_v2 = vsel %vm696_vm6, %v775_v4, %v779_v5  ;;  %v1050_v30 = vshll.u32 %v2388_v55, 16  ;;  %1831 = vmatpush3.bf16.msra.mxu1 %v1924_v19  ;;  %v938_v38 = vshrl.u32 %v2253_v1, 16  ;;  %v940_v5 = vshll.u32 %v2253_v1, 16 }
  0x64   : > { %1062 = vrot.lane.b32.xlu0 %v768_v27, %s1939_s17  ;;  %v1003_v18 = vrot.slane %v2386_v44, 1  ;;  %v931_v31 = vor.u32 %v930_v53, %v926_v46  ;;  %1832 = vmatprep.subr.bf16.mxu1 %v1940_v39  ;;  %vm1941_vm12 = vmmov 0   ;;  %v945_v43 = vshll.u32 %v2211_v8, 16 }
  0x65   : > { %874 = vrot.lane.b32.xlu1 %v2301_v60, %s1939_s17  ;;  %1834 = vmatprep.mubr.msk.bf16.mxu1 %vm1941_vm12, %v1940_v39  ;;  %v950_v45 = vshrl.u32 %v2301_v60, 16  ;;  %v952_v41 = vshll.u32 %v2301_v60, 16  ;;  %v957_v1 = vshll.u32 %v2265_v22, 16  ;;  %v962_v50 = vshrl.u32 %v2344_v6, 16 }
  0x66   : > { %v1005_v40 = vsel %vm795_vm5, %v1003_v18, %v1004_v56  ;;  %v2430_v32 = vsel %vm696_vm6, %v931_v31, %v935_v12  ;;  %v964_v51 = vshll.u32 %v2344_v6, 16  ;;  %v814_v56 = vrot.slane %v2363_v11, 1 }
  0x67   : > { %1833 = vmatpush3.bf16.msra.mxu1 %v1925_v25  ;;  %v947_v57 = vrot.slane %v945_v43, 1  ;;  %v954_v58 = vrot.slane %v952_v41, 1  ;;  %v969_v8 = vshll.u32 %v2306_v0, 16  ;;  %v1052_v49 = vrot.slane %v1050_v30, 1 }
  0x68   : > { %1016 = vrot.lane.b32.xlu0 %v1002_v23, %s1938_s4  ;;  %v959_v60 = vrot.slane %v957_v1, 1  ;;  %v966_v9 = vrot.slane %v964_v51, 1  ;;  %v974_v34 = vshrl.u32 %v2386_v44, 16  ;;  %v981_v29 = vshll.u32 %v2346_v10, 16 }
  0x69   : > { %791 = vrot.lane.b32.xlu1 %v768_v27, %s1938_s4  ;;  %v942_v27 = vrot.slane %v940_v5, 1  ;;  %v955_v22 = vor.u32 %v954_v58, %v950_v45  ;;  %v971_v37 = vrot.slane %v969_v8, 1  ;;  %vm1086_vm13 = vcmask 523264   ;;  %v1927_v8 = vld [vmem:[#allocation2 + $0x30] sm:$0xff]  }
  0x6a   : > { %v2414_v28 = vld [vmem:[#allocation2 + $0xa8] sm:$0xff]   ;;  %1835 = vmatmul.mubr.msk.bf16.vlgmr.msra.gmra.mrb[0].mxu1 %vm1071_vm11, %v2195_v48  ;;  %v967_v23 = vor.u32 %v966_v9, %v962_v50  ;;  %v816_v48 = vsel %vm795_vm5, %v814_v56, %v815_v16  ;;  %v983_v46 = vrot.slane %v981_v29, 1  ;;  %vm1101_vm14 = vcmask 785408  }
  0x6b   : > { %v1043_v33 = vshrl.u32 %v2414_v28, 16  ;;  %v1045_v21 = vshll.u32 %v2414_v28, 16  ;;  %v943_v7 = vor.u32 %v942_v27, %v938_v38  ;;  %1838 = vmatprep.mubr.msk.bf16.mxu1 %vm1941_vm12, %v1940_v39  ;;  %v2461_v35 = vsel %vm696_vm6, %v955_v22, %v959_v60 }
  0x6c   : > { %1035 = vrot.lane.b32.xlu0 %v2363_v11, %s1937_s28  ;;  %v2464_v62 = vsel %vm696_vm6, %v967_v23, %v971_v37  ;;  %vm1599_vm15 = vcmask 519168   ;;  %vm1601_vm0 = vcmask 518144  }
  0x6d   : > { %827 = vrot.lane.b32.xlu1 %v2406_v14, %s1937_s28  ;;  %v1047_v24 = vrot.slane %v1045_v21, 1  ;;  %v2454_v0 = vsel %vm696_vm6, %v943_v7, %v947_v57 }
  0x6f   : > { %v1048_v59 = vor.u32 %v1047_v24, %v1043_v33 }
  0x70   : > { %1064 = vrot.lane.b32.xlu0 %v780_v2, %s1939_s17 }
  0x71   : > { %876 = vrot.lane.b32.xlu1 %v2344_v6, %s1939_s17  ;;  %v976_v6 = vshll.u32 %v2386_v44, 16  ;;  %v1053_v18 = vsel %vm696_vm6, %v1048_v59, %v1052_v49 }
  0x72   : > { %1839 = vmatmul.mubr.msk.bf16.gmra.mrb[4].mxu1 %vm1071_vm11, %v2228_v20 }
  0x73   : > { %v978_v19 = vrot.slane %v976_v6, 1  ;;  %1842 = vmatprep.mubr.msk.bf16.mxu1 %vm1941_vm12, %v1940_v39 }
  0x74   : > { %1018 = vrot.lane.b32.xlu0 %v1005_v40, %s1938_s4 }
  0x75   : > { %793 = vrot.lane.b32.xlu1 %v780_v2, %s1938_s4  ;;  %v979_v4 = vor.u32 %v978_v19, %v974_v34 }
  0x77   : > { %v2471_v10 = vsel %vm696_vm6, %v979_v4, %v983_v46 }
  0x78   : > { %1037 = vrot.lane.b32.xlu0 %v2414_v28, %s1937_s28 }
  0x79   : > { %829 = vrot.lane.b32.xlu1 %v816_v48, %s1937_s28 }
  0x7a   : > { %1843 = vmatmul.mubr.msk.bf16.gmra.mrb[8].mxu1 %vm1071_vm11, %v2288_v3  ;;  %v1068_v3 = vrot.slane %v2414_v28, 1  ;;  %v1926_v28 = vld [vmem:[#allocation2] sm:$0xff]  }
  0x7b   : > { %1846 = vmatprep.mubr.msk.bf16.mxu1 %vm1941_vm12, %v1940_v39 }
  0x7c   : > { %1066 = vrot.lane.b32.xlu0 %v1053_v18, %s1939_s17 }
  0x7d   : > { %878 = vrot.lane.b32.xlu1 %v2386_v44, %s1939_s17 }
  0x82   : > { %1847 = vmatmul.mubr.msk.bf16.gmra.mrb[12].mxu1 %vm1071_vm11, %v2353_v26  ;;  %v1069_v26 = vrot.slane %v2388_v55, 1 }
  0x83   : > { %1850 = vmatprep.mubr.msk.bf16.mxu1 %vm1941_vm12, %v1940_v39 }
  0x84   : > { %v1070_v15 = vsel %vm795_vm5, %v1068_v3, %v1069_v26 }
  0x8a   : > { %1851 = vmatmul.mubr.msk.bf16.gmra.mrb[16].mxu1 %vm1071_vm11, %v2406_v14 }
  0x8b   : > { %1854 = vmatprep.mubr.msk.bf16.mxu1 %vm1941_vm12, %v1940_v39 }
  0x92   : > { %v818_v44 = vpop.permute.xlu1 %817  ;;  %1855 = vmatmul.mubr.msk.bf16.gmra.mrb[20].mxu1 %vm1071_vm11, %v816_v48 }
  0x93   : > { %1858 = vmatprep.mubr.msk.bf16.mxu1 %vm1941_vm12, %v1940_v39 }
  0x94   : > { %v782_v20 = vpop.permute.xlu0 %781 }
  0x95   : > { %v1073_v55 = vsel %vm1071_vm11, %v1926_v28, %v782_v20 }
  0x96   : > { %v1088_v5 = vsel %vm1086_vm13, %v1073_v55, %v818_v44 }
  0x9a   : > { %1859 = vmatmul.mubr.msk.bf16.gmra.mrb[24].mxu1 %vm1071_vm11, %v1070_v15 }
  0x9d   : > { %v1028_v13 = vpop.permute.xlu0 %1027 }
  0xa1   : > { %v1026_v52 = vpop.permute.xlu1 %1025 }
  0xa3   : > { %v1030_v17 = vpop.permute.xlu0 %1029 }
  0xa7   : > { %v867_v14 = vpop.permute.xlu1 %866 }
  0xaa   : > { %v1007_v53 = vpop.permute.xlu0 %1006 }
  0xab   : > { %v869_v25 = vpop.permute.xlu1 %868  ;;  %v1125_v39 = vsel %vm1071_vm11, %v2392_v61, %v1007_v53  ;;  %v1103_v61 = vsel %vm1101_vm14, %v1088_v5, %v867_v14 }
  0xac   : > { %v1145_v40 = vsel %vm1086_vm13, %v1125_v39, %v1026_v52 }
  0xae   : > { %v1009_v12 = vpop.permute.xlu0 %1008 }
  0xaf   : > { %v871_v2 = vpop.permute.xlu1 %870  ;;  %v1128_v33 = vsel %vm1071_vm11, %v2417_v47, %v1009_v12 }
  0xb0   : > { %v1147_v43 = vsel %vm1086_vm13, %v1128_v33, %v1028_v13 }
  0xb2   : > { %v1011_v16 = vpop.permute.xlu0 %1010 }
  0xb3   : > { %v820_v30 = vpop.permute.xlu1 %819  ;;  %v1131_v47 = vsel %vm1071_vm11, %v2430_v32, %v1011_v16 }
  0xb4   : > { %v1149_v57 = vsel %vm1086_vm13, %v1131_v47, %v1030_v17 }
  0xb6   : > { %v1055_v31 = vpop.permute.xlu0 %1054 }
  0xb7   : > { %v822_v21 = vpop.permute.xlu1 %821  ;;  %v1159_v38 = vsel %vm1101_vm14, %v1145_v40, %v1055_v31 }
  0xb8   : > { %1383 = vmatprep.mubr.bf16.mxu0 %v1159_v38 }
  0xb9   : > { %1384 = vmatmul.mubr.bf16.vlgmr.msra.gmra.mrb[0].mxu0 %v1103_v61 }
  0xba   : > { %v1057_v24 = vpop.permute.xlu0 %1056 }
  0xbb   : > { %v784_v45 = vpop.permute.xlu1 %783  ;;  %v1162_v41 = vsel %vm1101_vm14, %v1147_v43, %v1057_v24 }
  0xbc   : > { %v1075_v27 = vsel %vm1071_vm11, %v2125_v54, %v784_v45  ;;  %1391 = vmatprep.mubr.bf16.mxu0 %v1162_v41 }
  0xbd   : > { %v1090_v1 = vsel %vm1086_vm13, %v1075_v27, %v820_v30 }
  0xbe   : > { %v1059_v50 = vpop.permute.xlu0 %1058  ;;  %v1106_v56 = vsel %vm1101_vm14, %v1090_v1, %v869_v25 }
  0xbf   : > { %v786_v51 = vpop.permute.xlu1 %785  ;;  %v1165_v58 = vsel %vm1101_vm14, %v1149_v57, %v1059_v50 }
  0xc0   : > { %v1077_v49 = vsel %vm1071_vm11, %v1927_v8, %v786_v51 }
  0xc1   : > { %1392 = vmatmul.mubr.bf16.gmra.mrb[4].mxu0 %v1106_v56  ;;  %v1092_v60 = vsel %vm1086_vm13, %v1077_v49, %v822_v21 }
  0xc2   : > { %v1013_v7 = vpop.permute.xlu0 %1012  ;;  %1399 = vmatprep.mubr.bf16.mxu0 %v1165_v58  ;;  %v1109_v22 = vsel %vm1101_vm14, %v1092_v60, %v871_v2 }
  0xc3   : > { %v788_v54 = vpop.permute.xlu1 %787  ;;  %v1134_v37 = vsel %vm1071_vm11, %v2454_v0, %v1013_v7 }
  0xc4   : > { %v1079_v29 = vsel %vm1071_vm11, %v2136_v63, %v788_v54 }
  0xc6   : > { %v1032_v32 = vpop.permute.xlu0 %1031 }
  0xc7   : > { %v824_v9 = vpop.permute.xlu1 %823  ;;  %v1151_v34 = vsel %vm1086_vm13, %v1134_v37, %v1032_v32 }
  0xc8   : > { %v1094_v19 = vsel %vm1086_vm13, %v1079_v29, %v824_v9 }
  0xc9   : > { %1400 = vmatmul.mubr.bf16.gmra.mrb[8].mxu0 %v1109_v22 }
  0xca   : > { %v1061_v6 = vpop.permute.xlu0 %1060 }
  0xcb   : > { %v873_v59 = vpop.permute.xlu1 %872  ;;  %v1168_v23 = vsel %vm1101_vm14, %v1151_v34, %v1061_v6 }
  0xcc   : > { %1407 = vmatprep.mubr.bf16.mxu0 %v1168_v23  ;;  %v1112_v4 = vsel %vm1101_vm14, %v1094_v19, %v873_v59 }
  0xce   : > { %v1015_v48 = vpop.permute.xlu0 %1014 }
  0xcf   : > { %v790_v46 = vpop.permute.xlu1 %789  ;;  %v1137_v20 = vsel %vm1071_vm11, %v2461_v35, %v1015_v48 }
  0xd0   : > { %v1081_v44 = vsel %vm1071_vm11, %v2279_v42, %v790_v46 }
  0xd1   : > { %1408 = vmatmul.mubr.bf16.gmra.mrb[12].mxu0 %v1112_v4 }
  0xd2   : > { %v1034_v18 = vpop.permute.xlu0 %1033 }
  0xd3   : > { %v826_v0 = vpop.permute.xlu1 %825  ;;  %v1153_v3 = vsel %vm1086_vm13, %v1137_v20, %v1034_v18  ;;  %v2576_v18 = vld [vmem:[%s2641_s2] ss:$0 sm:$0xff] }
  0xd4   : > { %v1096_v63 = vsel %vm1086_vm13, %v1081_v44, %v826_v0 }
  0xd6   : > { %v1063_v26 = vpop.permute.xlu0 %1062 }
  0xd7   : > { %v875_v13 = vpop.permute.xlu1 %874  ;;  %v1171_v52 = vsel %vm1101_vm14, %v1153_v3, %v1063_v26 }
  0xd8   : > { %1415 = vmatprep.mubr.bf16.mxu0 %v1171_v52  ;;  %v1115_v15 = vsel %vm1101_vm14, %v1096_v63, %v875_v13 }
  0xd9   : > { %1416 = vmatmul.mubr.bf16.gmra.mrb[16].mxu0 %v1115_v15 }
  0xda   : > { %v1017_v17 = vpop.permute.xlu0 %1016 }
  0xdb   : > { %v792_v14 = vpop.permute.xlu1 %791  ;;  %v1140_v35 = vsel %vm1071_vm11, %v2464_v62, %v1017_v17 }
  0xdc   : > { %v1083_v42 = vsel %vm1071_vm11, %v2321_v36, %v792_v14 }
  0xde   : > { %v1036_v53 = vpop.permute.xlu0 %1035 }
  0xdf   : > { %v828_v25 = vpop.permute.xlu1 %827  ;;  %v1155_v12 = vsel %vm1086_vm13, %v1140_v35, %v1036_v53 }
  0xe0   : > { %v1098_v16 = vsel %vm1086_vm13, %v1083_v42, %v828_v25 }
  0xe2   : > { %v1065_v2 = vpop.permute.xlu0 %1064 }
  0xe3   : > { %v877_v39 = vpop.permute.xlu1 %876  ;;  %v1174_v30 = vsel %vm1101_vm14, %v1155_v12, %v1065_v2 }
  0xe4   : > { %1423 = vmatprep.mubr.bf16.mxu0 %v1174_v30  ;;  %v1118_v28 = vsel %vm1101_vm14, %v1098_v16, %v877_v39 }
  0xe5   : > { %1424 = vmatmul.mubr.bf16.gmra.mrb[20].mxu0 %v1118_v28 }
  0xe6   : > { %v1019_v55 = vpop.permute.xlu0 %1018 }
  0xe7   : > { %v794_v31 = vpop.permute.xlu1 %793  ;;  %v1143_v62 = vsel %vm1071_vm11, %v2471_v10, %v1019_v55 }
  0xe8   : > { %v1085_v36 = vsel %vm1071_vm11, %v2363_v11, %v794_v31 }
  0xea   : > { %v1038_v40 = vpop.permute.xlu0 %1037 }
  0xeb   : > { %v830_v33 = vpop.permute.xlu1 %829  ;;  %v1157_v21 = vsel %vm1086_vm13, %v1143_v62, %v1038_v40 }
  0xec   : > { %v1100_v5 = vsel %vm1086_vm13, %v1085_v36, %v830_v33 }
  0xee   : > { %v1067_v38 = vpop.permute.xlu0 %1066 }
  0xef   : > { %v879_v61 = vpop.permute.xlu1 %878  ;;  %v1177_v24 = vsel %vm1101_vm14, %v1157_v21, %v1067_v38 }
  0xf0   : > { %1431 = vmatprep.mubr.bf16.mxu0 %v1177_v24  ;;  %v1121_v43 = vsel %vm1101_vm14, %v1100_v5, %v879_v61 }
  0xf1   : > { %1432 = vmatmul.mubr.bf16.gmra.mrb[24].mxu0 %v1121_v43 }
 0x13d   : > { %v1474_v45 = vpop.f32.mrb[0].mxu1 }
 0x13e   : > { %v1836_v41 = vpop.f32.mrb[1].mxu1 }
 0x13f   : > { %v1477_v27 = vpop.f32.mrb[2].mxu1 }
 0x140   : > { %v1837_v47 = vpop.f32.mrb[3].mxu1 }
 0x145   : > { %v1482_v10 = vpop.f32.mrb[4].mxu1 }
 0x146   : > { %v1840_v1 = vpop.f32.mrb[5].mxu1 }
 0x147   : > { %v1485_v50 = vpop.f32.mrb[6].mxu1 }
 0x148   : > { %v1841_v11 = vpop.f32.mrb[7].mxu1 }
 0x14d   : > { %v2553_v51 = vpop.f32.mrb[8].mxu1 }
 0x14e   : > { %v1844_v56 = vpop.f32.mrb[9].mxu1 }
 0x14f   : > { %v2555_v57 = vpop.f32.mrb[10].mxu1 }
 0x150   : > { %v1845_v58 = vpop.f32.mrb[11].mxu1 }
 0x155   : > { %v2557_v8 = vpop.f32.mrb[12].mxu1 }
 0x156   : > { %v1848_v49 = vpop.f32.mrb[13].mxu1 }
 0x157   : > { %v2559_v7 = vpop.f32.mrb[14].mxu1 }
 0x158   : > { %v1849_v54 = vpop.f32.mrb[15].mxu1 }
 0x15d   : > { %v2561_v60 = vpop.f32.mrb[16].mxu1 }
 0x15e   : > { %v1852_v32 = vpop.f32.mrb[17].mxu1 }
 0x15f   : > { %v2563_v9 = vpop.f32.mrb[18].mxu1 }
 0x160   : > { %v1853_v22 = vpop.f32.mrb[19].mxu1 }
 0x165   : > { %v2565_v37 = vpop.f32.mrb[20].mxu1 }
 0x166   : > { %v1856_v34 = vpop.f32.mrb[21].mxu1 }
 0x167   : > { %v2567_v6 = vpop.f32.mrb[22].mxu1 }
 0x168   : > { %v1857_v59 = vpop.f32.mrb[23].mxu1 }
 0x16d   : > { %v2569_v23 = vpop.f32.mrb[24].mxu1 }
 0x16e   : > { %v1860_v29 = vpop.f32.mrb[25].mxu1 }
 0x16f   : > { %v2571_v48 = vpop.f32.mrb[26].mxu1 }
 0x170   : > { %v1861_v19 = vpop.f32.mrb[27].mxu1 }
 0x18c   : > { %v1779_v46 = vpop.f32.mrb[0].mxu0 }
 0x18d   : > { %v1780_v4 = vpop.f32.mrb[1].mxu0 }
 0x18e   : > { %v1781_v0 = vadd.f32 %v1780_v4, %v1779_v46  ;;  %v1782_v20 = vpop.f32.mrb[2].mxu0 }
 0x18f   : > { %v1783_v44 = vpop.f32.mrb[3].mxu0 }
 0x190   : > { %v1784_v3 = vadd.f32 %v1783_v44, %v1782_v20  ;;  %v1386_v26 = vadd.f32 %v1781_v0, %v2576_v18 }
 0x192   : > { %v1475_v63 = vadd.f32 %v1474_v45, %v1386_v26  ;;  %v1389_v13 = vadd.f32 %v1784_v3, %v2576_v18 }
 0x194   : > { %v1529_v52 = vmax.f32 %v1475_v63, 0.0  ;;  %v1478_v15 = vadd.f32 %v1477_v27, %v1389_v13  ;;  %v1785_v17 = vpop.f32.mrb[4].mxu0 }
 0x195   : > { %v1786_v14 = vpop.f32.mrb[5].mxu0 }
 0x196   : > { %v1749_v53 = vpack.c.bf16 %v1529_v52, %v1529_v52  ;;  %v1530_v25 = vmax.f32 %v1478_v15, 0.0  ;;  %v1787_v35 = vadd.f32 %v1786_v14, %v1785_v17  ;;  %v1788_v42 = vpop.f32.mrb[6].mxu0 }
 0x197   : > { %v1789_v12 = vpop.f32.mrb[7].mxu0 }
 0x198   : > { %1600 = vst.msk [vmem:[%s2584_s10] sm:$0xf] %vm1599_vm15, %v1749_v53  ;;  %v1750_v2 = vpack.c.bf16 %v1530_v25, %v1530_v25  ;;  %v1790_v16 = vadd.f32 %v1789_v12, %v1788_v42  ;;  %v1394_v39 = vadd.f32 %v1787_v35, %v2576_v18 }
 0x19a   : > { %1602 = vst.msk [vmem:[%s2584_s10 + $0x4] sm:$0x7] %vm1601_vm0, %v1750_v2  ;;  %v1483_v30 = vadd.f32 %v1482_v10, %v1394_v39  ;;  %v1397_v28 = vadd.f32 %v1790_v16, %v2576_v18 }
 0x19c   : > { %v1531_v55 = vmax.f32 %v1483_v30, 0.0  ;;  %v1486_v31 = vadd.f32 %v1485_v50, %v1397_v28  ;;  %v1791_v40 = vpop.f32.mrb[8].mxu0 }
 0x19d   : > { %v1792_v33 = vpop.f32.mrb[9].mxu0 }
 0x19e   : > { %v1751_v62 = vpack.c.bf16 %v1531_v55, %v1531_v55  ;;  %v1532_v36 = vmax.f32 %v1486_v31, 0.0  ;;  %v1793_v21 = vadd.f32 %v1792_v33, %v1791_v40  ;;  %v1794_v38 = vpop.f32.mrb[10].mxu0 }
 0x19f   : > { %v1795_v5 = vpop.f32.mrb[11].mxu0 }
 0x1a0   : > { %1603 = vst.msk [vmem:[%s2584_s10 + $0x8] sm:$0xf] %vm1599_vm15, %v1751_v62  ;;  %v1752_v61 = vpack.c.bf16 %v1532_v36, %v1532_v36  ;;  %v1796_v24 = vadd.f32 %v1795_v5, %v1794_v38  ;;  %v1402_v43 = vadd.f32 %v1793_v21, %v2576_v18 }
 0x1a2   : > { %1604 = vst.msk [vmem:[%s2584_s10 + $0xc] sm:$0x7] %vm1601_vm0, %v1752_v61  ;;  %v1491_v45 = vadd.f32 %v2553_v51, %v1402_v43  ;;  %v1405_v41 = vadd.f32 %v1796_v24, %v2576_v18 }
 0x1a4   : > { %v1533_v27 = vmax.f32 %v1491_v45, 0.0  ;;  %v1494_v47 = vadd.f32 %v2555_v57, %v1405_v41  ;;  %v1797_v10 = vpop.f32.mrb[12].mxu0 }
 0x1a5   : > { %v1798_v1 = vpop.f32.mrb[13].mxu0 }
 0x1a6   : > { %v1753_v50 = vpack.c.bf16 %v1533_v27, %v1533_v27  ;;  %v1534_v11 = vmax.f32 %v1494_v47, 0.0  ;;  %v1799_v56 = vadd.f32 %v1798_v1, %v1797_v10  ;;  %v1800_v58 = vpop.f32.mrb[14].mxu0 }
 0x1a7   : > { %v1801_v49 = vpop.f32.mrb[15].mxu0 }
 0x1a8   : > { %1605 = vst.msk [vmem:[%s2584_s10 + $0x10] sm:$0xf] %vm1599_vm15, %v1753_v50  ;;  %v1754_v54 = vpack.c.bf16 %v1534_v11, %v1534_v11  ;;  %v1802_v32 = vadd.f32 %v1801_v49, %v1800_v58  ;;  %v1410_v22 = vadd.f32 %v1799_v56, %v2576_v18 }
 0x1aa   : > { %1606 = vst.msk [vmem:[%s2584_s10 + $0x14] sm:$0x7] %vm1601_vm0, %v1754_v54  ;;  %v1499_v51 = vadd.f32 %v2557_v8, %v1410_v22  ;;  %v1413_v57 = vadd.f32 %v1802_v32, %v2576_v18 }
 0x1ac   : > { %v1535_v34 = vmax.f32 %v1499_v51, 0.0  ;;  %v1502_v59 = vadd.f32 %v2559_v7, %v1413_v57  ;;  %v1803_v29 = vpop.f32.mrb[16].mxu0 }
 0x1ad   : > { %v1804_v19 = vpop.f32.mrb[17].mxu0 }
 0x1ae   : > { %v1755_v46 = vpack.c.bf16 %v1535_v34, %v1535_v34  ;;  %v1536_v4 = vmax.f32 %v1502_v59, 0.0  ;;  %v1805_v0 = vadd.f32 %v1804_v19, %v1803_v29  ;;  %v1806_v20 = vpop.f32.mrb[18].mxu0 }
 0x1af   : > { %v1807_v44 = vpop.f32.mrb[19].mxu0 }
 0x1b0   : > { %1607 = vst.msk [vmem:[%s2584_s10 + $0x18] sm:$0xf] %vm1599_vm15, %v1755_v46  ;;  %v1756_v3 = vpack.c.bf16 %v1536_v4, %v1536_v4  ;;  %v1808_v26 = vadd.f32 %v1807_v44, %v1806_v20  ;;  %v1418_v8 = vadd.f32 %v1805_v0, %v2576_v18 }
 0x1b2   : > { %1608 = vst.msk [vmem:[%s2584_s10 + $0x1c] sm:$0x7] %vm1601_vm0, %v1756_v3  ;;  %v1507_v63 = vadd.f32 %v2561_v60, %v1418_v8  ;;  %v1421_v7 = vadd.f32 %v1808_v26, %v2576_v18 }
 0x1b4   : > { %v1537_v13 = vmax.f32 %v1507_v63, 0.0  ;;  %v1510_v52 = vadd.f32 %v2563_v9, %v1421_v7 }
 0x1b6   : > { %v1757_v15 = vpack.c.bf16 %v1537_v13, %v1537_v13  ;;  %v1538_v17 = vmax.f32 %v1510_v52, 0.0 }
 0x1b8   : > { %1609 = vst.msk [vmem:[%s2584_s10 + $0x20] sm:$0xf] %vm1599_vm15, %v1757_v15  ;;  %v1758_v14 = vpack.c.bf16 %v1538_v17, %v1538_v17  ;;  %v1809_v53 = vpop.f32.mrb[20].mxu0 }
 0x1b9   : > { %v1810_v25 = vpop.f32.mrb[21].mxu0 }
 0x1ba   : > { %1610 = vst.msk [vmem:[%s2584_s10 + $0x24] sm:$0x7] %vm1601_vm0, %v1758_v14  ;;  %v1811_v35 = vadd.f32 %v1810_v25, %v1809_v53  ;;  %v1812_v42 = vpop.f32.mrb[22].mxu0 }
 0x1bb   : > { %v1813_v12 = vpop.f32.mrb[23].mxu0 }
 0x1bc   : > { %v1814_v60 = vadd.f32 %v1813_v12, %v1812_v42  ;;  %v1426_v2 = vadd.f32 %v1811_v35, %v2576_v18 }
 0x1be   : > { %v1515_v16 = vadd.f32 %v2565_v37, %v1426_v2  ;;  %v1429_v9 = vadd.f32 %v1814_v60, %v2576_v18 }
 0x1c0   : > { %v1539_v39 = vmax.f32 %v1515_v16, 0.0  ;;  %v1518_v30 = vadd.f32 %v2567_v6, %v1429_v9 }
 0x1c2   : > { %v1759_v28 = vpack.c.bf16 %v1539_v39, %v1539_v39  ;;  %v1540_v55 = vmax.f32 %v1518_v30, 0.0 }
 0x1c4   : > { %1611 = vst.msk [vmem:[%s2584_s10 + $0x28] sm:$0xf] %vm1599_vm15, %v1759_v28  ;;  %v1760_v31 = vpack.c.bf16 %v1540_v55, %v1540_v55  ;;  %v1815_v40 = vpop.f32.mrb[24].mxu0 }
 0x1c5   : > { %v1816_v33 = vpop.f32.mrb[25].mxu0 }
 0x1c6   : > { %1612 = vst.msk [vmem:[%s2584_s10 + $0x2c] sm:$0x7] %vm1601_vm0, %v1760_v31  ;;  %v1817_v62 = vadd.f32 %v1816_v33, %v1815_v40  ;;  %v1818_v36 = vpop.f32.mrb[26].mxu0 }
 0x1c7   : > { %v1819_v21 = vpop.f32.mrb[27].mxu0 }
 0x1c8   : > { %v1434_v37 = vadd.f32 %v1817_v62, %v2576_v18  ;;  %v1820_v38 = vadd.f32 %v1819_v21, %v1818_v36 }
 0x1ca   : > { %v1523_v5 = vadd.f32 %v2569_v23, %v1434_v37  ;;  %v1437_v6 = vadd.f32 %v1820_v38, %v2576_v18 }
 0x1cc   : > { %v1541_v61 = vmax.f32 %v1523_v5, 0.0  ;;  %v1526_v24 = vadd.f32 %v2571_v48, %v1437_v6 }
 0x1ce   : > { %v1761_v43 = vpack.c.bf16 %v1541_v61, %v1541_v61  ;;  %v1542_v45 = vmax.f32 %v1526_v24, 0.0 }
 0x1d0   : > { %1613 = vst.msk [vmem:[%s2584_s10 + $0x30] sm:$0xf] %vm1599_vm15, %v1761_v43  ;;  %v1762_v41 = vpack.c.bf16 %v1542_v45, %v1542_v45 }
 0x1d2   : > { %1614 = vst.msk [vmem:[%s2584_s10 + $0x34] sm:$0x7] %vm1601_vm0, %v1762_v41 }
 0x1d3 PF: > { %s13_s12 = sadd.s32 1, %s1934_s12  }
 0x1d4   : > { %p10_p4 = scmp.ge.s32.totalorder %s13_s12, 4  }
 0x1d6   :  { %12 = sbr.rel (!%p10_p4) target bundleno = 1 (0x1), region = 63 }

// kernel: convnet_forward.5
= control target key start
LH: loop header
LB: loop body
LE: loop exit
PB: predicated region body
PF: predicated region fallthrough
CT: control target
= control target key end

     0   :  { %s3317_s12 = smov 0   ;;  %s4277_s0 = inlined_call_operand.vmem [shape: bf16[2,14,14,32], index: 0, kind: input, shape index: {}]   ;;  %s4278_s1 = inlined_call_operand.vmem [shape: bf16[288,128], index: 1, kind: input, shape index: {}]   ;;  %s4279_s2 = inlined_call_operand.vmem [shape: f32[1,128], index: 2, kind: input, shape index: {}]   ;;  %s4280_s3 = inlined_call_operand.vmem [shape: bf16[2,14,14,32], index: 3, kind: output, shape index: {}]  }
   0x1 LB: > { %s2778_s13 = sadd.s32 4294967295, %s3291_s12   ;;  %p2782_p0 = scmp.ge.s32.totalorder %s3291_s12, 1  ;;  %s3291_s12 = sphi %s3317_s12, %s13_s12  }
   0x2   : > { %p137_p1 = scmp.lt.s32.totalorder %s3291_s12, 3 }
   0x4   : > { %p138_p2 = pnand %p2782_p0, %p137_p1 }
   0x5   : > { %vm172_vm0 = vcmask (!%p138_p2), 257024   ;;  %vm175_vm1 = vcmask (!%p138_p2), 253952   ;;  %v3293_v0 = vmov (!%p138_p2), 0   ;;  %p161_p3 = scmp.lt.s32.totalorder (!%p138_p2), %s2778_s13, 1  ;;  %vm1031_vm2 = vcmask (!%p138_p2), 1046528   ;;  %s3294_s18 = smov (!%p138_p2), 64  }
   0x6   : > { %141 = sbr.rel (%p138_p2) target bundleno = 550 (0x226), region = 32  ;;  %173 = vst.msk [vmem:[#allocation2] sm:$0xf] (!%p138_p2), %vm172_vm0, %v3293_v0  ;;  %174 = vst.msk [vmem:[#allocation2 + $0x4] sm:$0xf] (!%p138_p2), %vm172_vm0, %v3293_v0  ;;  %v3195_v28 = vld [vmem:[%s4278_s1 + $0x40] sm:$0xff] (!%p138_p2)  }
   0x7   : > { %176 = vst.msk [vmem:[#allocation2 + $0x8] sm:$0x1] (!%p138_p2), %vm175_vm1, %v3293_v0  ;;  %179 = vst.msk [vmem:[#allocation2 + $0x14] sm:$0x1] (!%p138_p2), %vm175_vm1, %v3293_v0  ;;  %vm250_vm3 = vsmask.f32 (!%p138_p2), 256  ;;  %2960 = vmatprep.subr.bf16.mxu0 (!%p138_p2), %v3195_v28  ;;  %3108 = vmatprep.subr.bf16.mxu1 (!%p138_p2), %v3195_v28 }
   0x8   : > { %177 = vst.msk [vmem:[#allocation2 + $0xc] sm:$0xf] (!%p138_p2), %vm172_vm0, %v3293_v0  ;;  %178 = vst.msk [vmem:[#allocation2 + $0x10] sm:$0xf] (!%p138_p2), %vm172_vm0, %v3293_v0  ;;  %vm251_vm4 = vsmask.f32 (!%p138_p2), 4368 }
   0x9   : > { %180 = vst.msk [vmem:[#allocation2 + $0x18] sm:$0xf] (!%p138_p2), %vm172_vm0, %v3293_v0  ;;  %181 = vst.msk [vmem:[#allocation2 + $0x1c] sm:$0xf] (!%p138_p2), %vm172_vm0, %v3293_v0  ;;  %vm507_vm5 = vsmask.f32 (!%p138_p2), 7938 }
   0xa   : > { %182 = vst.msk [vmem:[#allocation2 + $0x20] sm:$0x1] (!%p138_p2), %vm175_vm1, %v3293_v0  ;;  %185 = vst.msk [vmem:[#allocation2 + $0x2c] sm:$0x1] (!%p138_p2), %vm175_vm1, %v3293_v0  ;;  %vm834_vm6 = vsmask.f32 (!%p138_p2), 7424 }
   0xb   : > { %183 = vst.msk [vmem:[#allocation2 + $0x24] sm:$0xf] (!%p138_p2), %vm172_vm0, %v3293_v0  ;;  %184 = vst.msk [vmem:[#allocation2 + $0x28] sm:$0xf] (!%p138_p2), %vm172_vm0, %v3293_v0  ;;  %vm512_vm7 = vsmask.f32 (!%p138_p2), 3328 }
   0xc   : > { %186 = vst.msk [vmem:[#allocation2 + $0x30] sm:$0xf] (!%p138_p2), %vm172_vm0, %v3293_v0  ;;  %187 = vst.msk [vmem:[#allocation2 + $0x34] sm:$0xf] (!%p138_p2), %vm172_vm0, %v3293_v0  ;;  %v3196_v35 = vld [vmem:[%s4278_s1] sm:$0xff] (!%p138_p2)   ;;  %s3295_s23 = smov (!%p138_p2), 32  }
   0xd   : > { %188 = vst.msk [vmem:[#allocation2 + $0x38] sm:$0x1] %vm175_vm1, %v3293_v0  ;;  %191 = vst.msk [vmem:[#allocation2 + $0x44] sm:$0x1] %vm175_vm1, %v3293_v0  ;;  %s4288_s13 = smov (!%p161_p3, %s2778_s13), 1  ;;  %v3137_v1 = vld [vmem:[#allocation2] sm:$0xff]   ;;  %2961 = vmatpush3.bf16.msra.mxu0 %v3196_v35  ;;  %3116 = vmatpush3.bf16.msra.mxu1 %v3196_v35 }
   0xe   : > { %189 = vst.msk [vmem:[#allocation2 + $0x3c] sm:$0xf] %vm172_vm0, %v3293_v0  ;;  %190 = vst.msk [vmem:[#allocation2 + $0x40] sm:$0xf] %vm172_vm0, %v3293_v0  ;;  %s3124_s14 = smul.u32 112, %s4288_s13  ;;  %v1032_v7 = vrot.slane %v3137_v1, 1 }
   0xf   : > { %192 = vst.msk [vmem:[#allocation2 + $0x48] sm:$0xf] %vm172_vm0, %v3293_v0  ;;  %193 = vst.msk [vmem:[#allocation2 + $0x4c] sm:$0xf] %vm172_vm0, %v3293_v0  ;;  %v836_v9 = vshrl.u32 %v3137_v1, 16  ;;  %v838_v10 = vshll.u32 %v3137_v1, 16 }
  0x10   : > { %194 = vst.msk [vmem:[#allocation2 + $0x50] sm:$0x1] %vm175_vm1, %v3293_v0  ;;  %197 = vst.msk [vmem:[#allocation2 + $0x5c] sm:$0x1] %vm175_vm1, %v3293_v0  ;;  %s3385_s17 = scalar_lea.vmem %s4277_s0, %s3124_s14  ;;  %v517_v38 = vld [vmem:[#allocation2 + $0x18] sm:$0xf]  ;;  %s4168_s10 = scalar_lea.vmem %s4280_s3, %s3124_s14 }
  0x11   : > { %195 = vst.msk [vmem:[#allocation2 + $0x54] sm:$0xf] %vm172_vm0, %v3293_v0  ;;  %196 = vst.msk [vmem:[#allocation2 + $0x58] sm:$0xf] %vm172_vm0, %v3293_v0  ;;  %v226_v3 = vld [vmem:[%s3385_s17 + $0x10] sm:$0xf] }
  0x12   : > { %198 = vst.msk [vmem:[#allocation2 + $0x60] sm:$0xf] %vm172_vm0, %v3293_v0  ;;  %199 = vst.msk [vmem:[#allocation2 + $0x64] sm:$0xf] %vm172_vm0, %v3293_v0  ;;  %v227_v4 = vld [vmem:[%s3385_s17 + $0x14] sm:$0x7] }
  0x13   : > { %200 = vst.msk [vmem:[#allocation2 + $0x68] sm:$0x1] %vm175_vm1, %v3293_v0  ;;  %203 = vst.msk [vmem:[#allocation2 + $0x74] sm:$0x1] %vm175_vm1, %v3293_v0  ;;  %v286_v5 = vshrl.u32 %v226_v3, 16  ;;  %v289_v6 = vshll.u32 %v226_v3, 16 }
  0x14   : > { %201 = vst.msk [vmem:[#allocation2 + $0x6c] sm:$0xf] %vm172_vm0, %v3293_v0  ;;  %202 = vst.msk [vmem:[#allocation2 + $0x70] sm:$0xf] %vm172_vm0, %v3293_v0  ;;  %v523_v11 = vld [vmem:[#allocation2 + $0x24] sm:$0xf] }
  0x15   : > { %204 = vst.msk [vmem:[#allocation2 + $0x78] sm:$0xf] %vm172_vm0, %v3293_v0  ;;  %205 = vst.msk [vmem:[#allocation2 + $0x7c] sm:$0xf] %vm172_vm0, %v3293_v0  ;;  %v288_v13 = vrot.slane %v286_v5, 7  ;;  %v294_v14 = vshrl.u32 %v227_v4, 16 }
  0x16   : > { %206 = vst.msk [vmem:[#allocation2 + $0x80] sm:$0x1] %vm175_vm1, %v3293_v0  ;;  %209 = vst.msk [vmem:[#allocation2 + $0x8c] sm:$0x1] %vm175_vm1, %v3293_v0  ;;  %v297_v15 = vshll.u32 %v227_v4, 16  ;;  %v840_v18 = vrot.slane %v838_v10, 1 }
  0x17   : > { %207 = vst.msk [vmem:[#allocation2 + $0x84] sm:$0xf] %vm172_vm0, %v3293_v0  ;;  %208 = vst.msk [vmem:[#allocation2 + $0x88] sm:$0xf] %vm172_vm0, %v3293_v0  ;;  %v224_v16 = vld [vmem:[%s3385_s17 + $0x8] sm:$0xf]  ;;  %v291_v25 = vor.u32 %v289_v6, %v288_v13 }
  0x18   : > { %210 = vst.msk [vmem:[#allocation2 + $0x90] sm:$0xf] %vm172_vm0, %v3293_v0  ;;  %211 = vst.msk [vmem:[#allocation2 + $0x94] sm:$0xf] %vm172_vm0, %v3293_v0  ;;  %v225_v20 = vld [vmem:[%s3385_s17 + $0xc] sm:$0x7]  ;;  %v841_v29 = vor.u32 %v840_v18, %v836_v9 }
  0x19   : > { %212 = vst.msk [vmem:[#allocation2 + $0x98] sm:$0x1] %vm175_vm1, %v3293_v0  ;;  %215 = vst.msk [vmem:[#allocation2 + $0xa4] sm:$0x1] %vm175_vm1, %v3293_v0  ;;  %v270_v21 = vshrl.u32 %v224_v16, 16  ;;  %v273_v22 = vshll.u32 %v224_v16, 16 }
  0x1a   : > { %213 = vst.msk [vmem:[#allocation2 + $0x9c] sm:$0xf] %vm172_vm0, %v3293_v0  ;;  %214 = vst.msk [vmem:[#allocation2 + $0xa0] sm:$0xf] %vm172_vm0, %v3293_v0  ;;  %v292_v26 = vrot.slane %v288_v13, 4  ;;  %v296_v27 = vrot.slane %v294_v14, 7 }
  0x1b   : > { %216 = vst.msk [vmem:[#allocation2 + $0xa8] sm:$0xf] %vm172_vm0, %v3293_v0  ;;  %217 = vst.msk [vmem:[#allocation2 + $0xac] sm:$0xf] %vm172_vm0, %v3293_v0  ;;  %v526_v31 = vld [vmem:[#allocation2 + $0x28] sm:$0xf] }
  0x1c   : > { %218 = vst.msk [vmem:[#allocation2 + $0xb0] sm:$0x1] %vm175_vm1, %v3293_v0  ;;  %221 = vst.msk [vmem:[#allocation2 + $0xbc] sm:$0x1] %vm175_vm1, %v3293_v0  ;;  %v272_v32 = vrot.slane %v270_v21, 7  ;;  %v278_v33 = vshrl.u32 %v225_v20, 16  ;;  %v299_v36 = vor.u32 %v297_v15, %v296_v27 }
  0x1d   : > { %219 = vst.msk [vmem:[#allocation2 + $0xb4] sm:$0xf] %vm172_vm0, %v3293_v0  ;;  %220 = vst.msk [vmem:[#allocation2 + $0xb8] sm:$0xf] %vm172_vm0, %v3293_v0  ;;  %v281_v34 = vshll.u32 %v225_v20, 16  ;;  %v3198_v51 = vld [vmem:[%s4278_s1 + $0x48] sm:$0xff]  }
  0x1e   : > { %v3138_v2 = vld [vmem:[#allocation2 + $0x8] ss:$0 sps:$4 sm:$0x11]   ;;  %vm3393_vm8 = vmand %vm172_vm0, %vm507_vm5  ;;  %v246_v39 = vld [vmem:[%s3385_s17 + $0x60] sm:$0xf]  ;;  %v275_v42 = vor.u32 %v273_v22, %v272_v32  ;;  %v276_v43 = vrot.slane %v272_v32, 4  ;;  %2962 = vmatprep.subr.bf16.mxu0 %v3198_v51  ;;  %3109 = vmatprep.subr.bf16.mxu1 %v3198_v51 }
  0x1f   : > { %v1033_v8 = vrot.slane %v3138_v2, 1  ;;  %v843_v12 = vshll.u32 %v3138_v2, 16  ;;  %vm3401_vm9 = vmor %vm250_vm3, %vm251_vm4  ;;  %v524_v37 = vsel %vm3393_vm8, %v291_v25, %v523_v11  ;;  %v247_v40 = vld [vmem:[%s3385_s17 + $0x64] sm:$0x7]  ;;  %v280_v44 = vrot.slane %v278_v33, 7  ;;  %v3199_v58 = vld [vmem:[%s4278_s1 + $0x8] sm:$0xff]  }
  0x20   : > { %vm3410_vm10 = vmand %vm172_vm0, %vm512_vm7  ;;  %525 = vst [vmem:[#allocation2 + $0x24] sm:$0xf] %v524_v37  ;;  %v222_v45 = vld [vmem:[%s3385_s17] sm:$0xf]  ;;  %v300_v46 = vsel %vm3401_vm9, %v292_v26, %v299_v36  ;;  %v446_v47 = vshrl.u32 %v246_v39, 16  ;;  %v449_v48 = vshll.u32 %v246_v39, 16  ;;  %v518_v54 = vsel %vm3393_vm8, %v275_v42, %v517_v38  ;;  %2963 = vmatpush3.bf16.msra.mxu0 %v3199_v58  ;;  %3117 = vmatpush3.bf16.msra.mxu1 %v3199_v58 }
  0x21   : > { %v1034_v17 = vsel %vm1031_vm2, %v1032_v7, %v1033_v8  ;;  %v845_v23 = vrot.slane %v843_v12, 1  ;;  %v454_v49 = vshrl.u32 %v247_v40, 16  ;;  %v223_v50 = vld [vmem:[%s3385_s17 + $0x4] sm:$0x7]  ;;  %v527_v52 = vsel %vm3410_vm10, %v300_v46, %v526_v31  ;;  %v520_v55 = vld [vmem:[#allocation2 + $0x1c] sm:$0xf] }
  0x22   : > { %1074 = vrot.lane.b32.xlu1 %v1034_v17, %s3294_s18  ;;  %v283_v53 = vor.u32 %v281_v34, %v280_v44  ;;  %v457_v56 = vshll.u32 %v247_v40, 16  ;;  %v583_v57 = vld [vmem:[#allocation2 + $0x9c] sm:$0xf]  ;;  %528 = vst [vmem:[#allocation2 + $0x28] sm:$0xf] %v527_v52  ;;  %v448_v59 = vrot.slane %v446_v47, 7 }
  0x23   : > { %v846_v41 = vsel %vm834_vm6, %v841_v29, %v845_v23  ;;  %519 = vst [vmem:[#allocation2 + $0x18] sm:$0xf] %v518_v54  ;;  %v456_v60 = vrot.slane %v454_v49, 7  ;;  %v254_v61 = vshrl.u32 %v222_v45, 16  ;;  %v586_v63 = vld [vmem:[#allocation2 + $0xa0] sm:$0xf] }
  0x24   : > { %1003 = vrot.lane.b32.xlu0 %v846_v41, %s3295_s23  ;;  %v284_v62 = vsel %vm3401_vm9, %v276_v43, %v283_v53  ;;  %v257_v0 = vshll.u32 %v222_v45, 16  ;;  %v262_v1 = vshrl.u32 %v223_v50, 16  ;;  %v265_v2 = vshll.u32 %v223_v50, 16  ;;  %v244_v7 = vld [vmem:[%s3385_s17 + $0x58] sm:$0xf]  ;;  %v3201_v9 = vld [vmem:[%s4278_s1 + $0x50] sm:$0xff]  }
  0x25   : > { %v521_v3 = vsel %vm3410_vm10, %v284_v62, %v520_v55  ;;  %v451_v4 = vor.u32 %v449_v48, %v448_v59  ;;  %v452_v5 = vrot.slane %v448_v59, 4  ;;  %v459_v6 = vor.u32 %v457_v56, %v456_v60  ;;  %v245_v8 = vld [vmem:[%s3385_s17 + $0x5c] sm:$0x7]  ;;  %v509_v12 = vld [vmem:[#allocation2 + $0xc] sm:$0xf]  ;;  %2964 = vmatprep.subr.bf16.mxu0 %v3201_v9  ;;  %3110 = vmatprep.subr.bf16.mxu1 %v3201_v9  ;;  %s3296_s30 = smov 96  }
  0x26   : > { %522 = vst [vmem:[#allocation2 + $0x1c] sm:$0xf] %v521_v3  ;;  %v256_v10 = vrot.slane %v254_v61, 7  ;;  %v264_v11 = vrot.slane %v262_v1, 7  ;;  %v430_v13 = vshrl.u32 %v244_v7, 16  ;;  %v433_v17 = vshll.u32 %v244_v7, 16 }
  0x27   : > { %v460_v14 = vsel %vm3401_vm9, %v452_v5, %v459_v6  ;;  %v584_v15 = vsel %vm3393_vm8, %v451_v4, %v583_v57  ;;  %v514_v16 = vld [vmem:[#allocation2 + $0x10] sm:$0xf]  ;;  %v438_v18 = vshrl.u32 %v245_v8, 16  ;;  %v441_v28 = vshll.u32 %v245_v8, 16  ;;  %v580_v38 = vld [vmem:[#allocation2 + $0x94] sm:$0xf] }
  0x28   : > { %585 = vst [vmem:[#allocation2 + $0x9c] sm:$0xf] %v584_v15  ;;  %v587_v20 = vsel %vm3410_vm10, %v460_v14, %v586_v63  ;;  %v259_v21 = vor.u32 %v257_v0, %v256_v10  ;;  %v260_v22 = vrot.slane %v256_v10, 4  ;;  %v267_v23 = vor.u32 %v265_v2, %v264_v11  ;;  %v577_v25 = vld [vmem:[#allocation2 + $0x90] sm:$0xf]  ;;  %v3823_v24 = vld [vmem:[%s4278_s1 + $0x80] sm:$0xff]  }
  0x29   : > { %588 = vst [vmem:[#allocation2 + $0xa0] sm:$0xf] %v587_v20  ;;  %v432_v26 = vrot.slane %v430_v13, 7  ;;  %v440_v27 = vrot.slane %v438_v18, 7  ;;  %v3452_v29 = vld [vmem:[#allocation2 + $0x24] sm:$0xff]   ;;  %vm1858_vm11 = vcmask 261120  }
  0x2a   : > { %v268_v31 = vsel %vm3401_vm9, %v260_v22, %v267_v23  ;;  %v510_v32 = vsel %vm3393_vm8, %v259_v21, %v509_v12  ;;  %v3144_v34 = vld [vmem:[#allocation2 + $0x14] ss:$0 sps:$4 sm:$0x11]   ;;  %1552 = vrot.lane.b32.xlu0 %v3452_v29, %s3294_s18  ;;  %v3146_v39 = vld [vmem:[#allocation2 + $0x20] ss:$0 sps:$4 sm:$0x11]  }
  0x2b   : > { %511 = vst [vmem:[#allocation2 + $0xc] sm:$0xf] %v510_v32  ;;  %v515_v33 = vsel %vm3410_vm10, %v268_v31, %v514_v16  ;;  %v435_v35 = vor.u32 %v433_v17, %v432_v26  ;;  %v436_v36 = vrot.slane %v432_v26, 4  ;;  %v443_v37 = vor.u32 %v441_v28, %v440_v27  ;;  %v242_v44 = vld [vmem:[%s3385_s17 + $0x50] sm:$0xf] }
  0x2c   : > { %516 = vst [vmem:[#allocation2 + $0x10] sm:$0xf] %v515_v33  ;;  %v3147_v47 = vld [vmem:[#allocation2 + $0x98] ss:$0 sps:$4 sm:$0x11]   ;;  %v414_v48 = vshrl.u32 %v242_v44, 16 }
  0x2d   : > { %v3140_v40 = vld [vmem:[#allocation2 + $0x18] sm:$0xff]   ;;  %v444_v41 = vsel %vm3401_vm9, %v436_v36, %v443_v37  ;;  %v578_v42 = vsel %vm3393_vm8, %v435_v35, %v577_v25  ;;  %v1411_v49 = vrot.slane %v3144_v34, 1  ;;  %v3150_v50 = vld [vmem:[#allocation2 + $0x20] ss:$0 sps:$4 sm:$0x11]   ;;  %v417_v52 = vshll.u32 %v242_v44, 16 }
  0x2e   : > { %579 = vst [vmem:[#allocation2 + $0x90] sm:$0xf] %v578_v42  ;;  %v581_v43 = vsel %vm3410_vm10, %v444_v41, %v580_v38  ;;  %1550 = vrot.lane.b32.xlu1 %v3140_v40, %s3294_s18  ;;  %v3143_v46 = vld [vmem:[#allocation2 + $0x18] sm:$0xff]   ;;  %v243_v51 = vld [vmem:[%s3385_s17 + $0x54] sm:$0x7]  ;;  %v1414_v54 = vrot.slane %v3146_v39, 1 }
  0x2f   : > { %582 = vst [vmem:[#allocation2 + $0x94] sm:$0xf] %v581_v43  ;;  %v571_v53 = vld [vmem:[#allocation2 + $0x84] sm:$0xf]  ;;  %v416_v55 = vrot.slane %v414_v48, 7  ;;  %v1623_v57 = vshll.u32 %v3140_v40, 16 }
  0x30   : > { %v3470_v45 = vld [vmem:[#allocation2 + $0x9c] sm:$0xff]   ;;  %v1413_v58 = vrot.slane %v3143_v46, 1  ;;  %v3149_v60 = vld [vmem:[#allocation2 + $0x14] ss:$0 sps:$4 sm:$0x11]   ;;  %v422_v62 = vshrl.u32 %v243_v51, 16 }
  0x31   : > { %1572 = vrot.lane.b32.xlu0 %v3470_v45, %s3294_s18  ;;  %v419_v61 = vor.u32 %v417_v52, %v416_v55  ;;  %v425_v0 = vshll.u32 %v243_v51, 16  ;;  %v1444_v2 = vrot.slane %v3147_v47, 1  ;;  %v420_v3 = vrot.slane %v416_v55, 4  ;;  %v574_v11 = vld [vmem:[#allocation2 + $0x88] sm:$0xf] }
  0x32   : > { %v424_v4 = vrot.slane %v422_v62, 7  ;;  %v1621_v7 = vshrl.u32 %v3140_v40, 16  ;;  %v1625_v8 = vrot.slane %v1623_v57, 1  ;;  %v1628_v9 = vshll.u32 %v3150_v50, 16  ;;  %v3498_v35 = vld [vmem:[#allocation2 + $0x24] sm:$0xff]  }
  0x33   : > { %v3142_v56 = vld [vmem:[#allocation2 + $0xc] sm:$0xff]   ;;  %v572_v5 = vsel %vm3393_vm8, %v419_v61, %v571_v53  ;;  %v1635_v13 = vshll.u32 %v3452_v29, 16  ;;  %v1415_v14 = vsel %vm1031_vm2, %v1413_v58, %v1414_v54  ;;  %v1036_v17 = vrot.slane %v3149_v60, 1  ;;  %v3154_v21 = vld [vmem:[#allocation2 + $0xa4] ss:$0 sps:$4 sm:$0x11]  }
  0x34   : > { %v3475_v59 = vld [vmem:[#allocation2 + $0xc] sm:$0xff]   ;;  %1172 = vrot.lane.b32.xlu1 %v3142_v56, %s3296_s30  ;;  %v1410_v63 = vrot.slane %v3142_v56, 1  ;;  %573 = vst [vmem:[#allocation2 + $0x84] sm:$0xf] %v572_v5  ;;  %v427_v10 = vor.u32 %v425_v0, %v424_v4  ;;  %v1626_v22 = vor.u32 %v1625_v8, %v1621_v7  ;;  %v1630_v23 = vrot.slane %v1628_v9, 1 }
  0x35   : > { %v3153_v12 = vld [vmem:[#allocation2 + $0x2c] ss:$0 sps:$4 sm:$0x11]   ;;  %v1035_v16 = vrot.slane %v3475_v59, 1  ;;  %v850_v26 = vshll.u32 %v3475_v59, 16  ;;  %v1633_v27 = vshrl.u32 %v3452_v29, 16 }
  0x36   : > { %v3145_v1 = vld [vmem:[#allocation2 + $0x90] sm:$0xff]   ;;  %v1412_v6 = vsel %vm1031_vm2, %v1410_v63, %v1411_v49  ;;  %v428_v18 = vsel %vm3401_vm9, %v420_v3, %v427_v10  ;;  %v3488_v20 = vld [vmem:[#allocation2 + $0x8c] ss:$0 sps:$4 sm:$0x11]   ;;  %v1637_v28 = vrot.slane %v1635_v13, 1  ;;  %v1640_v31 = vshll.u32 %v3153_v12, 16 }
  0x37   : > { %1452 = vrot.lane.b32.xlu0 %v1412_v6, %s3295_s23  ;;  %v1443_v15 = vrot.slane %v3145_v1, 1  ;;  %v575_v25 = vsel %vm3410_vm10, %v428_v18, %v574_v11  ;;  %v1755_v32 = vshll.u32 %v3470_v45, 16  ;;  %v855_v34 = vshll.u32 %v3149_v60, 16  ;;  %v228_v47 = vld [vmem:[%s3385_s17 + $0x18] sm:$0xf]  ;;  %v3202_v10 = vld [vmem:[%s4278_s1 + $0x10] sm:$0xff]  }
  0x38   : > { %1174 = vrot.lane.b32.xlu1 %v3143_v46, %s3296_s30  ;;  %576 = vst [vmem:[#allocation2 + $0x88] sm:$0xf] %v575_v25  ;;  %v1037_v36 = vsel %vm1031_vm2, %v1035_v16, %v1036_v17  ;;  %v1066_v37 = vrot.slane %v3488_v20, 1  ;;  %v848_v38 = vshrl.u32 %v3475_v59, 16  ;;  %v1631_v29 = vsel %vm834_vm6, %v1626_v22, %v1630_v23  ;;  %v3506_v46 = vld [vmem:[#allocation2 + $0x18] sm:$0xff]   ;;  %2965 = vmatpush3.bf16.msra.mxu0 %v3202_v10 }
  0x39   : > { %v1445_v33 = vsel %vm1031_vm2, %v1443_v15, %v1444_v2  ;;  %v852_v39 = vrot.slane %v850_v26, 1  ;;  %v1760_v40 = vshll.u32 %v3154_v21, 16  ;;  %v1638_v41 = vor.u32 %v1637_v28, %v1633_v27  ;;  %v229_v50 = vld [vmem:[%s3385_s17 + $0x1c] sm:$0x7]  ;;  %v529_v2 = vld [vmem:[#allocation2 + $0x30] sm:$0xf]  ;;  %3118 = vmatpush3.bf16.msra.mxu1 %v3202_v10 }
  0x3a   : > { %v1642_v42 = vrot.slane %v1640_v31, 1  ;;  %v1753_v43 = vshrl.u32 %v3470_v45, 16  ;;  %v1757_v44 = vrot.slane %v1755_v32, 1  ;;  %v857_v48 = vrot.slane %v855_v34, 1  ;;  %v532_v7 = vld [vmem:[#allocation2 + $0x34] sm:$0xf] }
  0x3b   : > { %1454 = vrot.lane.b32.xlu0 %v1415_v14, %s3295_s23  ;;  %v975_v49 = vshll.u32 %v3488_v20, 16  ;;  %v302_v51 = vshrl.u32 %v228_v47, 16  ;;  %v305_v52 = vshll.u32 %v228_v47, 16  ;;  %v3156_v53 = vld [vmem:[#allocation2 + $0x2c] ss:$0 sps:$4 sm:$0x11]   ;;  %v853_v45 = vor.u32 %v852_v39, %v848_v38 }
  0x3c   : > { %1194 = vrot.lane.b32.xlu1 %v3145_v1, %s3296_s30  ;;  %v1416_v54 = vrot.slane %v3498_v35, 1  ;;  %v860_v55 = vshrl.u32 %v3506_v46, 16  ;;  %v310_v56 = vshrl.u32 %v229_v50, 16  ;;  %v1762_v58 = vrot.slane %v1760_v40, 1  ;;  %v248_v25 = vld [vmem:[%s3385_s17 + $0x68] sm:$0xf] }
  0x3d   : > { %v3514_v59 = vld [vmem:[#allocation2 + $0x20] ss:$0 sps:$4 sm:$0x11]   ;;  %v304_v60 = vrot.slane %v302_v51, 7  ;;  %v313_v61 = vshll.u32 %v229_v50, 16  ;;  %v1643_v62 = vsel %vm834_vm6, %v1638_v41, %v1642_v42  ;;  %v1758_v63 = vor.u32 %v1757_v44, %v1753_v43  ;;  %v3207_v31 = vld [vmem:[%s4278_s1 + $0x58] sm:$0xff]  }
  0x3e   : > { %v862_v0 = vshll.u32 %v3506_v46, 16  ;;  %v312_v1 = vrot.slane %v310_v56, 7  ;;  %v858_v12 = vsel %vm834_vm6, %v853_v45, %v857_v48  ;;  %v977_v16 = vrot.slane %v975_v49, 1  ;;  %v249_v26 = vld [vmem:[%s3385_s17 + $0x6c] sm:$0x7]  ;;  %v3546_v40 = vld [vmem:[#allocation2 + $0x90] sm:$0xff]   ;;  %2966 = vmatprep.subr.bf16.mxu0 %v3207_v31  ;;  %3111 = vmatprep.subr.bf16.mxu1 %v3207_v31 }
  0x3f   : > { %1474 = vrot.lane.b32.xlu0 %v1445_v33, %s3295_s23  ;;  %v3151_v57 = vld [vmem:[#allocation2 + $0x84] sm:$0xff]   ;;  %v307_v6 = vor.u32 %v305_v52, %v304_v60  ;;  %v308_v8 = vrot.slane %v304_v60, 4  ;;  %v1763_v15 = vsel %vm834_vm6, %v1758_v63, %v1762_v58  ;;  %v1417_v17 = vrot.slane %v3156_v53, 1  ;;  %v3160_v33 = vld [vmem:[#allocation2 + $0x38] ss:$0 sps:$4 sm:$0x11]  }
  0x40   : > { %1076 = vrot.lane.b32.xlu1 %v1037_v36, %s3294_s18  ;;  %v1065_v3 = vrot.slane %v3151_v57, 1  ;;  %v968_v4 = vshrl.u32 %v3151_v57, 16  ;;  %v970_v5 = vshll.u32 %v3151_v57, 16  ;;  %v315_v9 = vor.u32 %v313_v61, %v312_v1  ;;  %v3548_v42 = vld [vmem:[#allocation2 + $0x98] ss:$0 sps:$4 sm:$0x11]  }
  0x41   : > { %v530_v14 = vsel %vm3393_vm8, %v307_v6, %v529_v2  ;;  %v864_v21 = vrot.slane %v862_v0, 1  ;;  %v867_v22 = vshll.u32 %v3514_v59, 16  ;;  %v462_v27 = vshrl.u32 %v248_v25, 16  ;;  %v589_v44 = vld [vmem:[#allocation2 + $0xa8] sm:$0xf]  ;;  %v3558_v57 = vld [vmem:[#allocation2 + $0x9c] sm:$0xff]  }
  0x42   : > { %v1067_v11 = vsel %vm1031_vm2, %v1065_v3, %v1066_v37  ;;  %v972_v13 = vrot.slane %v970_v5, 1  ;;  %v316_v18 = vsel %vm3401_vm9, %v308_v8, %v315_v9  ;;  %531 = vst [vmem:[#allocation2 + $0x30] sm:$0xf] %v530_v14  ;;  %v465_v28 = vshll.u32 %v248_v25, 16  ;;  %v3208_v37 = vld [vmem:[%s4278_s1 + $0x18] sm:$0xff]   ;;  %v3210_v25 = vld [vmem:[%s4278_s1 + $0x60] sm:$0xff]  }
  0x43   : > { %1788 = vrot.lane.b32.xlu0 %v1631_v29, %s3296_s30  ;;  %v533_v23 = vsel %vm3410_vm10, %v316_v18, %v532_v7  ;;  %v1418_v32 = vsel %vm1031_vm2, %v1416_v54, %v1417_v17  ;;  %v470_v34 = vshrl.u32 %v249_v26, 16  ;;  %v473_v36 = vshll.u32 %v249_v26, 16  ;;  %2967 = vmatpush3.bf16.msra.mxu0 %v3208_v37  ;;  %v592_v53 = vld [vmem:[#allocation2 + $0xac] sm:$0xf]  ;;  %v230_v2 = vld [vmem:[%s3385_s17 + $0x20] sm:$0xf] }
  0x44   : > { %1096 = vrot.lane.b32.xlu1 %v1067_v11, %s3294_s18  ;;  %v973_v20 = vor.u32 %v972_v13, %v968_v4  ;;  %534 = vst [vmem:[#allocation2 + $0x34] sm:$0xf] %v533_v23  ;;  %v865_v29 = vor.u32 %v864_v21, %v860_v55  ;;  %v869_v39 = vrot.slane %v867_v22, 1  ;;  %v464_v41 = vrot.slane %v462_v27, 7  ;;  %3119 = vmatpush3.bf16.msra.mxu1 %v3208_v37  ;;  %v231_v5 = vld [vmem:[%s3385_s17 + $0x24] sm:$0x7] }
  0x45   : > { %v472_v43 = vrot.slane %v470_v34, 7  ;;  %v1038_v47 = vrot.slane %v3506_v46, 1  ;;  %v1039_v50 = vrot.slane %v3514_v59, 1  ;;  %v1652_v51 = vshll.u32 %v3160_v33, 16  ;;  %v535_v18 = vld [vmem:[#allocation2 + $0x3c] sm:$0xf]  ;;  %2968 = vmatprep.subr.bf16.mxu0 %v3210_v25  ;;  %3112 = vmatprep.subr.bf16.mxu1 %v3210_v25 }
  0x46   : > { %v978_v38 = vsel %vm834_vm6, %v973_v20, %v977_v16  ;;  %v467_v48 = vor.u32 %v465_v28, %v464_v41  ;;  %v468_v49 = vrot.slane %v464_v41, 4  ;;  %v870_v54 = vsel %vm834_vm6, %v865_v29, %v869_v39  ;;  %v3162_v45 = vld [vmem:[#allocation2 + $0xa4] ss:$0 sps:$4 sm:$0x11]   ;;  %v538_v31 = vld [vmem:[#allocation2 + $0x40] sm:$0xf] }
  0x47   : > { %1790 = vrot.lane.b32.xlu0 %v1643_v62, %s3296_s30  ;;  %v475_v52 = vor.u32 %v473_v36, %v472_v43  ;;  %v982_v56 = vshll.u32 %v3546_v40, 16  ;;  %v1040_v62 = vsel %vm1031_vm2, %v1038_v47, %v1039_v50  ;;  %v1654_v63 = vrot.slane %v1652_v51, 1  ;;  %v3166_v13 = vld [vmem:[#allocation2 + $0xb0] ss:$0 sps:$4 sm:$0x11]   ;;  %v3573_v16 = vld [vmem:[#allocation2 + $0x24] sm:$0xff]  }
  0x48   : > { %1005 = vrot.lane.b32.xlu1 %v858_v12, %s3295_s23  ;;  %v590_v46 = vsel %vm3393_vm8, %v467_v48, %v589_v44  ;;  %v980_v0 = vshrl.u32 %v3546_v40, 16  ;;  %v987_v1 = vshll.u32 %v3548_v42, 16  ;;  %v318_v6 = vshrl.u32 %v230_v2, 16  ;;  %v3587_v37 = vld [vmem:[#allocation2 + $0x2c] ss:$0 sps:$4 sm:$0x11]  }
  0x49   : > { %v476_v58 = vsel %vm3401_vm9, %v468_v49, %v475_v52  ;;  %591 = vst [vmem:[#allocation2 + $0xa8] sm:$0xf] %v590_v46  ;;  %v984_v4 = vrot.slane %v982_v56, 1  ;;  %v321_v7 = vshll.u32 %v230_v2, 16  ;;  %v1446_v8 = vrot.slane %v3558_v57, 1  ;;  %v3600_v50 = vld [vmem:[#allocation2 + $0xb4] sm:$0xff]  }
  0x4a   : > { %v593_v61 = vsel %vm3410_vm10, %v476_v58, %v592_v53  ;;  %v1447_v9 = vrot.slane %v3162_v45, 1  ;;  %v326_v10 = vshrl.u32 %v231_v5, 16  ;;  %v329_v11 = vshll.u32 %v231_v5, 16  ;;  %v3608_v45 = vld [vmem:[#allocation2 + $0x9c] sm:$0xff]   ;;  %v233_v2 = vld [vmem:[%s3385_s17 + $0x2c] sm:$0x7] }
  0x4b   : > { %1810 = vrot.lane.b32.xlu0 %v1763_v15, %s3296_s30  ;;  %v3159_v55 = vld [vmem:[#allocation2 + $0x30] sm:$0xff]   ;;  %594 = vst [vmem:[#allocation2 + $0xac] sm:$0xf] %v593_v61  ;;  %v320_v14 = vrot.slane %v318_v6, 7  ;;  %v989_v15 = vrot.slane %v987_v1, 1  ;;  %v985_v21 = vor.u32 %v984_v4, %v980_v0  ;;  %v1068_v26 = vrot.slane %v3546_v40, 1 }
  0x4c   : > { %1025 = vrot.lane.b32.xlu1 %v978_v38, %s3295_s23  ;;  %v1645_v59 = vshrl.u32 %v3159_v55, 16  ;;  %v1647_v60 = vshll.u32 %v3159_v55, 16  ;;  %v328_v17 = vrot.slane %v326_v10, 7  ;;  %v1069_v27 = vrot.slane %v3548_v42, 1  ;;  %v3596_v43 = vld [vmem:[#allocation2 + $0x30] sm:$0xff]  }
  0x4d   : > { %v323_v22 = vor.u32 %v321_v7, %v320_v14  ;;  %v324_v23 = vrot.slane %v320_v14, 4  ;;  %v1772_v34 = vshll.u32 %v3166_v13, 16  ;;  %v874_v38 = vshll.u32 %v3573_v16, 16  ;;  %v232_v1 = vld [vmem:[%s3385_s17 + $0x28] sm:$0xf] }
  0x4e   : > { %v1649_v3 = vrot.slane %v1647_v60, 1  ;;  %v331_v28 = vor.u32 %v329_v11, %v328_v17  ;;  %v990_v39 = vsel %vm834_vm6, %v985_v21, %v989_v15  ;;  %v872_v48 = vshrl.u32 %v3573_v16, 16  ;;  %v3239_v19 = vld [vmem:[#allocation2 + $0x14] ss:$0 sps:$4 sm:$0x11]  }
  0x4f   : > { %1456 = vrot.lane.b32.xlu0 %v1418_v32, %s3295_s23  ;;  %v1448_v32 = vsel %vm1031_vm2, %v1446_v8, %v1447_v9  ;;  %v536_v36 = vsel %vm3393_vm8, %v323_v22, %v535_v18  ;;  %v1774_v47 = vrot.slane %v1772_v34, 1  ;;  %v876_v49 = vrot.slane %v874_v38, 1  ;;  %v3174_v8 = vld [vmem:[#allocation2 + $0xb0] ss:$0 sps:$4 sm:$0x11]   ;;  %v3211_v34 = vld [vmem:[%s4278_s1 + $0x20] sm:$0xff]  }
  0x50   : > { %1007 = vrot.lane.b32.xlu1 %v870_v54, %s3295_s23  ;;  %v1650_v12 = vor.u32 %v1649_v3, %v1645_v59  ;;  %v332_v29 = vsel %vm3401_vm9, %v324_v23, %v331_v28  ;;  %537 = vst [vmem:[#allocation2 + $0x3c] sm:$0xf] %v536_v36  ;;  %v1070_v51 = vsel %vm1031_vm2, %v1068_v26, %v1069_v27  ;;  %v879_v53 = vshll.u32 %v3587_v37, 16  ;;  %v3172_v54 = vld [vmem:[#allocation2 + $0x44] ss:$0 sps:$4 sm:$0x11]  }
  0x51   : > { %v539_v42 = vsel %vm3410_vm10, %v332_v29, %v538_v31  ;;  %v1779_v58 = vshll.u32 %v3600_v50, 16  ;;  %v877_v59 = vor.u32 %v876_v49, %v872_v48  ;;  %v1664_v0 = vshll.u32 %v3172_v54, 16  ;;  %v3619_v9 = vld [vmem:[#allocation2 + $0xa4] ss:$0 sps:$4 sm:$0x11]   ;;  %2969 = vmatpush3.bf16.msra.mxu0 %v3211_v34  ;;  %3120 = vmatpush3.bf16.msra.mxu1 %v3211_v34  ;;  %v3649_v48 = vld [vmem:[#allocation2 + $0x30] sm:$0xff]  }
  0x52   : > { %v1655_v20 = vsel %vm834_vm6, %v1650_v12, %v1654_v63  ;;  %v3165_v33 = vld [vmem:[#allocation2 + $0xa8] sm:$0xff]   ;;  %540 = vst [vmem:[#allocation2 + $0x40] sm:$0xf] %v539_v42  ;;  %v881_v60 = vrot.slane %v879_v53, 1  ;;  %v1041_v63 = vrot.slane %v3573_v16, 1  ;;  %v334_v5 = vshrl.u32 %v232_v1, 16 }
  0x53   : > { %1554 = vrot.lane.b32.xlu0 %v3159_v55, %s3294_s18  ;;  %v1765_v40 = vshrl.u32 %v3165_v33, 16  ;;  %v1767_v41 = vshll.u32 %v3165_v33, 16  ;;  %v1419_v55 = vrot.slane %v3596_v43, 1  ;;  %v337_v6 = vshll.u32 %v232_v1, 16  ;;  %v541_v18 = vld [vmem:[#allocation2 + $0x48] sm:$0xf] }
  0x54   : > { %1078 = vrot.lane.b32.xlu1 %v1040_v62, %s3294_s18  ;;  %v1042_v7 = vrot.slane %v3587_v37, 1  ;;  %v342_v10 = vshrl.u32 %v233_v2, 16  ;;  %v345_v11 = vshll.u32 %v233_v2, 16  ;;  %v882_v12 = vsel %vm834_vm6, %v877_v59, %v881_v60  ;;  %v3625_v21 = vld [vmem:[#allocation2 + $0xa8] sm:$0xff]   ;;  %v234_v29 = vld [vmem:[%s3385_s17 + $0x30] sm:$0xf] }
  0x55   : > { %v1769_v44 = vrot.slane %v1767_v41, 1  ;;  %v994_v14 = vshll.u32 %v3608_v45, 16  ;;  %v336_v15 = vrot.slane %v334_v5, 7  ;;  %v992_v16 = vshrl.u32 %v3608_v45, 16  ;;  %v544_v26 = vld [vmem:[#allocation2 + $0x4c] sm:$0xf] }
  0x56   : > { %v344_v17 = vrot.slane %v342_v10, 7  ;;  %v1043_v27 = vsel %vm1031_vm2, %v1041_v63, %v1042_v7  ;;  %v999_v31 = vshll.u32 %v3619_v9, 16  ;;  %v1450_v36 = vrot.slane %v3174_v8, 1  ;;  %v547_v59 = vld [vmem:[#allocation2 + $0x54] sm:$0xf] }
  0x57   : > { %1792 = vrot.lane.b32.xlu0 %v1655_v20, %s3296_s30  ;;  %v1770_v52 = vor.u32 %v1769_v44, %v1765_v40  ;;  %v1666_v20 = vrot.slane %v1664_v0, 1  ;;  %v339_v22 = vor.u32 %v337_v6, %v336_v15  ;;  %v340_v23 = vrot.slane %v336_v15, 4  ;;  %v3213_v44 = vld [vmem:[%s4278_s1 + $0x68] sm:$0xff]   ;;  %v3653_v60 = vld [vmem:[#allocation2 + $0x38] ss:$0 sps:$4 sm:$0x11]  }
  0x58   : > { %1176 = vrot.lane.b32.xlu1 %v3498_v35, %s3296_s30  ;;  %v3168_v35 = vld [vmem:[#allocation2 + $0x38] ss:$0 sps:$4 sm:$0x11]   ;;  %v347_v25 = vor.u32 %v345_v11, %v344_v17  ;;  %v996_v28 = vrot.slane %v994_v14, 1  ;;  %v1777_v37 = vshrl.u32 %v3600_v50, 16  ;;  %v1449_v41 = vrot.slane %v3625_v21, 1  ;;  %2970 = vmatprep.subr.bf16.mxu0 %v3213_v44 }
  0x59   : > { %v1420_v56 = vrot.slane %v3168_v35, 1  ;;  %v1775_v46 = vsel %vm834_vm6, %v1770_v52, %v1774_v47  ;;  %v3171_v61 = vld [vmem:[#allocation2 + $0x3c] sm:$0xff]   ;;  %v350_v35 = vshrl.u32 %v234_v29, 16  ;;  %v1781_v47 = vrot.slane %v1779_v58, 1  ;;  %3113 = vmatprep.subr.bf16.mxu1 %v3213_v44  ;;  %v236_v63 = vld [vmem:[%s3385_s17 + $0x38] sm:$0xf] }
  0x5a   : > { %v1657_v3 = vshrl.u32 %v3171_v61, 16  ;;  %v1659_v4 = vshll.u32 %v3171_v61, 16  ;;  %v348_v38 = vsel %vm3401_vm9, %v340_v23, %v347_v25  ;;  %v353_v49 = vshll.u32 %v234_v29, 16  ;;  %v3180_v2 = vld [vmem:[#allocation2 + $0x44] ss:$0 sps:$4 sm:$0x11]  }
  0x5b   : > { %1476 = vrot.lane.b32.xlu0 %v1448_v32, %s3295_s23  ;;  %v1421_v62 = vsel %vm1031_vm2, %v1419_v55, %v1420_v56  ;;  %v3178_v32 = vld [vmem:[#allocation2 + $0xbc] ss:$0 sps:$4 sm:$0x11]   ;;  %v545_v42 = vsel %vm3410_vm10, %v348_v38, %v544_v26  ;;  %v997_v53 = vor.u32 %v996_v28, %v992_v16  ;;  %v1001_v54 = vrot.slane %v999_v31, 1  ;;  %v553_v25 = vld [vmem:[#allocation2 + $0x60] sm:$0xf] }
  0x5c   : > { %1027 = vrot.lane.b32.xlu1 %v990_v39, %s3295_s23  ;;  %v1661_v13 = vrot.slane %v1659_v4, 1  ;;  %v235_v39 = vld [vmem:[%s3385_s17 + $0x34] sm:$0x7]  ;;  %546 = vst [vmem:[#allocation2 + $0x4c] sm:$0xf] %v545_v42  ;;  %v352_v55 = vrot.slane %v350_v35, 7  ;;  %v1451_v58 = vsel %vm1031_vm2, %v1449_v41, %v1450_v36  ;;  %v1782_v11 = vor.u32 %v1781_v47, %v1777_v37 }
  0x5d   : > { %v361_v52 = vshll.u32 %v235_v39, 16  ;;  %v1784_v56 = vshll.u32 %v3178_v32, 16  ;;  %v1071_v0 = vrot.slane %v3608_v45, 1  ;;  %v1072_v1 = vrot.slane %v3619_v9, 1  ;;  %v550_v4 = vld [vmem:[#allocation2 + $0x58] sm:$0xf] }
  0x5e   : > { %v237_v5 = vld [vmem:[%s3385_s17 + $0x3c] sm:$0x7]  ;;  %v1002_v6 = vsel %vm834_vm6, %v997_v53, %v1001_v54  ;;  %v886_v7 = vshll.u32 %v3649_v48, 16  ;;  %v366_v10 = vshrl.u32 %v236_v63, 16  ;;  %v369_v9 = vshll.u32 %v236_v63, 16  ;;  %v3219_v26 = vld [vmem:[%s4278_s1 + $0x70] sm:$0xff]  }
  0x5f   : > { %1574 = vrot.lane.b32.xlu0 %v3165_v33, %s3294_s18  ;;  %v542_v33 = vsel %vm3393_vm8, %v339_v22, %v541_v18  ;;  %v891_v17 = vshll.u32 %v3653_v60, 16  ;;  %v374_v18 = vshrl.u32 %v237_v5, 16  ;;  %v1423_v31 = vrot.slane %v3180_v2, 1  ;;  %v3184_v32 = vld [vmem:[#allocation2 + $0x50] ss:$0 sps:$4 sm:$0x11]  }
  0x60   : > { %1098 = vrot.lane.b32.xlu1 %v1070_v51, %s3294_s18  ;;  %543 = vst [vmem:[#allocation2 + $0x48] sm:$0xf] %v542_v33  ;;  %v358_v51 = vshrl.u32 %v235_v39, 16  ;;  %v368_v16 = vrot.slane %v366_v10, 7  ;;  %v888_v22 = vrot.slane %v886_v7, 1  ;;  %v377_v37 = vshll.u32 %v237_v5, 16 }
  0x61   : > { %v376_v33 = vrot.slane %v374_v18, 7  ;;  %v3220_v29 = vld [vmem:[%s4278_s1 + $0x30] sm:$0xff]   ;;  %v3695_v39 = vld [vmem:[#allocation2 + $0x3c] sm:$0xff]   ;;  %v1676_v35 = vshll.u32 %v3184_v32, 16  ;;  %vm1887_vm12 = vcmask 523264   ;;  %vm1916_vm13 = vcmask 785408  }
  0x62   : > { %v371_v23 = vor.u32 %v369_v9, %v368_v16  ;;  %v372_v36 = vrot.slane %v368_v16, 4  ;;  %v898_v53 = vshll.u32 %v3695_v39, 16  ;;  %v559_v9 = vld [vmem:[#allocation2 + $0x6c] sm:$0xf]  ;;  %vm2695_vm14 = vcmask 256000  }
  0x63   : > { %1812 = vrot.lane.b32.xlu0 %v1775_v46, %s3296_s30  ;;  %v360_v46 = vrot.slane %v358_v51, 7  ;;  %v379_v42 = vor.u32 %v377_v37, %v376_v33  ;;  %v3740_v33 = vld [vmem:[#allocation2 + $0x5c] ss:$0 sps:$4 sm:$0x11]  }
  0x64   : > { %1196 = vrot.lane.b32.xlu1 %v3558_v57, %s3296_s30  ;;  %v1662_v57 = vor.u32 %v1661_v13, %v1657_v3  ;;  %v3214_v13 = vld [vmem:[%s4278_s1 + $0x28] sm:$0xff]   ;;  %v554_v38 = vsel %vm3393_vm8, %v371_v23, %v553_v25  ;;  %v3194_v37 = vld [vmem:[#allocation2 + $0x50] ss:$0 sps:$4 sm:$0x11]  }
  0x65   : > { %v363_v3 = vor.u32 %v361_v52, %v360_v46  ;;  %2971 = vmatpush3.bf16.msra.mxu0 %v3214_v13  ;;  %3121 = vmatpush3.bf16.msra.mxu1 %v3214_v13  ;;  %555 = vst [vmem:[#allocation2 + $0x60] sm:$0xf] %v554_v38  ;;  %v380_v51 = vsel %vm3401_vm9, %v372_v36, %v379_v42  ;;  %v3704_v52 = vld [vmem:[#allocation2 + $0x44] ss:$0 sps:$4 sm:$0x11]   ;;  %v1045_v46 = vrot.slane %v3653_v60, 1 }
  0x66   : > { %v1667_v40 = vsel %vm834_vm6, %v1662_v57, %v1666_v20  ;;  %v1073_v57 = vsel %vm1031_vm2, %v1071_v0, %v1072_v1  ;;  %v884_v20 = vshrl.u32 %v3649_v48, 16  ;;  %2972 = vmatprep.subr.bf16.mxu0 %v3219_v26  ;;  %3114 = vmatprep.subr.bf16.mxu1 %v3219_v26  ;;  %v900_v0 = vrot.slane %v898_v53, 1  ;;  %v238_v60 = vld [vmem:[%s3385_s17 + $0x40] sm:$0xf]  ;;  %v3223_v13 = vld [vmem:[%s4278_s1 + $0x38] sm:$0xff]  }
  0x67   : > { %1458 = vrot.lane.b32.xlu0 %v1421_v62, %s3295_s23  ;;  %v356_v62 = vrot.slane %v352_v55, 4  ;;  %v3673_v14 = vld [vmem:[#allocation2 + $0x48] sm:$0xff]   ;;  %v903_v1 = vshll.u32 %v3704_v52, 16  ;;  %v385_v7 = vshll.u32 %v238_v60, 16  ;;  %v1048_v32 = vrot.slane %v3704_v52, 1 }
  0x68   : > { %1009 = vrot.lane.b32.xlu1 %v882_v12, %s3295_s23  ;;  %v3666_v12 = vld [vmem:[#allocation2 + $0x3c] sm:$0xff]   ;;  %v1671_v34 = vshll.u32 %v3673_v14, 16  ;;  %v889_v41 = vor.u32 %v888_v22, %v884_v20  ;;  %v1669_v47 = vshrl.u32 %v3673_v14, 16  ;;  %v3756_v42 = vld [vmem:[#allocation2 + $0x68] ss:$0 sps:$4 sm:$0x11]  }
  0x69   : > { %v364_v45 = vsel %vm3401_vm9, %v356_v62, %v363_v3  ;;  %v1422_v28 = vrot.slane %v3666_v12, 1  ;;  %2973 = vmatpush3.bf16.msra.mxu0 %v3220_v29  ;;  %3122 = vmatpush3.bf16.msra.mxu1 %v3220_v29  ;;  %v1678_v62 = vrot.slane %v1676_v35, 1  ;;  %v239_v3 = vld [vmem:[%s3385_s17 + $0x44] sm:$0x7] }
  0x6a   : > { %v551_v15 = vsel %vm3410_vm10, %v364_v45, %v550_v4  ;;  %v393_v45 = vshll.u32 %v239_v3, 16 }
  0x6b   : > { %1556 = vrot.lane.b32.xlu0 %v3171_v61, %s3294_s18  ;;  %v355_v61 = vor.u32 %v353_v49, %v352_v55  ;;  %552 = vst [vmem:[#allocation2 + $0x58] sm:$0xf] %v551_v15  ;;  %v1424_v44 = vsel %vm1031_vm2, %v1422_v28, %v1423_v31  ;;  %v1673_v49 = vrot.slane %v1671_v34, 1  ;;  %v562_v28 = vld [vmem:[#allocation2 + $0x70] sm:$0xf]  ;;  %v1047_v31 = vrot.slane %v3695_v39, 1 }
  0x6c   : > { %1080 = vrot.lane.b32.xlu1 %v1043_v27, %s3294_s18 }
  0x6d   : > { %v548_v8 = vsel %vm3393_vm8, %v355_v61, %v547_v59  ;;  %v3713_v59 = vld [vmem:[#allocation2 + $0x48] sm:$0xff]   ;;  %v1674_v61 = vor.u32 %v1673_v49, %v1669_v47  ;;  %v1049_v35 = vsel %vm1031_vm2, %v1047_v31, %v1048_v32  ;;  %v915_v49 = vshll.u32 %v3194_v37, 16  ;;  %v568_v32 = vld [vmem:[#allocation2 + $0x7c] sm:$0xf] }
  0x6e   : > { %549 = vst [vmem:[#allocation2 + $0x54] sm:$0xf] %v548_v8  ;;  %v1425_v4 = vrot.slane %v3713_v59, 1  ;;  %v3222_v8 = vld [vmem:[%s4278_s1 + $0x78] sm:$0xff]  }
  0x6f   : > { %1794 = vrot.lane.b32.xlu0 %v1667_v40, %s3296_s30  ;;  %v556_v40 = vld [vmem:[#allocation2 + $0x64] sm:$0xf]  ;;  %v1679_v10 = vsel %vm834_vm6, %v1674_v61, %v1678_v62  ;;  %2974 = vmatprep.subr.bf16.mxu0 %v3222_v8 }
  0x70   : > { %1178 = vrot.lane.b32.xlu1 %v3596_v43, %s3296_s30  ;;  %v1786_v43 = vrot.slane %v1784_v56, 1  ;;  %v557_v54 = vsel %vm3410_vm10, %v380_v51, %v556_v40  ;;  %v1044_v56 = vrot.slane %v3649_v48, 1  ;;  %v3190_v48 = vld [vmem:[#allocation2 + $0x5c] ss:$0 sps:$4 sm:$0x11]   ;;  %2975 = vmatpush3.bf16.msra.mxu0 %v3223_v13  ;;  %v1429_v51 = vrot.slane %v3740_v33, 1 }
  0x71   : > { %558 = vst [vmem:[#allocation2 + $0x64] sm:$0xf] %v557_v54  ;;  %3115 = vmatprep.subr.bf16.mxu1 %v3222_v8  ;;  %v3783_v8 = vld [vmem:[#allocation2 + $0x5c] ss:$0 sps:$4 sm:$0x11]  }
  0x72   : > { %v1787_v27 = vsel %vm834_vm6, %v1782_v11, %v1786_v43  ;;  %v1046_v2 = vsel %vm1031_vm2, %v1044_v56, %v1045_v46  ;;  %v390_v43 = vshrl.u32 %v239_v3, 16  ;;  %3123 = vmatpush3.bf16.msra.mxu1 %v3223_v13  ;;  %v1700_v56 = vshll.u32 %v3756_v42, 16  ;;  %v565_v13 = vld [vmem:[#allocation2 + $0x78] sm:$0xf] }
  0x73   : > { %1478 = vrot.lane.b32.xlu0 %v1451_v58, %s3295_s23  ;;  %v896_v58 = vshrl.u32 %v3695_v39, 16  ;;  %3076 = vmatprep.subr.bf16.mxu1 %v3823_v24 }
  0x74   : > { %1029 = vrot.lane.b32.xlu1 %v1002_v6, %s3295_s23  ;;  %v382_v6 = vshrl.u32 %v238_v60, 16  ;;  %v392_v18 = vrot.slane %v390_v43, 7  ;;  %v1051_v60 = vrot.slane %v3194_v37, 1 }
  0x75   : > { %v3189_v63 = vld [vmem:[#allocation2 + $0x54] sm:$0xff]   ;;  %v901_v16 = vor.u32 %v900_v0, %v896_v58  ;;  %v240_v58 = vld [vmem:[%s3385_s17 + $0x48] sm:$0xf] }
  0x76   : > { %v1683_v11 = vshll.u32 %v3189_v63, 16  ;;  %v384_v15 = vrot.slane %v382_v6, 7  ;;  %v1681_v25 = vshrl.u32 %v3189_v63, 16  ;;  %v3762_v52 = vld [vmem:[#allocation2 + $0x54] sm:$0xff]   ;;  %v401_v6 = vshll.u32 %v240_v58, 16 }
  0x77   : > { %1576 = vrot.lane.b32.xlu0 %v3600_v50, %s3294_s18  ;;  %v893_v50 = vrot.slane %v891_v17, 1  ;;  %v3732_v17 = vld [vmem:[#allocation2 + $0x48] sm:$0xff]   ;;  %v922_v62 = vshll.u32 %v3762_v52, 16 }
  0x78   : > { %1100 = vrot.lane.b32.xlu1 %v1073_v57, %s3294_s18  ;;  %v1688_v57 = vshll.u32 %v3190_v48, 16  ;;  %v387_v20 = vor.u32 %v385_v7, %v384_v15  ;;  %v388_v22 = vrot.slane %v384_v15, 4  ;;  %v1685_v26 = vrot.slane %v1683_v11, 1  ;;  %v241_v48 = vld [vmem:[%s3385_s17 + $0x4c] sm:$0x7] }
  0x79   : > { %v894_v55 = vsel %vm834_vm6, %v889_v41, %v893_v50  ;;  %v910_v38 = vshll.u32 %v3732_v17, 16  ;;  %v3753_v41 = vld [vmem:[#allocation2 + $0x60] sm:$0xff]   ;;  %v1050_v61 = vrot.slane %v3732_v17, 1  ;;  %v406_v43 = vshrl.u32 %v241_v48, 16 }
  0x7a   : > { %v560_v34 = vsel %vm3393_vm8, %v387_v20, %v559_v9  ;;  %v1686_v39 = vor.u32 %v1685_v26, %v1681_v25  ;;  %v1690_v40 = vrot.slane %v1688_v57, 1  ;;  %v1693_v0 = vshrl.u32 %v3753_v41, 16  ;;  %v3796_v25 = vld [vmem:[#allocation2 + $0x74] ss:$0 sps:$4 sm:$0x11]  }
  0x7b   : > { %1814 = vrot.lane.b32.xlu0 %v1787_v27, %s3296_s30  ;;  %v395_v27 = vor.u32 %v393_v45, %v392_v18  ;;  %561 = vst [vmem:[#allocation2 + $0x6c] sm:$0xf] %v560_v34  ;;  %v912_v47 = vrot.slane %v910_v38, 1  ;;  %v3787_v45 = vld [vmem:[#allocation2 + $0x60] sm:$0xff]   ;;  %v409_v9 = vshll.u32 %v241_v48, 16  ;;  %v408_v20 = vrot.slane %v406_v43, 7 }
  0x7c   : > { %1198 = vrot.lane.b32.xlu1 %v3625_v21, %s3296_s30  ;;  %v3186_v21 = vld [vmem:[#allocation2 + $0x50] ss:$0 sps:$4 sm:$0x11]   ;;  %v1691_v53 = vsel %vm834_vm6, %v1686_v39, %v1690_v40  ;;  %v1250_v38 = vshll.u32 %v3239_v19, 16  ;;  %v1712_v30 = vshll.u32 %v3796_v25, 16 }
  0x7d   : > { %v1426_v5 = vrot.slane %v3186_v21, 1  ;;  %v396_v29 = vsel %vm3401_vm9, %v388_v22, %v395_v27  ;;  %v917_v21 = vrot.slane %v915_v49, 1  ;;  %v1052_v22 = vsel %vm1031_vm2, %v1050_v61, %v1051_v60 }
  0x7e   : > { %v563_v50 = vsel %vm3410_vm10, %v396_v29, %v562_v28  ;;  %v411_v31 = vor.u32 %v409_v9, %v408_v20  ;;  %v3809_v29 = vld [vmem:[#allocation2 + $0x60] sm:$0xff]  }
  0x7f   : > { %1460 = vrot.lane.b32.xlu0 %v1424_v44, %s3295_s23  ;;  %v1427_v23 = vsel %vm1031_vm2, %v1425_v4, %v1426_v5  ;;  %564 = vst [vmem:[#allocation2 + $0x70] sm:$0xf] %v563_v50  ;;  %v908_v44 = vshrl.u32 %v3732_v17, 16  ;;  %v1702_v4 = vrot.slane %v1700_v56, 1  ;;  %v934_v61 = vshll.u32 %v3809_v29, 16 }
  0x80   : > { %1011 = vrot.lane.b32.xlu1 %v894_v55, %s3295_s23  ;;  %v1695_v55 = vshll.u32 %v3753_v41, 16  ;;  %v3780_v5 = vld [vmem:[#allocation2 + $0x68] ss:$0 sps:$4 sm:$0x11]   ;;  %v932_v43 = vshrl.u32 %v3809_v29, 16 }
  0x81   : > { %v913_v46 = vor.u32 %v912_v47, %v908_v44  ;;  %v1432_v28 = vrot.slane %v3780_v5, 1  ;;  %v3240_v44 = vld [vmem:[#allocation2 + $0xc] sm:$0xff]   ;;  %v936_v9 = vrot.slane %v934_v61, 1  ;;  %v1056_v61 = vrot.slane %v3809_v29, 1 }
  0x82   : > { %v1245_v47 = vshll.u32 %v3240_v44, 16 }
  0x83   : > { %1558 = vrot.lane.b32.xlu0 %v3673_v14, %s3294_s18  ;;  %v905_v14 = vrot.slane %v903_v1, 1  ;;  %v1697_v1 = vrot.slane %v1695_v55, 1  ;;  %v918_v7 = vsel %vm834_vm6, %v913_v46, %v917_v21  ;;  %v3828_v46 = vld [vmem:[#allocation2 + $0x68] ss:$0 sps:$4 sm:$0x11]  }
  0x84   : > { %1082 = vrot.lane.b32.xlu1 %v1046_v2, %s3294_s18  ;;  %v398_v2 = vshrl.u32 %v240_v58, 16  ;;  %v1252_v58 = vrot.slane %v1250_v38, 1 }
  0x85   : > { %v906_v36 = vsel %vm834_vm6, %v901_v16, %v905_v14  ;;  %v1698_v15 = vor.u32 %v1697_v1, %v1693_v0  ;;  %v924_v16 = vrot.slane %v922_v62, 1  ;;  %v1247_v0 = vrot.slane %v1245_v47, 1  ;;  %v3241_v1 = vld [vmem:[#allocation2 + $0x18] sm:$0xff]  }
  0x86   : > { %v400_v11 = vrot.slane %v398_v2, 7  ;;  %v3791_v17 = vld [vmem:[#allocation2 + $0x6c] sm:$0xff]   ;;  %v1257_v48 = vshll.u32 %v3241_v1, 16  ;;  %v3838_v2 = vld [vmem:[#allocation2 + $0x74] ss:$0 sps:$4 sm:$0x11]  }
  0x87   : > { %1796 = vrot.lane.b32.xlu0 %v1679_v10, %s3296_s30  ;;  %v920_v10 = vshrl.u32 %v3762_v52, 16  ;;  %v1703_v34 = vsel %vm834_vm6, %v1698_v15, %v1702_v4  ;;  %v1707_v37 = vshll.u32 %v3791_v17, 16  ;;  %v1705_v55 = vshrl.u32 %v3791_v17, 16  ;;  %v3861_v38 = vld [vmem:[#allocation2 + $0x6c] sm:$0xff]  }
  0x88   : > { %1180 = vrot.lane.b32.xlu1 %v3666_v12, %s3296_s30  ;;  %v3749_v12 = vld [vmem:[#allocation2 + $0x54] sm:$0xff]   ;;  %v403_v18 = vor.u32 %v401_v6, %v400_v11  ;;  %v404_v57 = vrot.slane %v400_v11, 4  ;;  %v1714_v6 = vrot.slane %v1712_v30, 1  ;;  %v939_v15 = vshll.u32 %v3828_v46, 16 }
  0x89   : > { %v1428_v54 = vrot.slane %v3749_v12, 1  ;;  %v925_v40 = vor.u32 %v924_v16, %v920_v10  ;;  %v1709_v56 = vrot.slane %v1707_v37, 1  ;;  %v3242_v10 = vld [vmem:[#allocation2 + $0x20] ss:$0 sps:$4 sm:$0x11]   ;;  %v1259_v20 = vrot.slane %v1257_v48, 1 }
  0x8a   : > { %v566_v26 = vsel %vm3393_vm8, %v403_v18, %v565_v13  ;;  %v412_v50 = vsel %vm3401_vm9, %v404_v57, %v411_v31  ;;  %v1262_v11 = vshll.u32 %v3242_v10, 16  ;;  %v1435_v31 = vrot.slane %v3838_v2, 1  ;;  %v3244_v30 = vld [vmem:[#allocation2 + $0x98] ss:$0 sps:$4 sm:$0x11]   ;;  %v3245_v48 = vld [vmem:[#allocation2] sm:$0xff]  }
  0x8b   : > { %1462 = vrot.lane.b32.xlu0 %v1427_v23, %s3295_s23  ;;  %v927_v23 = vshll.u32 %v3783_v8, 16  ;;  %567 = vst [vmem:[#allocation2 + $0x78] sm:$0xf] %v566_v26  ;;  %v569_v49 = vsel %vm3410_vm10, %v412_v50, %v568_v32  ;;  %v1710_v4 = vor.u32 %v1709_v56, %v1705_v55  ;;  %v937_v37 = vor.u32 %v936_v9, %v932_v43  ;;  %v3883_v10 = vld [vmem:[#allocation2 + $0x84] sm:$0xff]  }
  0x8c   : > { %1013 = vrot.lane.b32.xlu1 %v906_v36, %s3295_s23  ;;  %v1431_v36 = vrot.slane %v3787_v45, 1  ;;  %570 = vst [vmem:[#allocation2 + $0x7c] sm:$0xf] %v569_v49  ;;  %v941_v19 = vrot.slane %v939_v15, 1 }
  0x8d   : > { %v1715_v26 = vsel %vm834_vm6, %v1710_v4, %v1714_v6 }
  0x8f   : > { %1560 = vrot.lane.b32.xlu0 %v3189_v63, %s3294_s18  ;;  %v1430_v63 = vsel %vm1031_vm2, %v1428_v54, %v1429_v51  ;;  %v1053_v51 = vrot.slane %v3762_v52, 1  ;;  %v1433_v54 = vsel %vm1031_vm2, %v1431_v36, %v1432_v28 }
  0x90   : > { %1084 = vrot.lane.b32.xlu1 %v1049_v35, %s3294_s18  ;;  %v929_v35 = vrot.slane %v927_v23, 1 }
  0x92   : > { %v930_v62 = vsel %vm834_vm6, %v925_v40, %v929_v35  ;;  %v1264_v40 = vrot.slane %v1262_v11, 1 }
  0x93   : > { %1798 = vrot.lane.b32.xlu0 %v1691_v53, %s3296_s30  ;;  %v1054_v53 = vrot.slane %v3783_v8, 1  ;;  %v1255_v8 = vshrl.u32 %v3241_v1, 16  ;;  %v3848_v16 = vld [vmem:[#allocation2 + $0x78] sm:$0xff]   ;;  %v946_v1 = vshll.u32 %v3861_v38, 16 }
  0x94   : > { %1182 = vrot.lane.b32.xlu1 %v3713_v59, %s3296_s30  ;;  %v3789_v14 = vpop.permute.xlu1 %1074  ;;  %v1719_v32 = vshll.u32 %v3848_v16, 16  ;;  %v3886_v9 = vld [vmem:[#allocation2 + $0x78] sm:$0xff]  }
  0x95   : > { %v1055_v13 = vsel %vm1031_vm2, %v1053_v51, %v1054_v53  ;;  %v1260_v51 = vor.u32 %v1259_v20, %v1255_v8  ;;  %v3881_v8 = vld [vmem:[#allocation2 + $0x80] ss:$0 sps:$4 sm:$0x11]  }
  0x96   : > { %v3778_v3 = vpop.permute.xlu0 %1003  ;;  %v1721_v55 = vrot.slane %v1719_v32, 1 }
  0x97   : > { %1464 = vrot.lane.b32.xlu0 %v1430_v63, %s3295_s23  ;;  %v1243_v63 = vshrl.u32 %v3240_v44, 16  ;;  %v1860_v4 = vsel %vm1858_vm11, %v3245_v48, %v3778_v3 }
  0x98   : > { %1015 = vrot.lane.b32.xlu1 %v918_v7, %s3295_s23  ;;  %v3842_v7 = vld [vmem:[#allocation2 + $0x6c] sm:$0xff]  }
  0x99   : > { %v1248_v57 = vor.u32 %v1247_v0, %v1243_v63  ;;  %v1434_v28 = vrot.slane %v3842_v7, 1  ;;  %v942_v63 = vsel %vm834_vm6, %v937_v37, %v941_v19  ;;  %v3875_v0 = vld [vmem:[#allocation2 + $0x74] ss:$0 sps:$4 sm:$0x11]   ;;  %v1731_v19 = vshll.u32 %v3883_v10, 16 }
  0x9a   : > { %v3902_v37 = vld [vmem:[#allocation2 + $0x8c] ss:$0 sps:$4 sm:$0x11]  }
  0x9b   : > { %1562 = vrot.lane.b32.xlu0 %v3753_v41, %s3294_s18  ;;  %v1253_v50 = vsel %vm834_vm6, %v1248_v57, %v1252_v58  ;;  %v1436_v53 = vsel %vm1031_vm2, %v1434_v28, %v1435_v31  ;;  %v1382_v58 = vshll.u32 %v3244_v30, 16  ;;  %v948_v28 = vrot.slane %v946_v1, 1 }
  0x9c   : > { %v3802_v27 = vpop.permute.xlu0 %1552  ;;  %1086 = vrot.lane.b32.xlu1 %v1052_v22, %s3294_s18  ;;  %v3852_v22 = vld [vmem:[#allocation2 + $0x80] ss:$0 sps:$4 sm:$0x11]   ;;  %v1060_v30 = vrot.slane %v3875_v0, 1  ;;  %v1736_v1 = vshll.u32 %v3902_v37, 16 }
  0x9d   : > { %v1724_v47 = vshll.u32 %v3852_v22, 16  ;;  %v1384_v3 = vrot.slane %v1382_v58, 1 }
  0x9f   : > { %1800 = vrot.lane.b32.xlu0 %v1703_v34, %s3296_s30  ;;  %v3243_v34 = vld [vmem:[#allocation2 + $0x90] sm:$0xff]   ;;  %v1726_v43 = vrot.slane %v1724_v47, 1  ;;  %v1437_v47 = vrot.slane %v3886_v9, 1 }
  0xa0   : > { %v3813_v39 = vpop.permute.xlu1 %1550  ;;  %1184 = vrot.lane.b32.xlu1 %v3749_v12, %s3296_s30  ;;  %v1377_v36 = vshll.u32 %v3243_v34, 16  ;;  %v1375_v44 = vshrl.u32 %v3243_v34, 16  ;;  %v1889_v34 = vsel %vm1887_vm12, %v1860_v4, %v3789_v14 }
  0xa2   : > { %v1379_v56 = vrot.slane %v1377_v36, 1  ;;  %v1438_v36 = vrot.slane %v3881_v8, 1 }
  0xa3   : > { %v3832_v21 = vpop.permute.xlu0 %1572  ;;  %1466 = vrot.lane.b32.xlu0 %v1433_v54, %s3295_s23  ;;  %v1717_v54 = vshrl.u32 %v3848_v16, 16 }
  0xa4   : > { %1017 = vrot.lane.b32.xlu1 %v930_v62, %s3295_s23  ;;  %v1057_v62 = vrot.slane %v3828_v46, 1  ;;  %v1380_v15 = vor.u32 %v1379_v56, %v1375_v44  ;;  %v1059_v56 = vrot.slane %v3861_v38, 1  ;;  %v1439_v4 = vsel %vm1031_vm2, %v1437_v47, %v1438_v36  ;;  %v3939_v36 = vld [vmem:[#allocation2 + $0x90] sm:$0xff]  }
  0xa5   : > { %v1722_v46 = vor.u32 %v1721_v55, %v1717_v54  ;;  %v3913_v54 = vld [vmem:[#allocation2 + $0x78] sm:$0xff]  }
  0xa6   : > { %v3840_v60 = vpop.permute.xlu1 %1172  ;;  %v1058_v20 = vsel %vm1031_vm2, %v1056_v61, %v1057_v62 }
  0xa7   : > { %1564 = vrot.lane.b32.xlu0 %v3791_v17, %s3294_s18  ;;  %v1918_v14 = vsel %vm1916_vm13, %v1889_v34, %v3840_v60  ;;  %v1729_v60 = vshrl.u32 %v3883_v10, 16  ;;  %v1738_v34 = vrot.slane %v1736_v1, 1  ;;  %v1838_v1 = vrot.slane %v3796_v25, 1 }
  0xa8   : > { %1088 = vrot.lane.b32.xlu1 %v1055_v13, %s3294_s18  ;;  %v1265_v13 = vsel %vm834_vm6, %v1260_v51, %v1264_v40  ;;  %v1727_v40 = vsel %vm834_vm6, %v1722_v46, %v1726_v43  ;;  %v1385_v51 = vsel %vm834_vm6, %v1380_v15, %v1384_v3  ;;  %v3247_v46 = vld [vmem:[#allocation2 + $0x2c] ss:$0 sps:$4 sm:$0x11]   ;;  %v3925_v43 = vld [vmem:[#allocation2 + $0x80] ss:$0 sps:$4 sm:$0x11]  }
  0xa9   : > { %v1453_v18 = vpop.permute.xlu0 %1452  ;;  %v958_v15 = vshll.u32 %v3913_v54, 16  ;;  %v963_v47 = vshll.u32 %v3925_v43, 16 }
  0xaa   : > { %v3854_v23 = vpop.permute.xlu1 %1174  ;;  %v1961_v11 = vsel %vm1858_vm11, %v1253_v50, %v1453_v18  ;;  %v951_v18 = vshll.u32 %v3875_v0, 16  ;;  %v1274_v0 = vshll.u32 %v3247_v46, 16  ;;  %v1063_v46 = vrot.slane %v3925_v43, 1 }
  0xab   : > { %1802 = vrot.lane.b32.xlu0 %v1715_v26, %s3296_s30  ;;  %v944_v26 = vshrl.u32 %v3861_v38, 16  ;;  %v2002_v32 = vsel %vm1887_vm12, %v1961_v11, %v3813_v39  ;;  %v3246_v39 = vld [vmem:[#allocation2 + $0x24] sm:$0xff]   ;;  %v1840_v43 = vrot.slane %v3848_v16, 1 }
  0xac   : > { %1186 = vrot.lane.b32.xlu1 %v3787_v45, %s3296_s30  ;;  %v953_v55 = vrot.slane %v951_v18, 1 }
  0xad   : > { %v1455_v35 = vpop.permute.xlu0 %1454 }
  0xae   : > { %v3866_v49 = vpop.permute.xlu1 %1194  ;;  %v1964_v50 = vsel %vm1858_vm11, %v1265_v13, %v1455_v35  ;;  %v949_v35 = vor.u32 %v948_v28, %v944_v26 }
  0xaf   : > { %1468 = vrot.lane.b32.xlu0 %v1436_v53, %s3295_s23  ;;  %v1269_v53 = vshll.u32 %v3246_v39, 16  ;;  %v2004_v62 = vsel %vm1887_vm12, %v1964_v50, %v3802_v27  ;;  %v1267_v27 = vshrl.u32 %v3246_v39, 16  ;;  %v960_v39 = vrot.slane %v958_v15, 1  ;;  %v3238_v15 = vld [vmem:[%s4278_s1 + $0x88] sm:$0xff]  }
  0xb0   : > { %1019 = vrot.lane.b32.xlu1 %v942_v63, %s3295_s23  ;;  %v1733_v63 = vrot.slane %v1731_v19, 1  ;;  %v954_v3 = vsel %vm834_vm6, %v949_v35, %v953_v55  ;;  %v3248_v19 = vld [vmem:[#allocation2 + $0xc] sm:$0xff]  }
  0xb1   : > { %v1475_v6 = vpop.permute.xlu0 %1474  ;;  %v1271_v13 = vrot.slane %v1269_v53, 1 }
  0xb2   : > { %v3890_v57 = vpop.permute.xlu1 %1076  ;;  %v1994_v48 = vsel %vm1858_vm11, %v1385_v51, %v1475_v6  ;;  %v3933_v6 = vld [vmem:[#allocation2 + $0x8c] ss:$0 sps:$4 sm:$0x11]  }
  0xb3   : > { %1566 = vrot.lane.b32.xlu0 %v3848_v16, %s3294_s18  ;;  %v2024_v18 = vsel %vm1887_vm12, %v1994_v48, %v3832_v21  ;;  %v1272_v51 = vor.u32 %v1271_v13, %v1267_v27  ;;  %v1441_v55 = vrot.slane %v3933_v6, 1  ;;  %v3250_v48 = vld [vmem:[#allocation2 + $0x84] sm:$0xff]   ;;  %v1741_v13 = vshrl.u32 %v3939_v36, 16 }
  0xb4   : > { %1090 = vrot.lane.b32.xlu1 %v1058_v20, %s3294_s18  ;;  %v3931_v20 = vld [vmem:[#allocation2 + $0x84] sm:$0xff]  }
  0xb5   : > { %v1789_v31 = vpop.permute.xlu0 %1788  ;;  %v1440_v35 = vrot.slane %v3931_v20, 1 }
  0xb6   : > { %v2030_v44 = vsel %vm1916_vm13, %v2002_v32, %v1789_v31  ;;  %v1097_v58 = vpop.permute.xlu1 %1096  ;;  %v1061_v31 = vsel %vm1031_vm2, %v1059_v56, %v1060_v30  ;;  %v1734_v32 = vor.u32 %v1733_v63, %v1729_v60  ;;  %v3236_v56 = vld [vmem:[#allocation2 + $0x98] ss:$0 sps:$4 sm:$0x11]   ;;  %v1837_v30 = vrot.slane %v3791_v17, 1  ;;  %v3956_v60 = vld [vmem:[#allocation2 + $0x9c] sm:$0xff]  }
  0xb7   : > { %2296 = vmatprep.mubr.bf16.mxu0 %v2030_v44  ;;  %1804 = vrot.lane.b32.xlu0 %v1727_v40, %s3296_s30  ;;  %v1276_v44 = vrot.slane %v1274_v0, 1  ;;  %v1389_v63 = vshll.u32 %v3956_v60, 16  ;;  %v965_v17 = vrot.slane %v963_v47, 1 }
  0xb8   : > { %2297 = vmatmul.mubr.bf16.vlgmr.msra.gmra.mrb[0].mxu0 %v1918_v14  ;;  %1188 = vrot.lane.b32.xlu1 %v3842_v7, %s3296_s30  ;;  %v956_v14 = vshrl.u32 %v3913_v54, 16  ;;  %v3971_v25 = vsel %vm1031_vm2, %v1837_v30, %v1838_v1  ;;  %v1353_v1 = vshll.u32 %v3886_v9, 16 }
  0xb9   : > { %v1791_v61 = vpop.permute.xlu0 %1790 }
  0xba   : > { %v2033_v11 = vsel %vm1916_vm13, %v2004_v62, %v1791_v61  ;;  %v1006_v26 = vpop.permute.xlu1 %1005  ;;  %v1739_v62 = vsel %vm834_vm6, %v1734_v32, %v1738_v34  ;;  %v961_v27 = vor.u32 %v960_v39, %v956_v14  ;;  %v1843_v32 = vrot.slane %v3883_v10, 1 }
  0xbb   : > { %2304 = vmatprep.mubr.bf16.mxu0 %v2033_v11  ;;  %1470 = vrot.lane.b32.xlu0 %v1439_v4, %s3295_s23  ;;  %v1862_v50 = vsel %vm1858_vm11, %v3248_v19, %v1006_v26  ;;  %v1062_v11 = vrot.slane %v3913_v54, 1  ;;  %v1748_v26 = vshll.u32 %v3236_v56, 16  ;;  %v1844_v34 = vrot.slane %v3902_v37, 1 }
  0xbc   : > { %1021 = vrot.lane.b32.xlu1 %v954_v3, %s3295_s23  ;;  %v1891_v21 = vsel %vm1887_vm12, %v1862_v50, %v3890_v57  ;;  %v1846_v19 = vrot.slane %v3939_v36, 1  ;;  %v1277_v50 = vsel %vm834_vm6, %v1272_v51, %v1276_v44  ;;  %v1391_v37 = vrot.slane %v1389_v63, 1 }
  0xbd   : > { %v1811_v28 = vpop.permute.xlu0 %1810  ;;  %v1921_v53 = vsel %vm1916_vm13, %v1891_v21, %v3854_v23  ;;  %v1743_v23 = vshll.u32 %v3939_v36, 16  ;;  %v3992_v47 = vsel %vm1031_vm2, %v1843_v32, %v1844_v34  ;;  %v1341_v21 = vshll.u32 %v3842_v7, 16 }
  0xbe   : > { %v2063_v40 = vsel %vm1916_vm13, %v2024_v18, %v1811_v28  ;;  %v1026_v61 = vpop.permute.xlu1 %1025  ;;  %v1841_v28 = vrot.slane %v3852_v22, 1  ;;  %v1847_v22 = vrot.slane %v3236_v56, 1  ;;  %v1346_v51 = vshll.u32 %v3838_v2, 16 }
  0xbf   : > { %2384 = vmatprep.mubr.bf16.mxu1 %v2063_v40  ;;  %1568 = vrot.lane.b32.xlu0 %v3883_v10, %s3294_s18  ;;  %v1882_v4 = vsel %vm1858_vm11, %v3250_v48, %v1026_v61  ;;  %v966_v40 = vsel %vm834_vm6, %v961_v27, %v965_v17  ;;  %v1387_v10 = vshrl.u32 %v3956_v60, 16  ;;  %v1064_v39 = vsel %vm1031_vm2, %v1062_v11, %v1063_v46  ;;  %v3252_v61 = vld [vmem:[#allocation2 + $0x18] sm:$0xff]  }
  0xc0   : > { %2305 = vmatmul.mubr.bf16.gmra.mrb[4].mxu0 %v1921_v53  ;;  %1092 = vrot.lane.b32.xlu1 %v1061_v31, %s3294_s18  ;;  %v1911_v0 = vsel %vm1887_vm12, %v1882_v4, %v1097_v58  ;;  %v1745_v31 = vrot.slane %v1743_v23, 1  ;;  %v3985_v16 = vsel %vm1031_vm2, %v1840_v43, %v1841_v28  ;;  %v3995_v44 = vsel %vm1031_vm2, %v1846_v19, %v1847_v22  ;;  %v3251_v53 = vld [vmem:[#allocation2 + $0xa4] ss:$0 sps:$4 sm:$0x11]  }
  0xc1   : > { %v1457_v57 = vpop.permute.xlu0 %1456  ;;  %v1951_v3 = vsel %vm1916_vm13, %v1911_v0, %v3866_v49  ;;  %v1442_v49 = vsel %vm1031_vm2, %v1440_v35, %v1441_v55  ;;  %v1394_v35 = vshll.u32 %v3251_v53, 16  ;;  %v1750_v56 = vrot.slane %v1748_v26, 1  ;;  %v3255_v53 = vld [vmem:[#allocation2 + $0x90] sm:$0xff]  }
  0xc2   : > { %2385 = vmatmul.mubr.bf16.vlgmr.msra.gmra.mrb[0].mxu1 %v1951_v3  ;;  %v1008_v58 = vpop.permute.xlu1 %1007  ;;  %v1746_v55 = vor.u32 %v1745_v31, %v1741_v13  ;;  %v1967_v30 = vsel %vm1858_vm11, %v1277_v50, %v1457_v57  ;;  %v1343_v60 = vrot.slane %v1341_v21, 1  ;;  %v1348_v63 = vrot.slane %v1346_v51, 1  ;;  %v3253_v50 = vld [vmem:[#allocation2 + $0x30] sm:$0xff]  }
  0xc3   : > { %1806 = vrot.lane.b32.xlu0 %v1739_v62, %s3296_s30  ;;  %3077 = vmatpush3.bf16.msra.mxu1 %v3823_v24  ;;  %v1339_v24 = vshrl.u32 %v3842_v7, 16  ;;  %v1864_v62 = vsel %vm1858_vm11, %v3252_v61, %v1008_v58  ;;  %v1351_v23 = vshrl.u32 %v3886_v9, 16  ;;  %v1358_v48 = vshll.u32 %v3881_v8, 16 }
  0xc4   : > { %1190 = vrot.lane.b32.xlu1 %v3886_v9, %s3296_s30  ;;  %3078 = vmatprep.subr.bf16.mxu1 %v3238_v15  ;;  %v1363_v11 = vshrl.u32 %v3931_v20, 16  ;;  %v1355_v0 = vrot.slane %v1353_v1, 1  ;;  %v1365_v13 = vshll.u32 %v3931_v20, 16  ;;  %v1370_v9 = vshll.u32 %v3933_v6, 16 }
  0xc5   : > { %v1555_v18 = vpop.permute.xlu0 %1554  ;;  %v1344_v17 = vor.u32 %v1343_v60, %v1339_v24  ;;  %v1360_v27 = vrot.slane %v1358_v48, 1  ;;  %v1751_v3 = vsel %vm834_vm6, %v1746_v55, %v1750_v56  ;;  %v1396_v43 = vrot.slane %v1394_v35, 1 }
  0xc6   : > { %v1079_v14 = vpop.permute.xlu1 %1078  ;;  %v2006_v7 = vsel %vm1887_vm12, %v1967_v30, %v1555_v18  ;;  %v1356_v28 = vor.u32 %v1355_v0, %v1351_v23  ;;  %v1367_v58 = vrot.slane %v1365_v13, 1  ;;  %v1372_v18 = vrot.slane %v1370_v9, 1  ;;  %v3256_v23 = vld [vmem:[#allocation2 + $0xa8] sm:$0xff]   ;;  %v3257_v0 = vld [vmem:[#allocation2 + $0xb0] ss:$0 sps:$4 sm:$0x11]  }
  0xc7   : > { %1472 = vrot.lane.b32.xlu0 %v1442_v49, %s3295_s23  ;;  %3079 = vmatpush3.bf16.msra.mxu1 %v3238_v15  ;;  %v1893_v4 = vsel %vm1887_vm12, %v1864_v62, %v1079_v14  ;;  %v1392_v15 = vor.u32 %v1391_v37, %v1387_v10  ;;  %v4019_v26 = vsel %vm834_vm6, %v1344_v17, %v1348_v63  ;;  %v1281_v49 = vshll.u32 %v3253_v50, 16  ;;  %v3254_v14 = vld [vmem:[#allocation2 + $0x38] ss:$0 sps:$4 sm:$0x11]   ;;  %v3258_v13 = vld [vmem:[#allocation2 + $0x24] sm:$0xff]  }
  0xc8   : > { %1023 = vrot.lane.b32.xlu1 %v966_v40, %s3295_s23  ;;  %v4024_v6 = vsel %vm834_vm6, %v1356_v28, %v1360_v27  ;;  %v1368_v32 = vor.u32 %v1367_v58, %v1363_v11  ;;  %v1279_v21 = vshrl.u32 %v3253_v50, 16  ;;  %v1401_v1 = vshll.u32 %v3256_v23, 16 }
  0xc9   : > { %v1793_v2 = vpop.permute.xlu0 %1792  ;;  %v1397_v34 = vsel %vm834_vm6, %v1392_v15, %v1396_v43  ;;  %v1283_v51 = vrot.slane %v1281_v49, 1  ;;  %v1399_v11 = vshrl.u32 %v3256_v23, 16  ;;  %v1406_v27 = vshll.u32 %v3257_v0, 16  ;;  %v3260_v49 = vld [vmem:[#allocation2 + $0x18] sm:$0xff]  }
  0xca   : > { %v2036_v57 = vsel %vm1916_vm13, %v2006_v7, %v1793_v2  ;;  %v1177_v46 = vpop.permute.xlu1 %1176  ;;  %v4030_v22 = vsel %vm834_vm6, %v1368_v32, %v1372_v18  ;;  %v3264_v23 = vld [vmem:[#allocation2 + $0x2c] ss:$0 sps:$4 sm:$0x11]  }
  0xcb   : > { %1570 = vrot.lane.b32.xlu0 %v3939_v36, %s3294_s18  ;;  %2312 = vmatprep.mubr.bf16.mxu0 %v2036_v57  ;;  %v1924_v8 = vsel %vm1916_vm13, %v1893_v4, %v1177_v46  ;;  %v1284_v61 = vor.u32 %v1283_v51, %v1279_v21  ;;  %v1403_v46 = vrot.slane %v1401_v1, 1  ;;  %v1408_v28 = vrot.slane %v1406_v27, 1 }
  0xcc   : > { %1094 = vrot.lane.b32.xlu1 %v1064_v39, %s3294_s18  ;;  %2313 = vmatmul.mubr.bf16.gmra.mrb[8].mxu0 %v1924_v8  ;;  %v1286_v39 = vshll.u32 %v3254_v14, 16  ;;  %v1820_v1 = vrot.slane %v3264_v23, 1 }
  0xcd   : > { %v1477_v36 = vpop.permute.xlu0 %1476 }
  0xce   : > { %v1028_v31 = vpop.permute.xlu1 %1027  ;;  %v1997_v10 = vsel %vm1858_vm11, %v1397_v34, %v1477_v36  ;;  %v1288_v62 = vrot.slane %v1286_v39, 1  ;;  %v1404_v36 = vor.u32 %v1403_v46, %v1399_v11  ;;  %v3259_v34 = vld [vmem:[#allocation2 + $0x3c] sm:$0xff]   ;;  %v3267_v46 = vld [vmem:[#allocation2 + $0x38] ss:$0 sps:$4 sm:$0x11]  }
  0xcf   : > { %1808 = vrot.lane.b32.xlu0 %v1751_v3, %s3296_s30  ;;  %v1884_v35 = vsel %vm1858_vm11, %v3255_v53, %v1028_v31  ;;  %v1291_v14 = vshrl.u32 %v3259_v34, 16  ;;  %v3262_v53 = vld [vmem:[#allocation2 + $0x44] ss:$0 sps:$4 sm:$0x11]   ;;  %v1823_v0 = vrot.slane %v3267_v46, 1 }
  0xd0   : > { %1192 = vrot.lane.b32.xlu1 %v3931_v20, %s3296_s30  ;;  %v1289_v7 = vsel %vm834_vm6, %v1284_v61, %v1288_v62  ;;  %v1409_v31 = vsel %vm834_vm6, %v1404_v36, %v1408_v28 }
  0xd1   : > { %v1575_v19 = vpop.permute.xlu0 %1574 }
  0xd2   : > { %v1099_v40 = vpop.permute.xlu1 %1098  ;;  %v2026_v37 = vsel %vm1887_vm12, %v1997_v10, %v1575_v19  ;;  %v1293_v19 = vshll.u32 %v3259_v34, 16  ;;  %v3261_v10 = vld [vmem:[#allocation2 + $0x20] ss:$0 sps:$4 sm:$0x11]  }
  0xd3   : > { %v1913_v55 = vsel %vm1887_vm12, %v1884_v35, %v1099_v40  ;;  %v1816_v40 = vrot.slane %v3260_v49, 1  ;;  %v1298_v35 = vshll.u32 %v3262_v53, 16  ;;  %v3271_v49 = vld [vmem:[#allocation2 + $0x3c] sm:$0xff]  }
  0xd4   : > { %v1295_v39 = vrot.slane %v1293_v19, 1  ;;  %v3270_v19 = vld [vmem:[#allocation2 + $0x30] sm:$0xff]  }
  0xd5   : > { %v1813_v24 = vpop.permute.xlu0 %1812 }
  0xd6   : > { %v2066_v20 = vsel %vm1916_vm13, %v2026_v37, %v1813_v24  ;;  %v1197_v56 = vpop.permute.xlu1 %1196  ;;  %v1817_v37 = vrot.slane %v3261_v10, 1  ;;  %v3272_v10 = vld [vmem:[#allocation2 + $0x44] ss:$0 sps:$4 sm:$0x11]  }
  0xd7   : > { %2392 = vmatprep.mubr.bf16.mxu1 %v2066_v20  ;;  %v1954_v30 = vsel %vm1916_vm13, %v1913_v55, %v1197_v56  ;;  %v3263_v20 = vld [vmem:[#allocation2 + $0x9c] sm:$0xff]  }
  0xd8   : > { %2393 = vmatmul.mubr.bf16.gmra.mrb[4].mxu1 %v1954_v30  ;;  %v1818_v62 = vsel %vm1031_vm2, %v1816_v40, %v1817_v37  ;;  %v1825_v40 = vrot.slane %v3271_v49, 1  ;;  %v1826_v37 = vrot.slane %v3272_v10, 1 }
  0xd9   : > { %v1459_v60 = vpop.permute.xlu0 %1458 }
  0xda   : > { %v1010_v63 = vpop.permute.xlu1 %1009  ;;  %v1970_v4 = vsel %vm1858_vm11, %v1289_v7, %v1459_v60  ;;  %v1300_v7 = vrot.slane %v1298_v35, 1 }
  0xdb   : > { %v1866_v9 = vsel %vm1858_vm11, %v3258_v13, %v1010_v63  ;;  %v1296_v63 = vor.u32 %v1295_v39, %v1291_v14  ;;  %v3274_v39 = vld [vmem:[#allocation2 + $0x50] ss:$0 sps:$4 sm:$0x11]  }
  0xdc   : > { %v1829_v53 = vrot.slane %v3274_v39, 1 }
  0xdd   : > { %v1557_v2 = vpop.permute.xlu0 %1556  ;;  %v1301_v27 = vsel %vm834_vm6, %v1296_v63, %v1300_v7  ;;  %v1317_v7 = vshll.u32 %v3749_v12, 16 }
  0xde   : > { %v1081_v48 = vpop.permute.xlu1 %1080  ;;  %v2008_v57 = vsel %vm1887_vm12, %v1970_v4, %v1557_v2 }
  0xdf   : > { %v1895_v15 = vsel %vm1887_vm12, %v1866_v9, %v1081_v48  ;;  %v3265_v48 = vld [vmem:[#allocation2 + $0x24] sm:$0xff]   ;;  %v1305_v9 = vshll.u32 %v3713_v59, 16 }
  0xe0   : > { %v1819_v4 = vrot.slane %v3265_v48, 1 }
  0xe1   : > { %v1795_v17 = vpop.permute.xlu0 %1794 }
  0xe2   : > { %v2039_v8 = vsel %vm1916_vm13, %v2008_v57, %v1795_v17  ;;  %v1179_v3 = vpop.permute.xlu1 %1178  ;;  %v3266_v17 = vld [vmem:[#allocation2 + $0x30] sm:$0xff]  }
  0xe3   : > { %2320 = vmatprep.mubr.bf16.mxu0 %v2039_v8  ;;  %v1927_v43 = vsel %vm1916_vm13, %v1895_v15, %v1179_v3  ;;  %v1822_v11 = vrot.slane %v3266_v17, 1  ;;  %v1821_v8 = vsel %vm1031_vm2, %v1819_v4, %v1820_v1  ;;  %v3276_v1 = vld [vmem:[#allocation2 + $0x5c] ss:$0 sps:$4 sm:$0x11]   ;;  %v1835_v17 = vrot.slane %v3756_v42, 1 }
  0xe4   : > { %2321 = vmatmul.mubr.bf16.gmra.mrb[12].mxu0 %v1927_v43  ;;  %v1832_v48 = vrot.slane %v3276_v1, 1 }
  0xe5   : > { %v1479_v58 = vpop.permute.xlu0 %1478  ;;  %v1824_v3 = vsel %vm1031_vm2, %v1822_v11, %v1823_v0 }
  0xe6   : > { %v1030_v18 = vpop.permute.xlu1 %1029  ;;  %v2000_v24 = vsel %vm1858_vm11, %v1409_v31, %v1479_v58  ;;  %v3268_v58 = vld [vmem:[#allocation2 + $0x48] sm:$0xff]   ;;  %v1307_v31 = vrot.slane %v1305_v9, 1  ;;  %v1322_v9 = vshll.u32 %v3740_v33, 16 }
  0xe7   : > { %v1886_v55 = vsel %vm1858_vm11, %v3263_v20, %v1030_v18  ;;  %v1303_v18 = vshrl.u32 %v3268_v58, 16 }
  0xe8   : > { %v1324_v33 = vrot.slane %v1322_v9, 1 }
  0xe9   : > { %v1577_v32 = vpop.permute.xlu0 %1576  ;;  %v1308_v20 = vor.u32 %v1307_v31, %v1303_v18 }
  0xea   : > { %v1101_v50 = vpop.permute.xlu1 %1100  ;;  %v2028_v21 = vsel %vm1887_vm12, %v2000_v24, %v1577_v32  ;;  %v3269_v32 = vld [vmem:[#allocation2 + $0x50] ss:$0 sps:$4 sm:$0x11]  }
  0xeb   : > { %v1915_v30 = vsel %vm1887_vm12, %v1886_v55, %v1101_v50  ;;  %v1310_v34 = vshll.u32 %v3269_v32, 16 }
  0xed   : > { %v1815_v51 = vpop.permute.xlu0 %1814  ;;  %v1312_v55 = vrot.slane %v1310_v34, 1  ;;  %v1329_v34 = vshll.u32 %v3787_v45, 16 }
  0xee   : > { %v2069_v56 = vsel %vm1916_vm13, %v2028_v21, %v1815_v51  ;;  %v1199_v61 = vpop.permute.xlu1 %1198  ;;  %v3273_v51 = vld [vmem:[#allocation2 + $0x48] sm:$0xff]  }
  0xef   : > { %2400 = vmatprep.mubr.bf16.mxu1 %v2069_v56  ;;  %v1957_v60 = vsel %vm1916_vm13, %v1915_v30, %v1199_v61  ;;  %v1828_v14 = vrot.slane %v3273_v51, 1  ;;  %v1827_v30 = vsel %vm1031_vm2, %v1825_v40, %v1826_v37  ;;  %v1327_v40 = vshrl.u32 %v3787_v45, 16 }
  0xf0   : > { %2401 = vmatmul.mubr.bf16.gmra.mrb[8].mxu1 %v1957_v60  ;;  %v1313_v60 = vsel %vm834_vm6, %v1308_v20, %v1312_v55  ;;  %v1331_v10 = vrot.slane %v1329_v34, 1  ;;  %v1334_v37 = vshll.u32 %v3780_v5, 16 }
  0xf1   : > { %v1461_v2 = vpop.permute.xlu0 %1460  ;;  %3080 = vmatprep.mubr.msk.bf16.mxu1 %vm1858_vm11, %v1818_v62  ;;  %v1830_v62 = vsel %vm1031_vm2, %v1828_v14, %v1829_v53 }
  0xf2   : > { %v1012_v57 = vpop.permute.xlu1 %1011  ;;  %v1973_v43 = vsel %vm1858_vm11, %v1301_v27, %v1461_v2  ;;  %v3275_v2 = vld [vmem:[#allocation2 + $0x54] sm:$0xff]   ;;  %v1315_v27 = vshrl.u32 %v3749_v12, 16  ;;  %v1332_v53 = vor.u32 %v1331_v10, %v1327_v40  ;;  %v1336_v45 = vrot.slane %v1334_v37, 1 }
  0xf3   : > { %v1868_v59 = vsel %vm1858_vm11, %v3270_v19, %v1012_v57  ;;  %v1831_v23 = vrot.slane %v3275_v2, 1  ;;  %v1834_v57 = vrot.slane %v3753_v41, 1 }
  0xf4   : > { %v1337_v5 = vsel %vm834_vm6, %v1332_v53, %v1336_v45 }
  0xf5   : > { %v1559_v13 = vpop.permute.xlu0 %1558 }
  0xf6   : > { %v1083_v15 = vpop.permute.xlu1 %1082  ;;  %v2010_v36 = vsel %vm1887_vm12, %v1973_v43, %v1559_v13  ;;  %v1319_v13 = vrot.slane %v1317_v7, 1  ;;  %v1833_v43 = vsel %vm1031_vm2, %v1831_v23, %v1832_v48  ;;  %v3282_v7 = vld [vmem:[#allocation2 + $0xb0] ss:$0 sps:$4 sm:$0x11]  }
  0xf7   : > { %v1897_v24 = vsel %vm1887_vm12, %v1868_v59, %v1083_v15  ;;  %v1853_v2 = vrot.slane %v3282_v7, 1 }
  0xf8   : > { %3081 = vmatmul.mubr.msk.bf16.vlgmr.msra.gmra.mrb[12].mxu1 %vm1858_vm11, %v1821_v8  ;;  %v3277_v8 = vld [vmem:[#allocation2 + $0x3c] sm:$0xff]   ;;  %v1320_v12 = vor.u32 %v1319_v13, %v1315_v27  ;;  %v3283_v27 = vld [vmem:[#allocation2 + $0xb4] sm:$0xff]  }
  0xf9   : > { %v1797_v28 = vpop.permute.xlu0 %1796  ;;  %3084 = vmatprep.mubr.msk.bf16.mxu1 %vm1858_vm11, %v1824_v3  ;;  %v3284_v13 = vld [vmem:[#allocation2 + $0xbc] ss:$0 sps:$4 sm:$0x11]  }
  0xfa   : > { %v2042_v50 = vsel %vm1916_vm13, %v2010_v36, %v1797_v28  ;;  %v1181_v21 = vpop.permute.xlu1 %1180  ;;  %v1836_v36 = vsel %vm1031_vm2, %v1834_v57, %v1835_v17  ;;  %v1325_v31 = vsel %vm834_vm6, %v1320_v12, %v1324_v33  ;;  %v1856_v9 = vrot.slane %v3284_v13, 1 }
  0xfb   : > { %2328 = vmatprep.mubr.bf16.mxu0 %v2042_v50  ;;  %v1930_v35 = vsel %vm1916_vm13, %v1897_v24, %v1181_v21  ;;  %v3278_v24 = vld [vmem:[#allocation2 + $0x48] sm:$0xff]  }
  0xfc   : > { %2329 = vmatmul.mubr.bf16.gmra.mrb[16].mxu0 %v1930_v35 }
  0xfd   : > { %v1463_v56 = vpop.permute.xlu0 %1462 }
  0xfe   : > { %v1014_v61 = vpop.permute.xlu1 %1013  ;;  %v1976_v11 = vsel %vm1858_vm11, %v1313_v60, %v1463_v56  ;;  %v3281_v60 = vld [vmem:[#allocation2 + $0xa8] sm:$0xff]  }
  0xff   : > { %v1870_v15 = vsel %vm1858_vm11, %v3277_v8, %v1014_v61 }
 0x100   : > { %3085 = vmatmul.mubr.msk.bf16.gmra.mrb[16].mxu1 %vm1858_vm11, %v1827_v30  ;;  %v3280_v30 = vld [vmem:[#allocation2 + $0xa4] ss:$0 sps:$4 sm:$0x11]  }
 0x101   : > { %v1561_v63 = vpop.permute.xlu0 %1560  ;;  %3088 = vmatprep.mubr.msk.bf16.mxu1 %vm1858_vm11, %v1830_v62  ;;  %v1850_v61 = vrot.slane %v3280_v30, 1 }
 0x102   : > { %v1085_v4 = vpop.permute.xlu1 %1084  ;;  %v2012_v46 = vsel %vm1887_vm12, %v1976_v11, %v1561_v63  ;;  %v1852_v63 = vrot.slane %v3281_v60, 1 }
 0x103   : > { %v1899_v41 = vsel %vm1887_vm12, %v1870_v15, %v1085_v4 }
 0x104   : > { %v1854_v11 = vsel %vm1031_vm2, %v1852_v63, %v1853_v2 }
 0x105   : > { %v1799_v0 = vpop.permute.xlu0 %1798 }
 0x106   : > { %v2045_v3 = vsel %vm1916_vm13, %v2012_v46, %v1799_v0  ;;  %v1183_v42 = vpop.permute.xlu1 %1182 }
 0x107   : > { %2336 = vmatprep.mubr.bf16.mxu0 %v2045_v3  ;;  %v1933_v28 = vsel %vm1916_vm13, %v1899_v41, %v1183_v42 }
 0x108   : > { %2337 = vmatmul.mubr.bf16.gmra.mrb[20].mxu0 %v1933_v28  ;;  %3089 = vmatmul.mubr.msk.bf16.gmra.mrb[20].mxu1 %vm1858_vm11, %v1833_v43 }
 0x109   : > { %v1465_v58 = vpop.permute.xlu0 %1464  ;;  %3092 = vmatprep.mubr.msk.bf16.mxu1 %vm1858_vm11, %v1836_v36 }
 0x10a   : > { %v1016_v18 = vpop.permute.xlu1 %1015  ;;  %v1979_v59 = vsel %vm1858_vm11, %v1325_v31, %v1465_v58 }
 0x10b   : > { %v1872_v21 = vsel %vm1858_vm11, %v3278_v24, %v1016_v18 }
 0x10d   : > { %v1563_v32 = vpop.permute.xlu0 %1562 }
 0x10e   : > { %v1087_v19 = vpop.permute.xlu1 %1086  ;;  %v2014_v50 = vsel %vm1887_vm12, %v1979_v59, %v1563_v32 }
 0x10f   : > { %v1901_v14 = vsel %vm1887_vm12, %v1872_v21, %v1087_v19 }
 0x110   : > { %3093 = vmatmul.mubr.msk.bf16.gmra.mrb[24].mxu1 %vm1858_vm11, %v3971_v25 }
 0x111   : > { %v1801_v49 = vpop.permute.xlu0 %1800  ;;  %3096 = vmatprep.mubr.msk.bf16.mxu1 %vm1858_vm11, %v3985_v16  ;;  %v3279_v16 = vld [vmem:[#allocation2 + $0x9c] sm:$0xff]  }
 0x112   : > { %v2048_v51 = vsel %vm1916_vm13, %v2014_v50, %v1801_v49  ;;  %v1185_v39 = vpop.permute.xlu1 %1184  ;;  %v1849_v56 = vrot.slane %v3279_v16, 1 }
 0x113   : > { %2344 = vmatprep.mubr.bf16.mxu0 %v2048_v51  ;;  %v1936_v25 = vsel %vm1916_vm13, %v1901_v14, %v1185_v39 }
 0x114   : > { %2345 = vmatmul.mubr.bf16.gmra.mrb[24].mxu0 %v1936_v25 }
 0x115   : > { %v1467_v35 = vpop.permute.xlu0 %1466 }
 0x116   : > { %v1018_v20 = vpop.permute.xlu1 %1017  ;;  %v1982_v23 = vsel %vm1858_vm11, %v1337_v5, %v1467_v35 }
 0x118   : > { %3097 = vmatmul.mubr.msk.bf16.gmra.mrb[28].mxu1 %vm1858_vm11, %v3992_v47  ;;  %v1874_v47 = vsel %vm1858_vm11, %v3762_v52, %v1018_v20  ;;  %v1855_v52 = vrot.slane %v3283_v27, 1 }
 0x119   : > { %v1565_v55 = vpop.permute.xlu0 %1564  ;;  %3100 = vmatprep.mubr.msk.bf16.mxu1 %vm1858_vm11, %v3995_v44  ;;  %v1851_v44 = vsel %vm1031_vm2, %v1849_v56, %v1850_v61 }
 0x11a   : > { %v1089_v62 = vpop.permute.xlu1 %1088  ;;  %v2016_v1 = vsel %vm1887_vm12, %v1982_v23, %v1565_v55  ;;  %v1857_v3 = vsel %vm1031_vm2, %v1855_v52, %v1856_v9 }
 0x11b   : > { %v1903_v57 = vsel %vm1887_vm12, %v1874_v47, %v1089_v62 }
 0x11d   : > { %v1803_v48 = vpop.permute.xlu0 %1802 }
 0x11e   : > { %v2051_v4 = vsel %vm1916_vm13, %v2016_v1, %v1803_v48  ;;  %v1187_v17 = vpop.permute.xlu1 %1186 }
 0x11f   : > { %2352 = vmatprep.mubr.bf16.mxu0 %v2051_v4  ;;  %v1939_v46 = vsel %vm1916_vm13, %v1903_v57, %v1187_v17 }
 0x120   : > { %2353 = vmatmul.mubr.bf16.gmra.mrb[28].mxu0 %v1939_v46  ;;  %3101 = vmatmul.mubr.msk.bf16.gmra.mrb[32].mxu1 %vm1858_vm11, %v1851_v44 }
 0x121   : > { %v1469_v0 = vpop.permute.xlu0 %1468  ;;  %3104 = vmatprep.mubr.msk.bf16.mxu1 %vm1858_vm11, %v1854_v11 }
 0x122   : > { %v1020_v8 = vpop.permute.xlu1 %1019  ;;  %v1985_v41 = vsel %vm1858_vm11, %v4019_v26, %v1469_v0 }
 0x123   : > { %v1876_v28 = vsel %vm1858_vm11, %v3809_v29, %v1020_v8 }
 0x125   : > { %v1567_v15 = vpop.permute.xlu0 %1566 }
 0x126   : > { %v1091_v43 = vpop.permute.xlu1 %1090  ;;  %v2018_v42 = vsel %vm1887_vm12, %v1985_v41, %v1567_v15 }
 0x127   : > { %v1905_v33 = vsel %vm1887_vm12, %v1876_v28, %v1091_v43 }
 0x128   : > { %3105 = vmatmul.mubr.msk.bf16.gmra.mrb[36].mxu1 %vm1858_vm11, %v1857_v3 }
 0x129   : > { %v1805_v36 = vpop.permute.xlu0 %1804 }
 0x12a   : > { %v2054_v12 = vsel %vm1916_vm13, %v2018_v42, %v1805_v36  ;;  %v1189_v58 = vpop.permute.xlu1 %1188 }
 0x12b   : > { %2360 = vmatprep.mubr.bf16.mxu0 %v2054_v12  ;;  %v1942_v18 = vsel %vm1916_vm13, %v1905_v33, %v1189_v58 }
 0x12c   : > { %2361 = vmatmul.mubr.bf16.gmra.mrb[32].mxu0 %v1942_v18 }
 0x12d   : > { %v1471_v31 = vpop.permute.xlu0 %1470 }
 0x12e   : > { %v1022_v32 = vpop.permute.xlu1 %1021  ;;  %v1988_v19 = vsel %vm1858_vm11, %v4024_v6, %v1471_v31 }
 0x12f   : > { %v1878_v29 = vsel %vm1858_vm11, %v3861_v38, %v1022_v32 }
 0x131   : > { %v1569_v26 = vpop.permute.xlu0 %1568 }
 0x132   : > { %v1093_v34 = vpop.permute.xlu1 %1092  ;;  %v2020_v59 = vsel %vm1887_vm12, %v1988_v19, %v1569_v26  ;;  %v4157_v26 = vld [vmem:[%s4279_s2] ss:$0 sm:$0xff] }
 0x133   : > { %v1907_v40 = vsel %vm1887_vm12, %v1878_v29, %v1093_v34 }
 0x135   : > { %v1807_v50 = vpop.permute.xlu0 %1806 }
 0x136   : > { %v2057_v49 = vsel %vm1916_vm13, %v2020_v59, %v1807_v50  ;;  %v1191_v10 = vpop.permute.xlu1 %1190 }
 0x137   : > { %2368 = vmatprep.mubr.bf16.mxu0 %v2057_v49  ;;  %v1945_v37 = vsel %vm1916_vm13, %v1907_v40, %v1191_v10 }
 0x138   : > { %2369 = vmatmul.mubr.bf16.gmra.mrb[36].mxu0 %v1945_v37 }
 0x139   : > { %v1473_v24 = vpop.permute.xlu0 %1472 }
 0x13a   : > { %v1024_v21 = vpop.permute.xlu1 %1023  ;;  %v1991_v6 = vsel %vm1858_vm11, %v4030_v22, %v1473_v24 }
 0x13b   : > { %v1880_v38 = vsel %vm1858_vm11, %v3913_v54, %v1024_v21 }
 0x13d   : > { %v1571_v51 = vpop.permute.xlu0 %1570 }
 0x13e   : > { %v1095_v14 = vpop.permute.xlu1 %1094  ;;  %v2022_v39 = vsel %vm1887_vm12, %v1991_v6, %v1571_v51 }
 0x13f   : > { %v1909_v45 = vsel %vm1887_vm12, %v1880_v38, %v1095_v14 }
 0x141   : > { %v1809_v25 = vpop.permute.xlu0 %1808 }
 0x142   : > { %v2060_v53 = vsel %vm1916_vm13, %v2022_v39, %v1809_v25  ;;  %v1193_v35 = vpop.permute.xlu1 %1192 }
 0x143   : > { %2376 = vmatprep.mubr.bf16.mxu0 %v2060_v53  ;;  %v1948_v20 = vsel %vm1916_vm13, %v1909_v45, %v1193_v35 }
 0x144   : > { %2377 = vmatmul.mubr.bf16.gmra.mrb[40].mxu0 %v1948_v20 }
 0x18b   : > { %v2976_v5 = vpop.f32.mrb[0].mxu0 }
 0x18c   : > { %v2977_v55 = vpop.f32.mrb[1].mxu0 }
 0x18d   : > { %v2978_v16 = vadd.f32 %v2977_v55, %v2976_v5  ;;  %v2979_v56 = vpop.f32.mrb[2].mxu0 }
 0x18e   : > { %v2980_v22 = vpop.f32.mrb[3].mxu0 }
 0x18f   : > { %v2981_v30 = vadd.f32 %v2980_v22, %v2979_v56  ;;  %v2299_v59 = vadd.f32 %v2978_v16, %v4157_v26 }
 0x191   : > { %v2302_v37 = vadd.f32 %v2981_v30, %v4157_v26 }
 0x193   : > { %v2982_v61 = vpop.f32.mrb[4].mxu0 }
 0x194   : > { %v2983_v62 = vpop.f32.mrb[5].mxu0 }
 0x195   : > { %v2984_v60 = vadd.f32 %v2983_v62, %v2982_v61  ;;  %v2985_v63 = vpop.f32.mrb[6].mxu0  ;;  %v3042_v7 = vpop.f32.mrb[0].mxu1 }
 0x196   : > { %v2986_v54 = vpop.f32.mrb[7].mxu0  ;;  %v3043_v23 = vpop.f32.mrb[1].mxu1 }
 0x197   : > { %v2987_v2 = vadd.f32 %v2986_v54, %v2985_v63  ;;  %v4142_v1 = vadd.f32 %v3043_v23, %v3042_v7  ;;  %v3045_v48 = vpop.f32.mrb[2].mxu1  ;;  %v2307_v34 = vadd.f32 %v2984_v60, %v4157_v26 }
 0x198   : > { %v3046_v47 = vpop.f32.mrb[3].mxu1 }
 0x199   : > { %v4144_v4 = vadd.f32 %v3046_v47, %v3045_v48  ;;  %v2310_v49 = vadd.f32 %v2987_v2, %v4157_v26 }
 0x19f   : > { %v2988_v44 = vpop.f32.mrb[8].mxu0 }
 0x1a0   : > { %v2989_v57 = vpop.f32.mrb[9].mxu0 }
 0x1a1   : > { %v2990_v17 = vadd.f32 %v2989_v57, %v2988_v44  ;;  %v2991_v11 = vpop.f32.mrb[10].mxu0 }
 0x1a2   : > { %v2992_v46 = vpop.f32.mrb[11].mxu0 }
 0x1a3   : > { %v2993_v0 = vadd.f32 %v2992_v46, %v2991_v11  ;;  %v2315_v62 = vadd.f32 %v2990_v17, %v4157_v26 }
 0x1a5   : > { %v2318_v23 = vadd.f32 %v2993_v0, %v4157_v26 }
 0x1ab   : > { %v3048_v27 = vpop.f32.mrb[4].mxu1 }
 0x1ac   : > { %v3049_v52 = vpop.f32.mrb[5].mxu1 }
 0x1ad   : > { %v4146_v13 = vadd.f32 %v3049_v52, %v3048_v27  ;;  %v3051_v9 = vpop.f32.mrb[6].mxu1 }
 0x1ae   : > { %v3052_v8 = vpop.f32.mrb[7].mxu1 }
 0x1af   : > { %v4148_v15 = vadd.f32 %v3052_v8, %v3051_v9 }
 0x1b7   : > { %v2994_v3 = vpop.f32.mrb[12].mxu0 }
 0x1b8   : > { %v2995_v43 = vpop.f32.mrb[13].mxu0 }
 0x1b9   : > { %v2996_v41 = vadd.f32 %v2995_v43, %v2994_v3  ;;  %v2997_v42 = vpop.f32.mrb[14].mxu0 }
 0x1ba   : > { %v2998_v36 = vpop.f32.mrb[15].mxu0 }
 0x1bb   : > { %v2999_v28 = vadd.f32 %v2998_v36, %v2997_v42  ;;  %v2323_v56 = vadd.f32 %v2996_v41, %v4157_v26 }
 0x1bd   : > { %v2326_v54 = vadd.f32 %v2999_v28, %v4157_v26 }
 0x1c3   : > { %v3054_v12 = vpop.f32.mrb[8].mxu1 }
 0x1c4   : > { %v3055_v33 = vpop.f32.mrb[9].mxu1 }
 0x1c5   : > { %v4150_v58 = vadd.f32 %v3055_v33, %v3054_v12  ;;  %v3057_v18 = vpop.f32.mrb[10].mxu1 }
 0x1c6   : > { %v3058_v31 = vpop.f32.mrb[11].mxu1 }
 0x1c7   : > { %v4152_v32 = vadd.f32 %v3058_v31, %v3057_v18 }
 0x1cb   : > { %v3082_v19 = vpop.f32.mrb[12].mxu1 }
 0x1cc   : > { %v2452_v50 = vadd.f32 %v3082_v19, %v2307_v34  ;;  %v2443_v29 = vpop.f32.mrb[13].mxu1 }
 0x1cd   : > { %v2444_v40 = vadd.f32 %v2443_v29, %v2299_v59  ;;  %v3083_v10 = vpop.f32.mrb[14].mxu1 }
 0x1ce   : > { %v2556_v24 = vmax.f32 %v2452_v50, 0.0  ;;  %v2455_v21 = vadd.f32 %v3083_v10, %v2310_v49  ;;  %v2446_v51 = vpop.f32.mrb[15].mxu1 }
 0x1cf   : > { %v2554_v14 = vmax.f32 %v2444_v40, 0.0  ;;  %v2447_v6 = vadd.f32 %v2446_v51, %v2302_v37  ;;  %v3000_v39 = vpop.f32.mrb[16].mxu0 }
 0x1d0   : > { %v2934_v25 = vpack.c.bf16 %v2556_v24, %v2556_v24  ;;  %v2557_v38 = vmax.f32 %v2455_v21, 0.0  ;;  %v3001_v53 = vpop.f32.mrb[17].mxu0 }
 0x1d1   : > { %v2932_v45 = vpack.c.bf16 %v2554_v14, %v2554_v14  ;;  %v2555_v35 = vmax.f32 %v2447_v6, 0.0  ;;  %v3002_v20 = vadd.f32 %v3001_v53, %v3000_v39  ;;  %v3003_v5 = vpop.f32.mrb[18].mxu0 }
 0x1d2   : > { %2697 = vst.msk [vmem:[%s4168_s10 + $0x8] sm:$0xf] %vm172_vm0, %v2934_v25  ;;  %v2935_v55 = vpack.c.bf16 %v2557_v38, %v2557_v38  ;;  %v3004_v16 = vpop.f32.mrb[19].mxu0 }
 0x1d3   : > { %2694 = vst.msk [vmem:[%s4168_s10] sm:$0xf] %vm172_vm0, %v2932_v45  ;;  %v2933_v22 = vpack.c.bf16 %v2555_v35, %v2555_v35  ;;  %v3005_v30 = vadd.f32 %v3004_v16, %v3003_v5  ;;  %v3086_v61 = vpop.f32.mrb[16].mxu1  ;;  %v2331_v0 = vadd.f32 %v3002_v20, %v4157_v26 }
 0x1d4   : > { %2698 = vst.msk [vmem:[%s4168_s10 + $0xc] sm:$0x7] %vm2695_vm14, %v2935_v55  ;;  %v2468_v60 = vadd.f32 %v3086_v61, %v2323_v56  ;;  %v2459_v63 = vpop.f32.mrb[17].mxu1 }
 0x1d5   : > { %2696 = vst.msk [vmem:[%s4168_s10 + $0x4] sm:$0x7] %vm2695_vm14, %v2933_v22  ;;  %v2460_v7 = vadd.f32 %v2459_v63, %v2315_v62  ;;  %v3087_v2 = vpop.f32.mrb[18].mxu1  ;;  %v2334_v18 = vadd.f32 %v3005_v30, %v4157_v26 }
 0x1d6   : > { %v2560_v48 = vmax.f32 %v2468_v60, 0.0  ;;  %v2471_v47 = vadd.f32 %v3087_v2, %v2326_v54  ;;  %v2462_v44 = vpop.f32.mrb[19].mxu1 }
 0x1d7   : > { %v2558_v57 = vmax.f32 %v2460_v7, 0.0  ;;  %v2463_v17 = vadd.f32 %v2462_v44, %v2318_v23 }
 0x1d8   : > { %v2938_v11 = vpack.c.bf16 %v2560_v48, %v2560_v48  ;;  %v2561_v46 = vmax.f32 %v2471_v47, 0.0  ;;  %v2387_v47 = vadd.f32 %v4142_v1, %v4157_v26 }
 0x1d9   : > { %v2936_v27 = vpack.c.bf16 %v2558_v57, %v2558_v57  ;;  %v2559_v52 = vmax.f32 %v2463_v17, 0.0 }
 0x1da   : > { %2701 = vst.msk [vmem:[%s4168_s10 + $0x18] sm:$0xf] %vm172_vm0, %v2938_v11  ;;  %v2939_v9 = vpack.c.bf16 %v2561_v46, %v2561_v46 }
 0x1db   : > { %2699 = vst.msk [vmem:[%s4168_s10 + $0x10] sm:$0xf] %vm172_vm0, %v2936_v27  ;;  %v2937_v8 = vpack.c.bf16 %v2559_v52, %v2559_v52  ;;  %v3006_v3 = vpop.f32.mrb[20].mxu0  ;;  %v3090_v43 = vpop.f32.mrb[20].mxu1  ;;  %v2390_v52 = vadd.f32 %v4144_v4, %v4157_v26 }
 0x1dc   : > { %2702 = vst.msk [vmem:[%s4168_s10 + $0x1c] sm:$0x7] %vm2695_vm14, %v2939_v9  ;;  %v3007_v41 = vpop.f32.mrb[21].mxu0  ;;  %v2475_v42 = vpop.f32.mrb[21].mxu1 }
 0x1dd   : > { %2700 = vst.msk [vmem:[%s4168_s10 + $0x14] sm:$0x7] %vm2695_vm14, %v2937_v8  ;;  %v3008_v36 = vadd.f32 %v3007_v41, %v3006_v3  ;;  %v2476_v28 = vadd.f32 %v2475_v42, %v2331_v0  ;;  %v3009_v12 = vpop.f32.mrb[22].mxu0  ;;  %v3091_v33 = vpop.f32.mrb[22].mxu1 }
 0x1de   : > { %v3010_v31 = vpop.f32.mrb[23].mxu0  ;;  %v2478_v34 = vpop.f32.mrb[23].mxu1 }
 0x1df   : > { %v2339_v19 = vadd.f32 %v3008_v36, %v4157_v26  ;;  %v2562_v59 = vmax.f32 %v2476_v28, 0.0  ;;  %v3011_v50 = vadd.f32 %v3010_v31, %v3009_v12  ;;  %v2479_v29 = vadd.f32 %v2478_v34, %v2334_v18 }
 0x1e0   : > { %v2403_v31 = vadd.f32 %v4150_v58, %v4157_v26  ;;  %v2398_v58 = vadd.f32 %v4148_v15, %v4157_v26 }
 0x1e1   : > { %v2484_v49 = vadd.f32 %v3090_v43, %v2339_v19  ;;  %v2940_v40 = vpack.c.bf16 %v2562_v59, %v2562_v59  ;;  %v2342_v10 = vadd.f32 %v3011_v50, %v4157_v26  ;;  %v2563_v37 = vmax.f32 %v2479_v29, 0.0 }
 0x1e2   : > { %v2395_v50 = vadd.f32 %v4146_v13, %v4157_v26 }
 0x1e3   : > { %v2564_v24 = vmax.f32 %v2484_v49, 0.0  ;;  %2703 = vst.msk [vmem:[%s4168_s10 + $0x20] sm:$0xf] %vm172_vm0, %v2940_v40  ;;  %v2487_v21 = vadd.f32 %v3091_v33, %v2342_v10  ;;  %v2941_v51 = vpack.c.bf16 %v2563_v37, %v2563_v37  ;;  %v3094_v14 = vpop.f32.mrb[24].mxu1  ;;  %v2406_v40 = vadd.f32 %v4152_v32, %v4157_v26 }
 0x1e4   : > { %v2491_v6 = vpop.f32.mrb[25].mxu1 }
 0x1e5   : > { %v2942_v39 = vpack.c.bf16 %v2564_v24, %v2564_v24  ;;  %v2565_v25 = vmax.f32 %v2487_v21, 0.0  ;;  %2704 = vst.msk [vmem:[%s4168_s10 + $0x24] sm:$0x7] %vm2695_vm14, %v2941_v51  ;;  %v3095_v38 = vpop.f32.mrb[26].mxu1 }
 0x1e6   : > { %v2494_v53 = vpop.f32.mrb[27].mxu1 }
 0x1e7   : > { %2705 = vst.msk [vmem:[%s4168_s10 + $0x28] sm:$0xf] %vm172_vm0, %v2942_v39  ;;  %v2943_v45 = vpack.c.bf16 %v2565_v25, %v2565_v25  ;;  %v3012_v35 = vpop.f32.mrb[24].mxu0 }
 0x1e8   : > { %v3013_v20 = vpop.f32.mrb[25].mxu0 }
 0x1e9   : > { %2706 = vst.msk [vmem:[%s4168_s10 + $0x2c] sm:$0x7] %vm2695_vm14, %v2943_v45  ;;  %v3014_v5 = vadd.f32 %v3013_v20, %v3012_v35  ;;  %v3015_v55 = vpop.f32.mrb[26].mxu0 }
 0x1ea   : > { %v3016_v16 = vpop.f32.mrb[27].mxu0 }
 0x1eb   : > { %v3017_v56 = vadd.f32 %v3016_v16, %v3015_v55  ;;  %v2347_v22 = vadd.f32 %v3014_v5, %v4157_v26  ;;  %v4203_v30 = vpop.f32.mrb[28].mxu1 }
 0x1ec   : > { %v4205_v61 = vpop.f32.mrb[29].mxu1 }
 0x1ed   : > { %v2492_v62 = vadd.f32 %v2491_v6, %v2347_v22  ;;  %v2350_v60 = vadd.f32 %v3017_v56, %v4157_v26  ;;  %v4208_v63 = vpop.f32.mrb[30].mxu1 }
 0x1ee   : > { %v4210_v54 = vpop.f32.mrb[31].mxu1 }
 0x1ef   : > { %v2566_v7 = vmax.f32 %v2492_v62, 0.0  ;;  %v2495_v2 = vadd.f32 %v2494_v53, %v2350_v60 }
 0x1f1   : > { %v2944_v23 = vpack.c.bf16 %v2566_v7, %v2566_v7  ;;  %v2567_v48 = vmax.f32 %v2495_v2, 0.0 }
 0x1f3   : > { %2707 = vst.msk [vmem:[%s4168_s10 + $0x30] sm:$0xf] %vm172_vm0, %v2944_v23  ;;  %v2945_v44 = vpack.c.bf16 %v2567_v48, %v2567_v48  ;;  %v3018_v57 = vpop.f32.mrb[28].mxu0  ;;  %v3102_v17 = vpop.f32.mrb[32].mxu1 }
 0x1f4   : > { %v2532_v11 = vadd.f32 %v3102_v17, %v2387_v47  ;;  %v3019_v46 = vpop.f32.mrb[29].mxu0  ;;  %v4216_v27 = vpop.f32.mrb[33].mxu1 }
 0x1f5   : > { %2708 = vst.msk [vmem:[%s4168_s10 + $0x34] sm:$0x7] %vm2695_vm14, %v2945_v44  ;;  %v3020_v9 = vadd.f32 %v3019_v46, %v3018_v57  ;;  %v3021_v8 = vpop.f32.mrb[30].mxu0  ;;  %v3103_v3 = vpop.f32.mrb[34].mxu1 }
 0x1f6   : > { %v2576_v43 = vmax.f32 %v2532_v11, 0.0  ;;  %v2535_v1 = vadd.f32 %v3103_v3, %v2390_v52  ;;  %v3022_v0 = vpop.f32.mrb[31].mxu0  ;;  %v4222_v41 = vpop.f32.mrb[35].mxu1 }
 0x1f7   : > { %v2355_v42 = vadd.f32 %v3020_v9, %v4157_v26  ;;  %v3023_v36 = vadd.f32 %v3022_v0, %v3021_v8 }
 0x1f8   : > { %v2954_v28 = vpack.c.bf16 %v2576_v43, %v2576_v43  ;;  %v2577_v12 = vmax.f32 %v2535_v1, 0.0 }
 0x1f9   : > { %v2500_v33 = vadd.f32 %v3094_v14, %v2355_v42  ;;  %v2358_v18 = vadd.f32 %v3023_v36, %v4157_v26 }
 0x1fa   : > { %2717 = vst.msk [vmem:[%s4168_s10 + $0x58] sm:$0xf] %vm172_vm0, %v2954_v28  ;;  %v2955_v4 = vpack.c.bf16 %v2577_v12, %v2577_v12 }
 0x1fb   : > { %v2568_v34 = vmax.f32 %v2500_v33, 0.0  ;;  %v2503_v19 = vadd.f32 %v3095_v38, %v2358_v18  ;;  %v3106_v59 = vpop.f32.mrb[36].mxu1 }
 0x1fc   : > { %2718 = vst.msk [vmem:[%s4168_s10 + $0x5c] sm:$0x7] %vm2695_vm14, %v2955_v4  ;;  %v2548_v29 = vadd.f32 %v3106_v59, %v2403_v31  ;;  %v2539_v49 = vpop.f32.mrb[37].mxu1 }
 0x1fd   : > { %v2946_v10 = vpack.c.bf16 %v2568_v34, %v2568_v34  ;;  %v2569_v37 = vmax.f32 %v2503_v19, 0.0  ;;  %v2540_v24 = vadd.f32 %v2539_v49, %v2395_v50  ;;  %v3107_v21 = vpop.f32.mrb[38].mxu1 }
 0x1fe   : > { %v2580_v51 = vmax.f32 %v2548_v29, 0.0  ;;  %v2551_v14 = vadd.f32 %v3107_v21, %v2406_v40  ;;  %v2542_v6 = vpop.f32.mrb[39].mxu1 }
 0x1ff   : > { %2709 = vst.msk [vmem:[%s4168_s10 + $0x38] sm:$0xf] %vm172_vm0, %v2946_v10  ;;  %v2947_v13 = vpack.c.bf16 %v2569_v37, %v2569_v37  ;;  %v2578_v39 = vmax.f32 %v2540_v24, 0.0  ;;  %v2543_v25 = vadd.f32 %v2542_v6, %v2398_v58  ;;  %v3024_v38 = vpop.f32.mrb[32].mxu0 }
 0x200   : > { %v2958_v32 = vpack.c.bf16 %v2580_v51, %v2580_v51  ;;  %v2581_v53 = vmax.f32 %v2551_v14, 0.0  ;;  %v3025_v45 = vpop.f32.mrb[33].mxu0 }
 0x201   : > { %2710 = vst.msk [vmem:[%s4168_s10 + $0x3c] sm:$0x7] %vm2695_vm14, %v2947_v13  ;;  %v2956_v35 = vpack.c.bf16 %v2578_v39, %v2578_v39  ;;  %v2579_v15 = vmax.f32 %v2543_v25, 0.0  ;;  %v3026_v20 = vadd.f32 %v3025_v45, %v3024_v38  ;;  %v3027_v5 = vpop.f32.mrb[34].mxu0 }
 0x202   : > { %2721 = vst.msk [vmem:[%s4168_s10 + $0x68] sm:$0xf] %vm172_vm0, %v2958_v32  ;;  %v2959_v55 = vpack.c.bf16 %v2581_v53, %v2581_v53  ;;  %v3028_v16 = vpop.f32.mrb[35].mxu0 }
 0x203   : > { %2719 = vst.msk [vmem:[%s4168_s10 + $0x60] sm:$0xf] %vm172_vm0, %v2956_v35  ;;  %v2957_v56 = vpack.c.bf16 %v2579_v15, %v2579_v15  ;;  %v2363_v22 = vadd.f32 %v3026_v20, %v4157_v26  ;;  %v3029_v62 = vadd.f32 %v3028_v16, %v3027_v5 }
 0x204   : > { %2722 = vst.msk [vmem:[%s4168_s10 + $0x6c] sm:$0x7] %vm2695_vm14, %v2959_v55 }
 0x205   : > { %2720 = vst.msk [vmem:[%s4168_s10 + $0x64] sm:$0x7] %vm2695_vm14, %v2957_v56  ;;  %v2508_v60 = vadd.f32 %v4205_v61, %v2363_v22  ;;  %v2366_v7 = vadd.f32 %v3029_v62, %v4157_v26 }
 0x207   : > { %v2570_v2 = vmax.f32 %v2508_v60, 0.0  ;;  %v2511_v23 = vadd.f32 %v4210_v54, %v2366_v7 }
 0x209   : > { %v2948_v48 = vpack.c.bf16 %v2570_v2, %v2570_v2  ;;  %v2571_v47 = vmax.f32 %v2511_v23, 0.0 }
 0x20b   : > { %2711 = vst.msk [vmem:[%s4168_s10 + $0x40] sm:$0xf] %vm172_vm0, %v2948_v48  ;;  %v2949_v44 = vpack.c.bf16 %v2571_v47, %v2571_v47  ;;  %v3030_v57 = vpop.f32.mrb[36].mxu0 }
 0x20c   : > { %v3031_v17 = vpop.f32.mrb[37].mxu0 }
 0x20d   : > { %2712 = vst.msk [vmem:[%s4168_s10 + $0x44] sm:$0x7] %vm2695_vm14, %v2949_v44  ;;  %v3032_v11 = vadd.f32 %v3031_v17, %v3030_v57  ;;  %v3033_v46 = vpop.f32.mrb[38].mxu0 }
 0x20e   : > { %v3034_v52 = vpop.f32.mrb[39].mxu0 }
 0x20f   : > { %v2371_v61 = vadd.f32 %v3032_v11, %v4157_v26  ;;  %v3035_v9 = vadd.f32 %v3034_v52, %v3033_v46 }
 0x211   : > { %v2516_v8 = vadd.f32 %v4203_v30, %v2371_v61  ;;  %v2374_v54 = vadd.f32 %v3035_v9, %v4157_v26 }
 0x213   : > { %v2572_v3 = vmax.f32 %v2516_v8, 0.0  ;;  %v2519_v43 = vadd.f32 %v4208_v63, %v2374_v54 }
 0x215   : > { %v2950_v1 = vpack.c.bf16 %v2572_v3, %v2572_v3  ;;  %v2573_v0 = vmax.f32 %v2519_v43, 0.0 }
 0x217   : > { %2713 = vst.msk [vmem:[%s4168_s10 + $0x48] sm:$0xf] %vm172_vm0, %v2950_v1  ;;  %v2951_v42 = vpack.c.bf16 %v2573_v0, %v2573_v0  ;;  %v3036_v36 = vpop.f32.mrb[40].mxu0 }
 0x218   : > { %v3037_v28 = vpop.f32.mrb[41].mxu0 }
 0x219   : > { %2714 = vst.msk [vmem:[%s4168_s10 + $0x4c] sm:$0x7] %vm2695_vm14, %v2951_v42  ;;  %v3038_v12 = vadd.f32 %v3037_v28, %v3036_v36  ;;  %v3039_v33 = vpop.f32.mrb[42].mxu0 }
 0x21a   : > { %v3040_v18 = vpop.f32.mrb[43].mxu0 }
 0x21b   : > { %v2379_v30 = vadd.f32 %v3038_v12, %v4157_v26  ;;  %v3041_v4 = vadd.f32 %v3040_v18, %v3039_v33 }
 0x21d   : > { %v2524_v31 = vadd.f32 %v4216_v27, %v2379_v30  ;;  %v2382_v63 = vadd.f32 %v3041_v4, %v4157_v26 }
 0x21f   : > { %v2574_v34 = vmax.f32 %v2524_v31, 0.0  ;;  %v2527_v19 = vadd.f32 %v4222_v41, %v2382_v63 }
 0x221   : > { %v2952_v59 = vpack.c.bf16 %v2574_v34, %v2574_v34  ;;  %v2575_v50 = vmax.f32 %v2527_v19, 0.0 }
 0x223   : > { %2715 = vst.msk [vmem:[%s4168_s10 + $0x50] sm:$0xf] %vm172_vm0, %v2952_v59  ;;  %v2953_v29 = vpack.c.bf16 %v2575_v50, %v2575_v50 }
 0x225   : > { %2716 = vst.msk [vmem:[%s4168_s10 + $0x54] sm:$0x7] %vm2695_vm14, %v2953_v29 }
 0x226 PF: > { %s13_s12 = sadd.s32 1, %s3291_s12  }
 0x227   : > { %p10_p4 = scmp.ge.s32.totalorder %s13_s12, 4  }
 0x229   :  { %12 = sbr.rel (!%p10_p4) target bundleno = 1 (0x1), region = 64 }

// kernel: convnet_forward.7
= control target key start
LH: loop header
LB: loop body
LE: loop exit
PB: predicated region body
PF: predicated region fallthrough
CT: control target
= control target key end

     0   :  { %10 = vsyncpa [#allocation4], 0  ;;  %s2606_s0 = inlined_call_operand.vmem [shape: bf16[2,7,7,64], index: 0, kind: input, shape index: {}]   ;;  %s2607_s1 = inlined_call_operand.vmem [shape: bf16[576,128], index: 1, kind: input, shape index: {}]   ;;  %s2608_s2 = inlined_call_operand.vmem [shape: f32[1,128], index: 2, kind: input, shape index: {}]   ;;  %s2609_s3 = inlined_call_operand.vmem [shape: bf16[128,128], index: 3, kind: input, shape index: {}]   ;;  %s2610_s4 = inlined_call_operand.vmem [shape: f32[1,128], index: 4, kind: input, shape index: {}]   ;;  %s2611_s5 = inlined_call_operand.hbm [shape: f32[2,1,128], index: 5, kind: output, shape index: {}]  }
   0x1   :  { %12 = vsyncpa [#allocation4 + $0x1], 0  ;;  %s2049_s18 = smov 0   ;;  %s2051_s19 = smov 0  }
   0x2   :  { %s2053_s20 = smov 0   ;;  %s2055_s21 = smov 0  }
   0x3 LB: > { %s2070_s22 = sadd.s32 4294967295, %s2012_s21   ;;  %s1596_s23 = sadd.s32 4294967294, %s2012_s21   ;;  %s2012_s21 = sphi %s2055_s21, %s2619_s21   ;;  %s2008_s20 = sphi %s2053_s20, %s2618_s20   ;;  %s2004_s19 = sphi %s2051_s19, %s2617_s19   ;;  %s2000_s18 = sphi %s2049_s18, %s2616_s18  }
   0x4   : > { %s2074_s24 = sadd.s32 1, %s2012_s21   ;;  %s135_s25 = sadd.s32 1, %s2008_s20 }
   0x5   : > { %s132_s26 = ssub.s32 %s2012_s21, %s2074_s24  ;;  %p145_p0 = scmp.ne.s32.totalorder %s2008_s20, %s2004_s19 }
   0x6   : > { %p133_p1 = scmp.eq.s32.totalorder %s132_s26, 0  ;;  %p146_p2 = scmp.eq.s32.totalorder %s2070_s22, 1 }
   0x7   : > { %p151_p3 = scmp.ne.s32.totalorder %s2004_s19, %s2000_s18  ;;  %p152_p4 = scmp.eq.s32.totalorder %s1596_s23, 1 }
   0x8   : > { %s2085_s27 = scalar_select %p133_p1, %s2008_s20, %s135_s25  }
   0x9   : > { %p2087_p5 = por %p146_p2, %p145_p0  ;;  %p2091_p6 = por %p152_p4, %p151_p3 }
   0xa   : > { %p1599_p7 = scmp.ge.s32.totalorder %s2012_s21, 1  ;;  %p190_p8 = scmp.lt.s32.totalorder %s2012_s21, 3 }
   0xc   : > { %p191_p9 = pnand %p1599_p7, %p190_p8 }
   0xd   : > { %vm223_vm0 = vcmask (!%p191_p9), 519168   ;;  %vm225_vm1 = vcmask (!%p191_p9), 516096   ;;  %p217_p10 = scmp.lt.s32.totalorder (!%p191_p9), %s2070_s22, 1  ;;  %v1906_v0 = vld [vmem:[%s2607_s1 + $0x40] sm:$0xff] (!%p191_p9)   ;;  %v2014_v1 = vmov (!%p191_p9), 0   ;;  %v1908_v3 = vld [vmem:[%s2607_s1 + $0x48] sm:$0xff] (!%p191_p9)  }
   0xe   : > { %194 = sbr.rel (%p191_p9) target bundleno = 686 (0x2ae), region = 40  ;;  %224 = vst.msk [vmem:[#allocation2] sm:$0xf] (!%p191_p9), %vm223_vm0, %v2014_v1  ;;  %227 = vst.msk [vmem:[#allocation2 + $0x8] sm:$0xf] (!%p191_p9), %vm223_vm0, %v2014_v1  ;;  %1701 = vmatprep.subr.bf16.mxu0 (!%p191_p9), %v1906_v0  ;;  %v1907_v2 = vld [vmem:[%s2607_s1] sm:$0xff] (!%p191_p9)  }
   0xf   : > { %226 = vst.msk [vmem:[#allocation2 + $0x4] sm:$0x1] (!%p191_p9), %vm225_vm1, %v2014_v1  ;;  %228 = vst.msk [vmem:[#allocation2 + $0xc] sm:$0x1] (!%p191_p9), %vm225_vm1, %v2014_v1  ;;  %vm308_vm2 = vsmask.f32 (!%p191_p9), 7938  ;;  %1702 = vmatpush3.bf16.msra.mxu0 (!%p191_p9), %v1907_v2 }
  0x10   : > { %229 = vst.msk [vmem:[#allocation2 + $0x10] sm:$0xf] (!%p191_p9), %vm223_vm0, %v2014_v1  ;;  %231 = vst.msk [vmem:[#allocation2 + $0x18] sm:$0xf] (!%p191_p9), %vm223_vm0, %v2014_v1  ;;  %v1909_v4 = vld [vmem:[%s2607_s1 + $0x8] sm:$0xff] (!%p191_p9)   ;;  %1703 = vmatprep.subr.bf16.mxu0 (!%p191_p9), %v1908_v3  ;;  %v1910_v5 = vld [vmem:[%s2607_s1 + $0x50] sm:$0xff] (!%p191_p9)  }
  0x11   : > { %230 = vst.msk [vmem:[#allocation2 + $0x14] sm:$0x1] (!%p191_p9), %vm225_vm1, %v2014_v1  ;;  %232 = vst.msk [vmem:[#allocation2 + $0x1c] sm:$0x1] (!%p191_p9), %vm225_vm1, %v2014_v1  ;;  %v1911_v28 = vld [vmem:[%s2607_s1 + $0x10] sm:$0xff] (!%p191_p9)   ;;  %v1912_v34 = vld [vmem:[%s2607_s1 + $0x58] sm:$0xff] (!%p191_p9)  }
  0x12   : > { %233 = vst.msk [vmem:[#allocation2 + $0x20] sm:$0xf] (!%p191_p9), %vm223_vm0, %v2014_v1  ;;  %235 = vst.msk [vmem:[#allocation2 + $0x28] sm:$0xf] (!%p191_p9), %vm223_vm0, %v2014_v1  ;;  %v1913_v48 = vld [vmem:[%s2607_s1 + $0x18] sm:$0xff] (!%p191_p9)   ;;  %v1914_v51 = vld [vmem:[%s2607_s1 + $0xc0] sm:$0xff] (!%p191_p9)  }
  0x13   : > { %234 = vst.msk [vmem:[#allocation2 + $0x24] sm:$0x1] (!%p191_p9), %vm225_vm1, %v2014_v1  ;;  %236 = vst.msk [vmem:[#allocation2 + $0x2c] sm:$0x1] (!%p191_p9), %vm225_vm1, %v2014_v1  ;;  %1704 = vmatpush3.bf16.msra.mxu0 (!%p191_p9), %v1909_v4  ;;  %v1915_v54 = vld [vmem:[%s2607_s1 + $0x80] sm:$0xff] (!%p191_p9)   ;;  %1741 = vmatprep.subr.bf16.mxu1 (!%p191_p9), %v1914_v51  ;;  %v1918_v20 = vld [vmem:[%s2607_s1 + $0xc8] sm:$0xff] (!%p191_p9)  }
  0x14   : > { %237 = vst.msk [vmem:[#allocation2 + $0x30] sm:$0xf] (!%p191_p9), %vm223_vm0, %v2014_v1  ;;  %239 = vst.msk [vmem:[#allocation2 + $0x38] sm:$0xf] (!%p191_p9), %vm223_vm0, %v2014_v1  ;;  %1705 = vmatprep.subr.bf16.mxu0 (!%p191_p9), %v1910_v5  ;;  %1742 = vmatpush3.bf16.msra.mxu1 (!%p191_p9), %v1915_v54  ;;  %vm710_vm4 = vcmask (!%p191_p9), 523264   ;;  %vm2017_vm5 = vmmov (!%p191_p9), 0  }
  0x15   : > { %238 = vst.msk [vmem:[#allocation2 + $0x34] sm:$0x1] %vm225_vm1, %v2014_v1  ;;  %240 = vst.msk [vmem:[#allocation2 + $0x3c] sm:$0x1] %vm225_vm1, %v2014_v1  ;;  %s218_s7 = scalar_select %p217_p10, %s2070_s22, 1  ;;  %1743 = vmatprep.subr.bf16.mxu1 %v1918_v20  ;;  %v1924_v20 = vld [vmem:[%s2607_s1 + $0x70] sm:$0xff]  }
  0x16   : > { %241 = vst.msk [vmem:[#allocation2 + $0x40] sm:$0xf] %vm223_vm0, %v2014_v1  ;;  %v2142_v9 = vld [vmem:[#allocation2] sm:$0xf]  ;;  %v332_v10 = vld [vmem:[#allocation2 + $0x4] sm:$0x1]  ;;  %vm2151_vm3 = vmand %vm223_vm0, %vm308_vm2 }
  0x17   : > { %242 = vst.msk [vmem:[#allocation2 + $0x44] sm:$0x1] %vm225_vm1, %v2014_v1  ;;  %s1834_s10 = smul.u32 28, %s218_s7  ;;  %v2145_v13 = vcombine.low %v2142_v9, %v332_v10  ;;  %v310_v25 = vld [vmem:[#allocation2 + $0x8] sm:$0xf]  ;;  %1706 = vmatpush3.bf16.msra.mxu0 %v1911_v28  ;;  %vm1400_vm6 = vcmask 1046528  }
  0x18   : > { %1707 = vmatprep.subr.bf16.mxu0 %v1912_v34  ;;  %v313_v44 = vld [vmem:[#allocation2 + $0x10] sm:$0xf]  ;;  %v316_v52 = vld [vmem:[#allocation2 + $0x18] sm:$0xf]  ;;  %v334_v61 = vld [vmem:[#allocation2 + $0xc] sm:$0x1] }
  0x19   : > { %s2134_s17 = scalar_lea.vmem %s2606_s0, %s1834_s10  ;;  %v410_v18 = vshrl.u32 %v2145_v13, 16  ;;  %v412_v19 = vshll.u32 %v2145_v13, 16  ;;  %v319_v21 = vld [vmem:[#allocation2 + $0x20] sm:$0xf]  ;;  %s2015_s10 = smov 64  }
  0x1a   : > { %v246_v6 = vld [vmem:[%s2134_s17 + $0xc] sm:$0xf]  ;;  %v243_v7 = vld [vmem:[%s2134_s17] sm:$0xf]  ;;  %v248_v8 = vld [vmem:[%s2134_s17 + $0x14] sm:$0xf] }
  0x1b   : > { %v272_v11 = vshrl.u32 %v246_v6, 16  ;;  %v275_v12 = vshll.u32 %v246_v6, 16  ;;  %v251_v14 = vshrl.u32 %v243_v7, 16  ;;  %v254_v15 = vshll.u32 %v243_v7, 16  ;;  %v244_v27 = vld [vmem:[%s2134_s17 + $0x4] sm:$0xf]  ;;  %1708 = vmatpush3.bf16.msra.mxu0 %v1913_v48 }
  0x1c   : > { %v286_v17 = vshrl.u32 %v248_v8, 16  ;;  %v289_v23 = vshll.u32 %v248_v8, 16  ;;  %v414_v29 = vrot.slane %v412_v19, 1  ;;  %v325_v31 = vld [vmem:[#allocation2 + $0x30] sm:$0xf]  ;;  %v258_v32 = vshrl.u32 %v244_v27, 16 }
  0x1d   : > { %v274_v16 = vrot.slane %v272_v11, 7  ;;  %v253_v22 = vrot.slane %v251_v14, 7  ;;  %v261_v33 = vshll.u32 %v244_v27, 16  ;;  %v245_v37 = vld [vmem:[%s2134_s17 + $0x8] sm:$0xf]  ;;  %v1916_v6 = vld [vmem:[%s2607_s1 + $0x60] sm:$0xff]  }
  0x1e   : > { %v288_v26 = vrot.slane %v286_v17, 7  ;;  %v415_v38 = vor.u32 %v414_v29, %v410_v18  ;;  %v260_v40 = vrot.slane %v258_v32, 7  ;;  %v265_v41 = vshrl.u32 %v245_v37, 16  ;;  %v247_v42 = vld [vmem:[%s2134_s17 + $0x10] sm:$0xf]  ;;  %1709 = vmatprep.subr.bf16.mxu0 %v1916_v6  ;;  %s215_s7 = sand.u32 1, %s2004_s19  }
  0x1f   : > { %v277_v24 = vor.u32 %v275_v12, %v274_v16  ;;  %v256_v30 = vor.u32 %v254_v15, %v253_v22  ;;  %v268_v45 = vshll.u32 %v245_v37, 16  ;;  %v279_v46 = vshrl.u32 %v247_v42, 16  ;;  %v322_v57 = vld [vmem:[#allocation2 + $0x28] sm:$0xf]  ;;  %v249_v59 = vld [vmem:[%s2134_s17 + $0x18] sm:$0xf] }
  0x20   : > { %v291_v36 = vor.u32 %v289_v23, %v288_v26  ;;  %v282_v47 = vshll.u32 %v247_v42, 16  ;;  %458 = vrot.lane.b32.xlu1 %v415_v38, %s2015_s10  ;;  %v263_v49 = vor.u32 %v261_v33, %v260_v40  ;;  %v267_v50 = vrot.slane %v265_v41, 7  ;;  %v348_v12 = vld [vmem:[#allocation2 + $0x14] sm:$0x1]  ;;  %v328_v16 = vld [vmem:[#allocation2 + $0x38] sm:$0xf] }
  0x21   : > { %v320_v35 = vsel %vm2151_vm3, %v277_v24, %v319_v21  ;;  %v311_v39 = vsel %vm2151_vm3, %v256_v30, %v310_v25  ;;  %v281_v53 = vrot.slane %v279_v46, 7  ;;  %v293_v62 = vshrl.u32 %v249_v59, 16  ;;  %v336_v15 = vld [vmem:[#allocation2 + $0x14] sm:$0x1]  ;;  %v346_v17 = vld [vmem:[#allocation2 + $0xc] sm:$0x1] }
  0x22   : > { %321 = vst [vmem:[#allocation2 + $0x20] sm:$0xf] %v320_v35  ;;  %312 = vst [vmem:[#allocation2 + $0x8] sm:$0xf] %v311_v39  ;;  %v326_v43 = vsel %vm2151_vm3, %v291_v36, %v325_v31  ;;  %v314_v55 = vsel %vm2151_vm3, %v263_v49, %v313_v44  ;;  %v270_v56 = vor.u32 %v268_v45, %v267_v50  ;;  %v296_v1 = vshll.u32 %v249_v59, 16  ;;  %v1917_v30 = vld [vmem:[%s2607_s1 + $0x20] sm:$0xff]  }
  0x23   : > { %327 = vst [vmem:[#allocation2 + $0x30] sm:$0xf] %v326_v43  ;;  %315 = vst [vmem:[#allocation2 + $0x10] sm:$0xf] %v314_v55  ;;  %v284_v58 = vor.u32 %v282_v47, %v281_v53  ;;  %v295_v5 = vrot.slane %v293_v62, 7  ;;  %1710 = vmatpush3.bf16.msra.mxu0 %v1917_v30  ;;  %v1920_v62 = vld [vmem:[%s2607_s1 + $0x68] sm:$0xff]  }
  0x24   : > { %v317_v60 = vsel %vm2151_vm3, %v270_v56, %v316_v52  ;;  %v338_v21 = vld [vmem:[#allocation2 + $0x1c] sm:$0x1]  ;;  %v361_v28 = vld [vmem:[#allocation2 + $0x14] sm:$0x1]  ;;  %v342_v29 = vld [vmem:[#allocation2 + $0x2c] sm:$0x1]  ;;  %1711 = vmatprep.subr.bf16.mxu0 %v1920_v62 }
  0x25   : > { %318 = vst [vmem:[#allocation2 + $0x18] sm:$0xf] %v317_v60  ;;  %v323_v0 = vsel %vm2151_vm3, %v284_v58, %v322_v57  ;;  %v363_v22 = vld [vmem:[#allocation2 + $0x1c] sm:$0x1]  ;;  %v298_v23 = vor.u32 %v296_v1, %v295_v5  ;;  %v340_v41 = vld [vmem:[#allocation2 + $0x24] sm:$0x1] }
  0x26   : > { %324 = vst [vmem:[#allocation2 + $0x28] sm:$0xf] %v323_v0  ;;  %v365_v42 = vld [vmem:[#allocation2 + $0x24] sm:$0x1]  ;;  %v367_v51 = vld [vmem:[#allocation2 + $0x2c] sm:$0x1] }
  0x27   : > { %v329_v34 = vsel %vm2151_vm3, %v298_v23, %v328_v16  ;;  %v1919_v52 = vld [vmem:[%s2607_s1 + $0x88] sm:$0xff]   ;;  %s1698_s11 = sshll.u32 %s2070_s22, 4  ;;  %s216_s12 = scalar_lea.vmem [#allocation3], %s215_s7 }
  0x28   : > { %330 = vst [vmem:[#allocation2 + $0x38] sm:$0xf] %v329_v34  ;;  %1744 = vmatpush3.bf16.msra.mxu1 %v1919_v52  ;;  %v1921_v5 = vld [vmem:[%s2607_s1 + $0x28] sm:$0xff]   ;;  %s1541_s13 = sshll.u32 %s216_s12, 4  ;;  %s1529_s16 = scalar_lea.sflag [#allocation4], %s215_s7  ;;  %s2566_s13 = int_to_ptr.vmem [resolvable:$true] %s1541_s13 }
  0x29   : > { %v2185_v63 = vld [vmem:[#allocation2 + $0x20] sm:$0xf]  ;;  %v345_v3 = vld [vmem:[#allocation2 + $0x8] sm:$0xf]  ;;  %1712 = vmatpush3.bf16.msra.mxu0 %v1921_v5  ;;  %s1950_s22 = scalar_lea.vmem %s2566_s13, 16  ;;  %s2018_s17 = smov [#allocation3]  }
  0x2a   : > { %v1611_v2 = vcombine.low %v2185_v63, %v2185_v63  ;;  %v2191_v4 = vld [vmem:[#allocation2 + $0x8] sm:$0xf]  ;;  %v1608_v7 = vcombine.low %v345_v3, %v345_v3  ;;  %v2196_v8 = vld [vmem:[#allocation2 + $0x30] sm:$0xf]  ;;  %v2239_v43 = vcombine.low %v345_v3, %v346_v17  ;;  %v2247_v46 = vld [vmem:[#allocation2 + $0x20] sm:$0xf]  ;;  %1713 = vmatprep.subr.bf16.mxu0 %v1924_v20  ;;  %p1951_p11 = scmp.ne.s32.totalorder %s2566_s13, %s1950_s22 }
  0x2b   : > { %v2199_v10 = vcombine.low %v2191_v4, %v334_v61  ;;  %v1613_v11 = vcombine.low %v2196_v8, %v2196_v8  ;;  %v347_v18 = vld [vmem:[#allocation2 + $0x10] sm:$0xf]  ;;  %v2249_v47 = vld [vmem:[#allocation2 + $0x20] sm:$0xf]  ;;  %v2269_v58 = vcombine.low %v2247_v46, %v340_v41  ;;  %v344_v61 = vld [vmem:[#allocation2 + $0x34] sm:$0x1] }
  0x2c   : > { %506 = vrot.lane.b32.xlu1 %v1611_v2, %s2015_s10  ;;  %500 = vrot.lane.b32.xlu0 %v1608_v7, %s2015_s10  ;;  %v2206_v19 = vld [vmem:[#allocation2 + $0x10] sm:$0xf]  ;;  %v1609_v24 = vcombine.low %v347_v18, %v347_v18  ;;  %v2208_v25 = vcombine.low %v347_v18, %v348_v12  ;;  %v2215_v31 = vld [vmem:[#allocation2 + $0x18] sm:$0xf]  ;;  %v584_v0 = vrot.slane %v2239_v43, 1  ;;  %v1624_v3 = vcombine.low %v2249_v47, %v365_v42  ;;  %p1952_p12 = pnand %p1951_p11, %p2087_p5  ;;  %s1954_s23 = sshll.u32 %s2018_s17, 4  ;;  %s1955_s23 = int_to_ptr.vmem [resolvable:$false] %s1954_s23 }
  0x2d   : > { %v419_v14 = vshll.u32 %v2199_v10, 16  ;;  %v417_v26 = vshrl.u32 %v2199_v10, 16  ;;  %v2217_v32 = vld [vmem:[#allocation2 + $0x18] sm:$0xf]  ;;  %v1610_v36 = vcombine.low %v2215_v31, %v2215_v31  ;;  %v2228_v37 = vcombine.low %v2206_v19, %v336_v15  ;;  %v2230_v38 = vld [vmem:[#allocation2 + $0x10] sm:$0xf]  ;;  %p1957_p0 = scmp.lt.s32.totalorder %s2566_s13, %s1955_s23 }
  0x2e   : > { %v2219_v33 = vld [vmem:[#allocation2 + $0x18] sm:$0xf]  ;;  %v585_v35 = vrot.slane %v2208_v25, 1  ;;  %v2232_v39 = vld [vmem:[#allocation2 + $0x28] sm:$0xf]  ;;  %v2242_v44 = vcombine.low %v2217_v32, %v338_v21  ;;  %v2253_v49 = vcombine.low %v2230_v38, %v361_v28  ;;  %v705_v17 = vrot.slane %v1624_v3, 1  ;;  %p1953_p13 = pneg %p1952_p12 }
  0x2f   : > { %v421_v27 = vrot.slane %v419_v14, 1  ;;  %v2237_v40 = vld [vmem:[#allocation2 + $0x28] sm:$0xf]  ;;  %v2245_v45 = vcombine.low %v2219_v33, %v363_v22  ;;  %v2256_v50 = vcombine.low %v2232_v39, %v342_v29  ;;  %v426_v54 = vshll.u32 %v2228_v37, 16  ;;  %v2273_v60 = vld [vmem:[#allocation2 + $0x30] sm:$0xf] }
  0x30   : > { %510 = vrot.lane.b32.xlu1 %v1613_v11, %s2015_s10  ;;  %502 = vrot.lane.b32.xlu0 %v1609_v24, %s2015_s10  ;;  %v1612_v53 = vcombine.low %v2237_v40, %v2237_v40  ;;  %v431_v55 = vshrl.u32 %v2242_v44, 16  ;;  %v433_v56 = vshll.u32 %v2242_v44, 16  ;;  %v2271_v59 = vld [vmem:[#allocation2 + $0x28] sm:$0xf]  ;;  %v424_v1 = vshrl.u32 %v2228_v37, 16  ;;  %v1922_v14 = vld [vmem:[%s2607_s1 + $0xd0] sm:$0xff]  }
  0x31   : > { %v422_v48 = vor.u32 %v421_v27, %v417_v26  ;;  %v650_v57 = vshll.u32 %v2245_v45, 16  ;;  %v643_v6 = vshll.u32 %v2253_v49, 16  ;;  %v648_v7 = vshrl.u32 %v2245_v45, 16  ;;  %1745 = vmatprep.subr.bf16.mxu1 %v1922_v14  ;;  %v1923_v29 = vld [vmem:[%s2607_s1 + $0x90] sm:$0xff]   ;;  %v352_v41 = vld [vmem:[#allocation2 + $0x24] sm:$0x1] }
  0x32   : > { %v435_v2 = vrot.slane %v433_v56, 1  ;;  %v447_v12 = vshll.u32 %v2256_v50, 16  ;;  %v428_v15 = vrot.slane %v426_v54, 1  ;;  %v2293_v18 = vcombine.low %v2271_v59, %v367_v51  ;;  %1746 = vmatpush3.bf16.msra.mxu1 %v1923_v29  ;;  %v2321_v62 = vld [vmem:[#allocation2 + $0x38] sm:$0xf]  ;;  %s1956_s25 = scalar_lea.vmem %s1955_s23, 32 }
  0x33   : > { %v652_v11 = vrot.slane %v650_v57, 1  ;;  %v440_v21 = vshll.u32 %v2269_v58, 16  ;;  %v2298_v23 = vcombine.low %v2273_v60, %v344_v61  ;;  %v445_v26 = vshrl.u32 %v2256_v50, 16  ;;  %v2319_v61 = vld [vmem:[#allocation2 + $0x30] sm:$0xf]  ;;  %p1958_p1 = scmp.lt.s32.totalorder %s1956_s25, %s1950_s22 }
  0x34   : > { %593 = vrot.lane.b32.xlu1 %v585_v35, %s2015_s10  ;;  %504 = vrot.lane.b32.xlu0 %v1610_v36, %s2015_s10  ;;  %v436_v16 = vor.u32 %v435_v2, %v431_v55  ;;  %v706_v22 = vrot.slane %v2293_v18, 1  ;;  %v449_v27 = vrot.slane %v447_v12, 1  ;;  %v657_v28 = vshll.u32 %v1624_v3, 16  ;;  %v2327_v2 = vld [vmem:[#allocation2 + $0x38] sm:$0xf] }
  0x35   : > { %v653_v24 = vor.u32 %v652_v11, %v648_v7  ;;  %v429_v30 = vor.u32 %v428_v15, %v424_v1  ;;  %v641_v34 = vshrl.u32 %v2253_v49, 16  ;;  %v645_v35 = vrot.slane %v643_v6, 1  ;;  %v369_v1 = vld [vmem:[#allocation2 + $0x34] sm:$0x1]  ;;  %v350_v11 = vld [vmem:[#allocation2 + $0x1c] sm:$0x1]  ;;  %p1959_p2 = por %p1958_p1, %p1957_p0 }
  0x36   : > { %v2307_v36 = vcombine.low %v705_v17, %v706_v22  ;;  %v438_v42 = vshrl.u32 %v2269_v58, 16  ;;  %v442_v51 = vrot.slane %v440_v21, 1  ;;  %v655_v52 = vshrl.u32 %v1624_v3, 16  ;;  %v1927_v21 = vld [vmem:[%s2607_s1 + $0x98] sm:$0xff]  }
  0x37   : > { %v450_v54 = vor.u32 %v449_v27, %v445_v26  ;;  %v659_v55 = vrot.slane %v657_v28, 1  ;;  %v454_v56 = vshll.u32 %v2298_v23, 16  ;;  %v646_v57 = vor.u32 %v645_v35, %v641_v34  ;;  %v1929_v28 = vld [vmem:[%s2607_s1 + $0x38] sm:$0xff]   ;;  %v1930_v34 = vld [vmem:[%s2607_s1 + $0xe0] sm:$0xff]   ;;  %v356_v35 = vld [vmem:[#allocation2 + $0x34] sm:$0x1]  ;;  %p1960_p3 = pnand %p1959_p2, %p1953_p13 }
  0x38   : > { %460 = vrot.lane.b32.xlu1 %v422_v48, %s2015_s10  ;;  %508 = vrot.lane.b32.xlu0 %v1612_v53, %s2015_s10  ;;  %v1925_v48 = vld [vmem:[%s2607_s1 + $0x30] sm:$0xff]   ;;  %v371_v53 = vld [vmem:[#allocation2 + $0x3c] sm:$0x1]  ;;  %v452_v5 = vshrl.u32 %v2298_v23, 16  ;;  %v443_v12 = vor.u32 %v442_v51, %v438_v42  ;;  %v664_v14 = vshll.u32 %v2293_v18, 16  ;;  %v2337_v15 = vcombine.low %v2319_v61, %v369_v1  ;;  %v1932_v51 = vld [vmem:[%s2607_s1 + $0xe8] sm:$0xff]  }
  0x39   : > { %1714 = vmatpush3.bf16.msra.mxu0 %v1925_v48  ;;  %v660_v3 = vor.u32 %v659_v55, %v655_v52  ;;  %v456_v6 = vrot.slane %v454_v56, 1  ;;  %v2331_v7 = vcombine.low %v2321_v62, %v371_v53  ;;  %v1614_v26 = vcombine.low %v2327_v2, %v2327_v2  ;;  %v373_v48 = vld [vmem:[#allocation2 + $0x44] sm:$0x1]  ;;  %v1933_v53 = vld [vmem:[%s2607_s1 + $0xa8] sm:$0xff]   ;;  %v1935_v1 = vld [vmem:[%s2607_s1 + $0xf0] sm:$0xff]  }
  0x3a   : > { %v666_v27 = vrot.slane %v664_v14, 1  ;;  %v2358_v29 = vcombine.low %v2215_v31, %v350_v11  ;;  %v2369_v31 = vld [vmem:[#allocation2 + $0x40] sm:$0xf]  ;;  %v354_v56 = vld [vmem:[#allocation2 + $0x2c] sm:$0x1] }
  0x3b   : > { %v457_v22 = vor.u32 %v456_v6, %v452_v5  ;;  %v676_v20 = vshrl.u32 %v2331_v7, 16  ;;  %v2382_v55 = vld [vmem:[%s2607_s1 + $0x100] sm:$0xff]   ;;  %v2389_v5 = vcombine.low %v2196_v8, %v356_v35  ;;  %v669_v6 = vshrl.u32 %v2337_v15, 16 }
  0x3c   : > { %464 = vrot.lane.b32.xlu1 %v436_v16, %s2015_s10  ;;  %591 = vrot.lane.b32.xlu0 %v584_v0, %s2015_s10  ;;  %v2324_v0 = vcombine.low %v2185_v63, %v352_v41  ;;  %v662_v63 = vshrl.u32 %v2293_v18, 16  ;;  %v1926_v16 = vld [vmem:[%s2607_s1 + $0xd8] sm:$0xff]   ;;  %v1931_v41 = vld [vmem:[%s2607_s1 + $0xa0] sm:$0xff]   ;;  %v2396_v14 = vcombine.low %v2369_v31, %v373_v48  ;;  %v704_v8 = vrot.slane %v2245_v45, 1 }
  0x3d   : > { %1747 = vmatprep.subr.bf16.mxu1 %v1926_v16  ;;  %v1928_v18 = vld [vmem:[%s2607_s1 + $0x78] sm:$0xff]  }
  0x3e   : > { %v587_v17 = vrot.slane %v2324_v0, 1  ;;  %1748 = vmatpush3.bf16.msra.mxu1 %v1927_v21  ;;  %1715 = vmatprep.subr.bf16.mxu0 %v1928_v18  ;;  %v667_v52 = vor.u32 %v666_v27, %v662_v63  ;;  %v1937_v63 = vld [vmem:[%s2607_s1 + $0xf8] sm:$0xff]  }
  0x3f   : > { %1716 = vmatpush3.bf16.msra.mxu0 %v1929_v28  ;;  %1749 = vmatprep.subr.bf16.mxu1 %v1930_v34  ;;  %v1938_v18 = vld [vmem:[%s2607_s1 + $0xb8] sm:$0xff]  }
  0x40   : > { %691 = vrot.lane.b32.xlu1 %v653_v24, %s2015_s10  ;;  %462 = vrot.lane.b32.xlu0 %v429_v30, %s2015_s10  ;;  %v678_v24 = vshll.u32 %v2331_v7, 16  ;;  %v671_v30 = vshll.u32 %v2337_v15, 16 }
  0x41   : > { %1798 = vmatprep.subr.bf16.mxu0 %v2382_v55 }
  0x42   : > { %v680_v42 = vrot.slane %v678_v24, 1  ;;  %1750 = vmatpush3.bf16.msra.mxu1 %v1931_v41  ;;  %v673_v11 = vrot.slane %v671_v30, 1  ;;  %v685_v24 = vshll.u32 %v2396_v14, 16  ;;  %v683_v30 = vshrl.u32 %v2396_v14, 16 }
  0x43   : > { %1751 = vmatprep.subr.bf16.mxu1 %v1932_v51  ;;  %v472_v41 = vrot.slane %v2145_v13, 1  ;;  %v538_v51 = vshll.u32 %v2239_v43, 16  ;;  %v536_v13 = vshrl.u32 %v2239_v43, 16 }
  0x44   : > { %468 = vrot.lane.b32.xlu1 %v450_v54, %s2015_s10  ;;  %689 = vrot.lane.b32.xlu0 %v646_v57, %s2015_s10  ;;  %v586_v54 = vrot.slane %v2358_v29, 1  ;;  %v358_v57 = vld [vmem:[#allocation2 + $0x3c] sm:$0x1]  ;;  %v674_v45 = vor.u32 %v673_v11, %v669_v6  ;;  %v687_v34 = vrot.slane %v685_v24, 1  ;;  %v543_v11 = vshrl.u32 %v2208_v25, 16 }
  0x45   : > { %v2411_v21 = vcombine.low %v2327_v2, %v358_v57  ;;  %v708_v2 = vrot.slane %v2331_v7, 1 }
  0x46   : > { %1752 = vmatpush3.bf16.msra.mxu1 %v1933_v53  ;;  %v545_v53 = vshll.u32 %v2208_v25, 16 }
  0x47   : > { %1753 = vmatprep.subr.bf16.mxu1 %v1935_v1  ;;  %v590_v27 = vrot.slane %v2411_v21, 1 }
  0x48   : > { %693 = vrot.lane.b32.xlu1 %v660_v3, %s2015_s10  ;;  %466 = vrot.lane.b32.xlu0 %v443_v12, %s2015_s10  ;;  %v703_v3 = vrot.slane %v2253_v49, 1  ;;  %v681_v12 = vor.u32 %v680_v42, %v676_v20  ;;  %v1936_v49 = vld [vmem:[%s2607_s1 + $0xb0] sm:$0xff]   ;;  %v473_v42 = vrot.slane %v2199_v10, 1  ;;  %v477_v10 = vrot.slane %v2256_v50, 1 }
  0x4a   : > { %v2405_v16 = vcombine.low %v703_v3, %v704_v8  ;;  %1754 = vmatpush3.bf16.msra.mxu1 %v1936_v49 }
  0x4b   : > { %1755 = vmatprep.subr.bf16.mxu1 %v1937_v63  ;;  %v540_v63 = vrot.slane %v538_v51, 1 }
  0x4c   : > { %470 = vrot.lane.b32.xlu1 %v457_v22, %s2015_s10  ;;  %512 = vrot.lane.b32.xlu0 %v1614_v26, %s2015_s10  ;;  %v589_v22 = vrot.slane %v2389_v5, 1 }
  0x4e   : > { %1756 = vmatpush3.bf16.msra.mxu1 %v1938_v18 }
  0x50   : > { %597 = vrot.lane.b32.xlu1 %v587_v17, %s2015_s10  ;;  %695 = vrot.lane.b32.xlu0 %v667_v52, %s2015_s10  ;;  %v2408_v17 = vcombine.low %v2237_v40, %v354_v56  ;;  %v707_v40 = vrot.slane %v2337_v15, 1  ;;  %v688_v15 = vor.u32 %v687_v34, %v683_v30  ;;  %v474_v56 = vrot.slane %v2228_v37, 1 }
  0x51   : > { %v476_v37 = vrot.slane %v2269_v58, 1  ;;  %v1939_v58 = vld [vmem:[%s2607_s1 + $0x108] sm:$0xff]  }
  0x52   : > { %v588_v26 = vrot.slane %v2408_v17, 1  ;;  %v2425_v28 = vcombine.low %v707_v40, %v708_v2 }
  0x54   : > { %699 = vrot.lane.b32.xlu1 %v681_v12, %s2015_s10  ;;  %595 = vrot.lane.b32.xlu0 %v586_v54, %s2015_s10  ;;  %v475_v54 = vrot.slane %v2242_v44, 1  ;;  %v547_v12 = vrot.slane %v545_v53, 1 }
  0x56   : > { %v548_v43 = vor.u32 %v547_v12, %v543_v11 }
  0x58   : > { %601 = vrot.lane.b32.xlu1 %v589_v22, %s2015_s10  ;;  %697 = vrot.lane.b32.xlu0 %v674_v45, %s2015_s10 }
  0x5c   : > { %603 = vrot.lane.b32.xlu1 %v590_v27, %s2015_s10  ;;  %599 = vrot.lane.b32.xlu0 %v588_v26, %s2015_s10  ;;  %v541_v26 = vor.u32 %v540_v63, %v536_v13  ;;  %v573_v63 = vshll.u32 %v2389_v5, 16 }
  0x60   : > { %701 = vrot.lane.b32.xlu0 %v688_v15, %s2015_s10  ;;  %v1940_v15 = vld [vmem:[%s2607_s1 + $0x110] sm:$0xff]   ;;  %s2564_s10 = scalar_lea.hbm %s2611_s5, %s1698_s11 }
  0x92   : > { %v459_v7 = vpop.permute.xlu1 %458 }
  0x93   : > { %v713_v24 = vsel %vm710_vm4, %v2142_v9, %v459_v7 }
  0x9e   : > { %v507_v35 = vpop.permute.xlu1 %506  ;;  %v501_v20 = vpop.permute.xlu0 %500 }
  0x9f   : > { %v734_v57 = vsel %vm710_vm4, %v472_v41, %v501_v20  ;;  %v743_v8 = vsel %vm710_vm4, %v475_v54, %v507_v35 }
  0xa2   : > { %v511_v48 = vpop.permute.xlu1 %510  ;;  %v503_v52 = vpop.permute.xlu0 %502 }
  0xa3   : > { %v737_v1 = vsel %vm710_vm4, %v473_v42, %v503_v52  ;;  %v749_v50 = vsel %vm710_vm4, %v477_v10, %v511_v48  ;;  %v1941_v48 = vld [vmem:[%s2607_s1 + $0x118] sm:$0xff]   ;;  %v557_v10 = vshrl.u32 %v2324_v0, 16 }
  0xa4   : > { %v1631_v3 = vcombine.low %v734_v57, %v737_v1  ;;  %v559_v57 = vshll.u32 %v2324_v0, 16 }
  0xa6   : > { %v594_v6 = vpop.permute.xlu1 %593  ;;  %v505_v49 = vpop.permute.xlu0 %504  ;;  %1233 = vmatprep.mubr.bf16.mxu0 %v1631_v3  ;;  %v478_v3 = vrot.slane %v2298_v23, 1  ;;  %v561_v11 = vrot.slane %v559_v57, 1  ;;  %v1948_v57 = vld [vmem:[%s2609_s3 + $0x30] sm:$0xff]  }
  0xa7   : > { %v740_v44 = vsel %vm710_vm4, %v474_v56, %v505_v49  ;;  %v758_v9 = vsel %vm710_vm4, %v548_v43, %v594_v6  ;;  %v552_v6 = vshll.u32 %v2358_v29, 16 }
  0xa8   : > { %v1636_v22 = vcombine.low %v740_v44, %v743_v8  ;;  %v562_v23 = vor.u32 %v561_v11, %v557_v10 }
  0xa9   : > { %v554_v8 = vrot.slane %v552_v6, 1 }
  0xaa   : > { %v461_v45 = vpop.permute.xlu1 %460  ;;  %v509_v18 = vpop.permute.xlu0 %508 }
  0xab   : > { %v716_v25 = vsel %vm710_vm4, %v2191_v4, %v461_v45  ;;  %v746_v40 = vsel %vm710_vm4, %v476_v37, %v509_v18 }
  0xac   : > { %v1630_v2 = vcombine.low %v713_v24, %v716_v25  ;;  %v1641_v27 = vcombine.low %v746_v40, %v749_v50  ;;  %v571_v50 = vshrl.u32 %v2389_v5, 16  ;;  %v575_v40 = vrot.slane %v573_v63, 1 }
  0xae   : > { %1234 = vmatmul.mubr.bf16.vlgmr.msra.gmra.mrb[0].mxu0 %v1630_v2  ;;  %v465_v30 = vpop.permute.xlu1 %464  ;;  %v592_v34 = vpop.permute.xlu0 %591 }
  0xaf   : > { %1241 = vmatprep.mubr.bf16.mxu0 %v1636_v22  ;;  %1799 = vmatpush3.bf16.msra.mxu0 %v2382_v55  ;;  %v755_v4 = vsel %vm710_vm4, %v541_v26, %v592_v34  ;;  %v722_v35 = vsel %vm710_vm4, %v2217_v32, %v465_v30  ;;  %v576_v34 = vor.u32 %v575_v40, %v571_v50 }
  0xb0   : > { %1800 = vmatprep.subr.bf16.mxu0 %v1939_v58  ;;  %v1632_v7 = vcombine.low %v755_v4, %v758_v9 }
  0xb2   : > { %v692_v20 = vpop.permute.xlu1 %691  ;;  %v463_v41 = vpop.permute.xlu0 %462 }
  0xb3   : > { %1801 = vmatpush3.bf16.msra.mxu0 %v1939_v58  ;;  %v719_v42 = vsel %vm710_vm4, %v2206_v19, %v463_v41  ;;  %v779_v51 = vsel %vm710_vm4, %v2219_v33, %v692_v20  ;;  %v580_v58 = vshll.u32 %v2411_v21, 16 }
  0xb4   : > { %1802 = vmatprep.subr.bf16.mxu0 %v1940_v15  ;;  %v1635_v55 = vcombine.low %v719_v42, %v722_v35 }
  0xb6   : > { %v469_v52 = vpop.permute.xlu1 %468  ;;  %v690_v53 = vpop.permute.xlu0 %689  ;;  %1242 = vmatmul.mubr.bf16.gmra.mrb[4].mxu0 %v1635_v55 }
  0xb7   : > { %1249 = vmatprep.mubr.bf16.mxu0 %v1641_v27  ;;  %v776_v32 = vsel %vm710_vm4, %v2230_v38, %v690_v53  ;;  %1803 = vmatpush3.bf16.msra.mxu0 %v1940_v15  ;;  %v728_v19 = vsel %vm710_vm4, %v2232_v39, %v469_v52 }
  0xb8   : > { %v1633_v54 = vcombine.low %v776_v32, %v779_v51  ;;  %1804 = vmatprep.subr.bf16.mxu0 %v1941_v48  ;;  %v1944_v32 = vld [vmem:[%s2609_s3 + $0x10] sm:$0xff]  }
  0xba   : > { %v694_v56 = vpop.permute.xlu1 %693  ;;  %v467_v1 = vpop.permute.xlu0 %466  ;;  %1297 = vmatprep.mubr.bf16.mxu1 %v1633_v54  ;;  %v1945_v54 = vld [vmem:[%s2609_s3 + $0x18] sm:$0xff]  }
  0xbb   : > { %v725_v33 = vsel %vm710_vm4, %v2247_v46, %v467_v1  ;;  %1298 = vmatmul.mubr.bf16.vlgmr.msra.gmra.mrb[0].mxu1 %v1632_v7  ;;  %1805 = vmatpush3.bf16.msra.mxu0 %v1941_v48  ;;  %v550_v46 = vshrl.u32 %v2358_v29, 16  ;;  %v782_v0 = vsel %vm710_vm4, %v2249_v47, %v694_v56  ;;  %v564_v47 = vshrl.u32 %v2408_v17, 16  ;;  %v1947_v56 = vld [vmem:[%s2609_s3 + $0x28] sm:$0xff]   ;;  %v1949_v1 = vld [vmem:[%s2609_s3 + $0x38] sm:$0xff]  }
  0xbc   : > { %v1640_v38 = vcombine.low %v725_v33, %v728_v19  ;;  %v578_v7 = vshrl.u32 %v2411_v21, 16  ;;  %v1946_v19 = vld [vmem:[%s2609_s3 + $0x20] sm:$0xff]  }
  0xbd   : > { %v555_v43 = vor.u32 %v554_v8, %v550_v46  ;;  %v2540_v8 = vld [vmem:[%s2608_s2] ss:$0 sm:$0xff] }
  0xbe   : > { %v471_v13 = vpop.permute.xlu1 %470  ;;  %v513_v39 = vpop.permute.xlu0 %512  ;;  %1250 = vmatmul.mubr.bf16.gmra.mrb[8].mxu0 %v1640_v38 }
  0xbf   : > { %v752_v12 = vsel %vm710_vm4, %v478_v3, %v513_v39  ;;  %v731_v49 = vsel %vm710_vm4, %v2273_v60, %v471_v13  ;;  %v566_v60 = vshll.u32 %v2408_v17, 16 }
  0xc0   : > { %v1646_v44 = vcombine.low %v752_v12, %v752_v12  ;;  %v1645_v45 = vcombine.low %v731_v49, %v731_v49 }
  0xc2   : > { %v598_v37 = vpop.permute.xlu1 %597  ;;  %v696_v22 = vpop.permute.xlu0 %695  ;;  %1257 = vmatprep.mubr.bf16.mxu0 %v1646_v44 }
  0xc3   : > { %v785_v24 = vsel %vm710_vm4, %v2271_v59, %v696_v22  ;;  %v764_v29 = vsel %vm710_vm4, %v562_v23, %v598_v37  ;;  %v568_v59 = vrot.slane %v566_v60, 1 }
  0xc4   : > { %v1638_v18 = vcombine.low %v782_v0, %v785_v24 }
  0xc5   : > { %v569_v15 = vor.u32 %v568_v59, %v564_v47 }
  0xc6   : > { %v700_v25 = vpop.permute.xlu1 %699  ;;  %v596_v2 = vpop.permute.xlu0 %595  ;;  %1258 = vmatmul.mubr.bf16.gmra.mrb[12].mxu0 %v1645_v45  ;;  %1305 = vmatprep.mubr.bf16.mxu1 %v1638_v18 }
  0xc7   : > { %v761_v26 = vsel %vm710_vm4, %v555_v43, %v596_v2  ;;  %1806 = vmatprep.mubr.msk.bf16.mxu0 %vm710_vm4, %v2405_v16  ;;  %v791_v30 = vsel %vm710_vm4, %v2321_v62, %v700_v25  ;;  %v582_v16 = vrot.slane %v580_v58, 1  ;;  %v709_v62 = vrot.slane %v2396_v14, 1  ;;  %v1942_v14 = vld [vmem:[%s2609_s3] sm:$0xff]  }
  0xc8   : > { %v1637_v27 = vcombine.low %v761_v26, %v764_v29 }
  0xc9   : > { %v1649_v48 = vcombine.low %v709_v62, %v709_v62 }
  0xca   : > { %v698_v5 = vpop.permute.xlu0 %697  ;;  %1306 = vmatmul.mubr.bf16.gmra.mrb[4].mxu1 %v1637_v27  ;;  %v602_v9 = vpop.permute.xlu1 %601 }
  0xcb   : > { %v788_v4 = vsel %vm710_vm4, %v2319_v61, %v698_v5  ;;  %v770_v17 = vsel %vm710_vm4, %v576_v34, %v602_v9  ;;  %v583_v61 = vor.u32 %v582_v16, %v578_v7 }
  0xcc   : > { %v1643_v35 = vcombine.low %v788_v4, %v791_v30 }
  0xce   : > { %v600_v20 = vpop.permute.xlu0 %599  ;;  %1313 = vmatprep.mubr.bf16.mxu1 %v1643_v35  ;;  %1807 = vmatmul.mubr.msk.bf16.vlgmr.msra.gmra.mrb[16].mxu0 %vm710_vm4, %v2307_v36  ;;  %v604_v55 = vpop.permute.xlu1 %603 }
  0xcf   : > { %v767_v41 = vsel %vm710_vm4, %v569_v15, %v600_v20  ;;  %1810 = vmatprep.mubr.msk.bf16.mxu0 %vm710_vm4, %v2425_v28  ;;  %v773_v52 = vsel %vm710_vm4, %v583_v61, %v604_v55  ;;  %v2016_v28 = vmov 0.0  }
  0xd0   : > { %v1642_v42 = vcombine.low %v767_v41, %v770_v17  ;;  %v1647_v36 = vcombine.low %v773_v52, %v773_v52  ;;  %1814 = vmatprep.subr.bf16.mxu1 %v2016_v28 }
  0xd1   : > { %1815 = vmatpush3.bf16.msra.mxu1 %v1942_v14 }
  0xd2   : > { %1314 = vmatmul.mubr.bf16.gmra.mrb[8].mxu1 %v1642_v42  ;;  %v702_v21 = vpop.permute.xlu0 %701  ;;  %1816 = vmatprep.subr.bf16.mxu1 %v2016_v28 }
  0xd3   : > { %v794_v51 = vsel %vm710_vm4, %v2369_v31, %v702_v21  ;;  %v1943_v31 = vld [vmem:[%s2609_s3 + $0x8] sm:$0xff]  }
  0xd4   : > { %v1648_v53 = vcombine.low %v794_v51, %v794_v51 }
  0xd5   : > { %1817 = vmatpush3.bf16.msra.mxu1 %v1943_v31 }
  0xd6   : > { %1811 = vmatmul.mubr.msk.bf16.gmra.mrb[20].mxu0 %vm710_vm4, %v1649_v48  ;;  %1321 = vmatprep.mubr.bf16.mxu1 %v1648_v53 }
  0xd7   : > { %1818 = vmatprep.subr.bf16.mxu1 %v2016_v28 }
  0xd9   : > { %1819 = vmatpush3.bf16.msra.mxu1 %v1944_v32 }
  0xda   : > { %1322 = vmatmul.mubr.bf16.gmra.mrb[12].mxu1 %v1647_v36  ;;  %1820 = vmatprep.subr.bf16.mxu1 %v2016_v28 }
  0xdb   : > { %1830 = vmatprep.mubr.msk.bf16.mxu1 %vm2017_vm5, %v2016_v28 }
  0xdd   : > { %1821 = vmatpush3.bf16.msra.mxu1 %v1945_v54 }
  0xde   : > { %1822 = vmatprep.subr.bf16.mxu1 %v2016_v28 }
  0xe1   : > { %1823 = vmatpush3.bf16.msra.mxu1 %v1946_v19 }
  0xe2   : > { %1824 = vmatprep.subr.bf16.mxu1 %v2016_v28 }
  0xe5   : > { %1825 = vmatpush3.bf16.msra.mxu1 %v1947_v56 }
  0xe6   : > { %1826 = vmatprep.subr.bf16.mxu1 %v2016_v28 }
  0xe9   : > { %1827 = vmatpush3.bf16.msra.mxu1 %v1948_v57 }
  0xea   : > { %1828 = vmatprep.subr.bf16.mxu1 %v2016_v28 }
  0xed   : > { %1829 = vmatpush3.bf16.msra.mxu1 %v1949_v1 }
 0x181   : > { %v1717_v33 = vpop.f32.mrb[0].mxu0 }
 0x182   : > { %v1718_v3 = vpop.f32.mrb[1].mxu0 }
 0x183   : > { %v1719_v6 = vadd.f32 %v1718_v3, %v1717_v33  ;;  %v1720_v38 = vpop.f32.mrb[2].mxu0 }
 0x184   : > { %v1721_v13 = vpop.f32.mrb[3].mxu0 }
 0x185   : > { %v1722_v10 = vadd.f32 %v1721_v13, %v1720_v38  ;;  %v1236_v63 = vadd.f32 %v1719_v6, %v2540_v8 }
 0x187   : > { %v1239_v43 = vadd.f32 %v1722_v10, %v2540_v8 }
 0x189   : > { %v1723_v11 = vpop.f32.mrb[4].mxu0 }
 0x18a   : > { %v1724_v39 = vpop.f32.mrb[5].mxu0 }
 0x18b   : > { %v1725_v12 = vadd.f32 %v1724_v39, %v1723_v11  ;;  %v1726_v49 = vpop.f32.mrb[6].mxu0 }
 0x18c   : > { %v1727_v46 = vpop.f32.mrb[7].mxu0 }
 0x18d   : > { %v1728_v44 = vadd.f32 %v1727_v46, %v1726_v49  ;;  %v1244_v9 = vadd.f32 %v1725_v12, %v2540_v8 }
 0x18e   : > { %v1757_v23 = vpop.f32.mrb[0].mxu1 }
 0x18f   : > { %v1758_v37 = vpop.f32.mrb[1].mxu1  ;;  %v1247_v16 = vadd.f32 %v1728_v44, %v2540_v8 }
 0x190   : > { %v1759_v22 = vadd.f32 %v1758_v37, %v1757_v23  ;;  %v1760_v45 = vpop.f32.mrb[2].mxu1 }
 0x191   : > { %v1729_v0 = vpop.f32.mrb[8].mxu0  ;;  %v1761_v24 = vpop.f32.mrb[3].mxu1 }
 0x192   : > { %v1762_v60 = vadd.f32 %v1761_v24, %v1760_v45  ;;  %v1730_v18 = vpop.f32.mrb[9].mxu0  ;;  %v1300_v29 = vadd.f32 %v1759_v22, %v1236_v63 }
 0x193   : > { %v1731_v25 = vadd.f32 %v1730_v18, %v1729_v0  ;;  %v1732_v50 = vpop.f32.mrb[10].mxu0 }
 0x194   : > { %v1733_v40 = vpop.f32.mrb[11].mxu0  ;;  %v1303_v2 = vadd.f32 %v1762_v60, %v1239_v43 }
 0x195   : > { %v1734_v26 = vadd.f32 %v1733_v40, %v1732_v50  ;;  %v1252_v32 = vadd.f32 %v1731_v25, %v2540_v8 }
 0x197   : > { %v1255_v54 = vadd.f32 %v1734_v26, %v2540_v8 }
 0x199   : > { %v1735_v47 = vpop.f32.mrb[12].mxu0 }
 0x19a   : > { %v1736_v59 = vpop.f32.mrb[13].mxu0 }
 0x19b   : > { %v1737_v58 = vadd.f32 %v1736_v59, %v1735_v47  ;;  %v1738_v27 = vpop.f32.mrb[14].mxu0 }
 0x19c   : > { %v1739_v30 = vpop.f32.mrb[15].mxu0 }
 0x19d   : > { %v1763_v34 = vpop.f32.mrb[4].mxu1  ;;  %v1260_v24 = vadd.f32 %v1737_v58, %v2540_v8 }
 0x19e   : > { %v1764_v5 = vpop.f32.mrb[5].mxu1 }
 0x19f   : > { %v1765_v4 = vadd.f32 %v1764_v5, %v1763_v34  ;;  %v1766_v15 = vpop.f32.mrb[6].mxu1 }
 0x1a0   : > { %v1767_v7 = vpop.f32.mrb[7].mxu1 }
 0x1a1   : > { %v1768_v35 = vadd.f32 %v1767_v7, %v1766_v15  ;;  %v1308_v17 = vadd.f32 %v1765_v4, %v1244_v9  ;;  %v1808_v20 = vpop.f32.mrb[16].mxu0 }
 0x1a2   : > { %v1363_v62 = vpop.f32.mrb[17].mxu0 }
 0x1a3   : > { %v1372_v41 = vadd.f32 %v1808_v20, %v1308_v17  ;;  %v1364_v61 = vadd.f32 %v1363_v62, %v1300_v29  ;;  %v1311_v42 = vadd.f32 %v1768_v35, %v1247_v16  ;;  %v1809_v55 = vpop.f32.mrb[18].mxu0  ;;  %v1438_v16 = vld [vmem:[%s2610_s4] sm:$0x1] }
 0x1a4   : > { %v1366_v21 = vpop.f32.mrb[19].mxu0 }
 0x1a5   : > { %v1393_v48 = vmax.f32 %v1364_v61, 0.0  ;;  %v1375_v51 = vadd.f32 %v1809_v55, %v1311_v42  ;;  %v1367_v52 = vadd.f32 %v1366_v21, %v1303_v2  ;;  %v1769_v53 = vpop.f32.mrb[8].mxu1  ;;  %v1395_v14 = vmax.f32 %v1372_v41, 0.0 }
 0x1a6   : > { %v1770_v36 = vpop.f32.mrb[9].mxu1 }
 0x1a7   : > { %v1394_v28 = vmax.f32 %v1367_v52, 0.0  ;;  %v1772_v31 = vpop.f32.mrb[10].mxu1  ;;  %v1771_v19 = vadd.f32 %v1770_v36, %v1769_v53  ;;  %v1401_v57 = vsel %vm1400_vm6, %v1393_v48, 0.0  ;;  %v1396_v1 = vmax.f32 %v1375_v51, 0.0 }
 0x1a8   : > { %v1773_v56 = vpop.f32.mrb[11].mxu1  ;;  %v1404_v11 = vsel %vm1400_vm6, %v1395_v14, 0.0 }
 0x1a9   : > { %v1402_v33 = vsel %vm1400_vm6, %v1394_v28, 0.0  ;;  %v1774_v3 = vadd.f32 %v1773_v56, %v1772_v31  ;;  %v1812_v6 = vpop.f32.mrb[20].mxu0  ;;  %v1316_v13 = vadd.f32 %v1771_v19, %v1252_v32  ;;  %v1406_v23 = vsel %vm1400_vm6, %v1396_v1, 0.0 }
 0x1aa   : > { %v1403_v38 = vadd.f32 %v1402_v33, %v1401_v57  ;;  %v1379_v10 = vpop.f32.mrb[21].mxu0 }
 0x1ab   : > { %v1813_v39 = vpop.f32.mrb[22].mxu0  ;;  %v1319_v12 = vadd.f32 %v1774_v3, %v1255_v54  ;;  %v1380_v46 = vadd.f32 %v1379_v10, %v1316_v13 }
 0x1ac   : > { %v1405_v49 = vadd.f32 %v1404_v11, %v1403_v38  ;;  %v1382_v44 = vpop.f32.mrb[23].mxu0 }
 0x1ad   : > { %v1383_v37 = vadd.f32 %v1382_v44, %v1319_v12  ;;  %v1775_v63 = vpop.f32.mrb[12].mxu1  ;;  %v1397_v22 = vmax.f32 %v1380_v46, 0.0 }
 0x1ae   : > { %v1407_v45 = vadd.f32 %v1406_v23, %v1405_v49  ;;  %v1776_v0 = vpop.f32.mrb[13].mxu1 }
 0x1af   : > { %v1398_v43 = vmax.f32 %v1383_v37, 0.0  ;;  %v1777_v60 = vadd.f32 %v1776_v0, %v1775_v63  ;;  %v1778_v18 = vpop.f32.mrb[14].mxu1  ;;  %v1408_v29 = vsel %vm1400_vm6, %v1397_v22, 0.0 }
 0x1b0   : > { %v1779_v25 = vpop.f32.mrb[15].mxu1  ;;  %v1409_v50 = vadd.f32 %v1408_v29, %v1407_v45 }
 0x1b1   : > { %v1410_v40 = vsel %vm1400_vm6, %v1398_v43, 0.0  ;;  %v1324_v2 = vadd.f32 %v1777_v60, %v1260_v24 }
 0x1b2   : > { %v1411_v26 = vadd.f32 %v1410_v40, %v1409_v50 }
 0x1b3   : > { %v1388_v47 = vadd.f32 %v1812_v6, %v1324_v2 }
 0x1b5   : > { %v1399_v59 = vmax.f32 %v1388_v47, 0.0 }
 0x1b7   : > { %v1412_v27 = vsel %vm1400_vm6, %v1399_v59, 0.0 }
 0x1b8   : > { %v1413_v30 = vadd.f32 %v1412_v27, %v1411_v26 }
 0x1ba   : > { %v1414_v34 = vrot.slane %v1413_v30, 4 }
 0x1bc   : > { %v1415_v8 = vadd.f32 %v1414_v34, %v1413_v30 }
 0x1be   : > { %v1416_v58 = vrot.slane %v1415_v8, 2 }
 0x1c0   : > { %v1417_v5 = vadd.f32 %v1416_v58, %v1415_v8 }
 0x1c2   : > { %v1418_v9 = vrot.slane %v1417_v5, 1 }
 0x1c4   : > { %v1419_v4 = vadd.f32 %v1418_v9, %v1417_v5 }
 0x1c6   : > { %v1420_v15 = vmul.f32 0.020408163, %v1419_v4 }
 0x1c8   : > { %v1421_v7 = vpack.c.bf16 %v1420_v15, %v1420_v15 }
 0x1ca   : > { %1831 = vmatmul.mubr.bf16.vlgmr.msra.gmra.mrb[16].mxu1 %v1421_v7 }
 0x29d   : > { %v1521_v35 = vpop.f32.mrb[16].mxu1 }
 0x29e   : > { %v1522_v17 = vadd.f32 %v1521_v35, %v1438_v16  ;;  %v1832_v20 = vpop.f32.mrb[17].mxu1 }
 0x29f   : > { %v1524_v62 = vpop.f32.mrb[18].mxu1 }
 0x2a0   : > { %1527 = vst [vmem:[%s216_s12] sm:$0x1] %v1522_v17  ;;  %v1833_v41 = vpop.f32.mrb[19].mxu1 }
 0x2a1   : > { %1963 = shalt.err (!%p1960_p3)
}
 0x2a2   : > { %s1964_s26 = scalar_lea.hbm %s2564_s10, 16  ;;  %s1968_s7 = scalar_lea.hbm %s2611_s5, 32 }
 0x2a3   : > { %p1965_p4 = scmp.ne.s32.totalorder %s2564_s10, %s1964_s26  ;;  %p1969_p9 = scmp.lt.u32.totalorder %s2564_s10, %s2611_s5 }
 0x2a4   : > { %p1970_p10 = scmp.lt.u32.totalorder %s1968_s7, %s1964_s26  ;;  %p1972_p12 = scmp.lt.u32.totalorder %s1964_s26, %s2564_s10 }
 0x2a5   : > { %p1966_p7 = pnand %p1965_p4, %p2087_p5 }
 0x2a6   : > { %p1971_p11 = por %p1970_p10, %p1969_p9 }
 0x2a7   : > { %p1967_p8 = pneg %p1966_p7 }
 0x2a8   : > { %p1973_p13 = por %p1972_p12, %p1971_p11 }
 0x2aa   : > { %p1974_p0 = pnand %p1973_p13, %p1967_p8 }
 0x2ac   : > { %1977 = shalt.err (!%p1974_p0)
}
 0x2ad   : > { %1835 = dma.vmem_to_hbm [thread:$0]  (%p2087_p5), %s2566_s13, 16, %s2564_s10, %s1529_s16  }
 0x2ae PF: > { %p1841_p1 = scmp.ge.s32.totalorder %s2012_s21, 2  ;;  %s1553_s11 = sand.u32 1, %s2000_s18  }
 0x2af   : > { %s1554_s12 = scalar_lea.sflag [#allocation4], %s1553_s11 }
 0x2b0   : > { %p1838_p2 = pnand %p1841_p1, %p2091_p6 }
 0x2b2   : > { %1995 = dma.done.wait (!%p1838_p2), %s1554_s12, 16  }
 0x2b3   : > { %1997 = vsyncadd (!%p1838_p2), %s1554_s12, 4294967280  ;;  %p15_p3 = scmp.ge.s32.totalorder %s2074_s24, 4   ;;  %s2616_s18 = smov %s2004_s19 }
 0x2b4   : > { %s2617_s19 = smov %s2008_s20  ;;  %s2618_s20 = smov %s2085_s27 }
 0x2b5   : > { %s2619_s21 = smov %s2074_s24  ;;  %17 = sbr.rel (!%p15_p3) target bundleno = 3 (0x3), region = 77 }
 0x2bc   :  { %1558 = vsyncpa [#allocation4], 1 }
 0x2bd   :  { %1560 = vsyncpa [#allocation4 + $0x1], 1 }

</bundles_post_ra>
